<compile_context>
chip_gen: v7x
topology: tpu7x:2x2x1
jax: 0.10.0
libtpu: 0.0.40
codegen_flags: <defaults>
</compile_context>

<pallas_src>
import functools
import math

import jax
import jax.numpy as jnp
from jax import lax
from jax.experimental import pallas as pl
from jax.experimental.pallas import tpu as pltpu


def _round_up(x, m):
    return ((x + m - 1) // m) * m


# --------------------------- fused recurrent kernel ---------------------------

def _make_fused_kernel(num_layers, hidden_p, tt, has_output, unroll):
    """Builds the fused (input proj + LSTM recurrence + output MLP) kernel."""
    L = num_layers
    H = hidden_p            # lane-padded hidden size (multiple of 128)

    def kernel(*refs):
        refs = list(refs)
        x_ref = refs.pop(0)          # (tt, Bblk, Din)
        w_in_ref = refs.pop(0)       # (Din, E)
        b_in_ref = refs.pop(0)       # (1, E)
        w_ih0_ref = refs.pop(0)      # (E, 4H)
        w_hh0_ref = refs.pop(0)      # (H, 4H)
        b0_ref = refs.pop(0)         # (1, 4H)
        if L > 1:
            w_ih_ref = refs.pop(0)   # (L-1, H, 4H)
            w_hh_ref = refs.pop(0)   # (L-1, H, 4H)
            b_ref = refs.pop(0)      # (L-1, 1, 4H)
        if has_output:
            w_o1_ref = refs.pop(0)   # (H, E)
            b_o1_ref = refs.pop(0)   # (1, E)
            w_o2_ref = refs.pop(0)   # (E, Op)
            b_o2_ref = refs.pop(0)   # (1, Op)
        o_ref = refs.pop(0)
        h_sc = refs.pop(0)           # (L, Bblk, H) persistent hidden state
        c_sc = refs.pop(0)           # (L, Bblk, H) persistent cell state
        g0_sc = refs.pop(0)          # (tt, Bblk, 4H) layer-0 gate inputs
        if has_output:
            y_sc = refs.pop(0)       # (tt, Bblk, H) top-layer hidden (chunk)

        B = x_ref.shape[1]
        Din = x_ref.shape[2]
        G = 4 * H

        # zero-init h/c at the first time chunk of each batch block
        @pl.when(pl.program_id(1) == 0)
        def _():
            h_sc[...] = jnp.zeros_like(h_sc)
            c_sc[...] = jnp.zeros_like(c_sc)

        # ---- batch-parallel per-chunk work, hoisted off the recurrence ----
        # emb = relu(x @ W_in + b_in);  g0 = emb @ W_ih0 + (b_ih0 + b_hh0)
        x2 = x_ref[...].reshape(tt * B, Din)
        emb = jnp.dot(x2, w_in_ref[...], preferred_element_type=jnp.float32)
        emb = jnp.maximum(emb + b_in_ref[...], 0.0)
        g0 = jnp.dot(emb, w_ih0_ref[...], preferred_element_type=jnp.float32)
        g0_sc[...] = (g0 + b0_ref[...]).reshape(tt, B, G)

        def lstm_cell(gates, c_prev):
            # PyTorch gate order i, f, g, o; slices are lane-tile aligned
            # because H is padded to a multiple of 128.
            i_g = jax.nn.sigmoid(gates[:, 0 * H:1 * H])
            f_g = jax.nn.sigmoid(gates[:, 1 * H:2 * H])
            g_g = jnp.tanh(gates[:, 2 * H:3 * H])
            o_g = jax.nn.sigmoid(gates[:, 3 * H:4 * H])
            c_new = f_g * c_prev + i_g * g_g
            h_new = o_g * jnp.tanh(c_new)
            return h_new, c_new

        def step(t_i, carry):
            # layer 0: x contribution + biases precomputed in g0_sc
            gates0 = g0_sc[t_i] + jnp.dot(
                h_sc[0], w_hh0_ref[...], preferred_element_type=jnp.float32)
            h_new, c_new = lstm_cell(gates0, c_sc[0])
            h_sc[0] = h_new
            c_sc[0] = c_new
            xt = h_new
            for l in range(1, L):
                # two dots (no per-timestep lane-axis concat)
                gates = (jnp.dot(xt, w_ih_ref[l - 1],
                                 preferred_element_type=jnp.float32)
                         + jnp.dot(h_sc[l], w_hh_ref[l - 1],
                                   preferred_element_type=jnp.float32)
                         + b_ref[l - 1])
                h_new, c_new = lstm_cell(gates, c_sc[l])
                h_sc[l] = h_new
                c_sc[l] = c_new
                xt = h_new
            if has_output:
                y_sc[t_i] = xt
            else:
                # batch-major direct write (avoids a wrapper (T,B,H) transpose)
                o_ref[:, pl.ds(t_i, 1), :] = xt[:, None, :]
            return carry

        lax.fori_loop(0, tt, step, 0, unroll=unroll)

        if has_output:
            # fused output MLP over the whole chunk (batch-parallel, off the
            # serial recurrence):  relu(y @ W_o1 + b_o1) @ W_o2 + b_o2
            Op = w_o2_ref.shape[1]
            y2 = y_sc[...].reshape(tt * B, H)
            h1 = jnp.dot(y2, w_o1_ref[...], preferred_element_type=jnp.float32)
            h1 = jnp.maximum(h1 + b_o1_ref[...], 0.0)
            out = jnp.dot(h1, w_o2_ref[...], preferred_element_type=jnp.float32)
            out = out + b_o2_ref[...]
            o_ref[...] = out.reshape(tt, B, Op)

    return kernel


# ------------------------------ parameter setup ------------------------------

def xavier_uniform(key, shape, gain):
    fan_out, fan_in = shape            # torch weight layout (out, in)
    bound = gain * math.sqrt(6.0 / (fan_in + fan_out))
    return jax.random.uniform(key, shape, jnp.float32, -bound, bound)


def init_params(key, input_size, embedding_size, hidden_size, num_layers,
                output_size, has_output):
    """Params in PyTorch layout (used by the pure-JAX reference)."""
    gain_sigmoid = 1.0
    gain_relu = math.sqrt(2.0)
    keys = jax.random.split(key, 4 + 2 * num_layers)
    p = {}
    p["w_in"] = xavier_uniform(keys[0], (embedding_size, input_size), gain_relu)
    p["b_in"] = jax.random.uniform(keys[1], (embedding_size,), jnp.float32,
                                   -1.0 / math.sqrt(input_size),
                                   1.0 / math.sqrt(input_size))
    p["w_ih"], p["w_hh"], p["b_ih"], p["b_hh"] = [], [], [], []
    for l in range(num_layers):
        in_dim = embedding_size if l == 0 else hidden_size
        p["w_ih"].append(xavier_uniform(keys[4 + 2 * l],
                                        (4 * hidden_size, in_dim), gain_sigmoid))
        p["w_hh"].append(xavier_uniform(keys[5 + 2 * l],
                                        (4 * hidden_size, hidden_size),
                                        gain_sigmoid))
        p["b_ih"].append(jnp.full((4 * hidden_size,), 0.25, jnp.float32))
        p["b_hh"].append(jnp.full((4 * hidden_size,), 0.25, jnp.float32))
    if has_output:
        p["w_o1"] = xavier_uniform(keys[2], (embedding_size, hidden_size), gain_relu)
        p["b_o1"] = jnp.zeros((embedding_size,), jnp.float32)
        p["w_o2"] = xavier_uniform(keys[3], (output_size, embedding_size), gain_relu)
        p["b_o2"] = jnp.zeros((embedding_size if output_size is None
                               else output_size,), jnp.float32)
    return p


def _pad_gate_cols(w_t, h, hp):
    """(in_dim, 4h) columns ordered [i|f|g|o] -> (in_dim, 4hp), zero padded."""
    if hp == h:
        return w_t
    in_dim = w_t.shape[0]
    w4 = w_t.reshape(in_dim, 4, h)
    w4 = jnp.pad(w4, ((0, 0), (0, 0), (0, hp - h)))
    return w4.reshape(in_dim, 4 * hp)


def _pad_gate_bias(b, h, hp):
    if hp == h:
        return b[None, :]
    b4 = jnp.pad(b.reshape(4, h), ((0, 0), (0, hp - h)))
    return b4.reshape(1, 4 * hp)


def prepare_pallas_params(params, num_layers, hidden_size, has_output,
                          weight_dtype=jnp.float32):
    """One-time weight prep: transpose, stack layers, sum biases, lane-pad.

    Hidden (and gate) width is padded to a multiple of 128 and the output
    width to a multiple of 128 so every gate slice and store in the kernel is
    lane-tile aligned.  Padded lanes are provably exact zeros in h/c.
    Pass weight_dtype=jnp.bfloat16 to halve weight VMEM/HBM (v7x), keeping
    f32 accumulation; loosen test tolerances in that case.
    """
    H = hidden_size
    Hp = _round_up(H, 128)
    wd = weight_dtype
    pp = {}
    pp["w_in"] = params["w_in"].T.astype(wd)                       # (Din, E)
    pp["b_in"] = params["b_in"][None, :]                           # (1, E)
    pp["w_ih0"] = _pad_gate_cols(params["w_ih"][0].T, H, Hp).astype(wd)
    pp["b0"] = _pad_gate_bias(params["b_ih"][0] + params["b_hh"][0], H, Hp)
    w_hh0 = jnp.pad(params["w_hh"][0].T, ((0, Hp - H), (0, 0)))
    pp["w_hh0"] = _pad_gate_cols(w_hh0, H, Hp).astype(wd)          # (Hp, 4Hp)
    if num_layers > 1:
        w_ih, w_hh, bias = [], [], []
        for l in range(1, num_layers):
            wi = jnp.pad(params["w_ih"][l].T, ((0, Hp - H), (0, 0)))
            wh = jnp.pad(params["w_hh"][l].T, ((0, Hp - H), (0, 0)))
            w_ih.append(_pad_gate_cols(wi, H, Hp))
            w_hh.append(_pad_gate_cols(wh, H, Hp))
            bias.append(_pad_gate_bias(params["b_ih"][l] + params["b_hh"][l],
                                       H, Hp))
        pp["w_ih"] = jnp.stack(w_ih).astype(wd)                    # (L-1,Hp,4Hp)
        pp["w_hh"] = jnp.stack(w_hh).astype(wd)                    # (L-1,Hp,4Hp)
        pp["bias"] = jnp.stack(bias)                               # (L-1,1,4Hp)
    if has_output:
        O = params["w_o2"].shape[0]
        Op = _round_up(O, 128)
        pp["w_o1"] = jnp.pad(params["w_o1"].T, ((0, Hp - H), (0, 0))).astype(wd)
        pp["b_o1"] = params["b_o1"][None, :]
        pp["w_o2"] = jnp.pad(params["w_o2"].T, ((0, 0), (0, Op - O))).astype(wd)
        pp["b_o2"] = jnp.pad(params["b_o2"], (0, Op - O))[None, :]
    return pp


# ------------------------------- forward pass --------------------------------

def lstm_plain_forward_pallas(x, pp, hidden_size, num_layers, has_output,
                              output_size=None, time_chunk=16):
    """x: (B, T, input_size) float32 -> (B, T, hidden_size or output_size)."""
    # TODO(synk): pack=True (pack_padded_sequence) and has_input=False paths
    #             are not implemented; fixed-length batch_first only.
    B, T, Din = x.shape
    H = hidden_size
    L = num_layers
    Hp = pp["w_hh0"].shape[0]          # lane-padded hidden
    G = 4 * Hp
    E = pp["w_in"].shape[1]

    Bp = _round_up(B, 8)                               # sublane-align batch
    tt = _round_up(min(time_chunk, _round_up(T, 8)), 8)  # timesteps per chunk
    T_pad = _round_up(T, tt)
    unroll = min(tt, 8)                                # partial unroll

    # time-major, zero-padded raw input (the smallest tensor in the model)
    x_tm = jnp.transpose(x, (1, 0, 2))
    x_tm = jnp.pad(x_tm, ((0, T_pad - T), (0, Bp - B), (0, 0)))

    # split the (independent) batch rows across two blocks when alignment
    # allows it -> v7x runs the recurrence on both TensorCores ("parallel").
    n_bblk = 2 if Bp % 16 == 0 else 1
    B_BLK = Bp // n_bblk
    n_tblk = T_pad // tt

    args = [x_tm, pp["w_in"], pp["b_in"], pp["w_ih0"], pp["w_hh0"], pp["b0"]]
    in_specs = [
        pl.BlockSpec((tt, B_BLK, Din), lambda b, t: (t, b, 0)),
        pl.BlockSpec(pp["w_in"].shape, lambda b, t: (0, 0)),
        pl.BlockSpec(pp["b_in"].shape, lambda b, t: (0, 0)),
        pl.BlockSpec(pp["w_ih0"].shape, lambda b, t: (0, 0)),
        pl.BlockSpec(pp["w_hh0"].shape, lambda b, t: (0, 0)),
        pl.BlockSpec(pp["b0"].shape, lambda b, t: (0, 0)),
    ]
    if L > 1:
        args += [pp["w_ih"], pp["w_hh"], pp["bias"]]
        in_specs += [pl.BlockSpec(pp["w_ih"].shape, lambda b, t: (0, 0, 0)),
                     pl.BlockSpec(pp["w_hh"].shape, lambda b, t: (0, 0, 0)),
                     pl.BlockSpec(pp["bias"].shape, lambda b, t: (0, 0, 0))]
    if has_output:
        args += [pp["w_o1"], pp["b_o1"], pp["w_o2"], pp["b_o2"]]
        in_specs += [pl.BlockSpec(pp["w_o1"].shape, lambda b, t: (0, 0)),
                     pl.BlockSpec(pp["b_o1"].shape, lambda b, t: (0, 0)),
                     pl.BlockSpec(pp["w_o2"].shape, lambda b, t: (0, 0)),
                     pl.BlockSpec(pp["b_o2"].shape, lambda b, t: (0, 0))]
        Op = pp["w_o2"].shape[1]
        out_spec = pl.BlockSpec((tt, B_BLK, Op), lambda b, t: (t, b, 0))
        out_shape = jax.ShapeDtypeStruct((T_pad, Bp, Op), jnp.float32)
    else:
        # batch-major hidden-state output written directly by the kernel
        out_spec = pl.BlockSpec((B_BLK, tt, Hp), lambda b, t: (b, t, 0))
        out_shape = jax.ShapeDtypeStruct((Bp, T_pad, Hp), jnp.float32)

    scratch = [pltpu.VMEM((L, B_BLK, Hp), jnp.float32),   # h state (persists)
               pltpu.VMEM((L, B_BLK, Hp), jnp.float32),   # c state (persists)
               pltpu.VMEM((tt, B_BLK, G), jnp.float32)]   # layer-0 gate inputs
    if has_output:
        scratch.append(pltpu.VMEM((tt, B_BLK, Hp), jnp.float32))  # chunk hidden

    out = pl.pallas_call(
        _make_fused_kernel(L, Hp, tt, has_output, unroll),
        grid=(n_bblk, n_tblk),
        in_specs=in_specs,
        out_specs=out_spec,
        out_shape=out_shape,
        scratch_shapes=scratch,
        compiler_params=pltpu.CompilerParams(
            dimension_semantics=("parallel", "arbitrary"),
            vmem_limit_bytes=64 * 1024 * 1024),
    )(*args)

    if has_output:
        # tiny final slice + transpose over the real output channels only
        return jnp.transpose(out[:T, :B, :output_size], (1, 0, 2))
    return out[:B, :T, :H]


# ---------------------------- pure-JAX reference -----------------------------

def lstm_plain_forward_ref(x, params, hidden_size, num_layers, has_output):
    B, T, _ = x.shape
    emb = jnp.maximum(
        jnp.einsum("bti,oi->bto", x, params["w_in"]) + params["b_in"], 0.0)

    H = hidden_size
    h0 = jnp.zeros((num_layers, B, H), jnp.float32)
    c0 = jnp.zeros((num_layers, B, H), jnp.float32)

    def step(carry, xt):
        h, c = carry
        inp = xt
        h_out, c_out = [], []
        for l in range(num_layers):
            gates = (inp @ params["w_ih"][l].T + params["b_ih"][l]
                     + h[l] @ params["w_hh"][l].T + params["b_hh"][l])
            i_g = jax.nn.sigmoid(gates[:, 0 * H:1 * H])
            f_g = jax.nn.sigmoid(gates[:, 1 * H:2 * H])
            g_g = jnp.tanh(gates[:, 2 * H:3 * H])
            o_g = jax.nn.sigmoid(gates[:, 3 * H:4 * H])
            c_new = f_g * c[l] + i_g * g_g
            h_new = o_g * jnp.tanh(c_new)
            h_out.append(h_new)
            c_out.append(c_new)
            inp = h_new
        return (jnp.stack(h_out), jnp.stack(c_out)), inp

    (_, _), ys = lax.scan(step, (h0, c0), jnp.transpose(emb, (1, 0, 2)))
    out = jnp.transpose(ys, (1, 0, 2))
    if has_output:
        h1 = jnp.maximum(
            jnp.einsum("bth,oh->bto", out, params["w_o1"]) + params["b_o1"], 0.0)
        out = jnp.einsum("bte,oe->bto", h1, params["w_o2"]) + params["b_o2"]
    return out


# ------------------------------------ main ------------------------------------

if __name__ == "__main__":
    configs = [
        # has_output=True (output MLP fused), aligned-ish toy shape
        dict(B=2, T=8, input_size=4, embedding_size=16, hidden_size=32,
             num_layers=2, output_size=4, has_output=True),
        # has_output=False: batch-major direct hidden-state write path
        dict(B=2, T=8, input_size=4, embedding_size=16, hidden_size=32,
             num_layers=2, output_size=None, has_output=False),
        # awkward shapes: exercises B/T/H/O padding and a 3-layer stack
        dict(B=3, T=5, input_size=5, embedding_size=12, hidden_size=20,
             num_layers=3, output_size=6, has_output=True),
    ]

    key = jax.random.PRNGKey(0)
    for cfg in configs:
        key, k_x, k_p = jax.random.split(key, 3)
        x = jax.random.normal(k_x, (cfg["B"], cfg["T"], cfg["input_size"]),
                              jnp.float32)
        params = init_params(k_p, cfg["input_size"], cfg["embedding_size"],
                             cfg["hidden_size"], cfg["num_layers"],
                             cfg["output_size"], cfg["has_output"])
        pp = prepare_pallas_params(params, cfg["num_layers"],
                                   cfg["hidden_size"], cfg["has_output"])

        fwd = jax.jit(functools.partial(
            lstm_plain_forward_pallas,
            hidden_size=cfg["hidden_size"], num_layers=cfg["num_layers"],
            has_output=cfg["has_output"], output_size=cfg["output_size"],
            time_chunk=16))
        out = jax.block_until_ready(fwd(x, pp))

        ref = lstm_plain_forward_ref(x, params, cfg["hidden_size"],
                                     cfg["num_layers"], cfg["has_output"])
        assert out.shape == ref.shape, (out.shape, ref.shape)
        max_err = float(jnp.max(jnp.abs(out - ref)))
        assert jnp.allclose(out, ref, rtol=1e-4, atol=1e-4), max_err

    print("KERNEL_OK")
</pallas_src>

<mosaic_0001>
module attributes {stable_mosaic.version = 11 : i64} {
  func.func @kernel(%arg0: i32, %arg1: i32, %arg2: memref<8x8x4xf32, #tpu.memory_space<vmem>>, %arg3: memref<4x16xf32, #tpu.memory_space<vmem>>, %arg4: memref<1x16xf32, #tpu.memory_space<vmem>>, %arg5: memref<16x512xf32, #tpu.memory_space<vmem>>, %arg6: memref<128x512xf32, #tpu.memory_space<vmem>>, %arg7: memref<1x512xf32, #tpu.memory_space<vmem>>, %arg8: memref<1x128x512xf32, #tpu.memory_space<vmem>>, %arg9: memref<1x128x512xf32, #tpu.memory_space<vmem>>, %arg10: memref<1x1x512xf32, #tpu.memory_space<vmem>>, %arg11: memref<128x16xf32, #tpu.memory_space<vmem>>, %arg12: memref<1x16xf32, #tpu.memory_space<vmem>>, %arg13: memref<16x128xf32, #tpu.memory_space<vmem>>, %arg14: memref<1x128xf32, #tpu.memory_space<vmem>>, %arg15: memref<8x8x128xf32, #tpu.memory_space<vmem>>, %arg16: memref<2x8x128xf32, #tpu.memory_space<vmem>>, %arg17: memref<2x8x128xf32, #tpu.memory_space<vmem>>, %arg18: memref<8x8x512xf32, #tpu.memory_space<vmem>>, %arg19: memref<8x8x128xf32, #tpu.memory_space<vmem>>) attributes {dimension_semantics = [#tpu.dimension_semantics<parallel>, #tpu.dimension_semantics<arbitrary>], iteration_bounds = array<i64: 1, 1>, scalar_prefetch = 0 : i64, scratch_operands = 4 : i64, tpu.core_type = #tpu.core_type<tc>, window_params = [{transform_indices = @transform_0, window_bounds = array<i64: 8, 8, 4>}, {pipeline_mode = #tpu.pipeline_mode<synchronous>, transform_indices = @transform_1, window_bounds = array<i64: 4, 16>}, {pipeline_mode = #tpu.pipeline_mode<synchronous>, transform_indices = @transform_2, window_bounds = array<i64: 1, 16>}, {pipeline_mode = #tpu.pipeline_mode<synchronous>, transform_indices = @transform_3, window_bounds = array<i64: 16, 512>}, {pipeline_mode = #tpu.pipeline_mode<synchronous>, transform_indices = @transform_4, window_bounds = array<i64: 128, 512>}, {pipeline_mode = #tpu.pipeline_mode<synchronous>, transform_indices = @transform_5, window_bounds = array<i64: 1, 512>}, {pipeline_mode = #tpu.pipeline_mode<synchronous>, transform_indices = @transform_6, window_bounds = array<i64: 1, 128, 512>}, {pipeline_mode = #tpu.pipeline_mode<synchronous>, transform_indices = @transform_7, window_bounds = array<i64: 1, 128, 512>}, {pipeline_mode = #tpu.pipeline_mode<synchronous>, transform_indices = @transform_8, window_bounds = array<i64: 1, 1, 512>}, {pipeline_mode = #tpu.pipeline_mode<synchronous>, transform_indices = @transform_9, window_bounds = array<i64: 128, 16>}, {pipeline_mode = #tpu.pipeline_mode<synchronous>, transform_indices = @transform_10, window_bounds = array<i64: 1, 16>}, {pipeline_mode = #tpu.pipeline_mode<synchronous>, transform_indices = @transform_11, window_bounds = array<i64: 16, 128>}, {pipeline_mode = #tpu.pipeline_mode<synchronous>, transform_indices = @transform_12, window_bounds = array<i64: 1, 128>}, {transform_indices = @transform_13, window_bounds = array<i64: 8, 8, 128>}]} {
    %c0_i32 = arith.constant 0 : i32
    %0 = arith.cmpi eq, %arg1, %c0_i32 : i32
    %1 = arith.extui %0 : i1 to i32
    %c0_i32_0 = arith.constant 0 : i32
    %2 = arith.cmpi ne, %1, %c0_i32_0 : i32
    scf.if %2 {
      %cst_417 = arith.constant 0.000000e+00 : f32
      %763 = vector.broadcast %cst_417 : f32 to vector<2x8x128xf32>
      %c0_418 = arith.constant 0 : index
      %c0_419 = arith.constant 0 : index
      %c0_420 = arith.constant 0 : index
      %764 = vector.load %arg16[%c0_418, %c0_419, %c0_420] : memref<2x8x128xf32, #tpu.memory_space<vmem>>, vector<2x8x128xf32>
      tpu.vector_store %arg16[%c0_418, %c0_419, %c0_420], %763 {strides = array<i32>} : memref<2x8x128xf32, #tpu.memory_space<vmem>>, vector<2x8x128xf32>,
      %cst_421 = arith.constant 0.000000e+00 : f32
      %765 = vector.broadcast %cst_421 : f32 to vector<2x8x128xf32>
      %c0_422 = arith.constant 0 : index
      %c0_423 = arith.constant 0 : index
      %c0_424 = arith.constant 0 : index
      %766 = vector.load %arg17[%c0_422, %c0_423, %c0_424] : memref<2x8x128xf32, #tpu.memory_space<vmem>>, vector<2x8x128xf32>
      tpu.vector_store %arg17[%c0_422, %c0_423, %c0_424], %765 {strides = array<i32>} : memref<2x8x128xf32, #tpu.memory_space<vmem>>, vector<2x8x128xf32>,
    } else {
    }
    %c0 = arith.constant 0 : index
    %c0_1 = arith.constant 0 : index
    %c0_2 = arith.constant 0 : index
    %3 = vector.load %arg2[%c0, %c0_1, %c0_2] : memref<8x8x4xf32, #tpu.memory_space<vmem>>, vector<8x8x4xf32>
    %4 = vector.shape_cast %3 : vector<8x8x4xf32> to vector<64x4xf32>
    %c0_3 = arith.constant 0 : index
    %c0_4 = arith.constant 0 : index
    %5 = vector.load %arg3[%c0_3, %c0_4] : memref<4x16xf32, #tpu.memory_space<vmem>>, vector<4x16xf32>
    %cst = arith.constant dense<0.000000e+00> : vector<64x16xf32>
    %6 = tpu.matmul %4, %5, %cst {dimension_numbers = #tpu.dot_dimension_numbers<[1], [0], [0], [1], [0, 0, 1, 1], [], []>} : vector<64x4xf32>, vector<4x16xf32>, vector<64x16xf32> -> vector<64x16xf32>
    %c0_5 = arith.constant 0 : index
    %c0_6 = arith.constant 0 : index
    %7 = vector.load %arg4[%c0_5, %c0_6] : memref<1x16xf32, #tpu.memory_space<vmem>>, vector<1x16xf32>
    %8 = vector.broadcast %7 : vector<1x16xf32> to vector<64x16xf32>
    %9 = arith.addf %6, %8 : vector<64x16xf32>
    %cst_7 = arith.constant 0.000000e+00 : f32
    %10 = vector.broadcast %cst_7 : f32 to vector<64x16xf32>
    %11 = arith.maximumf %9, %10 : vector<64x16xf32>
    %c0_8 = arith.constant 0 : index
    %c0_9 = arith.constant 0 : index
    %12 = vector.load %arg5[%c0_8, %c0_9] : memref<16x512xf32, #tpu.memory_space<vmem>>, vector<16x512xf32>
    %cst_10 = arith.constant dense<0.000000e+00> : vector<64x512xf32>
    %13 = tpu.matmul %11, %12, %cst_10 {dimension_numbers = #tpu.dot_dimension_numbers<[1], [0], [0], [1], [0, 0, 1, 1], [], []>} : vector<64x16xf32>, vector<16x512xf32>, vector<64x512xf32> -> vector<64x512xf32>
    %c0_11 = arith.constant 0 : index
    %c0_12 = arith.constant 0 : index
    %14 = vector.load %arg7[%c0_11, %c0_12] : memref<1x512xf32, #tpu.memory_space<vmem>>, vector<1x512xf32>
    %15 = vector.broadcast %14 : vector<1x512xf32> to vector<64x512xf32>
    %16 = arith.addf %13, %15 : vector<64x512xf32>
    %17 = vector.shape_cast %16 : vector<64x512xf32> to vector<8x8x512xf32>
    %c0_13 = arith.constant 0 : index
    %c0_14 = arith.constant 0 : index
    %c0_15 = arith.constant 0 : index
    %18 = vector.load %arg18[%c0_13, %c0_14, %c0_15] : memref<8x8x512xf32, #tpu.memory_space<vmem>>, vector<8x8x512xf32>
    tpu.vector_store %arg18[%c0_13, %c0_14, %c0_15], %17 {strides = array<i32>} : memref<8x8x512xf32, #tpu.memory_space<vmem>>, vector<8x8x512xf32>,
    %c0_i32_16 = arith.constant 0 : i32
    %19 = arith.index_cast %c0_i32_16 : i32 to index
    %c0_17 = arith.constant 0 : index
    %c0_18 = arith.constant 0 : index
    %20 = vector.load %arg18[%19, %c0_17, %c0_18] : memref<8x8x512xf32, #tpu.memory_space<vmem>>, vector<1x8x512xf32>
    %21 = vector.shape_cast %20 : vector<1x8x512xf32> to vector<8x512xf32>
    %c0_19 = arith.constant 0 : index
    %c0_20 = arith.constant 0 : index
    %c0_21 = arith.constant 0 : index
    %22 = vector.load %arg16[%c0_19, %c0_20, %c0_21] : memref<2x8x128xf32, #tpu.memory_space<vmem>>, vector<1x8x128xf32>
    %23 = vector.shape_cast %22 : vector<1x8x128xf32> to vector<8x128xf32>
    %c0_22 = arith.constant 0 : index
    %c0_23 = arith.constant 0 : index
    %24 = vector.load %arg6[%c0_22, %c0_23] : memref<128x512xf32, #tpu.memory_space<vmem>>, vector<128x512xf32>
    %cst_24 = arith.constant dense<0.000000e+00> : vector<8x512xf32>
    %25 = tpu.matmul %23, %24, %cst_24 {dimension_numbers = #tpu.dot_dimension_numbers<[1], [0], [0], [1], [0, 0, 1, 1], [], []>} : vector<8x128xf32>, vector<128x512xf32>, vector<8x512xf32> -> vector<8x512xf32>
    %26 = arith.addf %21, %25 : vector<8x512xf32>
    %c0_25 = arith.constant 0 : index
    %c0_26 = arith.constant 0 : index
    %c0_27 = arith.constant 0 : index
    %27 = vector.load %arg17[%c0_25, %c0_26, %c0_27] : memref<2x8x128xf32, #tpu.memory_space<vmem>>, vector<1x8x128xf32>
    %28 = vector.shape_cast %27 : vector<1x8x128xf32> to vector<8x128xf32>
    %29 = vector.extract_strided_slice %26 {offsets = [0, 0], sizes = [8, 128], strides = [1, 1]} : vector<8x512xf32> to vector<8x128xf32>
    %30 = arith.negf %29 : vector<8x128xf32>
    %31 = math.exp %30 : vector<8x128xf32>
    %cst_28 = arith.constant 1.000000e+00 : f32
    %32 = vector.broadcast %cst_28 : f32 to vector<8x128xf32>
    %33 = arith.addf %32, %31 : vector<8x128xf32>
    %34 = arith.divf %32, %33 : vector<8x128xf32>
    %35 = vector.extract_strided_slice %26 {offsets = [0, 128], sizes = [8, 128], strides = [1, 1]} : vector<8x512xf32> to vector<8x128xf32>
    %36 = arith.negf %35 : vector<8x128xf32>
    %37 = math.exp %36 : vector<8x128xf32>
    %cst_29 = arith.constant 1.000000e+00 : f32
    %38 = vector.broadcast %cst_29 : f32 to vector<8x128xf32>
    %39 = arith.addf %38, %37 : vector<8x128xf32>
    %40 = arith.divf %38, %39 : vector<8x128xf32>
    %41 = vector.extract_strided_slice %26 {offsets = [0, 256], sizes = [8, 128], strides = [1, 1]} : vector<8x512xf32> to vector<8x128xf32>
    %42 = math.tanh %41 : vector<8x128xf32>
    %43 = vector.extract_strided_slice %26 {offsets = [0, 384], sizes = [8, 128], strides = [1, 1]} : vector<8x512xf32> to vector<8x128xf32>
    %44 = arith.negf %43 : vector<8x128xf32>
    %45 = math.exp %44 : vector<8x128xf32>
    %cst_30 = arith.constant 1.000000e+00 : f32
    %46 = vector.broadcast %cst_30 : f32 to vector<8x128xf32>
    %47 = arith.addf %46, %45 : vector<8x128xf32>
    %48 = arith.divf %46, %47 : vector<8x128xf32>
    %49 = arith.mulf %40, %28 : vector<8x128xf32>
    %50 = arith.mulf %34, %42 : vector<8x128xf32>
    %51 = arith.addf %49, %50 : vector<8x128xf32>
    %52 = math.tanh %51 : vector<8x128xf32>
    %53 = arith.mulf %48, %52 : vector<8x128xf32>
    %c0_31 = arith.constant 0 : index
    %c0_32 = arith.constant 0 : index
    %c0_33 = arith.constant 0 : index
    %54 = vector.load %arg16[%c0_31, %c0_32, %c0_33] : memref<2x8x128xf32, #tpu.memory_space<vmem>>, vector<1x8x128xf32>
    %55 = vector.shape_cast %54 : vector<1x8x128xf32> to vector<8x128xf32>
    %56 = vector.shape_cast %53 : vector<8x128xf32> to vector<1x8x128xf32>
    tpu.vector_store %arg16[%c0_31, %c0_32, %c0_33], %56 {strides = array<i32>} : memref<2x8x128xf32, #tpu.memory_space<vmem>>, vector<1x8x128xf32>,
    %c0_34 = arith.constant 0 : index
    %c0_35 = arith.constant 0 : index
    %c0_36 = arith.constant 0 : index
    %57 = vector.load %arg17[%c0_34, %c0_35, %c0_36] : memref<2x8x128xf32, #tpu.memory_space<vmem>>, vector<1x8x128xf32>
    %58 = vector.shape_cast %57 : vector<1x8x128xf32> to vector<8x128xf32>
    %59 = vector.shape_cast %51 : vector<8x128xf32> to vector<1x8x128xf32>
    tpu.vector_store %arg17[%c0_34, %c0_35, %c0_36], %59 {strides = array<i32>} : memref<2x8x128xf32, #tpu.memory_space<vmem>>, vector<1x8x128xf32>,
    %c0_37 = arith.constant 0 : index
    %c0_38 = arith.constant 0 : index
    %c0_39 = arith.constant 0 : index
    %60 = vector.load %arg8[%c0_37, %c0_38, %c0_39] : memref<1x128x512xf32, #tpu.memory_space<vmem>>, vector<1x128x512xf32>
    %61 = vector.shape_cast %60 : vector<1x128x512xf32> to vector<128x512xf32>
    %cst_40 = arith.constant dense<0.000000e+00> : vector<8x512xf32>
    %62 = tpu.matmul %53, %61, %cst_40 {dimension_numbers = #tpu.dot_dimension_numbers<[1], [0], [0], [1], [0, 0, 1, 1], [], []>} : vector<8x128xf32>, vector<128x512xf32>, vector<8x512xf32> -> vector<8x512xf32>
    %c1 = arith.constant 1 : index
    %c0_41 = arith.constant 0 : index
    %c0_42 = arith.constant 0 : index
    %63 = vector.load %arg16[%c1, %c0_41, %c0_42] : memref<2x8x128xf32, #tpu.memory_space<vmem>>, vector<1x8x128xf32>
    %64 = vector.shape_cast %63 : vector<1x8x128xf32> to vector<8x128xf32>
    %c0_43 = arith.constant 0 : index
    %c0_44 = arith.constant 0 : index
    %c0_45 = arith.constant 0 : index
    %65 = vector.load %arg9[%c0_43, %c0_44, %c0_45] : memref<1x128x512xf32, #tpu.memory_space<vmem>>, vector<1x128x512xf32>
    %66 = vector.shape_cast %65 : vector<1x128x512xf32> to vector<128x512xf32>
    %cst_46 = arith.constant dense<0.000000e+00> : vector<8x512xf32>
    %67 = tpu.matmul %64, %66, %cst_46 {dimension_numbers = #tpu.dot_dimension_numbers<[1], [0], [0], [1], [0, 0, 1, 1], [], []>} : vector<8x128xf32>, vector<128x512xf32>, vector<8x512xf32> -> vector<8x512xf32>
    %68 = arith.addf %62, %67 : vector<8x512xf32>
    %c0_47 = arith.constant 0 : index
    %c0_48 = arith.constant 0 : index
    %c0_49 = arith.constant 0 : index
    %69 = vector.load %arg10[%c0_47, %c0_48, %c0_49] : memref<1x1x512xf32, #tpu.memory_space<vmem>>, vector<1x1x512xf32>
    %70 = vector.shape_cast %69 : vector<1x1x512xf32> to vector<1x512xf32>
    %71 = vector.broadcast %70 : vector<1x512xf32> to vector<8x512xf32>
    %72 = arith.addf %68, %71 : vector<8x512xf32>
    %c1_50 = arith.constant 1 : index
    %c0_51 = arith.constant 0 : index
    %c0_52 = arith.constant 0 : index
    %73 = vector.load %arg17[%c1_50, %c0_51, %c0_52] : memref<2x8x128xf32, #tpu.memory_space<vmem>>, vector<1x8x128xf32>
    %74 = vector.shape_cast %73 : vector<1x8x128xf32> to vector<8x128xf32>
    %75 = vector.extract_strided_slice %72 {offsets = [0, 0], sizes = [8, 128], strides = [1, 1]} : vector<8x512xf32> to vector<8x128xf32>
    %76 = arith.negf %75 : vector<8x128xf32>
    %77 = math.exp %76 : vector<8x128xf32>
    %cst_53 = arith.constant 1.000000e+00 : f32
    %78 = vector.broadcast %cst_53 : f32 to vector<8x128xf32>
    %79 = arith.addf %78, %77 : vector<8x128xf32>
    %80 = arith.divf %78, %79 : vector<8x128xf32>
    %81 = vector.extract_strided_slice %72 {offsets = [0, 128], sizes = [8, 128], strides = [1, 1]} : vector<8x512xf32> to vector<8x128xf32>
    %82 = arith.negf %81 : vector<8x128xf32>
    %83 = math.exp %82 : vector<8x128xf32>
    %cst_54 = arith.constant 1.000000e+00 : f32
    %84 = vector.broadcast %cst_54 : f32 to vector<8x128xf32>
    %85 = arith.addf %84, %83 : vector<8x128xf32>
    %86 = arith.divf %84, %85 : vector<8x128xf32>
    %87 = vector.extract_strided_slice %72 {offsets = [0, 256], sizes = [8, 128], strides = [1, 1]} : vector<8x512xf32> to vector<8x128xf32>
    %88 = math.tanh %87 : vector<8x128xf32>
    %89 = vector.extract_strided_slice %72 {offsets = [0, 384], sizes = [8, 128], strides = [1, 1]} : vector<8x512xf32> to vector<8x128xf32>
    %90 = arith.negf %89 : vector<8x128xf32>
    %91 = math.exp %90 : vector<8x128xf32>
    %cst_55 = arith.constant 1.000000e+00 : f32
    %92 = vector.broadcast %cst_55 : f32 to vector<8x128xf32>
    %93 = arith.addf %92, %91 : vector<8x128xf32>
    %94 = arith.divf %92, %93 : vector<8x128xf32>
    %95 = arith.mulf %86, %74 : vector<8x128xf32>
    %96 = arith.mulf %80, %88 : vector<8x128xf32>
    %97 = arith.addf %95, %96 : vector<8x128xf32>
    %98 = math.tanh %97 : vector<8x128xf32>
    %99 = arith.mulf %94, %98 : vector<8x128xf32>
    %c1_56 = arith.constant 1 : index
    %c0_57 = arith.constant 0 : index
    %c0_58 = arith.constant 0 : index
    %100 = vector.load %arg16[%c1_56, %c0_57, %c0_58] : memref<2x8x128xf32, #tpu.memory_space<vmem>>, vector<1x8x128xf32>
    %101 = vector.shape_cast %100 : vector<1x8x128xf32> to vector<8x128xf32>
    %102 = vector.shape_cast %99 : vector<8x128xf32> to vector<1x8x128xf32>
    tpu.vector_store %arg16[%c1_56, %c0_57, %c0_58], %102 {strides = array<i32>} : memref<2x8x128xf32, #tpu.memory_space<vmem>>, vector<1x8x128xf32>,
    %c1_59 = arith.constant 1 : index
    %c0_60 = arith.constant 0 : index
    %c0_61 = arith.constant 0 : index
    %103 = vector.load %arg17[%c1_59, %c0_60, %c0_61] : memref<2x8x128xf32, #tpu.memory_space<vmem>>, vector<1x8x128xf32>
    %104 = vector.shape_cast %103 : vector<1x8x128xf32> to vector<8x128xf32>
    %105 = vector.shape_cast %97 : vector<8x128xf32> to vector<1x8x128xf32>
    tpu.vector_store %arg17[%c1_59, %c0_60, %c0_61], %105 {strides = array<i32>} : memref<2x8x128xf32, #tpu.memory_space<vmem>>, vector<1x8x128xf32>,
    %106 = arith.index_cast %c0_i32_16 : i32 to index
    %c0_62 = arith.constant 0 : index
    %c0_63 = arith.constant 0 : index
    %107 = vector.load %arg19[%106, %c0_62, %c0_63] : memref<8x8x128xf32, #tpu.memory_space<vmem>>, vector<1x8x128xf32>
    %108 = vector.shape_cast %107 : vector<1x8x128xf32> to vector<8x128xf32>
    %109 = vector.shape_cast %99 : vector<8x128xf32> to vector<1x8x128xf32>
    tpu.vector_store %arg19[%106, %c0_62, %c0_63], %109 {strides = array<i32>} : memref<8x8x128xf32, #tpu.memory_space<vmem>>, vector<1x8x128xf32>,
    %c1_i32 = arith.constant 1 : i32
    %110 = arith.index_cast %c1_i32 : i32 to index
    %c0_64 = arith.constant 0 : index
    %c0_65 = arith.constant 0 : index
    %111 = vector.load %arg18[%110, %c0_64, %c0_65] : memref<8x8x512xf32, #tpu.memory_space<vmem>>, vector<1x8x512xf32>
    %112 = vector.shape_cast %111 : vector<1x8x512xf32> to vector<8x512xf32>
    %c0_66 = arith.constant 0 : index
    %c0_67 = arith.constant 0 : index
    %c0_68 = arith.constant 0 : index
    %113 = vector.load %arg16[%c0_66, %c0_67, %c0_68] : memref<2x8x128xf32, #tpu.memory_space<vmem>>, vector<1x8x128xf32>
    %114 = vector.shape_cast %113 : vector<1x8x128xf32> to vector<8x128xf32>
    %c0_69 = arith.constant 0 : index
    %c0_70 = arith.constant 0 : index
    %115 = vector.load %arg6[%c0_69, %c0_70] : memref<128x512xf32, #tpu.memory_space<vmem>>, vector<128x512xf32>
    %cst_71 = arith.constant dense<0.000000e+00> : vector<8x512xf32>
    %116 = tpu.matmul %114, %115, %cst_71 {dimension_numbers = #tpu.dot_dimension_numbers<[1], [0], [0], [1], [0, 0, 1, 1], [], []>} : vector<8x128xf32>, vector<128x512xf32>, vector<8x512xf32> -> vector<8x512xf32>
    %117 = arith.addf %112, %116 : vector<8x512xf32>
    %c0_72 = arith.constant 0 : index
    %c0_73 = arith.constant 0 : index
    %c0_74 = arith.constant 0 : index
    %118 = vector.load %arg17[%c0_72, %c0_73, %c0_74] : memref<2x8x128xf32, #tpu.memory_space<vmem>>, vector<1x8x128xf32>
    %119 = vector.shape_cast %118 : vector<1x8x128xf32> to vector<8x128xf32>
    %120 = vector.extract_strided_slice %117 {offsets = [0, 0], sizes = [8, 128], strides = [1, 1]} : vector<8x512xf32> to vector<8x128xf32>
    %121 = arith.negf %120 : vector<8x128xf32>
    %122 = math.exp %121 : vector<8x128xf32>
    %cst_75 = arith.constant 1.000000e+00 : f32
    %123 = vector.broadcast %cst_75 : f32 to vector<8x128xf32>
    %124 = arith.addf %123, %122 : vector<8x128xf32>
    %125 = arith.divf %123, %124 : vector<8x128xf32>
    %126 = vector.extract_strided_slice %117 {offsets = [0, 128], sizes = [8, 128], strides = [1, 1]} : vector<8x512xf32> to vector<8x128xf32>
    %127 = arith.negf %126 : vector<8x128xf32>
    %128 = math.exp %127 : vector<8x128xf32>
    %cst_76 = arith.constant 1.000000e+00 : f32
    %129 = vector.broadcast %cst_76 : f32 to vector<8x128xf32>
    %130 = arith.addf %129, %128 : vector<8x128xf32>
    %131 = arith.divf %129, %130 : vector<8x128xf32>
    %132 = vector.extract_strided_slice %117 {offsets = [0, 256], sizes = [8, 128], strides = [1, 1]} : vector<8x512xf32> to vector<8x128xf32>
    %133 = math.tanh %132 : vector<8x128xf32>
    %134 = vector.extract_strided_slice %117 {offsets = [0, 384], sizes = [8, 128], strides = [1, 1]} : vector<8x512xf32> to vector<8x128xf32>
    %135 = arith.negf %134 : vector<8x128xf32>
    %136 = math.exp %135 : vector<8x128xf32>
    %cst_77 = arith.constant 1.000000e+00 : f32
    %137 = vector.broadcast %cst_77 : f32 to vector<8x128xf32>
    %138 = arith.addf %137, %136 : vector<8x128xf32>
    %139 = arith.divf %137, %138 : vector<8x128xf32>
    %140 = arith.mulf %131, %119 : vector<8x128xf32>
    %141 = arith.mulf %125, %133 : vector<8x128xf32>
    %142 = arith.addf %140, %141 : vector<8x128xf32>
    %143 = math.tanh %142 : vector<8x128xf32>
    %144 = arith.mulf %139, %143 : vector<8x128xf32>
    %c0_78 = arith.constant 0 : index
    %c0_79 = arith.constant 0 : index
    %c0_80 = arith.constant 0 : index
    %145 = vector.load %arg16[%c0_78, %c0_79, %c0_80] : memref<2x8x128xf32, #tpu.memory_space<vmem>>, vector<1x8x128xf32>
    %146 = vector.shape_cast %145 : vector<1x8x128xf32> to vector<8x128xf32>
    %147 = vector.shape_cast %144 : vector<8x128xf32> to vector<1x8x128xf32>
    tpu.vector_store %arg16[%c0_78, %c0_79, %c0_80], %147 {strides = array<i32>} : memref<2x8x128xf32, #tpu.memory_space<vmem>>, vector<1x8x128xf32>,
    %c0_81 = arith.constant 0 : index
    %c0_82 = arith.constant 0 : index
    %c0_83 = arith.constant 0 : index
    %148 = vector.load %arg17[%c0_81, %c0_82, %c0_83] : memref<2x8x128xf32, #tpu.memory_space<vmem>>, vector<1x8x128xf32>
    %149 = vector.shape_cast %148 : vector<1x8x128xf32> to vector<8x128xf32>
    %150 = vector.shape_cast %142 : vector<8x128xf32> to vector<1x8x128xf32>
    tpu.vector_store %arg17[%c0_81, %c0_82, %c0_83], %150 {strides = array<i32>} : memref<2x8x128xf32, #tpu.memory_space<vmem>>, vector<1x8x128xf32>,
    %c0_84 = arith.constant 0 : index
    %c0_85 = arith.constant 0 : index
    %c0_86 = arith.constant 0 : index
    %151 = vector.load %arg8[%c0_84, %c0_85, %c0_86] : memref<1x128x512xf32, #tpu.memory_space<vmem>>, vector<1x128x512xf32>
    %152 = vector.shape_cast %151 : vector<1x128x512xf32> to vector<128x512xf32>
    %cst_87 = arith.constant dense<0.000000e+00> : vector<8x512xf32>
    %153 = tpu.matmul %144, %152, %cst_87 {dimension_numbers = #tpu.dot_dimension_numbers<[1], [0], [0], [1], [0, 0, 1, 1], [], []>} : vector<8x128xf32>, vector<128x512xf32>, vector<8x512xf32> -> vector<8x512xf32>
    %c1_88 = arith.constant 1 : index
    %c0_89 = arith.constant 0 : index
    %c0_90 = arith.constant 0 : index
    %154 = vector.load %arg16[%c1_88, %c0_89, %c0_90] : memref<2x8x128xf32, #tpu.memory_space<vmem>>, vector<1x8x128xf32>
    %155 = vector.shape_cast %154 : vector<1x8x128xf32> to vector<8x128xf32>
    %c0_91 = arith.constant 0 : index
    %c0_92 = arith.constant 0 : index
    %c0_93 = arith.constant 0 : index
    %156 = vector.load %arg9[%c0_91, %c0_92, %c0_93] : memref<1x128x512xf32, #tpu.memory_space<vmem>>, vector<1x128x512xf32>
    %157 = vector.shape_cast %156 : vector<1x128x512xf32> to vector<128x512xf32>
    %cst_94 = arith.constant dense<0.000000e+00> : vector<8x512xf32>
    %158 = tpu.matmul %155, %157, %cst_94 {dimension_numbers = #tpu.dot_dimension_numbers<[1], [0], [0], [1], [0, 0, 1, 1], [], []>} : vector<8x128xf32>, vector<128x512xf32>, vector<8x512xf32> -> vector<8x512xf32>
    %159 = arith.addf %153, %158 : vector<8x512xf32>
    %c0_95 = arith.constant 0 : index
    %c0_96 = arith.constant 0 : index
    %c0_97 = arith.constant 0 : index
    %160 = vector.load %arg10[%c0_95, %c0_96, %c0_97] : memref<1x1x512xf32, #tpu.memory_space<vmem>>, vector<1x1x512xf32>
    %161 = vector.shape_cast %160 : vector<1x1x512xf32> to vector<1x512xf32>
    %162 = vector.broadcast %161 : vector<1x512xf32> to vector<8x512xf32>
    %163 = arith.addf %159, %162 : vector<8x512xf32>
    %c1_98 = arith.constant 1 : index
    %c0_99 = arith.constant 0 : index
    %c0_100 = arith.constant 0 : index
    %164 = vector.load %arg17[%c1_98, %c0_99, %c0_100] : memref<2x8x128xf32, #tpu.memory_space<vmem>>, vector<1x8x128xf32>
    %165 = vector.shape_cast %164 : vector<1x8x128xf32> to vector<8x128xf32>
    %166 = vector.extract_strided_slice %163 {offsets = [0, 0], sizes = [8, 128], strides = [1, 1]} : vector<8x512xf32> to vector<8x128xf32>
    %167 = arith.negf %166 : vector<8x128xf32>
    %168 = math.exp %167 : vector<8x128xf32>
    %cst_101 = arith.constant 1.000000e+00 : f32
    %169 = vector.broadcast %cst_101 : f32 to vector<8x128xf32>
    %170 = arith.addf %169, %168 : vector<8x128xf32>
    %171 = arith.divf %169, %170 : vector<8x128xf32>
    %172 = vector.extract_strided_slice %163 {offsets = [0, 128], sizes = [8, 128], strides = [1, 1]} : vector<8x512xf32> to vector<8x128xf32>
    %173 = arith.negf %172 : vector<8x128xf32>
    %174 = math.exp %173 : vector<8x128xf32>
    %cst_102 = arith.constant 1.000000e+00 : f32
    %175 = vector.broadcast %cst_102 : f32 to vector<8x128xf32>
    %176 = arith.addf %175, %174 : vector<8x128xf32>
    %177 = arith.divf %175, %176 : vector<8x128xf32>
    %178 = vector.extract_strided_slice %163 {offsets = [0, 256], sizes = [8, 128], strides = [1, 1]} : vector<8x512xf32> to vector<8x128xf32>
    %179 = math.tanh %178 : vector<8x128xf32>
    %180 = vector.extract_strided_slice %163 {offsets = [0, 384], sizes = [8, 128], strides = [1, 1]} : vector<8x512xf32> to vector<8x128xf32>
    %181 = arith.negf %180 : vector<8x128xf32>
    %182 = math.exp %181 : vector<8x128xf32>
    %cst_103 = arith.constant 1.000000e+00 : f32
    %183 = vector.broadcast %cst_103 : f32 to vector<8x128xf32>
    %184 = arith.addf %183, %182 : vector<8x128xf32>
    %185 = arith.divf %183, %184 : vector<8x128xf32>
    %186 = arith.mulf %177, %165 : vector<8x128xf32>
    %187 = arith.mulf %171, %179 : vector<8x128xf32>
    %188 = arith.addf %186, %187 : vector<8x128xf32>
    %189 = math.tanh %188 : vector<8x128xf32>
    %190 = arith.mulf %185, %189 : vector<8x128xf32>
    %c1_104 = arith.constant 1 : index
    %c0_105 = arith.constant 0 : index
    %c0_106 = arith.constant 0 : index
    %191 = vector.load %arg16[%c1_104, %c0_105, %c0_106] : memref<2x8x128xf32, #tpu.memory_space<vmem>>, vector<1x8x128xf32>
    %192 = vector.shape_cast %191 : vector<1x8x128xf32> to vector<8x128xf32>
    %193 = vector.shape_cast %190 : vector<8x128xf32> to vector<1x8x128xf32>
    tpu.vector_store %arg16[%c1_104, %c0_105, %c0_106], %193 {strides = array<i32>} : memref<2x8x128xf32, #tpu.memory_space<vmem>>, vector<1x8x128xf32>,
    %c1_107 = arith.constant 1 : index
    %c0_108 = arith.constant 0 : index
    %c0_109 = arith.constant 0 : index
    %194 = vector.load %arg17[%c1_107, %c0_108, %c0_109] : memref<2x8x128xf32, #tpu.memory_space<vmem>>, vector<1x8x128xf32>
    %195 = vector.shape_cast %194 : vector<1x8x128xf32> to vector<8x128xf32>
    %196 = vector.shape_cast %188 : vector<8x128xf32> to vector<1x8x128xf32>
    tpu.vector_store %arg17[%c1_107, %c0_108, %c0_109], %196 {strides = array<i32>} : memref<2x8x128xf32, #tpu.memory_space<vmem>>, vector<1x8x128xf32>,
    %197 = arith.index_cast %c1_i32 : i32 to index
    %c0_110 = arith.constant 0 : index
    %c0_111 = arith.constant 0 : index
    %198 = vector.load %arg19[%197, %c0_110, %c0_111] : memref<8x8x128xf32, #tpu.memory_space<vmem>>, vector<1x8x128xf32>
    %199 = vector.shape_cast %198 : vector<1x8x128xf32> to vector<8x128xf32>
    %200 = vector.shape_cast %190 : vector<8x128xf32> to vector<1x8x128xf32>
    tpu.vector_store %arg19[%197, %c0_110, %c0_111], %200 {strides = array<i32>} : memref<8x8x128xf32, #tpu.memory_space<vmem>>, vector<1x8x128xf32>,
    %c2_i32 = arith.constant 2 : i32
    %201 = arith.index_cast %c2_i32 : i32 to index
    %c0_112 = arith.constant 0 : index
    %c0_113 = arith.constant 0 : index
    %202 = vector.load %arg18[%201, %c0_112, %c0_113] : memref<8x8x512xf32, #tpu.memory_space<vmem>>, vector<1x8x512xf32>
    %203 = vector.shape_cast %202 : vector<1x8x512xf32> to vector<8x512xf32>
    %c0_114 = arith.constant 0 : index
    %c0_115 = arith.constant 0 : index
    %c0_116 = arith.constant 0 : index
    %204 = vector.load %arg16[%c0_114, %c0_115, %c0_116] : memref<2x8x128xf32, #tpu.memory_space<vmem>>, vector<1x8x128xf32>
    %205 = vector.shape_cast %204 : vector<1x8x128xf32> to vector<8x128xf32>
    %c0_117 = arith.constant 0 : index
    %c0_118 = arith.constant 0 : index
    %206 = vector.load %arg6[%c0_117, %c0_118] : memref<128x512xf32, #tpu.memory_space<vmem>>, vector<128x512xf32>
    %cst_119 = arith.constant dense<0.000000e+00> : vector<8x512xf32>
    %207 = tpu.matmul %205, %206, %cst_119 {dimension_numbers = #tpu.dot_dimension_numbers<[1], [0], [0], [1], [0, 0, 1, 1], [], []>} : vector<8x128xf32>, vector<128x512xf32>, vector<8x512xf32> -> vector<8x512xf32>
    %208 = arith.addf %203, %207 : vector<8x512xf32>
    %c0_120 = arith.constant 0 : index
    %c0_121 = arith.constant 0 : index
    %c0_122 = arith.constant 0 : index
    %209 = vector.load %arg17[%c0_120, %c0_121, %c0_122] : memref<2x8x128xf32, #tpu.memory_space<vmem>>, vector<1x8x128xf32>
    %210 = vector.shape_cast %209 : vector<1x8x128xf32> to vector<8x128xf32>
    %211 = vector.extract_strided_slice %208 {offsets = [0, 0], sizes = [8, 128], strides = [1, 1]} : vector<8x512xf32> to vector<8x128xf32>
    %212 = arith.negf %211 : vector<8x128xf32>
    %213 = math.exp %212 : vector<8x128xf32>
    %cst_123 = arith.constant 1.000000e+00 : f32
    %214 = vector.broadcast %cst_123 : f32 to vector<8x128xf32>
    %215 = arith.addf %214, %213 : vector<8x128xf32>
    %216 = arith.divf %214, %215 : vector<8x128xf32>
    %217 = vector.extract_strided_slice %208 {offsets = [0, 128], sizes = [8, 128], strides = [1, 1]} : vector<8x512xf32> to vector<8x128xf32>
    %218 = arith.negf %217 : vector<8x128xf32>
    %219 = math.exp %218 : vector<8x128xf32>
    %cst_124 = arith.constant 1.000000e+00 : f32
    %220 = vector.broadcast %cst_124 : f32 to vector<8x128xf32>
    %221 = arith.addf %220, %219 : vector<8x128xf32>
    %222 = arith.divf %220, %221 : vector<8x128xf32>
    %223 = vector.extract_strided_slice %208 {offsets = [0, 256], sizes = [8, 128], strides = [1, 1]} : vector<8x512xf32> to vector<8x128xf32>
    %224 = math.tanh %223 : vector<8x128xf32>
    %225 = vector.extract_strided_slice %208 {offsets = [0, 384], sizes = [8, 128], strides = [1, 1]} : vector<8x512xf32> to vector<8x128xf32>
    %226 = arith.negf %225 : vector<8x128xf32>
    %227 = math.exp %226 : vector<8x128xf32>
    %cst_125 = arith.constant 1.000000e+00 : f32
    %228 = vector.broadcast %cst_125 : f32 to vector<8x128xf32>
    %229 = arith.addf %228, %227 : vector<8x128xf32>
    %230 = arith.divf %228, %229 : vector<8x128xf32>
    %231 = arith.mulf %222, %210 : vector<8x128xf32>
    %232 = arith.mulf %216, %224 : vector<8x128xf32>
    %233 = arith.addf %231, %232 : vector<8x128xf32>
    %234 = math.tanh %233 : vector<8x128xf32>
    %235 = arith.mulf %230, %234 : vector<8x128xf32>
    %c0_126 = arith.constant 0 : index
    %c0_127 = arith.constant 0 : index
    %c0_128 = arith.constant 0 : index
    %236 = vector.load %arg16[%c0_126, %c0_127, %c0_128] : memref<2x8x128xf32, #tpu.memory_space<vmem>>, vector<1x8x128xf32>
    %237 = vector.shape_cast %236 : vector<1x8x128xf32> to vector<8x128xf32>
    %238 = vector.shape_cast %235 : vector<8x128xf32> to vector<1x8x128xf32>
    tpu.vector_store %arg16[%c0_126, %c0_127, %c0_128], %238 {strides = array<i32>} : memref<2x8x128xf32, #tpu.memory_space<vmem>>, vector<1x8x128xf32>,
    %c0_129 = arith.constant 0 : index
    %c0_130 = arith.constant 0 : index
    %c0_131 = arith.constant 0 : index
    %239 = vector.load %arg17[%c0_129, %c0_130, %c0_131] : memref<2x8x128xf32, #tpu.memory_space<vmem>>, vector<1x8x128xf32>
    %240 = vector.shape_cast %239 : vector<1x8x128xf32> to vector<8x128xf32>
    %241 = vector.shape_cast %233 : vector<8x128xf32> to vector<1x8x128xf32>
    tpu.vector_store %arg17[%c0_129, %c0_130, %c0_131], %241 {strides = array<i32>} : memref<2x8x128xf32, #tpu.memory_space<vmem>>, vector<1x8x128xf32>,
    %c0_132 = arith.constant 0 : index
    %c0_133 = arith.constant 0 : index
    %c0_134 = arith.constant 0 : index
    %242 = vector.load %arg8[%c0_132, %c0_133, %c0_134] : memref<1x128x512xf32, #tpu.memory_space<vmem>>, vector<1x128x512xf32>
    %243 = vector.shape_cast %242 : vector<1x128x512xf32> to vector<128x512xf32>
    %cst_135 = arith.constant dense<0.000000e+00> : vector<8x512xf32>
    %244 = tpu.matmul %235, %243, %cst_135 {dimension_numbers = #tpu.dot_dimension_numbers<[1], [0], [0], [1], [0, 0, 1, 1], [], []>} : vector<8x128xf32>, vector<128x512xf32>, vector<8x512xf32> -> vector<8x512xf32>
    %c1_136 = arith.constant 1 : index
    %c0_137 = arith.constant 0 : index
    %c0_138 = arith.constant 0 : index
    %245 = vector.load %arg16[%c1_136, %c0_137, %c0_138] : memref<2x8x128xf32, #tpu.memory_space<vmem>>, vector<1x8x128xf32>
    %246 = vector.shape_cast %245 : vector<1x8x128xf32> to vector<8x128xf32>
    %c0_139 = arith.constant 0 : index
    %c0_140 = arith.constant 0 : index
    %c0_141 = arith.constant 0 : index
    %247 = vector.load %arg9[%c0_139, %c0_140, %c0_141] : memref<1x128x512xf32, #tpu.memory_space<vmem>>, vector<1x128x512xf32>
    %248 = vector.shape_cast %247 : vector<1x128x512xf32> to vector<128x512xf32>
    %cst_142 = arith.constant dense<0.000000e+00> : vector<8x512xf32>
    %249 = tpu.matmul %246, %248, %cst_142 {dimension_numbers = #tpu.dot_dimension_numbers<[1], [0], [0], [1], [0, 0, 1, 1], [], []>} : vector<8x128xf32>, vector<128x512xf32>, vector<8x512xf32> -> vector<8x512xf32>
    %250 = arith.addf %244, %249 : vector<8x512xf32>
    %c0_143 = arith.constant 0 : index
    %c0_144 = arith.constant 0 : index
    %c0_145 = arith.constant 0 : index
    %251 = vector.load %arg10[%c0_143, %c0_144, %c0_145] : memref<1x1x512xf32, #tpu.memory_space<vmem>>, vector<1x1x512xf32>
    %252 = vector.shape_cast %251 : vector<1x1x512xf32> to vector<1x512xf32>
    %253 = vector.broadcast %252 : vector<1x512xf32> to vector<8x512xf32>
    %254 = arith.addf %250, %253 : vector<8x512xf32>
    %c1_146 = arith.constant 1 : index
    %c0_147 = arith.constant 0 : index
    %c0_148 = arith.constant 0 : index
    %255 = vector.load %arg17[%c1_146, %c0_147, %c0_148] : memref<2x8x128xf32, #tpu.memory_space<vmem>>, vector<1x8x128xf32>
    %256 = vector.shape_cast %255 : vector<1x8x128xf32> to vector<8x128xf32>
    %257 = vector.extract_strided_slice %254 {offsets = [0, 0], sizes = [8, 128], strides = [1, 1]} : vector<8x512xf32> to vector<8x128xf32>
    %258 = arith.negf %257 : vector<8x128xf32>
    %259 = math.exp %258 : vector<8x128xf32>
    %cst_149 = arith.constant 1.000000e+00 : f32
    %260 = vector.broadcast %cst_149 : f32 to vector<8x128xf32>
    %261 = arith.addf %260, %259 : vector<8x128xf32>
    %262 = arith.divf %260, %261 : vector<8x128xf32>
    %263 = vector.extract_strided_slice %254 {offsets = [0, 128], sizes = [8, 128], strides = [1, 1]} : vector<8x512xf32> to vector<8x128xf32>
    %264 = arith.negf %263 : vector<8x128xf32>
    %265 = math.exp %264 : vector<8x128xf32>
    %cst_150 = arith.constant 1.000000e+00 : f32
    %266 = vector.broadcast %cst_150 : f32 to vector<8x128xf32>
    %267 = arith.addf %266, %265 : vector<8x128xf32>
    %268 = arith.divf %266, %267 : vector<8x128xf32>
    %269 = vector.extract_strided_slice %254 {offsets = [0, 256], sizes = [8, 128], strides = [1, 1]} : vector<8x512xf32> to vector<8x128xf32>
    %270 = math.tanh %269 : vector<8x128xf32>
    %271 = vector.extract_strided_slice %254 {offsets = [0, 384], sizes = [8, 128], strides = [1, 1]} : vector<8x512xf32> to vector<8x128xf32>
    %272 = arith.negf %271 : vector<8x128xf32>
    %273 = math.exp %272 : vector<8x128xf32>
    %cst_151 = arith.constant 1.000000e+00 : f32
    %274 = vector.broadcast %cst_151 : f32 to vector<8x128xf32>
    %275 = arith.addf %274, %273 : vector<8x128xf32>
    %276 = arith.divf %274, %275 : vector<8x128xf32>
    %277 = arith.mulf %268, %256 : vector<8x128xf32>
    %278 = arith.mulf %262, %270 : vector<8x128xf32>
    %279 = arith.addf %277, %278 : vector<8x128xf32>
    %280 = math.tanh %279 : vector<8x128xf32>
    %281 = arith.mulf %276, %280 : vector<8x128xf32>
    %c1_152 = arith.constant 1 : index
    %c0_153 = arith.constant 0 : index
    %c0_154 = arith.constant 0 : index
    %282 = vector.load %arg16[%c1_152, %c0_153, %c0_154] : memref<2x8x128xf32, #tpu.memory_space<vmem>>, vector<1x8x128xf32>
    %283 = vector.shape_cast %282 : vector<1x8x128xf32> to vector<8x128xf32>
    %284 = vector.shape_cast %281 : vector<8x128xf32> to vector<1x8x128xf32>
    tpu.vector_store %arg16[%c1_152, %c0_153, %c0_154], %284 {strides = array<i32>} : memref<2x8x128xf32, #tpu.memory_space<vmem>>, vector<1x8x128xf32>,
    %c1_155 = arith.constant 1 : index
    %c0_156 = arith.constant 0 : index
    %c0_157 = arith.constant 0 : index
    %285 = vector.load %arg17[%c1_155, %c0_156, %c0_157] : memref<2x8x128xf32, #tpu.memory_space<vmem>>, vector<1x8x128xf32>
    %286 = vector.shape_cast %285 : vector<1x8x128xf32> to vector<8x128xf32>
    %287 = vector.shape_cast %279 : vector<8x128xf32> to vector<1x8x128xf32>
    tpu.vector_store %arg17[%c1_155, %c0_156, %c0_157], %287 {strides = array<i32>} : memref<2x8x128xf32, #tpu.memory_space<vmem>>, vector<1x8x128xf32>,
    %288 = arith.index_cast %c2_i32 : i32 to index
    %c0_158 = arith.constant 0 : index
    %c0_159 = arith.constant 0 : index
    %289 = vector.load %arg19[%288, %c0_158, %c0_159] : memref<8x8x128xf32, #tpu.memory_space<vmem>>, vector<1x8x128xf32>
    %290 = vector.shape_cast %289 : vector<1x8x128xf32> to vector<8x128xf32>
    %291 = vector.shape_cast %281 : vector<8x128xf32> to vector<1x8x128xf32>
    tpu.vector_store %arg19[%288, %c0_158, %c0_159], %291 {strides = array<i32>} : memref<8x8x128xf32, #tpu.memory_space<vmem>>, vector<1x8x128xf32>,
    %c3_i32 = arith.constant 3 : i32
    %292 = arith.index_cast %c3_i32 : i32 to index
    %c0_160 = arith.constant 0 : index
    %c0_161 = arith.constant 0 : index
    %293 = vector.load %arg18[%292, %c0_160, %c0_161] : memref<8x8x512xf32, #tpu.memory_space<vmem>>, vector<1x8x512xf32>
    %294 = vector.shape_cast %293 : vector<1x8x512xf32> to vector<8x512xf32>
    %c0_162 = arith.constant 0 : index
    %c0_163 = arith.constant 0 : index
    %c0_164 = arith.constant 0 : index
    %295 = vector.load %arg16[%c0_162, %c0_163, %c0_164] : memref<2x8x128xf32, #tpu.memory_space<vmem>>, vector<1x8x128xf32>
    %296 = vector.shape_cast %295 : vector<1x8x128xf32> to vector<8x128xf32>
    %c0_165 = arith.constant 0 : index
    %c0_166 = arith.constant 0 : index
    %297 = vector.load %arg6[%c0_165, %c0_166] : memref<128x512xf32, #tpu.memory_space<vmem>>, vector<128x512xf32>
    %cst_167 = arith.constant dense<0.000000e+00> : vector<8x512xf32>
    %298 = tpu.matmul %296, %297, %cst_167 {dimension_numbers = #tpu.dot_dimension_numbers<[1], [0], [0], [1], [0, 0, 1, 1], [], []>} : vector<8x128xf32>, vector<128x512xf32>, vector<8x512xf32> -> vector<8x512xf32>
    %299 = arith.addf %294, %298 : vector<8x512xf32>
    %c0_168 = arith.constant 0 : index
    %c0_169 = arith.constant 0 : index
    %c0_170 = arith.constant 0 : index
    %300 = vector.load %arg17[%c0_168, %c0_169, %c0_170] : memref<2x8x128xf32, #tpu.memory_space<vmem>>, vector<1x8x128xf32>
    %301 = vector.shape_cast %300 : vector<1x8x128xf32> to vector<8x128xf32>
    %302 = vector.extract_strided_slice %299 {offsets = [0, 0], sizes = [8, 128], strides = [1, 1]} : vector<8x512xf32> to vector<8x128xf32>
    %303 = arith.negf %302 : vector<8x128xf32>
    %304 = math.exp %303 : vector<8x128xf32>
    %cst_171 = arith.constant 1.000000e+00 : f32
    %305 = vector.broadcast %cst_171 : f32 to vector<8x128xf32>
    %306 = arith.addf %305, %304 : vector<8x128xf32>
    %307 = arith.divf %305, %306 : vector<8x128xf32>
    %308 = vector.extract_strided_slice %299 {offsets = [0, 128], sizes = [8, 128], strides = [1, 1]} : vector<8x512xf32> to vector<8x128xf32>
    %309 = arith.negf %308 : vector<8x128xf32>
    %310 = math.exp %309 : vector<8x128xf32>
    %cst_172 = arith.constant 1.000000e+00 : f32
    %311 = vector.broadcast %cst_172 : f32 to vector<8x128xf32>
    %312 = arith.addf %311, %310 : vector<8x128xf32>
    %313 = arith.divf %311, %312 : vector<8x128xf32>
    %314 = vector.extract_strided_slice %299 {offsets = [0, 256], sizes = [8, 128], strides = [1, 1]} : vector<8x512xf32> to vector<8x128xf32>
    %315 = math.tanh %314 : vector<8x128xf32>
    %316 = vector.extract_strided_slice %299 {offsets = [0, 384], sizes = [8, 128], strides = [1, 1]} : vector<8x512xf32> to vector<8x128xf32>
    %317 = arith.negf %316 : vector<8x128xf32>
    %318 = math.exp %317 : vector<8x128xf32>
    %cst_173 = arith.constant 1.000000e+00 : f32
    %319 = vector.broadcast %cst_173 : f32 to vector<8x128xf32>
    %320 = arith.addf %319, %318 : vector<8x128xf32>
    %321 = arith.divf %319, %320 : vector<8x128xf32>
    %322 = arith.mulf %313, %301 : vector<8x128xf32>
    %323 = arith.mulf %307, %315 : vector<8x128xf32>
    %324 = arith.addf %322, %323 : vector<8x128xf32>
    %325 = math.tanh %324 : vector<8x128xf32>
    %326 = arith.mulf %321, %325 : vector<8x128xf32>
    %c0_174 = arith.constant 0 : index
    %c0_175 = arith.constant 0 : index
    %c0_176 = arith.constant 0 : index
    %327 = vector.load %arg16[%c0_174, %c0_175, %c0_176] : memref<2x8x128xf32, #tpu.memory_space<vmem>>, vector<1x8x128xf32>
    %328 = vector.shape_cast %327 : vector<1x8x128xf32> to vector<8x128xf32>
    %329 = vector.shape_cast %326 : vector<8x128xf32> to vector<1x8x128xf32>
    tpu.vector_store %arg16[%c0_174, %c0_175, %c0_176], %329 {strides = array<i32>} : memref<2x8x128xf32, #tpu.memory_space<vmem>>, vector<1x8x128xf32>,
    %c0_177 = arith.constant 0 : index
    %c0_178 = arith.constant 0 : index
    %c0_179 = arith.constant 0 : index
    %330 = vector.load %arg17[%c0_177, %c0_178, %c0_179] : memref<2x8x128xf32, #tpu.memory_space<vmem>>, vector<1x8x128xf32>
    %331 = vector.shape_cast %330 : vector<1x8x128xf32> to vector<8x128xf32>
    %332 = vector.shape_cast %324 : vector<8x128xf32> to vector<1x8x128xf32>
    tpu.vector_store %arg17[%c0_177, %c0_178, %c0_179], %332 {strides = array<i32>} : memref<2x8x128xf32, #tpu.memory_space<vmem>>, vector<1x8x128xf32>,
    %c0_180 = arith.constant 0 : index
    %c0_181 = arith.constant 0 : index
    %c0_182 = arith.constant 0 : index
    %333 = vector.load %arg8[%c0_180, %c0_181, %c0_182] : memref<1x128x512xf32, #tpu.memory_space<vmem>>, vector<1x128x512xf32>
    %334 = vector.shape_cast %333 : vector<1x128x512xf32> to vector<128x512xf32>
    %cst_183 = arith.constant dense<0.000000e+00> : vector<8x512xf32>
    %335 = tpu.matmul %326, %334, %cst_183 {dimension_numbers = #tpu.dot_dimension_numbers<[1], [0], [0], [1], [0, 0, 1, 1], [], []>} : vector<8x128xf32>, vector<128x512xf32>, vector<8x512xf32> -> vector<8x512xf32>
    %c1_184 = arith.constant 1 : index
    %c0_185 = arith.constant 0 : index
    %c0_186 = arith.constant 0 : index
    %336 = vector.load %arg16[%c1_184, %c0_185, %c0_186] : memref<2x8x128xf32, #tpu.memory_space<vmem>>, vector<1x8x128xf32>
    %337 = vector.shape_cast %336 : vector<1x8x128xf32> to vector<8x128xf32>
    %c0_187 = arith.constant 0 : index
    %c0_188 = arith.constant 0 : index
    %c0_189 = arith.constant 0 : index
    %338 = vector.load %arg9[%c0_187, %c0_188, %c0_189] : memref<1x128x512xf32, #tpu.memory_space<vmem>>, vector<1x128x512xf32>
    %339 = vector.shape_cast %338 : vector<1x128x512xf32> to vector<128x512xf32>
    %cst_190 = arith.constant dense<0.000000e+00> : vector<8x512xf32>
    %340 = tpu.matmul %337, %339, %cst_190 {dimension_numbers = #tpu.dot_dimension_numbers<[1], [0], [0], [1], [0, 0, 1, 1], [], []>} : vector<8x128xf32>, vector<128x512xf32>, vector<8x512xf32> -> vector<8x512xf32>
    %341 = arith.addf %335, %340 : vector<8x512xf32>
    %c0_191 = arith.constant 0 : index
    %c0_192 = arith.constant 0 : index
    %c0_193 = arith.constant 0 : index
    %342 = vector.load %arg10[%c0_191, %c0_192, %c0_193] : memref<1x1x512xf32, #tpu.memory_space<vmem>>, vector<1x1x512xf32>
    %343 = vector.shape_cast %342 : vector<1x1x512xf32> to vector<1x512xf32>
    %344 = vector.broadcast %343 : vector<1x512xf32> to vector<8x512xf32>
    %345 = arith.addf %341, %344 : vector<8x512xf32>
    %c1_194 = arith.constant 1 : index
    %c0_195 = arith.constant 0 : index
    %c0_196 = arith.constant 0 : index
    %346 = vector.load %arg17[%c1_194, %c0_195, %c0_196] : memref<2x8x128xf32, #tpu.memory_space<vmem>>, vector<1x8x128xf32>
    %347 = vector.shape_cast %346 : vector<1x8x128xf32> to vector<8x128xf32>
    %348 = vector.extract_strided_slice %345 {offsets = [0, 0], sizes = [8, 128], strides = [1, 1]} : vector<8x512xf32> to vector<8x128xf32>
    %349 = arith.negf %348 : vector<8x128xf32>
    %350 = math.exp %349 : vector<8x128xf32>
    %cst_197 = arith.constant 1.000000e+00 : f32
    %351 = vector.broadcast %cst_197 : f32 to vector<8x128xf32>
    %352 = arith.addf %351, %350 : vector<8x128xf32>
    %353 = arith.divf %351, %352 : vector<8x128xf32>
    %354 = vector.extract_strided_slice %345 {offsets = [0, 128], sizes = [8, 128], strides = [1, 1]} : vector<8x512xf32> to vector<8x128xf32>
    %355 = arith.negf %354 : vector<8x128xf32>
    %356 = math.exp %355 : vector<8x128xf32>
    %cst_198 = arith.constant 1.000000e+00 : f32
    %357 = vector.broadcast %cst_198 : f32 to vector<8x128xf32>
    %358 = arith.addf %357, %356 : vector<8x128xf32>
    %359 = arith.divf %357, %358 : vector<8x128xf32>
    %360 = vector.extract_strided_slice %345 {offsets = [0, 256], sizes = [8, 128], strides = [1, 1]} : vector<8x512xf32> to vector<8x128xf32>
    %361 = math.tanh %360 : vector<8x128xf32>
    %362 = vector.extract_strided_slice %345 {offsets = [0, 384], sizes = [8, 128], strides = [1, 1]} : vector<8x512xf32> to vector<8x128xf32>
    %363 = arith.negf %362 : vector<8x128xf32>
    %364 = math.exp %363 : vector<8x128xf32>
    %cst_199 = arith.constant 1.000000e+00 : f32
    %365 = vector.broadcast %cst_199 : f32 to vector<8x128xf32>
    %366 = arith.addf %365, %364 : vector<8x128xf32>
    %367 = arith.divf %365, %366 : vector<8x128xf32>
    %368 = arith.mulf %359, %347 : vector<8x128xf32>
    %369 = arith.mulf %353, %361 : vector<8x128xf32>
    %370 = arith.addf %368, %369 : vector<8x128xf32>
    %371 = math.tanh %370 : vector<8x128xf32>
    %372 = arith.mulf %367, %371 : vector<8x128xf32>
    %c1_200 = arith.constant 1 : index
    %c0_201 = arith.constant 0 : index
    %c0_202 = arith.constant 0 : index
    %373 = vector.load %arg16[%c1_200, %c0_201, %c0_202] : memref<2x8x128xf32, #tpu.memory_space<vmem>>, vector<1x8x128xf32>
    %374 = vector.shape_cast %373 : vector<1x8x128xf32> to vector<8x128xf32>
    %375 = vector.shape_cast %372 : vector<8x128xf32> to vector<1x8x128xf32>
    tpu.vector_store %arg16[%c1_200, %c0_201, %c0_202], %375 {strides = array<i32>} : memref<2x8x128xf32, #tpu.memory_space<vmem>>, vector<1x8x128xf32>,
    %c1_203 = arith.constant 1 : index
    %c0_204 = arith.constant 0 : index
    %c0_205 = arith.constant 0 : index
    %376 = vector.load %arg17[%c1_203, %c0_204, %c0_205] : memref<2x8x128xf32, #tpu.memory_space<vmem>>, vector<1x8x128xf32>
    %377 = vector.shape_cast %376 : vector<1x8x128xf32> to vector<8x128xf32>
    %378 = vector.shape_cast %370 : vector<8x128xf32> to vector<1x8x128xf32>
    tpu.vector_store %arg17[%c1_203, %c0_204, %c0_205], %378 {strides = array<i32>} : memref<2x8x128xf32, #tpu.memory_space<vmem>>, vector<1x8x128xf32>,
    %379 = arith.index_cast %c3_i32 : i32 to index
    %c0_206 = arith.constant 0 : index
    %c0_207 = arith.constant 0 : index
    %380 = vector.load %arg19[%379, %c0_206, %c0_207] : memref<8x8x128xf32, #tpu.memory_space<vmem>>, vector<1x8x128xf32>
    %381 = vector.shape_cast %380 : vector<1x8x128xf32> to vector<8x128xf32>
    %382 = vector.shape_cast %372 : vector<8x128xf32> to vector<1x8x128xf32>
    tpu.vector_store %arg19[%379, %c0_206, %c0_207], %382 {strides = array<i32>} : memref<8x8x128xf32, #tpu.memory_space<vmem>>, vector<1x8x128xf32>,
    %c4_i32 = arith.constant 4 : i32
    %383 = arith.index_cast %c4_i32 : i32 to index
    %c0_208 = arith.constant 0 : index
    %c0_209 = arith.constant 0 : index
    %384 = vector.load %arg18[%383, %c0_208, %c0_209] : memref<8x8x512xf32, #tpu.memory_space<vmem>>, vector<1x8x512xf32>
    %385 = vector.shape_cast %384 : vector<1x8x512xf32> to vector<8x512xf32>
    %c0_210 = arith.constant 0 : index
    %c0_211 = arith.constant 0 : index
    %c0_212 = arith.constant 0 : index
    %386 = vector.load %arg16[%c0_210, %c0_211, %c0_212] : memref<2x8x128xf32, #tpu.memory_space<vmem>>, vector<1x8x128xf32>
    %387 = vector.shape_cast %386 : vector<1x8x128xf32> to vector<8x128xf32>
    %c0_213 = arith.constant 0 : index
    %c0_214 = arith.constant 0 : index
    %388 = vector.load %arg6[%c0_213, %c0_214] : memref<128x512xf32, #tpu.memory_space<vmem>>, vector<128x512xf32>
    %cst_215 = arith.constant dense<0.000000e+00> : vector<8x512xf32>
    %389 = tpu.matmul %387, %388, %cst_215 {dimension_numbers = #tpu.dot_dimension_numbers<[1], [0], [0], [1], [0, 0, 1, 1], [], []>} : vector<8x128xf32>, vector<128x512xf32>, vector<8x512xf32> -> vector<8x512xf32>
    %390 = arith.addf %385, %389 : vector<8x512xf32>
    %c0_216 = arith.constant 0 : index
    %c0_217 = arith.constant 0 : index
    %c0_218 = arith.constant 0 : index
    %391 = vector.load %arg17[%c0_216, %c0_217, %c0_218] : memref<2x8x128xf32, #tpu.memory_space<vmem>>, vector<1x8x128xf32>
    %392 = vector.shape_cast %391 : vector<1x8x128xf32> to vector<8x128xf32>
    %393 = vector.extract_strided_slice %390 {offsets = [0, 0], sizes = [8, 128], strides = [1, 1]} : vector<8x512xf32> to vector<8x128xf32>
    %394 = arith.negf %393 : vector<8x128xf32>
    %395 = math.exp %394 : vector<8x128xf32>
    %cst_219 = arith.constant 1.000000e+00 : f32
    %396 = vector.broadcast %cst_219 : f32 to vector<8x128xf32>
    %397 = arith.addf %396, %395 : vector<8x128xf32>
    %398 = arith.divf %396, %397 : vector<8x128xf32>
    %399 = vector.extract_strided_slice %390 {offsets = [0, 128], sizes = [8, 128], strides = [1, 1]} : vector<8x512xf32> to vector<8x128xf32>
    %400 = arith.negf %399 : vector<8x128xf32>
    %401 = math.exp %400 : vector<8x128xf32>
    %cst_220 = arith.constant 1.000000e+00 : f32
    %402 = vector.broadcast %cst_220 : f32 to vector<8x128xf32>
    %403 = arith.addf %402, %401 : vector<8x128xf32>
    %404 = arith.divf %402, %403 : vector<8x128xf32>
    %405 = vector.extract_strided_slice %390 {offsets = [0, 256], sizes = [8, 128], strides = [1, 1]} : vector<8x512xf32> to vector<8x128xf32>
    %406 = math.tanh %405 : vector<8x128xf32>
    %407 = vector.extract_strided_slice %390 {offsets = [0, 384], sizes = [8, 128], strides = [1, 1]} : vector<8x512xf32> to vector<8x128xf32>
    %408 = arith.negf %407 : vector<8x128xf32>
    %409 = math.exp %408 : vector<8x128xf32>
    %cst_221 = arith.constant 1.000000e+00 : f32
    %410 = vector.broadcast %cst_221 : f32 to vector<8x128xf32>
    %411 = arith.addf %410, %409 : vector<8x128xf32>
    %412 = arith.divf %410, %411 : vector<8x128xf32>
    %413 = arith.mulf %404, %392 : vector<8x128xf32>
    %414 = arith.mulf %398, %406 : vector<8x128xf32>
    %415 = arith.addf %413, %414 : vector<8x128xf32>
    %416 = math.tanh %415 : vector<8x128xf32>
    %417 = arith.mulf %412, %416 : vector<8x128xf32>
    %c0_222 = arith.constant 0 : index
    %c0_223 = arith.constant 0 : index
    %c0_224 = arith.constant 0 : index
    %418 = vector.load %arg16[%c0_222, %c0_223, %c0_224] : memref<2x8x128xf32, #tpu.memory_space<vmem>>, vector<1x8x128xf32>
    %419 = vector.shape_cast %418 : vector<1x8x128xf32> to vector<8x128xf32>
    %420 = vector.shape_cast %417 : vector<8x128xf32> to vector<1x8x128xf32>
    tpu.vector_store %arg16[%c0_222, %c0_223, %c0_224], %420 {strides = array<i32>} : memref<2x8x128xf32, #tpu.memory_space<vmem>>, vector<1x8x128xf32>,
    %c0_225 = arith.constant 0 : index
    %c0_226 = arith.constant 0 : index
    %c0_227 = arith.constant 0 : index
    %421 = vector.load %arg17[%c0_225, %c0_226, %c0_227] : memref<2x8x128xf32, #tpu.memory_space<vmem>>, vector<1x8x128xf32>
    %422 = vector.shape_cast %421 : vector<1x8x128xf32> to vector<8x128xf32>
    %423 = vector.shape_cast %415 : vector<8x128xf32> to vector<1x8x128xf32>
    tpu.vector_store %arg17[%c0_225, %c0_226, %c0_227], %423 {strides = array<i32>} : memref<2x8x128xf32, #tpu.memory_space<vmem>>, vector<1x8x128xf32>,
    %c0_228 = arith.constant 0 : index
    %c0_229 = arith.constant 0 : index
    %c0_230 = arith.constant 0 : index
    %424 = vector.load %arg8[%c0_228, %c0_229, %c0_230] : memref<1x128x512xf32, #tpu.memory_space<vmem>>, vector<1x128x512xf32>
    %425 = vector.shape_cast %424 : vector<1x128x512xf32> to vector<128x512xf32>
    %cst_231 = arith.constant dense<0.000000e+00> : vector<8x512xf32>
    %426 = tpu.matmul %417, %425, %cst_231 {dimension_numbers = #tpu.dot_dimension_numbers<[1], [0], [0], [1], [0, 0, 1, 1], [], []>} : vector<8x128xf32>, vector<128x512xf32>, vector<8x512xf32> -> vector<8x512xf32>
    %c1_232 = arith.constant 1 : index
    %c0_233 = arith.constant 0 : index
    %c0_234 = arith.constant 0 : index
    %427 = vector.load %arg16[%c1_232, %c0_233, %c0_234] : memref<2x8x128xf32, #tpu.memory_space<vmem>>, vector<1x8x128xf32>
    %428 = vector.shape_cast %427 : vector<1x8x128xf32> to vector<8x128xf32>
    %c0_235 = arith.constant 0 : index
    %c0_236 = arith.constant 0 : index
    %c0_237 = arith.constant 0 : index
    %429 = vector.load %arg9[%c0_235, %c0_236, %c0_237] : memref<1x128x512xf32, #tpu.memory_space<vmem>>, vector<1x128x512xf32>
    %430 = vector.shape_cast %429 : vector<1x128x512xf32> to vector<128x512xf32>
    %cst_238 = arith.constant dense<0.000000e+00> : vector<8x512xf32>
    %431 = tpu.matmul %428, %430, %cst_238 {dimension_numbers = #tpu.dot_dimension_numbers<[1], [0], [0], [1], [0, 0, 1, 1], [], []>} : vector<8x128xf32>, vector<128x512xf32>, vector<8x512xf32> -> vector<8x512xf32>
    %432 = arith.addf %426, %431 : vector<8x512xf32>
    %c0_239 = arith.constant 0 : index
    %c0_240 = arith.constant 0 : index
    %c0_241 = arith.constant 0 : index
    %433 = vector.load %arg10[%c0_239, %c0_240, %c0_241] : memref<1x1x512xf32, #tpu.memory_space<vmem>>, vector<1x1x512xf32>
    %434 = vector.shape_cast %433 : vector<1x1x512xf32> to vector<1x512xf32>
    %435 = vector.broadcast %434 : vector<1x512xf32> to vector<8x512xf32>
    %436 = arith.addf %432, %435 : vector<8x512xf32>
    %c1_242 = arith.constant 1 : index
    %c0_243 = arith.constant 0 : index
    %c0_244 = arith.constant 0 : index
    %437 = vector.load %arg17[%c1_242, %c0_243, %c0_244] : memref<2x8x128xf32, #tpu.memory_space<vmem>>, vector<1x8x128xf32>
    %438 = vector.shape_cast %437 : vector<1x8x128xf32> to vector<8x128xf32>
    %439 = vector.extract_strided_slice %436 {offsets = [0, 0], sizes = [8, 128], strides = [1, 1]} : vector<8x512xf32> to vector<8x128xf32>
    %440 = arith.negf %439 : vector<8x128xf32>
    %441 = math.exp %440 : vector<8x128xf32>
    %cst_245 = arith.constant 1.000000e+00 : f32
    %442 = vector.broadcast %cst_245 : f32 to vector<8x128xf32>
    %443 = arith.addf %442, %441 : vector<8x128xf32>
    %444 = arith.divf %442, %443 : vector<8x128xf32>
    %445 = vector.extract_strided_slice %436 {offsets = [0, 128], sizes = [8, 128], strides = [1, 1]} : vector<8x512xf32> to vector<8x128xf32>
    %446 = arith.negf %445 : vector<8x128xf32>
    %447 = math.exp %446 : vector<8x128xf32>
    %cst_246 = arith.constant 1.000000e+00 : f32
    %448 = vector.broadcast %cst_246 : f32 to vector<8x128xf32>
    %449 = arith.addf %448, %447 : vector<8x128xf32>
    %450 = arith.divf %448, %449 : vector<8x128xf32>
    %451 = vector.extract_strided_slice %436 {offsets = [0, 256], sizes = [8, 128], strides = [1, 1]} : vector<8x512xf32> to vector<8x128xf32>
    %452 = math.tanh %451 : vector<8x128xf32>
    %453 = vector.extract_strided_slice %436 {offsets = [0, 384], sizes = [8, 128], strides = [1, 1]} : vector<8x512xf32> to vector<8x128xf32>
    %454 = arith.negf %453 : vector<8x128xf32>
    %455 = math.exp %454 : vector<8x128xf32>
    %cst_247 = arith.constant 1.000000e+00 : f32
    %456 = vector.broadcast %cst_247 : f32 to vector<8x128xf32>
    %457 = arith.addf %456, %455 : vector<8x128xf32>
    %458 = arith.divf %456, %457 : vector<8x128xf32>
    %459 = arith.mulf %450, %438 : vector<8x128xf32>
    %460 = arith.mulf %444, %452 : vector<8x128xf32>
    %461 = arith.addf %459, %460 : vector<8x128xf32>
    %462 = math.tanh %461 : vector<8x128xf32>
    %463 = arith.mulf %458, %462 : vector<8x128xf32>
    %c1_248 = arith.constant 1 : index
    %c0_249 = arith.constant 0 : index
    %c0_250 = arith.constant 0 : index
    %464 = vector.load %arg16[%c1_248, %c0_249, %c0_250] : memref<2x8x128xf32, #tpu.memory_space<vmem>>, vector<1x8x128xf32>
    %465 = vector.shape_cast %464 : vector<1x8x128xf32> to vector<8x128xf32>
    %466 = vector.shape_cast %463 : vector<8x128xf32> to vector<1x8x128xf32>
    tpu.vector_store %arg16[%c1_248, %c0_249, %c0_250], %466 {strides = array<i32>} : memref<2x8x128xf32, #tpu.memory_space<vmem>>, vector<1x8x128xf32>,
    %c1_251 = arith.constant 1 : index
    %c0_252 = arith.constant 0 : index
    %c0_253 = arith.constant 0 : index
    %467 = vector.load %arg17[%c1_251, %c0_252, %c0_253] : memref<2x8x128xf32, #tpu.memory_space<vmem>>, vector<1x8x128xf32>
    %468 = vector.shape_cast %467 : vector<1x8x128xf32> to vector<8x128xf32>
    %469 = vector.shape_cast %461 : vector<8x128xf32> to vector<1x8x128xf32>
    tpu.vector_store %arg17[%c1_251, %c0_252, %c0_253], %469 {strides = array<i32>} : memref<2x8x128xf32, #tpu.memory_space<vmem>>, vector<1x8x128xf32>,
    %470 = arith.index_cast %c4_i32 : i32 to index
    %c0_254 = arith.constant 0 : index
    %c0_255 = arith.constant 0 : index
    %471 = vector.load %arg19[%470, %c0_254, %c0_255] : memref<8x8x128xf32, #tpu.memory_space<vmem>>, vector<1x8x128xf32>
    %472 = vector.shape_cast %471 : vector<1x8x128xf32> to vector<8x128xf32>
    %473 = vector.shape_cast %463 : vector<8x128xf32> to vector<1x8x128xf32>
    tpu.vector_store %arg19[%470, %c0_254, %c0_255], %473 {strides = array<i32>} : memref<8x8x128xf32, #tpu.memory_space<vmem>>, vector<1x8x128xf32>,
    %c5_i32 = arith.constant 5 : i32
    %474 = arith.index_cast %c5_i32 : i32 to index
    %c0_256 = arith.constant 0 : index
    %c0_257 = arith.constant 0 : index
    %475 = vector.load %arg18[%474, %c0_256, %c0_257] : memref<8x8x512xf32, #tpu.memory_space<vmem>>, vector<1x8x512xf32>
    %476 = vector.shape_cast %475 : vector<1x8x512xf32> to vector<8x512xf32>
    %c0_258 = arith.constant 0 : index
    %c0_259 = arith.constant 0 : index
    %c0_260 = arith.constant 0 : index
    %477 = vector.load %arg16[%c0_258, %c0_259, %c0_260] : memref<2x8x128xf32, #tpu.memory_space<vmem>>, vector<1x8x128xf32>
    %478 = vector.shape_cast %477 : vector<1x8x128xf32> to vector<8x128xf32>
    %c0_261 = arith.constant 0 : index
    %c0_262 = arith.constant 0 : index
    %479 = vector.load %arg6[%c0_261, %c0_262] : memref<128x512xf32, #tpu.memory_space<vmem>>, vector<128x512xf32>
    %cst_263 = arith.constant dense<0.000000e+00> : vector<8x512xf32>
    %480 = tpu.matmul %478, %479, %cst_263 {dimension_numbers = #tpu.dot_dimension_numbers<[1], [0], [0], [1], [0, 0, 1, 1], [], []>} : vector<8x128xf32>, vector<128x512xf32>, vector<8x512xf32> -> vector<8x512xf32>
    %481 = arith.addf %476, %480 : vector<8x512xf32>
    %c0_264 = arith.constant 0 : index
    %c0_265 = arith.constant 0 : index
    %c0_266 = arith.constant 0 : index
    %482 = vector.load %arg17[%c0_264, %c0_265, %c0_266] : memref<2x8x128xf32, #tpu.memory_space<vmem>>, vector<1x8x128xf32>
    %483 = vector.shape_cast %482 : vector<1x8x128xf32> to vector<8x128xf32>
    %484 = vector.extract_strided_slice %481 {offsets = [0, 0], sizes = [8, 128], strides = [1, 1]} : vector<8x512xf32> to vector<8x128xf32>
    %485 = arith.negf %484 : vector<8x128xf32>
    %486 = math.exp %485 : vector<8x128xf32>
    %cst_267 = arith.constant 1.000000e+00 : f32
    %487 = vector.broadcast %cst_267 : f32 to vector<8x128xf32>
    %488 = arith.addf %487, %486 : vector<8x128xf32>
    %489 = arith.divf %487, %488 : vector<8x128xf32>
    %490 = vector.extract_strided_slice %481 {offsets = [0, 128], sizes = [8, 128], strides = [1, 1]} : vector<8x512xf32> to vector<8x128xf32>
    %491 = arith.negf %490 : vector<8x128xf32>
    %492 = math.exp %491 : vector<8x128xf32>
    %cst_268 = arith.constant 1.000000e+00 : f32
    %493 = vector.broadcast %cst_268 : f32 to vector<8x128xf32>
    %494 = arith.addf %493, %492 : vector<8x128xf32>
    %495 = arith.divf %493, %494 : vector<8x128xf32>
    %496 = vector.extract_strided_slice %481 {offsets = [0, 256], sizes = [8, 128], strides = [1, 1]} : vector<8x512xf32> to vector<8x128xf32>
    %497 = math.tanh %496 : vector<8x128xf32>
    %498 = vector.extract_strided_slice %481 {offsets = [0, 384], sizes = [8, 128], strides = [1, 1]} : vector<8x512xf32> to vector<8x128xf32>
    %499 = arith.negf %498 : vector<8x128xf32>
    %500 = math.exp %499 : vector<8x128xf32>
    %cst_269 = arith.constant 1.000000e+00 : f32
    %501 = vector.broadcast %cst_269 : f32 to vector<8x128xf32>
    %502 = arith.addf %501, %500 : vector<8x128xf32>
    %503 = arith.divf %501, %502 : vector<8x128xf32>
    %504 = arith.mulf %495, %483 : vector<8x128xf32>
    %505 = arith.mulf %489, %497 : vector<8x128xf32>
    %506 = arith.addf %504, %505 : vector<8x128xf32>
    %507 = math.tanh %506 : vector<8x128xf32>
    %508 = arith.mulf %503, %507 : vector<8x128xf32>
    %c0_270 = arith.constant 0 : index
    %c0_271 = arith.constant 0 : index
    %c0_272 = arith.constant 0 : index
    %509 = vector.load %arg16[%c0_270, %c0_271, %c0_272] : memref<2x8x128xf32, #tpu.memory_space<vmem>>, vector<1x8x128xf32>
    %510 = vector.shape_cast %509 : vector<1x8x128xf32> to vector<8x128xf32>
    %511 = vector.shape_cast %508 : vector<8x128xf32> to vector<1x8x128xf32>
    tpu.vector_store %arg16[%c0_270, %c0_271, %c0_272], %511 {strides = array<i32>} : memref<2x8x128xf32, #tpu.memory_space<vmem>>, vector<1x8x128xf32>,
    %c0_273 = arith.constant 0 : index
    %c0_274 = arith.constant 0 : index
    %c0_275 = arith.constant 0 : index
    %512 = vector.load %arg17[%c0_273, %c0_274, %c0_275] : memref<2x8x128xf32, #tpu.memory_space<vmem>>, vector<1x8x128xf32>
    %513 = vector.shape_cast %512 : vector<1x8x128xf32> to vector<8x128xf32>
    %514 = vector.shape_cast %506 : vector<8x128xf32> to vector<1x8x128xf32>
    tpu.vector_store %arg17[%c0_273, %c0_274, %c0_275], %514 {strides = array<i32>} : memref<2x8x128xf32, #tpu.memory_space<vmem>>, vector<1x8x128xf32>,
    %c0_276 = arith.constant 0 : index
    %c0_277 = arith.constant 0 : index
    %c0_278 = arith.constant 0 : index
    %515 = vector.load %arg8[%c0_276, %c0_277, %c0_278] : memref<1x128x512xf32, #tpu.memory_space<vmem>>, vector<1x128x512xf32>
    %516 = vector.shape_cast %515 : vector<1x128x512xf32> to vector<128x512xf32>
    %cst_279 = arith.constant dense<0.000000e+00> : vector<8x512xf32>
    %517 = tpu.matmul %508, %516, %cst_279 {dimension_numbers = #tpu.dot_dimension_numbers<[1], [0], [0], [1], [0, 0, 1, 1], [], []>} : vector<8x128xf32>, vector<128x512xf32>, vector<8x512xf32> -> vector<8x512xf32>
    %c1_280 = arith.constant 1 : index
    %c0_281 = arith.constant 0 : index
    %c0_282 = arith.constant 0 : index
    %518 = vector.load %arg16[%c1_280, %c0_281, %c0_282] : memref<2x8x128xf32, #tpu.memory_space<vmem>>, vector<1x8x128xf32>
    %519 = vector.shape_cast %518 : vector<1x8x128xf32> to vector<8x128xf32>
    %c0_283 = arith.constant 0 : index
    %c0_284 = arith.constant 0 : index
    %c0_285 = arith.constant 0 : index
    %520 = vector.load %arg9[%c0_283, %c0_284, %c0_285] : memref<1x128x512xf32, #tpu.memory_space<vmem>>, vector<1x128x512xf32>
    %521 = vector.shape_cast %520 : vector<1x128x512xf32> to vector<128x512xf32>
    %cst_286 = arith.constant dense<0.000000e+00> : vector<8x512xf32>
    %522 = tpu.matmul %519, %521, %cst_286 {dimension_numbers = #tpu.dot_dimension_numbers<[1], [0], [0], [1], [0, 0, 1, 1], [], []>} : vector<8x128xf32>, vector<128x512xf32>, vector<8x512xf32> -> vector<8x512xf32>
    %523 = arith.addf %517, %522 : vector<8x512xf32>
    %c0_287 = arith.constant 0 : index
    %c0_288 = arith.constant 0 : index
    %c0_289 = arith.constant 0 : index
    %524 = vector.load %arg10[%c0_287, %c0_288, %c0_289] : memref<1x1x512xf32, #tpu.memory_space<vmem>>, vector<1x1x512xf32>
    %525 = vector.shape_cast %524 : vector<1x1x512xf32> to vector<1x512xf32>
    %526 = vector.broadcast %525 : vector<1x512xf32> to vector<8x512xf32>
    %527 = arith.addf %523, %526 : vector<8x512xf32>
    %c1_290 = arith.constant 1 : index
    %c0_291 = arith.constant 0 : index
    %c0_292 = arith.constant 0 : index
    %528 = vector.load %arg17[%c1_290, %c0_291, %c0_292] : memref<2x8x128xf32, #tpu.memory_space<vmem>>, vector<1x8x128xf32>
    %529 = vector.shape_cast %528 : vector<1x8x128xf32> to vector<8x128xf32>
    %530 = vector.extract_strided_slice %527 {offsets = [0, 0], sizes = [8, 128], strides = [1, 1]} : vector<8x512xf32> to vector<8x128xf32>
    %531 = arith.negf %530 : vector<8x128xf32>
    %532 = math.exp %531 : vector<8x128xf32>
    %cst_293 = arith.constant 1.000000e+00 : f32
    %533 = vector.broadcast %cst_293 : f32 to vector<8x128xf32>
    %534 = arith.addf %533, %532 : vector<8x128xf32>
    %535 = arith.divf %533, %534 : vector<8x128xf32>
    %536 = vector.extract_strided_slice %527 {offsets = [0, 128], sizes = [8, 128], strides = [1, 1]} : vector<8x512xf32> to vector<8x128xf32>
    %537 = arith.negf %536 : vector<8x128xf32>
    %538 = math.exp %537 : vector<8x128xf32>
    %cst_294 = arith.constant 1.000000e+00 : f32
    %539 = vector.broadcast %cst_294 : f32 to vector<8x128xf32>
    %540 = arith.addf %539, %538 : vector<8x128xf32>
    %541 = arith.divf %539, %540 : vector<8x128xf32>
    %542 = vector.extract_strided_slice %527 {offsets = [0, 256], sizes = [8, 128], strides = [1, 1]} : vector<8x512xf32> to vector<8x128xf32>
    %543 = math.tanh %542 : vector<8x128xf32>
    %544 = vector.extract_strided_slice %527 {offsets = [0, 384], sizes = [8, 128], strides = [1, 1]} : vector<8x512xf32> to vector<8x128xf32>
    %545 = arith.negf %544 : vector<8x128xf32>
    %546 = math.exp %545 : vector<8x128xf32>
    %cst_295 = arith.constant 1.000000e+00 : f32
    %547 = vector.broadcast %cst_295 : f32 to vector<8x128xf32>
    %548 = arith.addf %547, %546 : vector<8x128xf32>
    %549 = arith.divf %547, %548 : vector<8x128xf32>
    %550 = arith.mulf %541, %529 : vector<8x128xf32>
    %551 = arith.mulf %535, %543 : vector<8x128xf32>
    %552 = arith.addf %550, %551 : vector<8x128xf32>
    %553 = math.tanh %552 : vector<8x128xf32>
    %554 = arith.mulf %549, %553 : vector<8x128xf32>
    %c1_296 = arith.constant 1 : index
    %c0_297 = arith.constant 0 : index
    %c0_298 = arith.constant 0 : index
    %555 = vector.load %arg16[%c1_296, %c0_297, %c0_298] : memref<2x8x128xf32, #tpu.memory_space<vmem>>, vector<1x8x128xf32>
    %556 = vector.shape_cast %555 : vector<1x8x128xf32> to vector<8x128xf32>
    %557 = vector.shape_cast %554 : vector<8x128xf32> to vector<1x8x128xf32>
    tpu.vector_store %arg16[%c1_296, %c0_297, %c0_298], %557 {strides = array<i32>} : memref<2x8x128xf32, #tpu.memory_space<vmem>>, vector<1x8x128xf32>,
    %c1_299 = arith.constant 1 : index
    %c0_300 = arith.constant 0 : index
    %c0_301 = arith.constant 0 : index
    %558 = vector.load %arg17[%c1_299, %c0_300, %c0_301] : memref<2x8x128xf32, #tpu.memory_space<vmem>>, vector<1x8x128xf32>
    %559 = vector.shape_cast %558 : vector<1x8x128xf32> to vector<8x128xf32>
    %560 = vector.shape_cast %552 : vector<8x128xf32> to vector<1x8x128xf32>
    tpu.vector_store %arg17[%c1_299, %c0_300, %c0_301], %560 {strides = array<i32>} : memref<2x8x128xf32, #tpu.memory_space<vmem>>, vector<1x8x128xf32>,
    %561 = arith.index_cast %c5_i32 : i32 to index
    %c0_302 = arith.constant 0 : index
    %c0_303 = arith.constant 0 : index
    %562 = vector.load %arg19[%561, %c0_302, %c0_303] : memref<8x8x128xf32, #tpu.memory_space<vmem>>, vector<1x8x128xf32>
    %563 = vector.shape_cast %562 : vector<1x8x128xf32> to vector<8x128xf32>
    %564 = vector.shape_cast %554 : vector<8x128xf32> to vector<1x8x128xf32>
    tpu.vector_store %arg19[%561, %c0_302, %c0_303], %564 {strides = array<i32>} : memref<8x8x128xf32, #tpu.memory_space<vmem>>, vector<1x8x128xf32>,
    %c6_i32 = arith.constant 6 : i32
    %565 = arith.index_cast %c6_i32 : i32 to index
    %c0_304 = arith.constant 0 : index
    %c0_305 = arith.constant 0 : index
    %566 = vector.load %arg18[%565, %c0_304, %c0_305] : memref<8x8x512xf32, #tpu.memory_space<vmem>>, vector<1x8x512xf32>
    %567 = vector.shape_cast %566 : vector<1x8x512xf32> to vector<8x512xf32>
    %c0_306 = arith.constant 0 : index
    %c0_307 = arith.constant 0 : index
    %c0_308 = arith.constant 0 : index
    %568 = vector.load %arg16[%c0_306, %c0_307, %c0_308] : memref<2x8x128xf32, #tpu.memory_space<vmem>>, vector<1x8x128xf32>
    %569 = vector.shape_cast %568 : vector<1x8x128xf32> to vector<8x128xf32>
    %c0_309 = arith.constant 0 : index
    %c0_310 = arith.constant 0 : index
    %570 = vector.load %arg6[%c0_309, %c0_310] : memref<128x512xf32, #tpu.memory_space<vmem>>, vector<128x512xf32>
    %cst_311 = arith.constant dense<0.000000e+00> : vector<8x512xf32>
    %571 = tpu.matmul %569, %570, %cst_311 {dimension_numbers = #tpu.dot_dimension_numbers<[1], [0], [0], [1], [0, 0, 1, 1], [], []>} : vector<8x128xf32>, vector<128x512xf32>, vector<8x512xf32> -> vector<8x512xf32>
    %572 = arith.addf %567, %571 : vector<8x512xf32>
    %c0_312 = arith.constant 0 : index
    %c0_313 = arith.constant 0 : index
    %c0_314 = arith.constant 0 : index
    %573 = vector.load %arg17[%c0_312, %c0_313, %c0_314] : memref<2x8x128xf32, #tpu.memory_space<vmem>>, vector<1x8x128xf32>
    %574 = vector.shape_cast %573 : vector<1x8x128xf32> to vector<8x128xf32>
    %575 = vector.extract_strided_slice %572 {offsets = [0, 0], sizes = [8, 128], strides = [1, 1]} : vector<8x512xf32> to vector<8x128xf32>
    %576 = arith.negf %575 : vector<8x128xf32>
    %577 = math.exp %576 : vector<8x128xf32>
    %cst_315 = arith.constant 1.000000e+00 : f32
    %578 = vector.broadcast %cst_315 : f32 to vector<8x128xf32>
    %579 = arith.addf %578, %577 : vector<8x128xf32>
    %580 = arith.divf %578, %579 : vector<8x128xf32>
    %581 = vector.extract_strided_slice %572 {offsets = [0, 128], sizes = [8, 128], strides = [1, 1]} : vector<8x512xf32> to vector<8x128xf32>
    %582 = arith.negf %581 : vector<8x128xf32>
    %583 = math.exp %582 : vector<8x128xf32>
    %cst_316 = arith.constant 1.000000e+00 : f32
    %584 = vector.broadcast %cst_316 : f32 to vector<8x128xf32>
    %585 = arith.addf %584, %583 : vector<8x128xf32>
    %586 = arith.divf %584, %585 : vector<8x128xf32>
    %587 = vector.extract_strided_slice %572 {offsets = [0, 256], sizes = [8, 128], strides = [1, 1]} : vector<8x512xf32> to vector<8x128xf32>
    %588 = math.tanh %587 : vector<8x128xf32>
    %589 = vector.extract_strided_slice %572 {offsets = [0, 384], sizes = [8, 128], strides = [1, 1]} : vector<8x512xf32> to vector<8x128xf32>
    %590 = arith.negf %589 : vector<8x128xf32>
    %591 = math.exp %590 : vector<8x128xf32>
    %cst_317 = arith.constant 1.000000e+00 : f32
    %592 = vector.broadcast %cst_317 : f32 to vector<8x128xf32>
    %593 = arith.addf %592, %591 : vector<8x128xf32>
    %594 = arith.divf %592, %593 : vector<8x128xf32>
    %595 = arith.mulf %586, %574 : vector<8x128xf32>
    %596 = arith.mulf %580, %588 : vector<8x128xf32>
    %597 = arith.addf %595, %596 : vector<8x128xf32>
    %598 = math.tanh %597 : vector<8x128xf32>
    %599 = arith.mulf %594, %598 : vector<8x128xf32>
    %c0_318 = arith.constant 0 : index
    %c0_319 = arith.constant 0 : index
    %c0_320 = arith.constant 0 : index
    %600 = vector.load %arg16[%c0_318, %c0_319, %c0_320] : memref<2x8x128xf32, #tpu.memory_space<vmem>>, vector<1x8x128xf32>
    %601 = vector.shape_cast %600 : vector<1x8x128xf32> to vector<8x128xf32>
    %602 = vector.shape_cast %599 : vector<8x128xf32> to vector<1x8x128xf32>
    tpu.vector_store %arg16[%c0_318, %c0_319, %c0_320], %602 {strides = array<i32>} : memref<2x8x128xf32, #tpu.memory_space<vmem>>, vector<1x8x128xf32>,
    %c0_321 = arith.constant 0 : index
    %c0_322 = arith.constant 0 : index
    %c0_323 = arith.constant 0 : index
    %603 = vector.load %arg17[%c0_321, %c0_322, %c0_323] : memref<2x8x128xf32, #tpu.memory_space<vmem>>, vector<1x8x128xf32>
    %604 = vector.shape_cast %603 : vector<1x8x128xf32> to vector<8x128xf32>
    %605 = vector.shape_cast %597 : vector<8x128xf32> to vector<1x8x128xf32>
    tpu.vector_store %arg17[%c0_321, %c0_322, %c0_323], %605 {strides = array<i32>} : memref<2x8x128xf32, #tpu.memory_space<vmem>>, vector<1x8x128xf32>,
    %c0_324 = arith.constant 0 : index
    %c0_325 = arith.constant 0 : index
    %c0_326 = arith.constant 0 : index
    %606 = vector.load %arg8[%c0_324, %c0_325, %c0_326] : memref<1x128x512xf32, #tpu.memory_space<vmem>>, vector<1x128x512xf32>
    %607 = vector.shape_cast %606 : vector<1x128x512xf32> to vector<128x512xf32>
    %cst_327 = arith.constant dense<0.000000e+00> : vector<8x512xf32>
    %608 = tpu.matmul %599, %607, %cst_327 {dimension_numbers = #tpu.dot_dimension_numbers<[1], [0], [0], [1], [0, 0, 1, 1], [], []>} : vector<8x128xf32>, vector<128x512xf32>, vector<8x512xf32> -> vector<8x512xf32>
    %c1_328 = arith.constant 1 : index
    %c0_329 = arith.constant 0 : index
    %c0_330 = arith.constant 0 : index
    %609 = vector.load %arg16[%c1_328, %c0_329, %c0_330] : memref<2x8x128xf32, #tpu.memory_space<vmem>>, vector<1x8x128xf32>
    %610 = vector.shape_cast %609 : vector<1x8x128xf32> to vector<8x128xf32>
    %c0_331 = arith.constant 0 : index
    %c0_332 = arith.constant 0 : index
    %c0_333 = arith.constant 0 : index
    %611 = vector.load %arg9[%c0_331, %c0_332, %c0_333] : memref<1x128x512xf32, #tpu.memory_space<vmem>>, vector<1x128x512xf32>
    %612 = vector.shape_cast %611 : vector<1x128x512xf32> to vector<128x512xf32>
    %cst_334 = arith.constant dense<0.000000e+00> : vector<8x512xf32>
    %613 = tpu.matmul %610, %612, %cst_334 {dimension_numbers = #tpu.dot_dimension_numbers<[1], [0], [0], [1], [0, 0, 1, 1], [], []>} : vector<8x128xf32>, vector<128x512xf32>, vector<8x512xf32> -> vector<8x512xf32>
    %614 = arith.addf %608, %613 : vector<8x512xf32>
    %c0_335 = arith.constant 0 : index
    %c0_336 = arith.constant 0 : index
    %c0_337 = arith.constant 0 : index
    %615 = vector.load %arg10[%c0_335, %c0_336, %c0_337] : memref<1x1x512xf32, #tpu.memory_space<vmem>>, vector<1x1x512xf32>
    %616 = vector.shape_cast %615 : vector<1x1x512xf32> to vector<1x512xf32>
    %617 = vector.broadcast %616 : vector<1x512xf32> to vector<8x512xf32>
    %618 = arith.addf %614, %617 : vector<8x512xf32>
    %c1_338 = arith.constant 1 : index
    %c0_339 = arith.constant 0 : index
    %c0_340 = arith.constant 0 : index
    %619 = vector.load %arg17[%c1_338, %c0_339, %c0_340] : memref<2x8x128xf32, #tpu.memory_space<vmem>>, vector<1x8x128xf32>
    %620 = vector.shape_cast %619 : vector<1x8x128xf32> to vector<8x128xf32>
    %621 = vector.extract_strided_slice %618 {offsets = [0, 0], sizes = [8, 128], strides = [1, 1]} : vector<8x512xf32> to vector<8x128xf32>
    %622 = arith.negf %621 : vector<8x128xf32>
    %623 = math.exp %622 : vector<8x128xf32>
    %cst_341 = arith.constant 1.000000e+00 : f32
    %624 = vector.broadcast %cst_341 : f32 to vector<8x128xf32>
    %625 = arith.addf %624, %623 : vector<8x128xf32>
    %626 = arith.divf %624, %625 : vector<8x128xf32>
    %627 = vector.extract_strided_slice %618 {offsets = [0, 128], sizes = [8, 128], strides = [1, 1]} : vector<8x512xf32> to vector<8x128xf32>
    %628 = arith.negf %627 : vector<8x128xf32>
    %629 = math.exp %628 : vector<8x128xf32>
    %cst_342 = arith.constant 1.000000e+00 : f32
    %630 = vector.broadcast %cst_342 : f32 to vector<8x128xf32>
    %631 = arith.addf %630, %629 : vector<8x128xf32>
    %632 = arith.divf %630, %631 : vector<8x128xf32>
    %633 = vector.extract_strided_slice %618 {offsets = [0, 256], sizes = [8, 128], strides = [1, 1]} : vector<8x512xf32> to vector<8x128xf32>
    %634 = math.tanh %633 : vector<8x128xf32>
    %635 = vector.extract_strided_slice %618 {offsets = [0, 384], sizes = [8, 128], strides = [1, 1]} : vector<8x512xf32> to vector<8x128xf32>
    %636 = arith.negf %635 : vector<8x128xf32>
    %637 = math.exp %636 : vector<8x128xf32>
    %cst_343 = arith.constant 1.000000e+00 : f32
    %638 = vector.broadcast %cst_343 : f32 to vector<8x128xf32>
    %639 = arith.addf %638, %637 : vector<8x128xf32>
    %640 = arith.divf %638, %639 : vector<8x128xf32>
    %641 = arith.mulf %632, %620 : vector<8x128xf32>
    %642 = arith.mulf %626, %634 : vector<8x128xf32>
    %643 = arith.addf %641, %642 : vector<8x128xf32>
    %644 = math.tanh %643 : vector<8x128xf32>
    %645 = arith.mulf %640, %644 : vector<8x128xf32>
    %c1_344 = arith.constant 1 : index
    %c0_345 = arith.constant 0 : index
    %c0_346 = arith.constant 0 : index
    %646 = vector.load %arg16[%c1_344, %c0_345, %c0_346] : memref<2x8x128xf32, #tpu.memory_space<vmem>>, vector<1x8x128xf32>
    %647 = vector.shape_cast %646 : vector<1x8x128xf32> to vector<8x128xf32>
    %648 = vector.shape_cast %645 : vector<8x128xf32> to vector<1x8x128xf32>
    tpu.vector_store %arg16[%c1_344, %c0_345, %c0_346], %648 {strides = array<i32>} : memref<2x8x128xf32, #tpu.memory_space<vmem>>, vector<1x8x128xf32>,
    %c1_347 = arith.constant 1 : index
    %c0_348 = arith.constant 0 : index
    %c0_349 = arith.constant 0 : index
    %649 = vector.load %arg17[%c1_347, %c0_348, %c0_349] : memref<2x8x128xf32, #tpu.memory_space<vmem>>, vector<1x8x128xf32>
    %650 = vector.shape_cast %649 : vector<1x8x128xf32> to vector<8x128xf32>
    %651 = vector.shape_cast %643 : vector<8x128xf32> to vector<1x8x128xf32>
    tpu.vector_store %arg17[%c1_347, %c0_348, %c0_349], %651 {strides = array<i32>} : memref<2x8x128xf32, #tpu.memory_space<vmem>>, vector<1x8x128xf32>,
    %652 = arith.index_cast %c6_i32 : i32 to index
    %c0_350 = arith.constant 0 : index
    %c0_351 = arith.constant 0 : index
    %653 = vector.load %arg19[%652, %c0_350, %c0_351] : memref<8x8x128xf32, #tpu.memory_space<vmem>>, vector<1x8x128xf32>
    %654 = vector.shape_cast %653 : vector<1x8x128xf32> to vector<8x128xf32>
    %655 = vector.shape_cast %645 : vector<8x128xf32> to vector<1x8x128xf32>
    tpu.vector_store %arg19[%652, %c0_350, %c0_351], %655 {strides = array<i32>} : memref<8x8x128xf32, #tpu.memory_space<vmem>>, vector<1x8x128xf32>,
    %c7_i32 = arith.constant 7 : i32
    %656 = arith.index_cast %c7_i32 : i32 to index
    %c0_352 = arith.constant 0 : index
    %c0_353 = arith.constant 0 : index
    %657 = vector.load %arg18[%656, %c0_352, %c0_353] : memref<8x8x512xf32, #tpu.memory_space<vmem>>, vector<1x8x512xf32>
    %658 = vector.shape_cast %657 : vector<1x8x512xf32> to vector<8x512xf32>
    %c0_354 = arith.constant 0 : index
    %c0_355 = arith.constant 0 : index
    %c0_356 = arith.constant 0 : index
    %659 = vector.load %arg16[%c0_354, %c0_355, %c0_356] : memref<2x8x128xf32, #tpu.memory_space<vmem>>, vector<1x8x128xf32>
    %660 = vector.shape_cast %659 : vector<1x8x128xf32> to vector<8x128xf32>
    %c0_357 = arith.constant 0 : index
    %c0_358 = arith.constant 0 : index
    %661 = vector.load %arg6[%c0_357, %c0_358] : memref<128x512xf32, #tpu.memory_space<vmem>>, vector<128x512xf32>
    %cst_359 = arith.constant dense<0.000000e+00> : vector<8x512xf32>
    %662 = tpu.matmul %660, %661, %cst_359 {dimension_numbers = #tpu.dot_dimension_numbers<[1], [0], [0], [1], [0, 0, 1, 1], [], []>} : vector<8x128xf32>, vector<128x512xf32>, vector<8x512xf32> -> vector<8x512xf32>
    %663 = arith.addf %658, %662 : vector<8x512xf32>
    %c0_360 = arith.constant 0 : index
    %c0_361 = arith.constant 0 : index
    %c0_362 = arith.constant 0 : index
    %664 = vector.load %arg17[%c0_360, %c0_361, %c0_362] : memref<2x8x128xf32, #tpu.memory_space<vmem>>, vector<1x8x128xf32>
    %665 = vector.shape_cast %664 : vector<1x8x128xf32> to vector<8x128xf32>
    %666 = vector.extract_strided_slice %663 {offsets = [0, 0], sizes = [8, 128], strides = [1, 1]} : vector<8x512xf32> to vector<8x128xf32>
    %667 = arith.negf %666 : vector<8x128xf32>
    %668 = math.exp %667 : vector<8x128xf32>
    %cst_363 = arith.constant 1.000000e+00 : f32
    %669 = vector.broadcast %cst_363 : f32 to vector<8x128xf32>
    %670 = arith.addf %669, %668 : vector<8x128xf32>
    %671 = arith.divf %669, %670 : vector<8x128xf32>
    %672 = vector.extract_strided_slice %663 {offsets = [0, 128], sizes = [8, 128], strides = [1, 1]} : vector<8x512xf32> to vector<8x128xf32>
    %673 = arith.negf %672 : vector<8x128xf32>
    %674 = math.exp %673 : vector<8x128xf32>
    %cst_364 = arith.constant 1.000000e+00 : f32
    %675 = vector.broadcast %cst_364 : f32 to vector<8x128xf32>
    %676 = arith.addf %675, %674 : vector<8x128xf32>
    %677 = arith.divf %675, %676 : vector<8x128xf32>
    %678 = vector.extract_strided_slice %663 {offsets = [0, 256], sizes = [8, 128], strides = [1, 1]} : vector<8x512xf32> to vector<8x128xf32>
    %679 = math.tanh %678 : vector<8x128xf32>
    %680 = vector.extract_strided_slice %663 {offsets = [0, 384], sizes = [8, 128], strides = [1, 1]} : vector<8x512xf32> to vector<8x128xf32>
    %681 = arith.negf %680 : vector<8x128xf32>
    %682 = math.exp %681 : vector<8x128xf32>
    %cst_365 = arith.constant 1.000000e+00 : f32
    %683 = vector.broadcast %cst_365 : f32 to vector<8x128xf32>
    %684 = arith.addf %683, %682 : vector<8x128xf32>
    %685 = arith.divf %683, %684 : vector<8x128xf32>
    %686 = arith.mulf %677, %665 : vector<8x128xf32>
    %687 = arith.mulf %671, %679 : vector<8x128xf32>
    %688 = arith.addf %686, %687 : vector<8x128xf32>
    %689 = math.tanh %688 : vector<8x128xf32>
    %690 = arith.mulf %685, %689 : vector<8x128xf32>
    %c0_366 = arith.constant 0 : index
    %c0_367 = arith.constant 0 : index
    %c0_368 = arith.constant 0 : index
    %691 = vector.load %arg16[%c0_366, %c0_367, %c0_368] : memref<2x8x128xf32, #tpu.memory_space<vmem>>, vector<1x8x128xf32>
    %692 = vector.shape_cast %691 : vector<1x8x128xf32> to vector<8x128xf32>
    %693 = vector.shape_cast %690 : vector<8x128xf32> to vector<1x8x128xf32>
    tpu.vector_store %arg16[%c0_366, %c0_367, %c0_368], %693 {strides = array<i32>} : memref<2x8x128xf32, #tpu.memory_space<vmem>>, vector<1x8x128xf32>,
    %c0_369 = arith.constant 0 : index
    %c0_370 = arith.constant 0 : index
    %c0_371 = arith.constant 0 : index
    %694 = vector.load %arg17[%c0_369, %c0_370, %c0_371] : memref<2x8x128xf32, #tpu.memory_space<vmem>>, vector<1x8x128xf32>
    %695 = vector.shape_cast %694 : vector<1x8x128xf32> to vector<8x128xf32>
    %696 = vector.shape_cast %688 : vector<8x128xf32> to vector<1x8x128xf32>
    tpu.vector_store %arg17[%c0_369, %c0_370, %c0_371], %696 {strides = array<i32>} : memref<2x8x128xf32, #tpu.memory_space<vmem>>, vector<1x8x128xf32>,
    %c0_372 = arith.constant 0 : index
    %c0_373 = arith.constant 0 : index
    %c0_374 = arith.constant 0 : index
    %697 = vector.load %arg8[%c0_372, %c0_373, %c0_374] : memref<1x128x512xf32, #tpu.memory_space<vmem>>, vector<1x128x512xf32>
    %698 = vector.shape_cast %697 : vector<1x128x512xf32> to vector<128x512xf32>
    %cst_375 = arith.constant dense<0.000000e+00> : vector<8x512xf32>
    %699 = tpu.matmul %690, %698, %cst_375 {dimension_numbers = #tpu.dot_dimension_numbers<[1], [0], [0], [1], [0, 0, 1, 1], [], []>} : vector<8x128xf32>, vector<128x512xf32>, vector<8x512xf32> -> vector<8x512xf32>
    %c1_376 = arith.constant 1 : index
    %c0_377 = arith.constant 0 : index
    %c0_378 = arith.constant 0 : index
    %700 = vector.load %arg16[%c1_376, %c0_377, %c0_378] : memref<2x8x128xf32, #tpu.memory_space<vmem>>, vector<1x8x128xf32>
    %701 = vector.shape_cast %700 : vector<1x8x128xf32> to vector<8x128xf32>
    %c0_379 = arith.constant 0 : index
    %c0_380 = arith.constant 0 : index
    %c0_381 = arith.constant 0 : index
    %702 = vector.load %arg9[%c0_379, %c0_380, %c0_381] : memref<1x128x512xf32, #tpu.memory_space<vmem>>, vector<1x128x512xf32>
    %703 = vector.shape_cast %702 : vector<1x128x512xf32> to vector<128x512xf32>
    %cst_382 = arith.constant dense<0.000000e+00> : vector<8x512xf32>
    %704 = tpu.matmul %701, %703, %cst_382 {dimension_numbers = #tpu.dot_dimension_numbers<[1], [0], [0], [1], [0, 0, 1, 1], [], []>} : vector<8x128xf32>, vector<128x512xf32>, vector<8x512xf32> -> vector<8x512xf32>
    %705 = arith.addf %699, %704 : vector<8x512xf32>
    %c0_383 = arith.constant 0 : index
    %c0_384 = arith.constant 0 : index
    %c0_385 = arith.constant 0 : index
    %706 = vector.load %arg10[%c0_383, %c0_384, %c0_385] : memref<1x1x512xf32, #tpu.memory_space<vmem>>, vector<1x1x512xf32>
    %707 = vector.shape_cast %706 : vector<1x1x512xf32> to vector<1x512xf32>
    %708 = vector.broadcast %707 : vector<1x512xf32> to vector<8x512xf32>
    %709 = arith.addf %705, %708 : vector<8x512xf32>
    %c1_386 = arith.constant 1 : index
    %c0_387 = arith.constant 0 : index
    %c0_388 = arith.constant 0 : index
    %710 = vector.load %arg17[%c1_386, %c0_387, %c0_388] : memref<2x8x128xf32, #tpu.memory_space<vmem>>, vector<1x8x128xf32>
    %711 = vector.shape_cast %710 : vector<1x8x128xf32> to vector<8x128xf32>
    %712 = vector.extract_strided_slice %709 {offsets = [0, 0], sizes = [8, 128], strides = [1, 1]} : vector<8x512xf32> to vector<8x128xf32>
    %713 = arith.negf %712 : vector<8x128xf32>
    %714 = math.exp %713 : vector<8x128xf32>
    %cst_389 = arith.constant 1.000000e+00 : f32
    %715 = vector.broadcast %cst_389 : f32 to vector<8x128xf32>
    %716 = arith.addf %715, %714 : vector<8x128xf32>
    %717 = arith.divf %715, %716 : vector<8x128xf32>
    %718 = vector.extract_strided_slice %709 {offsets = [0, 128], sizes = [8, 128], strides = [1, 1]} : vector<8x512xf32> to vector<8x128xf32>
    %719 = arith.negf %718 : vector<8x128xf32>
    %720 = math.exp %719 : vector<8x128xf32>
    %cst_390 = arith.constant 1.000000e+00 : f32
    %721 = vector.broadcast %cst_390 : f32 to vector<8x128xf32>
    %722 = arith.addf %721, %720 : vector<8x128xf32>
    %723 = arith.divf %721, %722 : vector<8x128xf32>
    %724 = vector.extract_strided_slice %709 {offsets = [0, 256], sizes = [8, 128], strides = [1, 1]} : vector<8x512xf32> to vector<8x128xf32>
    %725 = math.tanh %724 : vector<8x128xf32>
    %726 = vector.extract_strided_slice %709 {offsets = [0, 384], sizes = [8, 128], strides = [1, 1]} : vector<8x512xf32> to vector<8x128xf32>
    %727 = arith.negf %726 : vector<8x128xf32>
    %728 = math.exp %727 : vector<8x128xf32>
    %cst_391 = arith.constant 1.000000e+00 : f32
    %729 = vector.broadcast %cst_391 : f32 to vector<8x128xf32>
    %730 = arith.addf %729, %728 : vector<8x128xf32>
    %731 = arith.divf %729, %730 : vector<8x128xf32>
    %732 = arith.mulf %723, %711 : vector<8x128xf32>
    %733 = arith.mulf %717, %725 : vector<8x128xf32>
    %734 = arith.addf %732, %733 : vector<8x128xf32>
    %735 = math.tanh %734 : vector<8x128xf32>
    %736 = arith.mulf %731, %735 : vector<8x128xf32>
    %c1_392 = arith.constant 1 : index
    %c0_393 = arith.constant 0 : index
    %c0_394 = arith.constant 0 : index
    %737 = vector.load %arg16[%c1_392, %c0_393, %c0_394] : memref<2x8x128xf32, #tpu.memory_space<vmem>>, vector<1x8x128xf32>
    %738 = vector.shape_cast %737 : vector<1x8x128xf32> to vector<8x128xf32>
    %739 = vector.shape_cast %736 : vector<8x128xf32> to vector<1x8x128xf32>
    tpu.vector_store %arg16[%c1_392, %c0_393, %c0_394], %739 {strides = array<i32>} : memref<2x8x128xf32, #tpu.memory_space<vmem>>, vector<1x8x128xf32>,
    %c1_395 = arith.constant 1 : index
    %c0_396 = arith.constant 0 : index
    %c0_397 = arith.constant 0 : index
    %740 = vector.load %arg17[%c1_395, %c0_396, %c0_397] : memref<2x8x128xf32, #tpu.memory_space<vmem>>, vector<1x8x128xf32>
    %741 = vector.shape_cast %740 : vector<1x8x128xf32> to vector<8x128xf32>
    %742 = vector.shape_cast %734 : vector<8x128xf32> to vector<1x8x128xf32>
    tpu.vector_store %arg17[%c1_395, %c0_396, %c0_397], %742 {strides = array<i32>} : memref<2x8x128xf32, #tpu.memory_space<vmem>>, vector<1x8x128xf32>,
    %743 = arith.index_cast %c7_i32 : i32 to index
    %c0_398 = arith.constant 0 : index
    %c0_399 = arith.constant 0 : index
    %744 = vector.load %arg19[%743, %c0_398, %c0_399] : memref<8x8x128xf32, #tpu.memory_space<vmem>>, vector<1x8x128xf32>
    %745 = vector.shape_cast %744 : vector<1x8x128xf32> to vector<8x128xf32>
    %746 = vector.shape_cast %736 : vector<8x128xf32> to vector<1x8x128xf32>
    tpu.vector_store %arg19[%743, %c0_398, %c0_399], %746 {strides = array<i32>} : memref<8x8x128xf32, #tpu.memory_space<vmem>>, vector<1x8x128xf32>,
    %c8_i32 = arith.constant 8 : i32
    %c0_400 = arith.constant 0 : index
    %c0_401 = arith.constant 0 : index
    %c0_402 = arith.constant 0 : index
    %747 = vector.load %arg19[%c0_400, %c0_401, %c0_402] : memref<8x8x128xf32, #tpu.memory_space<vmem>>, vector<8x8x128xf32>
    %748 = vector.shape_cast %747 : vector<8x8x128xf32> to vector<64x128xf32>
    %c0_403 = arith.constant 0 : index
    %c0_404 = arith.constant 0 : index
    %749 = vector.load %arg11[%c0_403, %c0_404] : memref<128x16xf32, #tpu.memory_space<vmem>>, vector<128x16xf32>
    %cst_405 = arith.constant dense<0.000000e+00> : vector<64x16xf32>
    %750 = tpu.matmul %748, %749, %cst_405 {dimension_numbers = #tpu.dot_dimension_numbers<[1], [0], [0], [1], [0, 0, 1, 1], [], []>} : vector<64x128xf32>, vector<128x16xf32>, vector<64x16xf32> -> vector<64x16xf32>
    %c0_406 = arith.constant 0 : index
    %c0_407 = arith.constant 0 : index
    %751 = vector.load %arg12[%c0_406, %c0_407] : memref<1x16xf32, #tpu.memory_space<vmem>>, vector<1x16xf32>
    %752 = vector.broadcast %751 : vector<1x16xf32> to vector<64x16xf32>
    %753 = arith.addf %750, %752 : vector<64x16xf32>
    %cst_408 = arith.constant 0.000000e+00 : f32
    %754 = vector.broadcast %cst_408 : f32 to vector<64x16xf32>
    %755 = arith.maximumf %753, %754 : vector<64x16xf32>
    %c0_409 = arith.constant 0 : index
    %c0_410 = arith.constant 0 : index
    %756 = vector.load %arg13[%c0_409, %c0_410] : memref<16x128xf32, #tpu.memory_space<vmem>>, vector<16x128xf32>
    %cst_411 = arith.constant dense<0.000000e+00> : vector<64x128xf32>
    %757 = tpu.matmul %755, %756, %cst_411 {dimension_numbers = #tpu.dot_dimension_numbers<[1], [0], [0], [1], [0, 0, 1, 1], [], []>} : vector<64x16xf32>, vector<16x128xf32>, vector<64x128xf32> -> vector<64x128xf32>
    %c0_412 = arith.constant 0 : index
    %c0_413 = arith.constant 0 : index
    %758 = vector.load %arg14[%c0_412, %c0_413] : memref<1x128xf32, #tpu.memory_space<vmem>>, vector<1x128xf32>
    %759 = vector.broadcast %758 : vector<1x128xf32> to vector<64x128xf32>
    %760 = arith.addf %757, %759 : vector<64x128xf32>
    %761 = vector.shape_cast %760 : vector<64x128xf32> to vector<8x8x128xf32>
    %c0_414 = arith.constant 0 : index
    %c0_415 = arith.constant 0 : index
    %c0_416 = arith.constant 0 : index
    %762 = vector.load %arg15[%c0_414, %c0_415, %c0_416] : memref<8x8x128xf32, #tpu.memory_space<vmem>>, vector<8x8x128xf32>
    tpu.vector_store %arg15[%c0_414, %c0_415, %c0_416], %761 {strides = array<i32>} : memref<8x8x128xf32, #tpu.memory_space<vmem>>, vector<8x8x128xf32>,
    return
  }
  func.func @transform_0(%arg0: i32, %arg1: i32) -> (i32, i32, i32) {
    %c0_i32 = arith.constant 0 : i32
    %c0_i32_0 = arith.constant 0 : i32
    return %arg1, %arg0, %c0_i32 : i32, i32, i32
  }
  func.func @transform_1(%arg0: i32, %arg1: i32) -> (i32, i32) {
    %c0_i32 = arith.constant 0 : i32
    %c0_i32_0 = arith.constant 0 : i32
    %c0_i32_1 = arith.constant 0 : i32
    return %c0_i32, %c0_i32_0 : i32, i32
  }
  func.func @transform_2(%arg0: i32, %arg1: i32) -> (i32, i32) {
    %c0_i32 = arith.constant 0 : i32
    %c0_i32_0 = arith.constant 0 : i32
    %c0_i32_1 = arith.constant 0 : i32
    return %c0_i32, %c0_i32_0 : i32, i32
  }
  func.func @transform_3(%arg0: i32, %arg1: i32) -> (i32, i32) {
    %c0_i32 = arith.constant 0 : i32
    %c0_i32_0 = arith.constant 0 : i32
    %c0_i32_1 = arith.constant 0 : i32
    return %c0_i32, %c0_i32_0 : i32, i32
  }
  func.func @transform_4(%arg0: i32, %arg1: i32) -> (i32, i32) {
    %c0_i32 = arith.constant 0 : i32
    %c0_i32_0 = arith.constant 0 : i32
    %c0_i32_1 = arith.constant 0 : i32
    return %c0_i32, %c0_i32_0 : i32, i32
  }
  func.func @transform_5(%arg0: i32, %arg1: i32) -> (i32, i32) {
    %c0_i32 = arith.constant 0 : i32
    %c0_i32_0 = arith.constant 0 : i32
    %c0_i32_1 = arith.constant 0 : i32
    return %c0_i32, %c0_i32_0 : i32, i32
  }
  func.func @transform_6(%arg0: i32, %arg1: i32) -> (i32, i32, i32) {
    %c0_i32 = arith.constant 0 : i32
    %c0_i32_0 = arith.constant 0 : i32
    %c0_i32_1 = arith.constant 0 : i32
    %c0_i32_2 = arith.constant 0 : i32
    return %c0_i32, %c0_i32_0, %c0_i32_1 : i32, i32, i32
  }
  func.func @transform_7(%arg0: i32, %arg1: i32) -> (i32, i32, i32) {
    %c0_i32 = arith.constant 0 : i32
    %c0_i32_0 = arith.constant 0 : i32
    %c0_i32_1 = arith.constant 0 : i32
    %c0_i32_2 = arith.constant 0 : i32
    return %c0_i32, %c0_i32_0, %c0_i32_1 : i32, i32, i32
  }
  func.func @transform_8(%arg0: i32, %arg1: i32) -> (i32, i32, i32) {
    %c0_i32 = arith.constant 0 : i32
    %c0_i32_0 = arith.constant 0 : i32
    %c0_i32_1 = arith.constant 0 : i32
    %c0_i32_2 = arith.constant 0 : i32
    return %c0_i32, %c0_i32_0, %c0_i32_1 : i32, i32, i32
  }
  func.func @transform_9(%arg0: i32, %arg1: i32) -> (i32, i32) {
    %c0_i32 = arith.constant 0 : i32
    %c0_i32_0 = arith.constant 0 : i32
    %c0_i32_1 = arith.constant 0 : i32
    return %c0_i32, %c0_i32_0 : i32, i32
  }
  func.func @transform_10(%arg0: i32, %arg1: i32) -> (i32, i32) {
    %c0_i32 = arith.constant 0 : i32
    %c0_i32_0 = arith.constant 0 : i32
    %c0_i32_1 = arith.constant 0 : i32
    return %c0_i32, %c0_i32_0 : i32, i32
  }
  func.func @transform_11(%arg0: i32, %arg1: i32) -> (i32, i32) {
    %c0_i32 = arith.constant 0 : i32
    %c0_i32_0 = arith.constant 0 : i32
    %c0_i32_1 = arith.constant 0 : i32
    return %c0_i32, %c0_i32_0 : i32, i32
  }
  func.func @transform_12(%arg0: i32, %arg1: i32) -> (i32, i32) {
    %c0_i32 = arith.constant 0 : i32
    %c0_i32_0 = arith.constant 0 : i32
    %c0_i32_1 = arith.constant 0 : i32
    return %c0_i32, %c0_i32_0 : i32, i32
  }
  func.func @transform_13(%arg0: i32, %arg1: i32) -> (i32, i32, i32) {
    %c0_i32 = arith.constant 0 : i32
    %c0_i32_0 = arith.constant 0 : i32
    return %arg1, %arg0, %c0_i32 : i32, i32, i32
  }
}

</mosaic_0001>

<bundles_post_ra>
// kernel: lstm_plain_forward_pallas.1
= control target key start
LH: loop header
LB: loop body
LE: loop exit
PB: predicated region body
PF: predicated region fallthrough
CT: control target
= control target key end

     0   :  { %18 = vsyncpa [#allocation7], 0  ;;  %s11319_s0 = inlined_call_operand.hbm [shape: f32[8,8,4], index: 0, kind: input, shape index: {}]   ;;  %s11320_s1 = inlined_call_operand.hbm [shape: f32[4,16], index: 1, kind: input, shape index: {}]   ;;  %s11321_s2 = inlined_call_operand.hbm [shape: f32[1,16], index: 2, kind: input, shape index: {}]   ;;  %s11322_s3 = inlined_call_operand.hbm [shape: f32[16,512], index: 3, kind: input, shape index: {}]   ;;  %s11323_s4 = inlined_call_operand.hbm [shape: f32[128,512], index: 4, kind: input, shape index: {}]   ;;  %s11324_s5 = inlined_call_operand.hbm [shape: f32[1,512], index: 5, kind: input, shape index: {}]   ;;  %s11325_s6 = inlined_call_operand.hbm [shape: f32[1,128,512], index: 6, kind: input, shape index: {}]   ;;  %s11326_s7 = inlined_call_operand.hbm [shape: f32[1,128,512], index: 7, kind: input, shape index: {}]   ;;  %s11327_s8 = inlined_call_operand.hbm [shape: f32[1,1,512], index: 8, kind: input, shape index: {}]   ;;  %s11328_s9 = inlined_call_operand.hbm [shape: f32[128,16], index: 9, kind: input, shape index: {}]   ;;  %s11329_s10 = inlined_call_operand.hbm [shape: f32[1,16], index: 10, kind: input, shape index: {}]   ;;  %s11330_s11 = inlined_call_operand.hbm [shape: f32[16,128], index: 11, kind: input, shape index: {}]   ;;  %s11331_s12 = inlined_call_operand.hbm [shape: f32[1,128], index: 12, kind: input, shape index: {}]   ;;  %s11332_s13 = inlined_call_operand.hbm [shape: f32[8,8,128], index: 13, kind: output, shape index: {}]  }
   0x1   :  { %19 = vsyncpa [#allocation10], 0 }
   0x2   :  { %20 = vsyncpa [#allocation13], 0 }
   0x3   :  { %21 = vsyncpa [#allocation16], 0 }
   0x4   :  { %22 = vsyncpa [#allocation19], 0 }
   0x5   :  { %23 = vsyncpa [#allocation22], 0 }
   0x6   :  { %24 = vsyncpa [#allocation25], 0 }
   0x7   :  { %25 = vsyncpa [#allocation8], 0  ;;  %s9165_s25 = smov [#allocation9]   ;;  %s9166_s27 = smov [#allocation12]  }
   0x8   :  { %s44_s26 = sshll.u32 %s9165_s25, 4  ;;  %s63_s28 = sshll.u32 %s9166_s27, 4  ;;  %s45_s26 = int_to_ptr.vmem [resolvable:$true] %s44_s26  ;;  %s9254_s28 = int_to_ptr.vmem [resolvable:$true] %s63_s28 }
   0x9   :  { %s8841_s14 = scalar_lea.hbm %s11320_s1, 64 }
   0xa   :  { %p8842_p0 = scmp.ne.s32.totalorder %s11320_s1, %s8841_s14  ;;  %p8845_p1 = scmp.lt.u32.totalorder %s8841_s14, %s11320_s1 }
   0xc   :  { %p8847_p2 = pnand %p8845_p1, %p8842_p0 }
   0xe   :  { %8850 = shalt.err (!%p8847_p2)
}
   0xf   :  { %s8851_s19 = scalar_lea.vmem %s45_s26, 64  ;;  %p8856_p4 = scmp.lt.s32.totalorder %s45_s26, %s45_s26 }
  0x10   :  { %p8852_p3 = scmp.ne.s32.totalorder %s45_s26, %s8851_s19  ;;  %p8857_p5 = scmp.lt.s32.totalorder %s8851_s19, %s8851_s19 }
  0x12   :  { %p8858_p6 = por %p8857_p5, %p8856_p4 }
  0x14   :  { %p8859_p7 = pnand %p8858_p6, %p8852_p3 }
  0x16   :  { %8862 = shalt.err (!%p8859_p7)
}
  0x17   :  { %47 = dma.hbm_to_vmem [thread:$0]  %s11320_s1, 64, %s45_s26, [#allocation10]  }
  0x18   :  { %s8863_s24 = scalar_lea.hbm %s11322_s3, 1024 }
  0x19   :  { %p8864_p8 = scmp.ne.s32.totalorder %s11322_s3, %s8863_s24  ;;  %p8867_p9 = scmp.lt.u32.totalorder %s8863_s24, %s11322_s3 }
  0x1b   :  { %p8869_p10 = pnand %p8867_p9, %p8864_p8 }
  0x1d   :  { %8872 = shalt.err (!%p8869_p10)
}
  0x1e   :  { %s8873_s14 = scalar_lea.vmem %s9254_s28, 1024  ;;  %p8878_p12 = scmp.lt.s32.totalorder %s9254_s28, %s9254_s28 }
  0x1f   :  { %p8874_p11 = scmp.ne.s32.totalorder %s9254_s28, %s8873_s14  ;;  %p8879_p13 = scmp.lt.s32.totalorder %s8873_s14, %s8873_s14 }
  0x21   :  { %p8880_p0 = por %p8879_p13, %p8878_p12 }
  0x23   :  { %p8881_p1 = pnand %p8880_p0, %p8874_p11 }
  0x25   :  { %8884 = shalt.err (!%p8881_p1)
}
  0x26   :  { %s9167_s1 = smov 512   ;;  %s9168_s26 = smov 32  }
  0x27   :  { %69 = dma.hbm_to_vmem [thread:$0]  %s11322_s3, 1024, %s9254_s28, [#allocation13], %s9167_s1, %s9167_s1, %s9168_s26  }
  0x28   :  { %s9169_s17 = smov [#allocation15]   ;;  %s9170_s19 = smov [#allocation18]  }
  0x29   :  { %s88_s18 = sshll.u32 %s9169_s17, 4  ;;  %s109_s20 = sshll.u32 %s9170_s19, 4  ;;  %s89_s18 = int_to_ptr.vmem [resolvable:$true] %s88_s18  ;;  %s9288_s20 = int_to_ptr.vmem [resolvable:$true] %s109_s20 }
  0x2a   :  { %s8885_s23 = scalar_lea.hbm %s11324_s5, 64 }
  0x2b   :  { %p8886_p2 = scmp.ne.s32.totalorder %s11324_s5, %s8885_s23  ;;  %p8889_p3 = scmp.lt.u32.totalorder %s8885_s23, %s11324_s5 }
  0x2d   :  { %p8891_p4 = pnand %p8889_p3, %p8886_p2 }
  0x2f   :  { %8894 = shalt.err (!%p8891_p4)
}
  0x30   :  { %s8895_s3 = scalar_lea.vmem %s89_s18, 64  ;;  %p8900_p6 = scmp.lt.s32.totalorder %s89_s18, %s89_s18 }
  0x31   :  { %p8896_p5 = scmp.ne.s32.totalorder %s89_s18, %s8895_s3  ;;  %p8901_p7 = scmp.lt.s32.totalorder %s8895_s3, %s8895_s3 }
  0x33   :  { %p8902_p8 = por %p8901_p7, %p8900_p6 }
  0x35   :  { %p8903_p9 = pnand %p8902_p8, %p8896_p5 }
  0x37   :  { %8906 = shalt.err (!%p8903_p9)
}
  0x38   :  { %91 = dma.hbm_to_vmem [thread:$0]  %s11324_s5, 64, %s89_s18, [#allocation16]  }
  0x39   :  { %s8907_s16 = scalar_lea.hbm %s11326_s7, 8192 }
  0x3a   :  { %p8908_p10 = scmp.ne.s32.totalorder %s11326_s7, %s8907_s16  ;;  %p8911_p11 = scmp.lt.u32.totalorder %s8907_s16, %s11326_s7 }
  0x3c   :  { %p8913_p12 = pnand %p8911_p11, %p8908_p10 }
  0x3e   :  { %8916 = shalt.err (!%p8913_p12)
}
  0x3f   :  { %s8917_s23 = scalar_lea.vmem %s9288_s20, 8192  ;;  %p8922_p0 = scmp.lt.s32.totalorder %s9288_s20, %s9288_s20 }
  0x40   :  { %p8918_p13 = scmp.ne.s32.totalorder %s9288_s20, %s8917_s23  ;;  %p8923_p1 = scmp.lt.s32.totalorder %s8917_s23, %s8917_s23 }
  0x42   :  { %p8924_p2 = por %p8923_p1, %p8922_p0 }
  0x44   :  { %p8925_p3 = pnand %p8924_p2, %p8918_p13 }
  0x46   :  { %8928 = shalt.err (!%p8925_p3)
}
  0x47   :  { %115 = dma.hbm_to_vmem [thread:$0]  %s11326_s7, 8192, %s9288_s20, [#allocation19], %s9167_s1, %s9167_s1, %s9168_s26  }
  0x48   :  { %s9171_s24 = smov [#allocation21]   ;;  %s9172_s27 = smov [#allocation24]  }
  0x49   :  { %s131_s25 = sshll.u32 %s9171_s24, 4  ;;  %s153_s29 = sshll.u32 %s9172_s27, 4  ;;  %s132_s25 = int_to_ptr.vmem [resolvable:$true] %s131_s25  ;;  %s9322_s29 = int_to_ptr.vmem [resolvable:$true] %s153_s29 }
  0x4a   :  { %s8929_s30 = scalar_lea.hbm %s11328_s9, 2048 }
  0x4b   :  { %p8930_p4 = scmp.ne.s32.totalorder %s11328_s9, %s8929_s30  ;;  %p8933_p5 = scmp.lt.u32.totalorder %s8929_s30, %s11328_s9 }
  0x4d   :  { %p8935_p6 = pnand %p8933_p5, %p8930_p4 }
  0x4f   :  { %8938 = shalt.err (!%p8935_p6)
}
  0x50   :  { %s8939_s7 = scalar_lea.vmem %s132_s25, 2048  ;;  %p8944_p8 = scmp.lt.s32.totalorder %s132_s25, %s132_s25 }
  0x51   :  { %p8940_p7 = scmp.ne.s32.totalorder %s132_s25, %s8939_s7  ;;  %p8945_p9 = scmp.lt.s32.totalorder %s8939_s7, %s8939_s7 }
  0x53   :  { %p8946_p10 = por %p8945_p9, %p8944_p8 }
  0x55   :  { %p8947_p11 = pnand %p8946_p10, %p8940_p7 }
  0x57   :  { %8950 = shalt.err (!%p8947_p11)
}
  0x58   :  { %s9173_s20 = smov 128   ;;  %s9174_s19 = smov 8  }
  0x59   :  { %137 = dma.hbm_to_vmem [thread:$0]  %s11328_s9, 2048, %s132_s25, [#allocation22], %s9173_s20, %s9173_s20, %s9174_s19  }
  0x5a   :  { %s8951_s18 = scalar_lea.hbm %s11330_s11, 256 }
  0x5b   :  { %p8952_p12 = scmp.ne.s32.totalorder %s11330_s11, %s8951_s18  ;;  %p8955_p13 = scmp.lt.u32.totalorder %s8951_s18, %s11330_s11 }
  0x5d   :  { %p8957_p0 = pnand %p8955_p13, %p8952_p12 }
  0x5f   :  { %8960 = shalt.err (!%p8957_p0)
}
  0x60   :  { %s8961_s30 = scalar_lea.vmem %s9322_s29, 256  ;;  %p8966_p2 = scmp.lt.s32.totalorder %s9322_s29, %s9322_s29 }
  0x61   :  { %p8962_p1 = scmp.ne.s32.totalorder %s9322_s29, %s8961_s30  ;;  %p8967_p3 = scmp.lt.s32.totalorder %s8961_s30, %s8961_s30 }
  0x63   :  { %p8968_p4 = por %p8967_p3, %p8966_p2 }
  0x65   :  { %p8969_p5 = pnand %p8968_p4, %p8962_p1 }
  0x67   :  { %8972 = shalt.err (!%p8969_p5)
}
  0x68   :  { %159 = dma.hbm_to_vmem [thread:$0]  %s11330_s11, 256, %s9322_s29, [#allocation25], %s9173_s20, %s9173_s20, %s9174_s19  }
  0x69   :  { %s9175_s14 = smov [#allocation6]   ;;  %s9176_s16 = smov [#allocation11]  }
  0x6a   :  { %s31_s15 = sshll.u32 %s9175_s14, 4  ;;  %s54_s17 = sshll.u32 %s9176_s16, 4  ;;  %s32_s15 = int_to_ptr.vmem [resolvable:$true] %s31_s15  ;;  %s55_s17 = int_to_ptr.vmem [resolvable:$true] %s54_s17 }
  0x6b   :  { %s8973_s22 = scalar_lea.hbm %s11319_s0, 1024 }
  0x6c   :  { %p8974_p6 = scmp.ne.s32.totalorder %s11319_s0, %s8973_s22  ;;  %p8977_p7 = scmp.lt.u32.totalorder %s8973_s22, %s11319_s0 }
  0x6e   :  { %p8979_p8 = pnand %p8977_p7, %p8974_p6 }
  0x70   :  { %8982 = shalt.err (!%p8979_p8)
}
  0x71   :  { %s8983_s11 = scalar_lea.vmem %s32_s15, 1024  ;;  %p8988_p10 = scmp.lt.s32.totalorder %s32_s15, %s32_s15 }
  0x72   :  { %p8984_p9 = scmp.ne.s32.totalorder %s32_s15, %s8983_s11  ;;  %p8989_p11 = scmp.lt.s32.totalorder %s8983_s11, %s8983_s11 }
  0x74   :  { %p8990_p12 = por %p8989_p11, %p8988_p10 }
  0x76   :  { %p8991_p13 = pnand %p8990_p12, %p8984_p9 }
  0x78   :  { %8994 = shalt.err (!%p8991_p13)
}
  0x79   :  { %37 = dma.hbm_to_vmem [thread:$0]  %s11319_s0, 1024, %s32_s15, [#allocation7], %s9173_s20, %s9173_s20, %s9174_s19  }
  0x7a   :  { %s8995_s30 = scalar_lea.hbm %s11321_s2, 16 }
  0x7b   :  { %p8996_p0 = scmp.ne.s32.totalorder %s11321_s2, %s8995_s30  ;;  %p8999_p1 = scmp.lt.u32.totalorder %s8995_s30, %s11321_s2 }
  0x7d   :  { %p9001_p2 = pnand %p8999_p1, %p8996_p0 }
  0x7f   :  { %9004 = shalt.err (!%p9001_p2)
}
  0x80   :  { %s9005_s7 = scalar_lea.vmem %s55_s17, 16  ;;  %s9009_s21 = scalar_lea.vmem %s55_s17, 32 }
  0x81   :  { %p9006_p3 = scmp.ne.s32.totalorder %s55_s17, %s9005_s7  ;;  %p9010_p4 = scmp.lt.s32.totalorder %s55_s17, %s55_s17 }
  0x82   :  { %p9011_p5 = scmp.lt.s32.totalorder %s9009_s21, %s9005_s7 }
  0x84   :  { %p9012_p6 = por %p9011_p5, %p9010_p4 }
  0x86   :  { %p9013_p7 = pnand %p9012_p6, %p9006_p3 }
  0x88   :  { %9016 = shalt.err (!%p9013_p7)
}
  0x89   :  { %57 = dma.hbm_to_vmem [thread:$0]  %s11321_s2, 16, %s55_s17, [#allocation10]  }
  0x8a   :  { %s9177_s22 = smov [#allocation14]   ;;  %s9178_s5 = smov [#allocation17]  }
  0x8b   :  { %s75_s23 = sshll.u32 %s9177_s22, 4  ;;  %s97_s18 = sshll.u32 %s9178_s5, 4  ;;  %s76_s23 = int_to_ptr.vmem [resolvable:$true] %s75_s23  ;;  %s9386_s18 = int_to_ptr.vmem [resolvable:$true] %s97_s18 }
  0x8c   :  { %s9017_s29 = scalar_lea.hbm %s11323_s4, 8192 }
  0x8d   :  { %p9018_p8 = scmp.ne.s32.totalorder %s11323_s4, %s9017_s29  ;;  %p9021_p9 = scmp.lt.u32.totalorder %s9017_s29, %s11323_s4 }
  0x8f   :  { %p9023_p10 = pnand %p9021_p9, %p9018_p8 }
  0x91   :  { %9026 = shalt.err (!%p9023_p10)
}
  0x92   :  { %s9027_s2 = scalar_lea.vmem %s76_s23, 8192  ;;  %p9032_p12 = scmp.lt.s32.totalorder %s76_s23, %s76_s23 }
  0x93   :  { %p9028_p11 = scmp.ne.s32.totalorder %s76_s23, %s9027_s2  ;;  %p9033_p13 = scmp.lt.s32.totalorder %s9027_s2, %s9027_s2 }
  0x95   :  { %p9034_p0 = por %p9033_p13, %p9032_p12 }
  0x97   :  { %p9035_p1 = pnand %p9034_p0, %p9028_p11 }
  0x99   :  { %9038 = shalt.err (!%p9035_p1)
}
  0x9a   :  { %81 = dma.hbm_to_vmem [thread:$0]  %s11323_s4, 8192, %s76_s23, [#allocation13], %s9167_s1, %s9167_s1, %s9168_s26  }
  0x9b   :  { %s9039_s16 = scalar_lea.hbm %s11325_s6, 8192 }
  0x9c   :  { %p9040_p2 = scmp.ne.s32.totalorder %s11325_s6, %s9039_s16  ;;  %p9043_p3 = scmp.lt.u32.totalorder %s9039_s16, %s11325_s6 }
  0x9e   :  { %p9045_p4 = pnand %p9043_p3, %p9040_p2 }
  0xa0   :  { %9048 = shalt.err (!%p9045_p4)
}
  0xa1   :  { %s9049_s22 = scalar_lea.vmem %s9386_s18, 8192  ;;  %p9054_p6 = scmp.lt.s32.totalorder %s9386_s18, %s9386_s18 }
  0xa2   :  { %p9050_p5 = scmp.ne.s32.totalorder %s9386_s18, %s9049_s22  ;;  %p9055_p7 = scmp.lt.s32.totalorder %s9049_s22, %s9049_s22 }
  0xa4   :  { %p9056_p8 = por %p9055_p7, %p9054_p6 }
  0xa6   :  { %p9057_p9 = pnand %p9056_p8, %p9050_p5 }
  0xa8   :  { %9060 = shalt.err (!%p9057_p9)
}
  0xa9   :  { %103 = dma.hbm_to_vmem [thread:$0]  %s11325_s6, 8192, %s9386_s18, [#allocation16], %s9167_s1, %s9167_s1, %s9168_s26  }
  0xaa   :  { %s9179_s5 = smov [#allocation20]   ;;  %s9180_s11 = smov [#allocation23]  }
  0xab   :  { %s122_s24 = sshll.u32 %s9179_s5, 4  ;;  %s144_s29 = sshll.u32 %s9180_s11, 4  ;;  %s123_s24 = int_to_ptr.vmem [resolvable:$true] %s122_s24  ;;  %s145_s29 = int_to_ptr.vmem [resolvable:$true] %s144_s29 }
  0xac   :  { %s9061_s28 = scalar_lea.hbm %s11327_s8, 64 }
  0xad   :  { %p9062_p10 = scmp.ne.s32.totalorder %s11327_s8, %s9061_s28  ;;  %p9065_p11 = scmp.lt.u32.totalorder %s9061_s28, %s11327_s8 }
  0xaf   :  { %p9067_p12 = pnand %p9065_p11, %p9062_p10 }
  0xb1   :  { %9070 = shalt.err (!%p9067_p12)
}
  0xb2   :  { %s9071_s6 = scalar_lea.vmem %s123_s24, 64  ;;  %p9076_p0 = scmp.lt.s32.totalorder %s123_s24, %s123_s24 }
  0xb3   :  { %p9072_p13 = scmp.ne.s32.totalorder %s123_s24, %s9071_s6  ;;  %p9077_p1 = scmp.lt.s32.totalorder %s9071_s6, %s9071_s6 }
  0xb5   :  { %p9078_p2 = por %p9077_p1, %p9076_p0 }
  0xb7   :  { %p9079_p3 = pnand %p9078_p2, %p9072_p13 }
  0xb9   :  { %9082 = shalt.err (!%p9079_p3)
}
  0xba   :  { %125 = dma.hbm_to_vmem [thread:$0]  %s11327_s8, 64, %s123_s24, [#allocation19]  }
  0xbb   :  { %s9083_s14 = scalar_lea.hbm %s11329_s10, 16 }
  0xbc   :  { %p9084_p4 = scmp.ne.s32.totalorder %s11329_s10, %s9083_s14  ;;  %p9087_p5 = scmp.lt.u32.totalorder %s9083_s14, %s11329_s10 }
  0xbe   :  { %p9089_p6 = pnand %p9087_p5, %p9084_p4 }
  0xc0   :  { %9092 = shalt.err (!%p9089_p6)
}
  0xc1   :  { %s9093_s15 = scalar_lea.vmem %s145_s29, 16  ;;  %s9097_s22 = scalar_lea.vmem %s145_s29, 32 }
  0xc2   :  { %p9094_p7 = scmp.ne.s32.totalorder %s145_s29, %s9093_s15  ;;  %p9098_p8 = scmp.lt.s32.totalorder %s145_s29, %s145_s29 }
  0xc3   :  { %p9099_p9 = scmp.lt.s32.totalorder %s9097_s22, %s9093_s15 }
  0xc5   :  { %p9100_p10 = por %p9099_p9, %p9098_p8 }
  0xc7   :  { %p9101_p11 = pnand %p9100_p10, %p9094_p7 }
  0xc9   :  { %9104 = shalt.err (!%p9101_p11)
}
  0xca   :  { %147 = dma.hbm_to_vmem [thread:$0]  %s11329_s10, 16, %s145_s29, [#allocation22]  }
  0xcb   :  { %s9181_s23 = smov [#allocation26]   ;;  %s9105_s27 = scalar_lea.hbm %s11331_s12, 16 }
  0xcc   :  { %s166_s5 = sshll.u32 %s9181_s23, 4  ;;  %p9106_p12 = scmp.ne.s32.totalorder %s11331_s12, %s9105_s27  ;;  %s167_s5 = int_to_ptr.vmem [resolvable:$true] %s166_s5 }
  0xcd   :  { %p9109_p13 = scmp.lt.u32.totalorder %s9105_s27, %s11331_s12 }
  0xcf   :  { %p9111_p0 = pnand %p9109_p13, %p9106_p12 }
  0xd1   :  { %9114 = shalt.err (!%p9111_p0)
}
  0xd2   :  { %s9115_s17 = scalar_lea.vmem %s167_s5, 16  ;;  %s9119_s10 = scalar_lea.vmem %s167_s5, 32 }
  0xd3   :  { %p9116_p1 = scmp.ne.s32.totalorder %s167_s5, %s9115_s17  ;;  %p9120_p2 = scmp.lt.s32.totalorder %s167_s5, %s167_s5 }
  0xd4   :  { %p9121_p3 = scmp.lt.s32.totalorder %s9119_s10, %s9115_s17 }
  0xd6   :  { %p9122_p4 = por %p9121_p3, %p9120_p2 }
  0xd8   :  { %p9123_p5 = pnand %p9122_p4, %p9116_p1 }
  0xda   :  { %9126 = shalt.err (!%p9123_p5)
}
  0xdb   :  { %169 = dma.hbm_to_vmem [thread:$0]  %s11331_s12, 16, %s167_s5, [#allocation25]  }
  0xdc   :  { %9149 = dma.done.wait [#allocation7], 1024  }
  0xdd   :  { %9150 = vsyncadd [#allocation7], 4294966272 }
  0xde   :  { %9151 = dma.done.wait [#allocation10], 80  }
  0xdf   :  { %9152 = vsyncadd [#allocation10], 4294967216 }
  0xe0   :  { %9153 = dma.done.wait [#allocation13], 9216  }
  0xe1   :  { %9154 = vsyncadd [#allocation13], 4294958080 }
  0xe2   :  { %9155 = dma.done.wait [#allocation16], 8256  }
  0xe3   :  { %9156 = vsyncadd [#allocation16], 4294959040 }
  0xe4   :  { %9157 = dma.done.wait [#allocation19], 8256  }
  0xe5   :  { %9158 = vsyncadd [#allocation19], 4294959040 }
  0xe6   :  { %9159 = dma.done.wait [#allocation22], 2064  }
  0xe7   :  { %9160 = vsyncadd [#allocation22], 4294965232 }
  0xe8   :  { %9161 = dma.done.wait [#allocation25], 272  }
  0xe9   :  { %9162 = vsyncadd [#allocation25], 4294967024  ;;  %vm258_vm0 = vcmask 1043456   ;;  %vm233_vm1 = vcmask 31744   ;;  %v225_v0 = vld [vmem:[#allocation9] sm:$0xf] }
  0xea   :  { %v217_v1 = vld [vmem:[#allocation6] sm:$0xff]  ;;  %v218_v2 = vld [vmem:[#allocation6 + $0x8] sm:$0xff]  ;;  %6816 = vmatprep.subr.msk.mxu0 %vm258_vm0, %v225_v0  ;;  %v219_v3 = vld [vmem:[#allocation6 + $0x10] sm:$0xff]  ;;  %v11333_v26 = vmov 0.0   ;;  %vm405_vm2 = vcmask 130048   ;;  %s9183_s12 = smov [#allocation27]  }
  0xeb   :  { %6818 = vmatprep.mubr.msk.f32.mxu0 %vm233_vm1, %v217_v1  ;;  %6817 = vmatpush3.msk.msra.mxu0 %vm258_vm0, %v225_v0  ;;  %v220_v4 = vld [vmem:[#allocation6 + $0x18] sm:$0xff]  ;;  %v221_v5 = vld [vmem:[#allocation6 + $0x20] sm:$0xff]  ;;  %v222_v6 = vld [vmem:[#allocation6 + $0x28] sm:$0xff]  ;;  %s6671_s6 = sshll.u32 %s9183_s12, 4  ;;  %s6672_s6 = int_to_ptr.vmem [resolvable:$true] %s6671_s6 }
  0xec   :  { %6819 = vmatmul.mubr.msk.f32.vlgmr.msra.gmra.mrb[0].mxu0 %vm233_vm1, %v218_v2  ;;  %v223_v7 = vld [vmem:[#allocation6 + $0x30] sm:$0xff]  ;;  %v224_v8 = vld [vmem:[#allocation6 + $0x38] sm:$0xff]  ;;  %v375_v13 = vld [vmem:[#allocation12] sm:$0xff]  ;;  %494 = vmatprep.mubr.f32.mxu1 %v11333_v26  ;;  %s9127_s1 = scalar_lea.vmem %s6672_s6, 1024  ;;  %p9132_p7 = scmp.lt.s32.totalorder %s6672_s6, %s6672_s6 }
  0xed   :  { %6821 = vmatprep.mubr.msk.f32.mxu0 %vm233_vm1, %v219_v3  ;;  %v376_v9 = vld [vmem:[#allocation12 + $0x8] sm:$0xff]  ;;  %v378_v11 = vld [vmem:[#allocation12 + $0x18] sm:$0xff]  ;;  %v379_v14 = vld [vmem:[#allocation12 + $0x20] sm:$0xff]  ;;  %p9128_p6 = scmp.ne.s32.totalorder %s6672_s6, %s9127_s1  ;;  %p9133_p8 = scmp.lt.s32.totalorder %s9127_s1, %s9127_s1 }
  0xee   :  { %v380_v10 = vld [vmem:[#allocation12 + $0x28] sm:$0xff]  ;;  %v6892_v15 = vpack.c.bf16 %v379_v14, %v375_v13  ;;  %v382_v16 = vld [vmem:[#allocation12 + $0x38] sm:$0xff]  ;;  %v377_v17 = vld [vmem:[#allocation12 + $0x10] sm:$0xff] }
  0xef   :  { %v6890_v12 = vpack.c.bf16 %v380_v10, %v376_v9  ;;  %v381_v18 = vld [vmem:[#allocation12 + $0x30] sm:$0xff]  ;;  %v6894_v19 = vpack.c.bf16 %v382_v16, %v378_v11  ;;  %v694_v21 = vld [vmem:[#allocation14 + $0x8] sm:$0xff]  ;;  %v696_v23 = vld [vmem:[#allocation14 + $0x18] sm:$0xff]  ;;  %p9134_p9 = por %p9133_p8, %p9132_p7 }
  0xf0   :  { %6822 = vmatmul.mubr.msk.f32.gmra.mrb[2].mxu0 %vm233_vm1, %v220_v4  ;;  %v6896_v20 = vpack.c.bf16 %v381_v18, %v377_v17  ;;  %v698_v22 = vld [vmem:[#allocation14 + $0x28] sm:$0xff]  ;;  %v700_v25 = vld [vmem:[#allocation14 + $0x38] sm:$0xff]  ;;  %v693_v29 = vld [vmem:[#allocation14] sm:$0xff] }
  0xf1   :  { %6824 = vmatprep.mubr.msk.f32.mxu0 %vm233_vm1, %v221_v5  ;;  %6891 = vmatprep.subr.bf16.mxu1 %v6890_v12  ;;  %v9467_v24 = vpack.c.bf16 %v698_v22, %v694_v21  ;;  %v9470_v27 = vpack.c.bf16 %v700_v25, %v696_v23  ;;  %v9475_v28 = vld [vmem:[#allocation11] ss:$0 sm:$0xff]  ;;  %v697_v31 = vld [vmem:[#allocation14 + $0x20] sm:$0xff]  ;;  %v695_v32 = vld [vmem:[#allocation14 + $0x10] sm:$0xff]  ;;  %p9135_p10 = pnand %p9134_p9, %p9128_p6 }
  0xf2   :  { %6893 = vmatpush1.bf16.msra.mxu1 %v6892_v15  ;;  %6895 = vmatprep.subr.bf16.mxu0 %v6894_v19  ;;  %v699_v33 = vld [vmem:[#allocation14 + $0x30] sm:$0xff]  ;;  %v702_v35 = vld [vmem:[#allocation14 + $0x48] sm:$0xff]  ;;  %v704_v38 = vld [vmem:[#allocation14 + $0x58] sm:$0xff]  ;;  %v9478_v40 = vpack.c.bf16 %v697_v31, %v693_v29 }
  0xf3   :  { %6897 = vmatpush1.bf16.msra.mxu0 %v6896_v20  ;;  %6899 = vmatprep.subr.bf16.mxu1 %v9467_v24  ;;  %v706_v37 = vld [vmem:[#allocation14 + $0x68] sm:$0xff]  ;;  %v708_v39 = vld [vmem:[#allocation14 + $0x78] sm:$0xff]  ;;  %v9480_v41 = vpack.c.bf16 %v699_v33, %v695_v32  ;;  %v701_v42 = vld [vmem:[#allocation14 + $0x40] sm:$0xff] }
  0xf4   :  { %6825 = vmatmul.mubr.msk.f32.gmra.mrb[4].mxu0 %vm233_vm1, %v222_v6  ;;  %6931 = vmatprep.subr.bf16.mxu0 %v9470_v27  ;;  %v705_v46 = vld [vmem:[#allocation14 + $0x60] sm:$0xff]  ;;  %v703_v47 = vld [vmem:[#allocation14 + $0x50] sm:$0xff]  ;;  %v9483_v50 = vpack.c.bf16 %v706_v37, %v702_v35  ;;  %v9485_v51 = vpack.c.bf16 %v708_v39, %v704_v38  ;;  %v710_v52 = vld [vmem:[#allocation14 + $0x88] sm:$0xff] }
  0xf5   :  { %6827 = vmatprep.mubr.msk.f32.mxu0 %vm233_vm1, %v223_v7  ;;  %v707_v48 = vld [vmem:[#allocation14 + $0x70] sm:$0xff]  ;;  %v714_v54 = vld [vmem:[#allocation14 + $0xa8] sm:$0xff]  ;;  %v712_v55 = vld [vmem:[#allocation14 + $0x98] sm:$0xff]  ;;  %v9492_v57 = vpack.c.bf16 %v705_v46, %v701_v42 }
  0xf6   :  { %v716_v56 = vld [vmem:[#allocation14 + $0xb8] sm:$0xff]  ;;  %v9494_v58 = vpack.c.bf16 %v707_v48, %v703_v47  ;;  %v709_v59 = vld [vmem:[#allocation14 + $0x80] sm:$0xff]  ;;  %v711_v63 = vld [vmem:[#allocation14 + $0x90] sm:$0xff]  ;;  %v9502_v1 = vpack.c.bf16 %v714_v54, %v710_v52 }
  0xf7   :  { %v713_v61 = vld [vmem:[#allocation14 + $0xa0] sm:$0xff]  ;;  %v715_v0 = vld [vmem:[#allocation14 + $0xb0] sm:$0xff]  ;;  %v9504_v2 = vpack.c.bf16 %v716_v56, %v712_v55  ;;  %v718_v4 = vld [vmem:[#allocation14 + $0xc8] sm:$0xff] }
  0xf8   :  { %6828 = vmatmul.mubr.msk.f32.gmra.mrb[6].mxu0 %vm233_vm1, %v224_v8  ;;  %v722_v6 = vld [vmem:[#allocation14 + $0xe8] sm:$0xff]  ;;  %v720_v7 = vld [vmem:[#allocation14 + $0xd8] sm:$0xff]  ;;  %v9510_v9 = vpack.c.bf16 %v713_v61, %v709_v59  ;;  %v9512_v10 = vpack.c.bf16 %v715_v0, %v711_v63  ;;  %v717_v11 = vld [vmem:[#allocation14 + $0xc0] sm:$0xff] }
  0xf9   :  { %607 = vmatprep.mubr.f32.mxu0 %v11333_v26  ;;  %v724_v8 = vld [vmem:[#allocation14 + $0xf8] sm:$0xff]  ;;  %v721_v13 = vld [vmem:[#allocation14 + $0xe0] sm:$0xff]  ;;  %v719_v14 = vld [vmem:[#allocation14 + $0xd0] sm:$0xff]  ;;  %v9521_v17 = vpack.c.bf16 %v722_v6, %v718_v4 }
  0xfa   :  { %v723_v15 = vld [vmem:[#allocation14 + $0xf0] sm:$0xff]  ;;  %v9523_v18 = vpack.c.bf16 %v724_v8, %v720_v7  ;;  %v726_v19 = vld [vmem:[#allocation14 + $0x108] sm:$0xff]  ;;  %v728_v23 = vld [vmem:[#allocation14 + $0x118] sm:$0xff]  ;;  %v9530_v29 = vpack.c.bf16 %v721_v13, %v717_v11 }
  0xfb   :  { %v730_v22 = vld [vmem:[#allocation14 + $0x128] sm:$0xff]  ;;  %v732_v25 = vld [vmem:[#allocation14 + $0x138] sm:$0xff]  ;;  %v725_v31 = vld [vmem:[#allocation14 + $0x100] sm:$0xff] }
  0xfc   :  { %v729_v33 = vld [vmem:[#allocation14 + $0x120] sm:$0xff]  ;;  %v731_v35 = vld [vmem:[#allocation14 + $0x130] sm:$0xff]  ;;  %v9540_v37 = vpack.c.bf16 %v732_v25, %v728_v23  ;;  %v734_v38 = vld [vmem:[#allocation14 + $0x148] sm:$0xff] }
  0xfd   :  { %v738_v42 = vld [vmem:[#allocation14 + $0x168] sm:$0xff]  ;;  %v733_v47 = vld [vmem:[#allocation14 + $0x140] sm:$0xff]  ;;  %v735_v52 = vld [vmem:[#allocation14 + $0x150] sm:$0xff] }
  0xfe   :  { %v9556_v54 = vpack.c.bf16 %v738_v42, %v734_v38  ;;  %v742_v56 = vld [vmem:[#allocation14 + $0x188] sm:$0xff]  ;;  %v744_v61 = vld [vmem:[#allocation14 + $0x198] sm:$0xff]  ;;  %v743_v6 = vld [vmem:[#allocation14 + $0x190] sm:$0xff] }
  0xff   :  { %v747_v7 = vld [vmem:[#allocation14 + $0x1b0] sm:$0xff]  ;;  %v753_v25 = vld [vmem:[#allocation14 + $0x1e0] sm:$0xff] }
 0x100   :  { %v1003_v38 = vld [vmem:[#allocation18 + $0x38] sm:$0xff] }
 0x1bf   :  { %v6820_v30 = vpop.f32.mrb[0].mxu0 }
 0x1c0   :  { %v328_v34 = vpop.f32.mrb[1].mxu0  ;;  %v334_v43 = vadd.f32 %v6820_v30, %v9475_v28  ;;  %v9532_v30 = vpack.c.bf16 %v723_v15, %v719_v14  ;;  %v754_v14 = vld [vmem:[#allocation14 + $0x1e8] sm:$0xff]  ;;  %v752_v15 = vld [vmem:[#allocation14 + $0x1d8] sm:$0xff] }
 0x1c1   :  { %v329_v36 = vadd.f32 %v9475_v28, %v328_v34  ;;  %v727_v34 = vld [vmem:[#allocation14 + $0x110] sm:$0xff] }
 0x1c2   :  { %v368_v60 = vmax.f32 %v334_v43, 0.0  ;;  %v736_v43 = vld [vmem:[#allocation14 + $0x158] sm:$0xff]  ;;  %v9548_v46 = vpack.c.bf16 %v731_v35, %v727_v34  ;;  %v997_v35 = vld [vmem:[#allocation18 + $0x8] sm:$0xff] }
 0x1c3   :  { %v367_v44 = vmax.f32 %v329_v36, 0.0  ;;  %v6823_v45 = vpop.f32.mrb[2].mxu0  ;;  %v9538_v36 = vpack.c.bf16 %v730_v22, %v726_v19  ;;  %v756_v19 = vld [vmem:[#allocation14 + $0x1f8] sm:$0xff]  ;;  %v749_v22 = vld [vmem:[#allocation14 + $0x1c0] sm:$0xff] }
 0x1c4   :  { %v338_v49 = vpop.f32.mrb[3].mxu0  ;;  %v344_v12 = vadd.f32 %v6823_v45, %v9475_v28  ;;  %v9546_v45 = vpack.c.bf16 %v729_v33, %v725_v31  ;;  %v751_v31 = vld [vmem:[#allocation14 + $0x1d0] sm:$0xff]  ;;  %v9593_v34 = vpack.c.bf16 %v756_v19, %v752_v15  ;;  %v1015_v19 = vld [vmem:[#allocation18 + $0x98] sm:$0xff] }
 0x1c5   :  { %6699 = vmatmul.mubr.msk.f32.vlgmr.msra.gmra.mrb[0].mxu1 %vm405_vm2, %v367_v44  ;;  %6707 = vmatmul.mubr.msk.f32.vlgmr.msra.gmra.mrb[8].mxu0 %vm405_vm2, %v367_v44  ;;  %v339_v53 = vadd.f32 %v9475_v28, %v338_v49  ;;  %v740_v44 = vld [vmem:[#allocation14 + $0x178] sm:$0xff]  ;;  %v737_v49 = vld [vmem:[#allocation14 + $0x160] sm:$0xff]  ;;  %v1017_v15 = vld [vmem:[#allocation18 + $0xa8] sm:$0xff] }
 0x1c6   :  { %6901 = vmatpush1.bf16.msra.mxu1 %v9478_v40  ;;  %6933 = vmatpush1.bf16.msra.mxu0 %v9480_v41  ;;  %v370_v32 = vmax.f32 %v344_v12, 0.0  ;;  %v9558_v55 = vpack.c.bf16 %v740_v44, %v736_v43  ;;  %v9565_v63 = vpack.c.bf16 %v737_v49, %v733_v47  ;;  %v750_v12 = vld [vmem:[#allocation14 + $0x1c8] sm:$0xff]  ;;  %v1002_v49 = vld [vmem:[#allocation18 + $0x30] sm:$0xff] }
 0x1c7   :  { %500 = vmatprep.mubr.f32.mxu1 %v11333_v26  ;;  %613 = vmatprep.mubr.f32.mxu0 %v11333_v26  ;;  %v9498_v62 = vpop.f32.mrb[4].mxu0  ;;  %v369_v5 = vmax.f32 %v339_v53, 0.0  ;;  %v739_v53 = vld [vmem:[#allocation14 + $0x170] sm:$0xff]  ;;  %v9591_v33 = vpack.c.bf16 %v754_v14, %v750_v12  ;;  %v996_v43 = vld [vmem:[#allocation18] sm:$0xff] }
 0x1c8   :  { %6903 = vmatprep.subr.bf16.mxu1 %v9483_v50  ;;  %6935 = vmatprep.subr.bf16.mxu0 %v9485_v51  ;;  %v348_v3 = vpop.f32.mrb[5].mxu0  ;;  %v354_v48 = vadd.f32 %v9498_v62, %v9475_v28  ;;  %v748_v62 = vld [vmem:[#allocation14 + $0x1b8] sm:$0xff]  ;;  %v9567_v0 = vpack.c.bf16 %v739_v53, %v735_v52  ;;  %v1000_v44 = vld [vmem:[#allocation18 + $0x20] sm:$0xff]  ;;  %v1005_v52 = vld [vmem:[#allocation18 + $0x48] sm:$0xff] }
 0x1c9   :  { %6700 = vmatmul.mubr.msk.f32.gmra.mrb[2].mxu1 %vm405_vm2, %v368_v60  ;;  %6708 = vmatmul.mubr.msk.f32.gmra.mrb[10].mxu0 %vm405_vm2, %v368_v60  ;;  %v349_v21 = vadd.f32 %v9475_v28, %v348_v3  ;;  %v746_v60 = vld [vmem:[#allocation14 + $0x1a8] sm:$0xff]  ;;  %v741_v3 = vld [vmem:[#allocation14 + $0x180] sm:$0xff]  ;;  %v9575_v11 = vpack.c.bf16 %v748_v62, %v744_v61  ;;  %v9615_v62 = vpack.c.bf16 %v1000_v44, %v996_v43  ;;  %v1006_v12 = vld [vmem:[#allocation18 + $0x50] sm:$0xff] }
 0x1ca   :  { %6905 = vmatpush1.bf16.msra.mxu1 %v9492_v57  ;;  %6937 = vmatpush1.bf16.msra.mxu0 %v9494_v58  ;;  %v372_v4 = vmax.f32 %v354_v48, 0.0  ;;  %v9573_v8 = vpack.c.bf16 %v746_v60, %v742_v56  ;;  %v998_v48 = vld [vmem:[#allocation18 + $0x10] sm:$0xff]  ;;  %v1007_v60 = vld [vmem:[#allocation18 + $0x58] sm:$0xff]  ;;  %v1013_v14 = vld [vmem:[#allocation18 + $0x88] sm:$0xff] }
 0x1cb   :  { %506 = vmatprep.mubr.f32.mxu1 %v11333_v26  ;;  %619 = vmatprep.mubr.f32.mxu0 %v11333_v26  ;;  %v9517_v16 = vpop.f32.mrb[6].mxu0  ;;  %v371_v39 = vmax.f32 %v349_v21, 0.0  ;;  %v9583_v21 = vpack.c.bf16 %v747_v7, %v743_v6  ;;  %v1011_v61 = vld [vmem:[#allocation18 + $0x78] sm:$0xff]  ;;  %v1021_v43 = vld [vmem:[#allocation18 + $0xc8] sm:$0xff] }
 0x1cc   :  { %6907 = vmatprep.subr.bf16.mxu1 %v9502_v1  ;;  %6939 = vmatprep.subr.bf16.mxu0 %v9504_v2  ;;  %v358_v20 = vpop.f32.mrb[7].mxu0  ;;  %v364_v23 = vadd.f32 %v9517_v16, %v9475_v28  ;;  %v999_v16 = vld [vmem:[#allocation18 + $0x18] sm:$0xff]  ;;  %v9623_v7 = vpack.c.bf16 %v1011_v61, %v1007_v60  ;;  %v1025_v44 = vld [vmem:[#allocation18 + $0xe8] sm:$0xff]  ;;  %v1024_v60 = vld [vmem:[#allocation18 + $0xe0] sm:$0xff] }
 0x1cd   :  { %6701 = vmatmul.mubr.msk.f32.gmra.mrb[4].mxu1 %vm405_vm2, %v369_v5  ;;  %6709 = vmatmul.mubr.msk.f32.gmra.mrb[12].mxu0 %vm405_vm2, %v369_v5  ;;  %v359_v59 = vadd.f32 %v9475_v28, %v358_v20  ;;  %v745_v5 = vld [vmem:[#allocation14 + $0x1a0] sm:$0xff]  ;;  %v1001_v28 = vld [vmem:[#allocation18 + $0x28] sm:$0xff]  ;;  %v9609_v56 = vpack.c.bf16 %v1003_v38, %v999_v16  ;;  %v1014_v16 = vld [vmem:[#allocation18 + $0x90] sm:$0xff]  ;;  %v9651_v61 = vpack.c.bf16 %v1025_v44, %v1021_v43 }
 0x1ce   :  { %6909 = vmatpush1.bf16.msra.mxu1 %v9510_v9  ;;  %6941 = vmatpush1.bf16.msra.mxu0 %v9512_v10  ;;  %v9581_v20 = vpack.c.bf16 %v745_v5, %v741_v3  ;;  %v374_v47 = vmax.f32 %v364_v23, 0.0  ;;  %v9607_v53 = vpack.c.bf16 %v1001_v28, %v997_v35  ;;  %v9617_v3 = vpack.c.bf16 %v1002_v49, %v998_v48  ;;  %v1008_v5 = vld [vmem:[#allocation18 + $0x60] sm:$0xff]  ;;  %v1018_v38 = vld [vmem:[#allocation18 + $0xb0] sm:$0xff]  ;;  %v1027_v48 = vld [vmem:[#allocation18 + $0xf8] sm:$0xff] }
 0x1cf   :  { %512 = vmatprep.mubr.f32.mxu1 %v11333_v26  ;;  %625 = vmatprep.mubr.f32.mxu0 %v11333_v26  ;;  %v373_v13 = vmax.f32 %v359_v59, 0.0  ;;  %v1009_v59 = vld [vmem:[#allocation18 + $0x68] sm:$0xff]  ;;  %v9637_v35 = vpack.c.bf16 %v1017_v15, %v1013_v14  ;;  %v1031_v15 = vld [vmem:[#allocation18 + $0x118] sm:$0xff]  ;;  %v1032_v43 = vld [vmem:[#allocation18 + $0x120] sm:$0xff] }
 0x1d0   :  { %6911 = vmatprep.subr.bf16.mxu1 %v9521_v17  ;;  %6943 = vmatprep.subr.bf16.mxu0 %v9523_v18  ;;  %v9621_v6 = vpack.c.bf16 %v1009_v59, %v1005_v52  ;;  %v9647_v52 = vpack.c.bf16 %v1018_v38, %v1014_v16  ;;  %v1020_v59 = vld [vmem:[#allocation18 + $0xc0] sm:$0xff]  ;;  %v1033_v14 = vld [vmem:[#allocation18 + $0x128] sm:$0xff]  ;;  %v1030_v44 = vld [vmem:[#allocation18 + $0x110] sm:$0xff] }
 0x1d1   :  { %6702 = vmatmul.mubr.msk.f32.gmra.mrb[6].mxu1 %vm405_vm2, %v370_v32  ;;  %6710 = vmatmul.mubr.msk.f32.gmra.mrb[14].mxu0 %vm405_vm2, %v370_v32  ;;  %v755_v32 = vld [vmem:[#allocation14 + $0x1f0] sm:$0xff] }
 0x1d2   :  { %6913 = vmatpush1.bf16.msra.mxu1 %v9530_v29  ;;  %6945 = vmatpush1.bf16.msra.mxu0 %v9532_v30  ;;  %v9601_v42 = vpack.c.bf16 %v755_v32, %v751_v31  ;;  %v1012_v31 = vld [vmem:[#allocation18 + $0x80] sm:$0xff] }
 0x1d3   :  { %518 = vmatprep.mubr.f32.mxu1 %v11333_v26  ;;  %631 = vmatprep.mubr.f32.mxu0 %v11333_v26  ;;  %v1016_v32 = vld [vmem:[#allocation18 + $0xa0] sm:$0xff] }
 0x1d4   :  { %6915 = vmatprep.subr.bf16.mxu1 %v9538_v36  ;;  %6947 = vmatprep.subr.bf16.mxu0 %v9540_v37  ;;  %v9645_v49 = vpack.c.bf16 %v1016_v32, %v1012_v31  ;;  %v1028_v32 = vld [vmem:[#allocation18 + $0x100] sm:$0xff] }
 0x1d5   :  { %6703 = vmatmul.mubr.msk.f32.gmra.mrb[8].mxu1 %vm405_vm2, %v371_v39  ;;  %6711 = vmatmul.mubr.msk.f32.gmra.mrb[16].mxu0 %vm405_vm2, %v371_v39  ;;  %v9599_v39 = vpack.c.bf16 %v753_v25, %v749_v22  ;;  %v1019_v22 = vld [vmem:[#allocation18 + $0xb8] sm:$0xff] }
 0x1d6   :  { %6917 = vmatpush1.bf16.msra.mxu1 %v9546_v45  ;;  %6949 = vmatpush1.bf16.msra.mxu0 %v9548_v46  ;;  %v9639_v28 = vpack.c.bf16 %v1019_v22, %v1015_v19  ;;  %v1035_v19 = vld [vmem:[#allocation18 + $0x138] sm:$0xff]  ;;  %v9657_v22 = vpack.c.bf16 %v1024_v60, %v1020_v59  ;;  %v1037_v60 = vld [vmem:[#allocation18 + $0x148] sm:$0xff] }
 0x1d7   :  { %524 = vmatprep.mubr.f32.mxu1 %v11333_v26  ;;  %637 = vmatprep.mubr.f32.mxu0 %v11333_v26  ;;  %v9665_v38 = vpack.c.bf16 %v1035_v19, %v1031_v15  ;;  %v1036_v15 = vld [vmem:[#allocation18 + $0x140] sm:$0xff] }
 0x1d8   :  { %6919 = vmatprep.subr.bf16.mxu1 %v9556_v54  ;;  %6951 = vmatprep.subr.bf16.mxu0 %v9558_v55  ;;  %11562 = vst [vmem:[#allocation36_spill] sm:$0xff] %v9657_v22  ;;  %v1040_v19 = vld [vmem:[#allocation18 + $0x160] sm:$0xff] }
 0x1d9   :  { %6704 = vmatmul.mubr.msk.f32.gmra.mrb[10].mxu1 %vm405_vm2, %v372_v4  ;;  %6712 = vmatmul.mubr.msk.f32.gmra.mrb[18].mxu0 %vm405_vm2, %v372_v4  ;;  %v1004_v4 = vld [vmem:[#allocation18 + $0x40] sm:$0xff]  ;;  %11565 = vst [vmem:[#allocation39_spill] sm:$0xff] %v9665_v38 }
 0x1da   :  { %6921 = vmatpush1.bf16.msra.mxu1 %v9565_v63  ;;  %6953 = vmatpush1.bf16.msra.mxu0 %v9567_v0  ;;  %v9631_v23 = vpack.c.bf16 %v1008_v5, %v1004_v4  ;;  %v1022_v5 = vld [vmem:[#allocation18 + $0xd0] sm:$0xff] }
 0x1db   :  { %530 = vmatprep.mubr.f32.mxu1 %v11333_v26  ;;  %643 = vmatprep.mubr.f32.mxu0 %v11333_v26 }
 0x1dc   :  { %6923 = vmatprep.subr.bf16.mxu1 %v9573_v8  ;;  %6955 = vmatprep.subr.bf16.mxu0 %v9575_v11 }
 0x1dd   :  { %6705 = vmatmul.mubr.msk.f32.gmra.mrb[12].mxu1 %vm405_vm2, %v373_v13  ;;  %6713 = vmatmul.mubr.msk.f32.gmra.mrb[20].mxu0 %vm405_vm2, %v373_v13  ;;  %v1010_v13 = vld [vmem:[#allocation18 + $0x70] sm:$0xff] }
 0x1de   :  { %6925 = vmatpush1.bf16.msra.mxu1 %v9581_v20  ;;  %6957 = vmatpush1.bf16.msra.mxu0 %v9583_v21  ;;  %v9633_v25 = vpack.c.bf16 %v1010_v13, %v1006_v12  ;;  %v1026_v12 = vld [vmem:[#allocation18 + $0xf0] sm:$0xff]  ;;  %v1029_v13 = vld [vmem:[#allocation18 + $0x108] sm:$0xff] }
 0x1df   :  { %536 = vmatprep.mubr.f32.mxu1 %v11333_v26  ;;  %649 = vmatprep.mubr.f32.mxu0 %v11333_v26  ;;  %v9659_v31 = vpack.c.bf16 %v1026_v12, %v1022_v5  ;;  %v9663_v16 = vpack.c.bf16 %v1033_v14, %v1029_v13  ;;  %v1041_v5 = vld [vmem:[#allocation18 + $0x168] sm:$0xff]  ;;  %v1039_v12 = vld [vmem:[#allocation18 + $0x158] sm:$0xff] }
 0x1e0   :  { %6927 = vmatprep.subr.bf16.mxu1 %v9591_v33  ;;  %6959 = vmatprep.subr.bf16.mxu0 %v9593_v34  ;;  %v9677_v13 = vpack.c.bf16 %v1041_v5, %v1037_v60  ;;  %v1043_v14 = vld [vmem:[#allocation18 + $0x178] sm:$0xff]  ;;  %v1049_v60 = vld [vmem:[#allocation18 + $0x1a8] sm:$0xff] }
 0x1e1   :  { %6706 = vmatmul.mubr.msk.f32.gmra.mrb[14].mxu1 %vm405_vm2, %v374_v47  ;;  %6714 = vmatmul.mubr.msk.f32.gmra.mrb[22].mxu0 %vm405_vm2, %v374_v47  ;;  %v1023_v47 = vld [vmem:[#allocation18 + $0xd8] sm:$0xff]  ;;  %11563 = vst [vmem:[#allocation37_spill] sm:$0xff] %v9659_v31  ;;  %11564 = vst [vmem:[#allocation38_spill] sm:$0xff] %v9663_v16 }
 0x1e2   :  { %6929 = vmatpush1.bf16.msra.mxu1 %v9599_v39  ;;  %6961 = vmatpush1.bf16.msra.mxu0 %v9601_v42  ;;  %v9653_v4 = vpack.c.bf16 %v1027_v48, %v1023_v47  ;;  %v1034_v47 = vld [vmem:[#allocation18 + $0x130] sm:$0xff]  ;;  %v9669_v48 = vpack.c.bf16 %v1032_v43, %v1028_v32  ;;  %11568 = vst [vmem:[#allocation42_spill] sm:$0xff] %v9677_v13  ;;  %v1047_v5 = vld [vmem:[#allocation18 + $0x198] sm:$0xff] }
 0x1e3   :  { %821 = vmatprep.mubr.f32.mxu1 %v11333_v26  ;;  %892 = vmatprep.mubr.f32.mxu0 %v11333_v26  ;;  %v9671_v59 = vpack.c.bf16 %v1034_v47, %v1030_v44  ;;  %v9679_v32 = vpack.c.bf16 %v1043_v14, %v1039_v12  ;;  %v9681_v43 = vpack.c.bf16 %v1040_v19, %v1036_v15  ;;  %v1038_v44 = vld [vmem:[#allocation18 + $0x150] sm:$0xff]  ;;  %v1051_v12 = vld [vmem:[#allocation18 + $0x1b8] sm:$0xff]  ;;  %v1044_v14 = vld [vmem:[#allocation18 + $0x180] sm:$0xff] }
 0x1e4   :  { %6963 = vmatprep.subr.bf16.mxu1 %v9607_v53  ;;  %6995 = vmatprep.subr.bf16.mxu0 %v9609_v56  ;;  %11566 = vst [vmem:[#allocation40_spill] sm:$0xff] %v9669_v48  ;;  %v1042_v47 = vld [vmem:[#allocation18 + $0x170] sm:$0xff]  ;;  %v1048_v15 = vld [vmem:[#allocation18 + $0x1a0] sm:$0xff]  ;;  %v9691_v19 = vpack.c.bf16 %v1051_v12, %v1047_v5  ;;  %v1059_v5 = vld [vmem:[#allocation18 + $0x1f8] sm:$0xff] }
 0x1e5   :  { %822 = vmatmul.mubr.f32.vlgmr.msra.gmra.mrb[0].mxu1 %v11333_v26  ;;  %893 = vmatmul.mubr.f32.vlgmr.msra.gmra.mrb[8].mxu0 %v11333_v26  ;;  %11567 = vst [vmem:[#allocation41_spill] sm:$0xff] %v9671_v59  ;;  %11569 = vst [vmem:[#allocation43_spill] sm:$0xff] %v9679_v32  ;;  %v1052_v12 = vld [vmem:[#allocation18 + $0x1c0] sm:$0xff] }
 0x1e6   :  { %6965 = vmatpush1.bf16.msra.mxu1 %v9615_v62  ;;  %6997 = vmatpush1.bf16.msra.mxu0 %v9617_v3  ;;  %11570 = vst [vmem:[#allocation44_spill] sm:$0xff] %v9681_v43  ;;  %11573 = vst [vmem:[#allocation47_spill] sm:$0xff] %v9691_v19 }
 0x1e7   :  { %6967 = vmatprep.subr.bf16.mxu1 %v9621_v6  ;;  %6999 = vmatprep.subr.bf16.mxu0 %v9623_v7 }
 0x1e8   :  { %1124 = vmatprep.mubr.f32.mxu1 %v11333_v26  ;;  %1195 = vmatprep.mubr.f32.mxu0 %v11333_v26  ;;  %v9684_v26 = vpack.c.bf16 %v1042_v47, %v1038_v44  ;;  %v1046_v44 = vld [vmem:[#allocation18 + $0x190] sm:$0xff] }
 0x1e9   :  { %v1050_v47 = vld [vmem:[#allocation18 + $0x1b0] sm:$0xff] }
 0x1ea   :  { %6969 = vmatpush1.bf16.msra.mxu1 %v9631_v23  ;;  %7001 = vmatpush1.bf16.msra.mxu0 %v9633_v25  ;;  %11571 = vst [vmem:[#allocation45_spill] sm:$0xff] %v9684_v26 }
 0x1eb   :  { %6971 = vmatprep.subr.bf16.mxu1 %v9637_v35  ;;  %7003 = vmatprep.subr.bf16.mxu0 %v9639_v28 }
 0x1ee   :  { %6973 = vmatpush1.bf16.msra.mxu1 %v9645_v49  ;;  %7005 = vmatpush1.bf16.msra.mxu0 %v9647_v52 }
 0x1ef   :  { %6975 = vmatprep.subr.bf16.mxu1 %v9651_v61  ;;  %7007 = vmatprep.subr.bf16.mxu0 %v9653_v4 }
 0x1f2   :  { %6977 = vmatpush1.bf16.msra.mxu1 %v9657_v22  ;;  %7009 = vmatpush1.bf16.msra.mxu0 %v9659_v31  ;;  %v983_v31 = vld [vmem:[#allocation17 + $0x1a8] sm:$0xff]  ;;  %v985_v22 = vld [vmem:[#allocation17 + $0x1b8] sm:$0xff] }
 0x1f3   :  { %6979 = vmatprep.subr.bf16.mxu1 %v9663_v16  ;;  %7011 = vmatprep.subr.bf16.mxu0 %v9665_v38  ;;  %v9693_v38 = vpack.c.bf16 %v1048_v15, %v1044_v14  ;;  %v1056_v14 = vld [vmem:[#allocation18 + $0x1e0] sm:$0xff] }
 0x1f5   :  { %11574 = vst [vmem:[#allocation48_spill] sm:$0xff] %v9693_v38 }
 0x1f6   :  { %6981 = vmatpush1.bf16.msra.mxu1 %v9669_v48  ;;  %7013 = vmatpush1.bf16.msra.mxu0 %v9671_v59  ;;  %v1045_v59 = vld [vmem:[#allocation18 + $0x188] sm:$0xff] }
 0x1f7   :  { %6983 = vmatprep.subr.bf16.mxu1 %v9677_v13  ;;  %7015 = vmatprep.subr.bf16.mxu0 %v9679_v32  ;;  %v9689_v48 = vpack.c.bf16 %v1049_v60, %v1045_v59  ;;  %v9696_v32 = vpack.c.bf16 %v1050_v47, %v1046_v44  ;;  %v1057_v59 = vld [vmem:[#allocation18 + $0x1e8] sm:$0xff]  ;;  %v1055_v60 = vld [vmem:[#allocation18 + $0x1d8] sm:$0xff]  ;;  %v9705_v13 = vpack.c.bf16 %v1056_v14, %v1052_v12  ;;  %v1054_v44 = vld [vmem:[#allocation18 + $0x1d0] sm:$0xff] }
 0x1f8   :  { %v9703_v15 = vpack.c.bf16 %v1059_v5, %v1055_v60  ;;  %v1058_v47 = vld [vmem:[#allocation18 + $0x1f0] sm:$0xff]  ;;  %v937_v60 = vld [vmem:[#allocation17 + $0x38] sm:$0xff]  ;;  %v930_v5 = vld [vmem:[#allocation17] sm:$0xff] }
 0x1f9   :  { %11572 = vst [vmem:[#allocation46_spill] sm:$0xff] %v9689_v48  ;;  %11575 = vst [vmem:[#allocation49_spill] sm:$0xff] %v9696_v32  ;;  %v934_v12 = vld [vmem:[#allocation17 + $0x20] sm:$0xff] }
 0x1fa   :  { %6985 = vmatpush1.bf16.msra.mxu1 %v9681_v43  ;;  %7017 = vmatpush1.bf16.msra.mxu0 %v9684_v26  ;;  %v1053_v26 = vld [vmem:[#allocation18 + $0x1c8] sm:$0xff]  ;;  %11577 = vst [vmem:[#allocation51_spill] sm:$0xff] %v9703_v15  ;;  %11578 = vst [vmem:[#allocation52_spill] sm:$0xff] %v9705_v13 }
 0x1fb   :  { %6987 = vmatprep.subr.bf16.mxu1 %v9689_v48  ;;  %7019 = vmatprep.subr.bf16.mxu0 %v9691_v19  ;;  %v9701_v43 = vpack.c.bf16 %v1057_v59, %v1053_v26  ;;  %v9708_v19 = vpack.c.bf16 %v1058_v47, %v1054_v44  ;;  %v935_v26 = vld [vmem:[#allocation17 + $0x28] sm:$0xff]  ;;  %v933_v59 = vld [vmem:[#allocation17 + $0x18] sm:$0xff]  ;;  %v9717_v48 = vpack.c.bf16 %v934_v12, %v930_v5  ;;  %v932_v44 = vld [vmem:[#allocation17 + $0x10] sm:$0xff] }
 0x1fc   :  { %v9715_v14 = vpack.c.bf16 %v937_v60, %v933_v59  ;;  %v936_v47 = vld [vmem:[#allocation17 + $0x30] sm:$0xff]  ;;  %v945_v60 = vld [vmem:[#allocation17 + $0x78] sm:$0xff]  ;;  %v938_v5 = vld [vmem:[#allocation17 + $0x40] sm:$0xff] }
 0x1fd   :  { %11576 = vst [vmem:[#allocation50_spill] sm:$0xff] %v9701_v43  ;;  %11579 = vst [vmem:[#allocation53_spill] sm:$0xff] %v9708_v19  ;;  %v942_v12 = vld [vmem:[#allocation17 + $0x60] sm:$0xff] }
 0x1fe   :  { %6989 = vmatpush1.bf16.msra.mxu1 %v9693_v38  ;;  %7021 = vmatpush1.bf16.msra.mxu0 %v9696_v32  ;;  %v931_v32 = vld [vmem:[#allocation17 + $0x8] sm:$0xff]  ;;  %11581 = vst [vmem:[#allocation55_spill] sm:$0xff] %v9715_v14  ;;  %11582 = vst [vmem:[#allocation56_spill] sm:$0xff] %v9717_v48 }
 0x1ff   :  { %6991 = vmatprep.subr.bf16.mxu1 %v9701_v43  ;;  %7023 = vmatprep.subr.bf16.mxu0 %v9703_v15  ;;  %v9713_v38 = vpack.c.bf16 %v935_v26, %v931_v32  ;;  %v11583_v15 = vmov 0.0   ;;  %v939_v32 = vld [vmem:[#allocation17 + $0x48] sm:$0xff] }
 0x200   :  { %v943_v26 = vld [vmem:[#allocation17 + $0x68] sm:$0xff] }
 0x201   :  { %11580 = vst [vmem:[#allocation54_spill] sm:$0xff] %v9713_v38  ;;  %v9727_v59 = vpack.c.bf16 %v943_v26, %v939_v32  ;;  %v947_v32 = vld [vmem:[#allocation17 + $0x88] sm:$0xff] }
 0x202   :  { %6993 = vmatpush1.bf16.msra.mxu1 %v9705_v13  ;;  %7025 = vmatpush1.bf16.msra.mxu0 %v9708_v19  ;;  %v9721_v13 = vpack.c.bf16 %v936_v47, %v932_v44  ;;  %v941_v19 = vld [vmem:[#allocation17 + $0x58] sm:$0xff]  ;;  %v9731_v44 = vpack.c.bf16 %v942_v12, %v938_v5  ;;  %v940_v47 = vld [vmem:[#allocation17 + $0x50] sm:$0xff]  ;;  %v951_v26 = vld [vmem:[#allocation17 + $0xa8] sm:$0xff] }
 0x203   :  { %7027 = vmatprep.subr.bf16.mxu1 %v9713_v38  ;;  %7059 = vmatprep.subr.bf16.mxu0 %v9715_v14  ;;  %11585 = vst [vmem:[#allocation58_spill] sm:$0xff] %v9727_v59  ;;  %v9729_v38 = vpack.c.bf16 %v945_v60, %v941_v19  ;;  %v944_v14 = vld [vmem:[#allocation17 + $0x70] sm:$0xff]  ;;  %v9741_v19 = vpack.c.bf16 %v951_v26, %v947_v32  ;;  %v953_v60 = vld [vmem:[#allocation17 + $0xb8] sm:$0xff]  ;;  %v946_v5 = vld [vmem:[#allocation17 + $0x80] sm:$0xff] }
 0x204   :  { %11584 = vst [vmem:[#allocation57_spill] sm:$0xff] %v9721_v13  ;;  %11587 = vst [vmem:[#allocation60_spill] sm:$0xff] %v9731_v44  ;;  %v950_v12 = vld [vmem:[#allocation17 + $0xa0] sm:$0xff] }
 0x205   :  { %1125 = vmatmul.mubr.f32.vlgmr.msra.gmra.mrb[16].mxu1 %v11583_v15  ;;  %1196 = vmatmul.mubr.f32.vlgmr.msra.gmra.mrb[24].mxu0 %v11583_v15  ;;  %11586 = vst [vmem:[#allocation59_spill] sm:$0xff] %v9729_v38  ;;  %11589 = vst [vmem:[#allocation62_spill] sm:$0xff] %v9741_v19  ;;  %v9745_v16 = vpack.c.bf16 %v950_v12, %v946_v5  ;;  %v954_v26 = vld [vmem:[#allocation17 + $0xc0] sm:$0xff] }
 0x206   :  { %7029 = vmatpush1.bf16.msra.mxu1 %v9717_v48  ;;  %7061 = vmatpush1.bf16.msra.mxu0 %v9721_v13  ;;  %v9736_v48 = vpack.c.bf16 %v944_v14, %v940_v47  ;;  %v949_v13 = vld [vmem:[#allocation17 + $0x98] sm:$0xff]  ;;  %v948_v14 = vld [vmem:[#allocation17 + $0x90] sm:$0xff] }
 0x207   :  { %1266 = vmatprep.mubr.f32.mxu1 %v11583_v15  ;;  %1337 = vmatprep.mubr.f32.mxu0 %v11583_v15  ;;  %v9743_v43 = vpack.c.bf16 %v953_v60, %v949_v13  ;;  %11591 = vst [vmem:[#allocation64_spill] sm:$0xff] %v9745_v16  ;;  %v952_v47 = vld [vmem:[#allocation17 + $0xb0] sm:$0xff]  ;;  %v961_v13 = vld [vmem:[#allocation17 + $0xf8] sm:$0xff]  ;;  %v958_v60 = vld [vmem:[#allocation17 + $0xe0] sm:$0xff] }
 0x208   :  { %7031 = vmatprep.subr.bf16.mxu1 %v9727_v59  ;;  %11588 = vst [vmem:[#allocation61_spill] sm:$0xff] %v9736_v48  ;;  %7063 = vmatprep.subr.bf16.mxu0 %v9729_v38  ;;  %v9748_v38 = vpack.c.bf16 %v952_v47, %v948_v14  ;;  %v959_v59 = vld [vmem:[#allocation17 + $0xe8] sm:$0xff]  ;;  %v9757_v12 = vpack.c.bf16 %v958_v60, %v954_v26  ;;  %v956_v14 = vld [vmem:[#allocation17 + $0xd0] sm:$0xff] }
 0x209   :  { %11590 = vst [vmem:[#allocation63_spill] sm:$0xff] %v9743_v43  ;;  %v960_v47 = vld [vmem:[#allocation17 + $0xf0] sm:$0xff] }
 0x20a   :  { %7033 = vmatpush1.bf16.msra.mxu1 %v9731_v44  ;;  %7065 = vmatpush1.bf16.msra.mxu0 %v9736_v48  ;;  %11592 = vst [vmem:[#allocation65_spill] sm:$0xff] %v9748_v38  ;;  %v955_v44 = vld [vmem:[#allocation17 + $0xc8] sm:$0xff]  ;;  %v957_v48 = vld [vmem:[#allocation17 + $0xd8] sm:$0xff]  ;;  %11595 = vst [vmem:[#allocation68_spill] sm:$0xff] %v9757_v12 }
 0x20b   :  { %7035 = vmatprep.subr.bf16.mxu1 %v9741_v19  ;;  %7067 = vmatprep.subr.bf16.mxu0 %v9743_v43  ;;  %v9753_v32 = vpack.c.bf16 %v959_v59, %v955_v44  ;;  %v9755_v5 = vpack.c.bf16 %v961_v13, %v957_v48  ;;  %v9760_v43 = vpack.c.bf16 %v960_v47, %v956_v14  ;;  %v967_v19 = vld [vmem:[#allocation17 + $0x128] sm:$0xff]  ;;  %v969_v48 = vld [vmem:[#allocation17 + $0x138] sm:$0xff]  ;;  %v962_v44 = vld [vmem:[#allocation17 + $0x100] sm:$0xff] }
 0x20c   :  { %v966_v13 = vld [vmem:[#allocation17 + $0x120] sm:$0xff]  ;;  %v964_v14 = vld [vmem:[#allocation17 + $0x110] sm:$0xff] }
 0x20d   :  { %11593 = vst [vmem:[#allocation66_spill] sm:$0xff] %v9753_v32  ;;  %11594 = vst [vmem:[#allocation67_spill] sm:$0xff] %v9755_v5  ;;  %v9769_v60 = vpack.c.bf16 %v966_v13, %v962_v44  ;;  %v968_v47 = vld [vmem:[#allocation17 + $0x130] sm:$0xff] }
 0x20e   :  { %7037 = vmatpush1.bf16.msra.mxu1 %v9745_v16  ;;  %7069 = vmatpush1.bf16.msra.mxu0 %v9748_v38  ;;  %11596 = vst [vmem:[#allocation69_spill] sm:$0xff] %v9760_v43  ;;  %v963_v16 = vld [vmem:[#allocation17 + $0x108] sm:$0xff]  ;;  %v965_v38 = vld [vmem:[#allocation17 + $0x118] sm:$0xff] }
 0x20f   :  { %7039 = vmatprep.subr.bf16.mxu1 %v9753_v32  ;;  %7071 = vmatprep.subr.bf16.mxu0 %v9755_v5  ;;  %v9765_v59 = vpack.c.bf16 %v967_v19, %v963_v16  ;;  %v9767_v26 = vpack.c.bf16 %v969_v48, %v965_v38  ;;  %11599 = vst [vmem:[#allocation72_spill] sm:$0xff] %v9769_v60  ;;  %v975_v32 = vld [vmem:[#allocation17 + $0x168] sm:$0xff]  ;;  %v977_v38 = vld [vmem:[#allocation17 + $0x178] sm:$0xff]  ;;  %v970_v19 = vld [vmem:[#allocation17 + $0x140] sm:$0xff] }
 0x210   :  { %v9772_v5 = vpack.c.bf16 %v968_v47, %v964_v14  ;;  %v974_v48 = vld [vmem:[#allocation17 + $0x160] sm:$0xff]  ;;  %v972_v14 = vld [vmem:[#allocation17 + $0x150] sm:$0xff] }
 0x211   :  { %11597 = vst [vmem:[#allocation70_spill] sm:$0xff] %v9765_v59  ;;  %11598 = vst [vmem:[#allocation71_spill] sm:$0xff] %v9767_v26  ;;  %v9781_v13 = vpack.c.bf16 %v974_v48, %v970_v19  ;;  %v976_v47 = vld [vmem:[#allocation17 + $0x170] sm:$0xff] }
 0x212   :  { %7041 = vmatpush1.bf16.msra.mxu1 %v9757_v12  ;;  %7073 = vmatpush1.bf16.msra.mxu0 %v9760_v43  ;;  %11600 = vst [vmem:[#allocation73_spill] sm:$0xff] %v9772_v5  ;;  %v971_v12 = vld [vmem:[#allocation17 + $0x148] sm:$0xff]  ;;  %v973_v43 = vld [vmem:[#allocation17 + $0x158] sm:$0xff]  ;;  %v980_v19 = vld [vmem:[#allocation17 + $0x190] sm:$0xff] }
 0x213   :  { %7043 = vmatprep.subr.bf16.mxu1 %v9765_v59  ;;  %7075 = vmatprep.subr.bf16.mxu0 %v9767_v26  ;;  %v9777_v16 = vpack.c.bf16 %v975_v32, %v971_v12  ;;  %v9779_v44 = vpack.c.bf16 %v977_v38, %v973_v43  ;;  %11603 = vst [vmem:[#allocation76_spill] sm:$0xff] %v9781_v13  ;;  %v979_v59 = vld [vmem:[#allocation17 + $0x188] sm:$0xff]  ;;  %v978_v43 = vld [vmem:[#allocation17 + $0x180] sm:$0xff] }
 0x214   :  { %v9784_v26 = vpack.c.bf16 %v976_v47, %v972_v14  ;;  %v9787_v32 = vpack.c.bf16 %v983_v31, %v979_v59  ;;  %v982_v38 = vld [vmem:[#allocation17 + $0x1a0] sm:$0xff]  ;;  %v984_v14 = vld [vmem:[#allocation17 + $0x1b0] sm:$0xff]  ;;  %v987_v47 = vld [vmem:[#allocation17 + $0x1c8] sm:$0xff] }
 0x215   :  { %11601 = vst [vmem:[#allocation74_spill] sm:$0xff] %v9777_v16  ;;  %11602 = vst [vmem:[#allocation75_spill] sm:$0xff] %v9779_v44  ;;  %v9793_v48 = vpack.c.bf16 %v982_v38, %v978_v43  ;;  %v9797_v31 = vpack.c.bf16 %v984_v14, %v980_v19  ;;  %v989_v59 = vld [vmem:[#allocation17 + $0x1d8] sm:$0xff]  ;;  %v992_v43 = vld [vmem:[#allocation17 + $0x1f0] sm:$0xff] }
 0x216   :  { %7045 = vmatpush1.bf16.msra.mxu1 %v9769_v60  ;;  %7077 = vmatpush1.bf16.msra.mxu0 %v9772_v5  ;;  %11604 = vst [vmem:[#allocation77_spill] sm:$0xff] %v9784_v26  ;;  %v981_v60 = vld [vmem:[#allocation17 + $0x198] sm:$0xff]  ;;  %11605 = vst [vmem:[#allocation78_spill] sm:$0xff] %v9787_v32 }
 0x217   :  { %7047 = vmatprep.subr.bf16.mxu1 %v9777_v16  ;;  %7079 = vmatprep.subr.bf16.mxu0 %v9779_v44  ;;  %v9789_v12 = vpack.c.bf16 %v985_v22, %v981_v60  ;;  %11607 = vst [vmem:[#allocation80_spill] sm:$0xff] %v9793_v48  ;;  %v991_v16 = vld [vmem:[#allocation17 + $0x1e8] sm:$0xff]  ;;  %11608 = vst [vmem:[#allocation81_spill] sm:$0xff] %v9797_v31  ;;  %v993_v60 = vld [vmem:[#allocation17 + $0x1f8] sm:$0xff] }
 0x218   :  { %v9799_v22 = vpack.c.bf16 %v991_v16, %v987_v47  ;;  %v986_v44 = vld [vmem:[#allocation17 + $0x1c0] sm:$0xff]  ;;  %v9801_v5 = vpack.c.bf16 %v993_v60, %v989_v59  ;;  %v385_v16 = vlaneseq }
 0x219   :  { %11606 = vst [vmem:[#allocation79_spill] sm:$0xff] %v9789_v12 }
 0x21a   :  { %7049 = vmatpush1.bf16.msra.mxu1 %v9781_v13  ;;  %7081 = vmatpush1.bf16.msra.mxu0 %v9784_v26  ;;  %11609 = vst [vmem:[#allocation82_spill] sm:$0xff] %v9799_v22  ;;  %11610 = vst [vmem:[#allocation83_spill] sm:$0xff] %v9801_v5  ;;  %v990_v13 = vld [vmem:[#allocation17 + $0x1e0] sm:$0xff]  ;;  %v988_v26 = vld [vmem:[#allocation17 + $0x1d0] sm:$0xff]  ;;  %v386_v19 = vshrl.u32 %v385_v16, 7 }
 0x21b   :  { %7051 = vmatprep.subr.bf16.mxu1 %v9787_v32  ;;  %7083 = vmatprep.subr.bf16.mxu0 %v9789_v12  ;;  %v9805_v38 = vpack.c.bf16 %v990_v13, %v986_v44  ;;  %v9807_v32 = vpack.c.bf16 %v992_v43, %v988_v26  ;;  %v383_v44 = vld [vmem:[#allocation15] sm:$0xf] }
 0x21c   :  { %v9815_v14 = vsub.s32 0, %v386_v19  ;;  %v9817_v13 = vsub.s32 1, %v386_v19  ;;  %v9825_v43 = vsub.s32 3, %v386_v19 }
 0x21d   :  { %11611 = vst [vmem:[#allocation84_spill] sm:$0xff] %v9805_v38  ;;  %11612 = vst [vmem:[#allocation85_spill] sm:$0xff] %v9807_v32 }
 0x21e   :  { %7053 = vmatpush1.bf16.msra.mxu1 %v9793_v48  ;;  %7085 = vmatpush1.bf16.msra.mxu0 %v9797_v31  ;;  %11613 = vst [vmem:[#allocation86_spill] sm:$0xff] %v9815_v14  ;;  %11614 = vst [vmem:[#allocation87_spill] sm:$0xff] %v9817_v13  ;;  %v9820_v26 = vrot.slane %v383_v44, %v9815_v14  ;;  %v9823_v47 = vrot.slane %v383_v44, %v9817_v13  ;;  %v9832_v31 = vsub.s32 2, %v386_v19 }
 0x21f   :  { %7055 = vmatprep.subr.bf16.mxu1 %v9799_v22  ;;  %7087 = vmatprep.subr.bf16.mxu0 %v9801_v5  ;;  %11617 = vst [vmem:[#allocation90_spill] sm:$0xff] %v9825_v43  ;;  %v9830_v22 = vrot.slane %v383_v44, %v9825_v43 }
 0x220   :  { %11615 = vst [vmem:[#allocation88_spill] sm:$0xff] %v9820_v26  ;;  %11616 = vst [vmem:[#allocation89_spill] sm:$0xff] %v9823_v47  ;;  %v9836_v12 = vrot.slane %v383_v44, %v9832_v31 }
 0x221   :  { %11618 = vst [vmem:[#allocation91_spill] sm:$0xff] %v9830_v22  ;;  %11619 = vst [vmem:[#allocation92_spill] sm:$0xff] %v9832_v31 }
 0x222   :  { %7057 = vmatpush1.bf16.msra.mxu1 %v9805_v38  ;;  %7089 = vmatpush1.bf16.msra.mxu0 %v9807_v32 }
 0x223   :  { %7091 = vmatprep.subr.bf16.mxu1 %v9467_v24  ;;  %7123 = vmatprep.subr.bf16.mxu0 %v9470_v27 }
 0x2b8   :  { %v823_v59 = vpop.f32.mrb[0].mxu1  ;;  %v894_v60 = vpop.f32.mrb[8].mxu0 }
 0x2b9   :  { %v8470_v24 = vadd.f32 %v823_v59, %v9820_v26  ;;  %v825_v27 = vpop.f32.mrb[1].mxu1  ;;  %v896_v32 = vpop.f32.mrb[9].mxu0  ;;  %v8486_v59 = vadd.f32 %v894_v60, %v9836_v12 }
 0x2ba   :  { %v8471_v16 = vadd.f32 %v825_v27, %v9823_v47  ;;  %v8487_v48 = vadd.f32 %v896_v32, %v9830_v22 }
 0x2bb   :  { %v6715_v38 = vmul.f32 -1.442695, %v8470_v24 }
 0x2bc   :  { %v6716_v5 = vmul.f32 -1.442695, %v8471_v16  ;;  %v6717_v13 = vmul.f32 -1.442695, %v8487_v48 }
 0x2bd   :  { %8585 = vpow2.f32 %v6715_v38 }
 0x2be   :  { %8587 = vpow2.f32 %v6716_v5 }
 0x2bf   :  { %8589 = vpow2.f32 %v6717_v13 }
 0x2c0   :  { %8591 = vtanh.f32 %v8486_v59 }
 0x2c7   :  { %v8586_v26 = vpop.eup %8585 }
 0x2c8   :  { %v8588_v14 = vpop.eup %8587  ;;  %v907_v27 = vadd.f32 1.0, %v8586_v26 }
 0x2c9   :  { %v913_v24 = vadd.f32 1.0, %v8588_v14  ;;  %v8590_v38 = vpop.eup %8589 }
 0x2ca   :  { %8593 = vrcp.f32 %v907_v27  ;;  %v8592_v19 = vpop.eup %8591  ;;  %v920_v32 = vadd.f32 1.0, %v8590_v38 }
 0x2cb   :  { %8595 = vrcp.f32 %v913_v24 }
 0x2cc   :  { %8597 = vrcp.f32 %v920_v32 }
 0x2d4   :  { %v8594_v16 = vpop.eup %8593 }
 0x2d5   :  { %v8596_v5 = vpop.eup %8595  ;;  %v924_v47 = vmul.f32 %v8594_v16, %v8592_v19  ;;  %v11642_v19 = vld [vmem:[#allocation88_spill] sm:$0xff] }
 0x2d6   :  { %v923_v22 = vmul.f32 0.0, %v8596_v5  ;;  %v8598_v48 = vpop.eup %8597 }
 0x2d8   :  { %v9839_v44 = vadd.f32 %v924_v47, %v923_v22 }
 0x2da   :  { %8599 = vtanh.f32 %v9839_v44 }
 0x2e4   :  { %v8600_v60 = vpop.eup %8599 }
 0x2e5   :  { %v927_v26 = vmul.f32 %v8600_v60, %v8598_v48  ;;  %v11643_v48 = vld [vmem:[#allocation89_spill] sm:$0xff] }
 0x2e7   :  { %1267 = vmatmul.mubr.f32.vlgmr.msra.gmra.mrb[16].mxu1 %v927_v26  ;;  %1338 = vmatmul.mubr.f32.vlgmr.msra.gmra.mrb[24].mxu0 %v927_v26 }
 0x2e8   :  { %7093 = vmatpush1.bf16.msra.mxu1 %v9478_v40  ;;  %7125 = vmatpush1.bf16.msra.mxu0 %v9480_v41  ;;  %v11620_v40 = vld [vmem:[#allocation36_spill] sm:$0xff]  ;;  %v11621_v41 = vld [vmem:[#allocation37_spill] sm:$0xff] }
 0x2e9   :  { %7095 = vmatprep.subr.bf16.mxu1 %v9483_v50  ;;  %7127 = vmatprep.subr.bf16.mxu0 %v9485_v51  ;;  %v11622_v50 = vld [vmem:[#allocation38_spill] sm:$0xff]  ;;  %v11623_v51 = vld [vmem:[#allocation39_spill] sm:$0xff] }
 0x2ea   :  { %1533 = vmatprep.mubr.f32.mxu1 %v11583_v15  ;;  %1604 = vmatprep.mubr.f32.mxu0 %v11583_v15 }
 0x2ec   :  { %7097 = vmatpush1.bf16.msra.mxu1 %v9492_v57  ;;  %7129 = vmatpush1.bf16.msra.mxu0 %v9494_v58  ;;  %v11624_v57 = vld [vmem:[#allocation40_spill] sm:$0xff]  ;;  %v11625_v58 = vld [vmem:[#allocation41_spill] sm:$0xff] }
 0x2ed   :  { %7099 = vmatprep.subr.bf16.mxu1 %v9502_v1  ;;  %7131 = vmatprep.subr.bf16.mxu0 %v9504_v2  ;;  %v11626_v1 = vld [vmem:[#allocation42_spill] sm:$0xff]  ;;  %v11627_v2 = vld [vmem:[#allocation43_spill] sm:$0xff] }
 0x2f0   :  { %7101 = vmatpush1.bf16.msra.mxu1 %v9510_v9  ;;  %7133 = vmatpush1.bf16.msra.mxu0 %v9512_v10  ;;  %v11628_v9 = vld [vmem:[#allocation44_spill] sm:$0xff]  ;;  %v11629_v10 = vld [vmem:[#allocation45_spill] sm:$0xff] }
 0x2f1   :  { %7103 = vmatprep.subr.bf16.mxu1 %v9521_v17  ;;  %7135 = vmatprep.subr.bf16.mxu0 %v9523_v18  ;;  %v11630_v17 = vld [vmem:[#allocation46_spill] sm:$0xff]  ;;  %v11631_v18 = vld [vmem:[#allocation47_spill] sm:$0xff] }
 0x2f4   :  { %7105 = vmatpush1.bf16.msra.mxu1 %v9530_v29  ;;  %7137 = vmatpush1.bf16.msra.mxu0 %v9532_v30  ;;  %v11632_v29 = vld [vmem:[#allocation48_spill] sm:$0xff]  ;;  %v11633_v30 = vld [vmem:[#allocation49_spill] sm:$0xff] }
 0x2f5   :  { %7107 = vmatprep.subr.bf16.mxu1 %v9538_v36  ;;  %7139 = vmatprep.subr.bf16.mxu0 %v9540_v37  ;;  %v11634_v36 = vld [vmem:[#allocation50_spill] sm:$0xff]  ;;  %v11635_v37 = vld [vmem:[#allocation51_spill] sm:$0xff] }
 0x2f8   :  { %7109 = vmatpush1.bf16.msra.mxu1 %v9546_v45  ;;  %7141 = vmatpush1.bf16.msra.mxu0 %v9548_v46  ;;  %v11636_v45 = vld [vmem:[#allocation52_spill] sm:$0xff]  ;;  %v11637_v46 = vld [vmem:[#allocation53_spill] sm:$0xff] }
 0x2f9   :  { %7111 = vmatprep.subr.bf16.mxu1 %v9556_v54  ;;  %7143 = vmatprep.subr.bf16.mxu0 %v9558_v55  ;;  %v11638_v54 = vld [vmem:[#allocation54_spill] sm:$0xff]  ;;  %v11639_v55 = vld [vmem:[#allocation55_spill] sm:$0xff] }
 0x2fc   :  { %7113 = vmatpush1.bf16.msra.mxu1 %v9565_v63  ;;  %7145 = vmatpush1.bf16.msra.mxu0 %v9567_v0  ;;  %v1344_v63 = vld [vmem:[#allocation20] sm:$0xf]  ;;  %v11640_v0 = vld [vmem:[#allocation86_spill] sm:$0xff] }
 0x2fd   :  { %7115 = vmatprep.subr.bf16.mxu1 %v9573_v8  ;;  %7147 = vmatprep.subr.bf16.mxu0 %v9575_v11  ;;  %v1349_v8 = vrot.slane %v1344_v63, %v11640_v0  ;;  %v11641_v11 = vld [vmem:[#allocation87_spill] sm:$0xff] }
 0x300   :  { %7117 = vmatpush1.bf16.msra.mxu1 %v9581_v20  ;;  %7149 = vmatpush1.bf16.msra.mxu0 %v9583_v21  ;;  %v1353_v20 = vrot.slane %v1344_v63, %v11641_v11 }
 0x301   :  { %7119 = vmatprep.subr.bf16.mxu1 %v9591_v33  ;;  %7151 = vmatprep.subr.bf16.mxu0 %v9593_v34 }
 0x304   :  { %7121 = vmatpush1.bf16.msra.mxu1 %v9599_v39  ;;  %7153 = vmatpush1.bf16.msra.mxu0 %v9601_v42 }
 0x305   :  { %7155 = vmatprep.subr.bf16.mxu1 %v9607_v53  ;;  %7187 = vmatprep.subr.bf16.mxu0 %v9609_v56 }
 0x307   :  { %1534 = vmatmul.mubr.f32.vlgmr.msra.gmra.mrb[2].mxu1 %v927_v26  ;;  %1605 = vmatmul.mubr.f32.vlgmr.msra.gmra.mrb[10].mxu0 %v927_v26 }
 0x308   :  { %7157 = vmatpush1.bf16.msra.mxu1 %v9615_v62  ;;  %7189 = vmatpush1.bf16.msra.mxu0 %v9617_v3  ;;  %v1361_v3 = vrot.slane %v1344_v63, %v9825_v43 }
 0x309   :  { %7159 = vmatprep.subr.bf16.mxu1 %v9621_v6  ;;  %7191 = vmatprep.subr.bf16.mxu0 %v9623_v7  ;;  %v1357_v7 = vrot.slane %v1344_v63, %v9832_v31  ;;  %v11654_v63 = vld [vmem:[#allocation64_spill] sm:$0xff] }
 0x30a   :  { %1835 = vmatprep.mubr.f32.mxu1 %v11583_v15  ;;  %1906 = vmatprep.mubr.f32.mxu0 %v11583_v15 }
 0x30c   :  { %7161 = vmatpush1.bf16.msra.mxu1 %v9631_v23  ;;  %7193 = vmatpush1.bf16.msra.mxu0 %v9633_v25 }
 0x30d   :  { %7163 = vmatprep.subr.bf16.mxu1 %v9637_v35  ;;  %7195 = vmatprep.subr.bf16.mxu0 %v9639_v28 }
 0x310   :  { %7165 = vmatpush1.bf16.msra.mxu1 %v9645_v49  ;;  %7197 = vmatpush1.bf16.msra.mxu0 %v9647_v52 }
 0x311   :  { %7167 = vmatprep.subr.bf16.mxu1 %v9651_v61  ;;  %7199 = vmatprep.subr.bf16.mxu0 %v9653_v4 }
 0x314   :  { %7169 = vmatpush1.bf16.msra.mxu1 %v11620_v40  ;;  %7201 = vmatpush1.bf16.msra.mxu0 %v11621_v41  ;;  %v11644_v41 = vld [vmem:[#allocation91_spill] sm:$0xff] }
 0x315   :  { %7171 = vmatprep.subr.bf16.mxu1 %v11622_v50  ;;  %7203 = vmatprep.subr.bf16.mxu0 %v11623_v51 }
 0x318   :  { %7173 = vmatpush1.bf16.msra.mxu1 %v11624_v57  ;;  %7205 = vmatpush1.bf16.msra.mxu0 %v11625_v58 }
 0x319   :  { %7175 = vmatprep.subr.bf16.mxu1 %v11626_v1  ;;  %7207 = vmatprep.subr.bf16.mxu0 %v11627_v2 }
 0x31c   :  { %7177 = vmatpush1.bf16.msra.mxu1 %v11628_v9  ;;  %7209 = vmatpush1.bf16.msra.mxu0 %v11629_v10 }
 0x31d   :  { %7179 = vmatprep.subr.bf16.mxu1 %v11630_v17  ;;  %7211 = vmatprep.subr.bf16.mxu0 %v11631_v18  ;;  %v11646_v18 = vld [vmem:[#allocation56_spill] sm:$0xff] }
 0x320   :  { %7181 = vmatpush1.bf16.msra.mxu1 %v11632_v29  ;;  %7213 = vmatpush1.bf16.msra.mxu0 %v11633_v30  ;;  %v11647_v29 = vld [vmem:[#allocation57_spill] sm:$0xff] }
 0x321   :  { %7183 = vmatprep.subr.bf16.mxu1 %v11634_v36  ;;  %7215 = vmatprep.subr.bf16.mxu0 %v11635_v37  ;;  %v11648_v36 = vld [vmem:[#allocation58_spill] sm:$0xff]  ;;  %v11649_v37 = vld [vmem:[#allocation59_spill] sm:$0xff] }
 0x324   :  { %7185 = vmatpush1.bf16.msra.mxu1 %v11636_v45  ;;  %7217 = vmatpush1.bf16.msra.mxu0 %v11637_v46  ;;  %v11650_v45 = vld [vmem:[#allocation60_spill] sm:$0xff]  ;;  %v11651_v46 = vld [vmem:[#allocation61_spill] sm:$0xff] }
 0x325   :  { %7219 = vmatprep.subr.bf16.mxu1 %v11638_v54  ;;  %7251 = vmatprep.subr.bf16.mxu0 %v11639_v55  ;;  %v11652_v54 = vld [vmem:[#allocation62_spill] sm:$0xff]  ;;  %v11653_v55 = vld [vmem:[#allocation63_spill] sm:$0xff] }
 0x3ba   :  { %v1268_v21 = vpop.f32.mrb[16].mxu1  ;;  %v1339_v33 = vpop.f32.mrb[24].mxu0 }
 0x3bb   :  { %v1366_v34 = vadd.f32 %v1349_v8, %v1268_v21  ;;  %v1270_v39 = vpop.f32.mrb[17].mxu1  ;;  %v1341_v42 = vpop.f32.mrb[25].mxu0  ;;  %v1368_v25 = vadd.f32 %v1357_v7, %v1339_v33  ;;  %v11655_v8 = vld [vmem:[#allocation65_spill] sm:$0xff]  ;;  %v11657_v21 = vld [vmem:[#allocation67_spill] sm:$0xff] }
 0x3bc   :  { %v1367_v53 = vadd.f32 %v1353_v20, %v1270_v39  ;;  %v1369_v6 = vadd.f32 %v1361_v3, %v1341_v42  ;;  %v11656_v20 = vld [vmem:[#allocation66_spill] sm:$0xff]  ;;  %v11658_v42 = vld [vmem:[#allocation68_spill] sm:$0xff]  ;;  %v11661_v7 = vld [vmem:[#allocation71_spill] sm:$0xff] }
 0x3bd   :  { %v6718_v56 = vmul.f32 -1.442695, %v1366_v34 }
 0x3be   :  { %v6719_v62 = vmul.f32 -1.442695, %v1367_v53  ;;  %v6720_v23 = vmul.f32 -1.442695, %v1369_v6  ;;  %v11659_v53 = vld [vmem:[#allocation69_spill] sm:$0xff]  ;;  %v11660_v6 = vld [vmem:[#allocation70_spill] sm:$0xff] }
 0x3bf   :  { %8601 = vpow2.f32 %v6718_v56 }
 0x3c0   :  { %8603 = vpow2.f32 %v6719_v62 }
 0x3c1   :  { %8605 = vpow2.f32 %v6720_v23 }
 0x3c2   :  { %8607 = vtanh.f32 %v1368_v25 }
 0x3c9   :  { %v8602_v35 = vpop.eup %8601 }
 0x3ca   :  { %v8604_v28 = vpop.eup %8603  ;;  %v1375_v49 = vadd.f32 1.0, %v8602_v35  ;;  %v11662_v35 = vld [vmem:[#allocation72_spill] sm:$0xff] }
 0x3cb   :  { %v1381_v52 = vadd.f32 1.0, %v8604_v28  ;;  %v8606_v61 = vpop.eup %8605  ;;  %v11663_v28 = vld [vmem:[#allocation73_spill] sm:$0xff] }
 0x3cc   :  { %8609 = vrcp.f32 %v1375_v49  ;;  %v8608_v4 = vpop.eup %8607  ;;  %v1388_v47 = vadd.f32 1.0, %v8606_v61  ;;  %v11664_v49 = vld [vmem:[#allocation74_spill] sm:$0xff]  ;;  %v11666_v61 = vld [vmem:[#allocation76_spill] sm:$0xff] }
 0x3cd   :  { %8611 = vrcp.f32 %v1381_v52  ;;  %v11665_v52 = vld [vmem:[#allocation75_spill] sm:$0xff] }
 0x3ce   :  { %8613 = vrcp.f32 %v1388_v47  ;;  %v2119_v47 = vld [vmem:[#allocation14 + $0x18] sm:$0xff] }
 0x3d6   :  { %v8610_v22 = vpop.eup %8609 }
 0x3d7   :  { %v8612_v14 = vpop.eup %8611  ;;  %v1392_v13 = vmul.f32 %v8610_v22, %v8608_v4  ;;  %v11667_v4 = vld [vmem:[#allocation77_spill] sm:$0xff]  ;;  %v11668_v22 = vld [vmem:[#allocation78_spill] sm:$0xff] }
 0x3d8   :  { %v1391_v59 = vmul.f32 0.0, %v8612_v14  ;;  %v8614_v51 = vpop.eup %8613  ;;  %v2117_v14 = vld [vmem:[#allocation14 + $0x8] sm:$0xff] }
 0x3da   :  { %v9914_v27 = vadd.f32 %v1392_v13, %v1391_v59  ;;  %v1535_v24 = vpop.f32.mrb[2].mxu1  ;;  %v1606_v38 = vpop.f32.mrb[10].mxu0  ;;  %v2121_v13 = vld [vmem:[#allocation14 + $0x28] sm:$0xff]  ;;  %v2123_v59 = vld [vmem:[#allocation14 + $0x38] sm:$0xff] }
 0x3db   :  { %v8472_v16 = vadd.f32 %v1535_v24, %v11642_v19  ;;  %v1537_v5 = vpop.f32.mrb[3].mxu1  ;;  %v1608_v32 = vpop.f32.mrb[11].mxu0  ;;  %v8488_v1 = vadd.f32 %v1606_v38, %v9836_v12  ;;  %v11670_v24 = vld [vmem:[#allocation80_spill] sm:$0xff]  ;;  %v11671_v38 = vld [vmem:[#allocation81_spill] sm:$0xff] }
 0x3dc   :  { %8615 = vtanh.f32 %v9914_v27  ;;  %v8473_v60 = vadd.f32 %v1537_v5, %v11643_v48  ;;  %v8489_v50 = vadd.f32 %v1608_v32, %v11644_v41  ;;  %v2120_v5 = vld [vmem:[#allocation14 + $0x20] sm:$0xff]  ;;  %v11672_v32 = vld [vmem:[#allocation82_spill] sm:$0xff] }
 0x3dd   :  { %v6721_v26 = vmul.f32 -1.442695, %v8472_v16  ;;  %v2116_v16 = vld [vmem:[#allocation14] sm:$0xff] }
 0x3de   :  { %v6722_v40 = vmul.f32 -1.442695, %v8473_v60  ;;  %v6723_v58 = vmul.f32 -1.442695, %v8489_v50  ;;  %v11673_v60 = vld [vmem:[#allocation83_spill] sm:$0xff] }
 0x3df   :  { %8617 = vpow2.f32 %v6721_v26  ;;  %v9959_v26 = vpack.c.bf16 %v2121_v13, %v2117_v14  ;;  %v2118_v50 = vld [vmem:[#allocation14 + $0x10] sm:$0xff] }
 0x3e0   :  { %8619 = vpow2.f32 %v6722_v40  ;;  %v9961_v40 = vpack.c.bf16 %v2123_v59, %v2119_v47  ;;  %v2142_v13 = vld [vmem:[#allocation14 + $0xd0] sm:$0xff]  ;;  %v2149_v59 = vld [vmem:[#allocation14 + $0x108] sm:$0xff] }
 0x3e1   :  { %8621 = vpow2.f32 %v6723_v58  ;;  %v2129_v58 = vld [vmem:[#allocation14 + $0x68] sm:$0xff]  ;;  %v2146_v47 = vld [vmem:[#allocation14 + $0xf0] sm:$0xff] }
 0x3e2   :  { %8623 = vtanh.f32 %v8488_v1  ;;  %v2127_v1 = vld [vmem:[#allocation14 + $0x58] sm:$0xff] }
 0x3e6   :  { %v8616_v57 = vpop.eup %8615 }
 0x3e7   :  { %v9921_v2 = vmul.f32 %v8616_v57, %v8614_v51  ;;  %v2122_v51 = vld [vmem:[#allocation14 + $0x30] sm:$0xff]  ;;  %v2125_v57 = vld [vmem:[#allocation14 + $0x48] sm:$0xff] }
 0x3e9   :  { %11645 = vst [vmem:[#allocation36_spill] sm:$0xff] %v9921_v2  ;;  %v8618_v9 = vpop.eup %8617  ;;  %1836 = vmatmul.mubr.f32.vlgmr.msra.gmra.mrb[18].mxu1 %v9921_v2  ;;  %1907 = vmatmul.mubr.f32.vlgmr.msra.gmra.mrb[26].mxu0 %v9921_v2  ;;  %v2443_v2 = vld [vmem:[#allocation18 + $0xc8] sm:$0xff] }
 0x3ea   :  { %v8620_v10 = vpop.eup %8619  ;;  %v1619_v17 = vadd.f32 1.0, %v8618_v9  ;;  %7221 = vmatpush1.bf16.msra.mxu1 %v11646_v18  ;;  %7253 = vmatpush1.bf16.msra.mxu0 %v11647_v29  ;;  %v2131_v9 = vld [vmem:[#allocation14 + $0x78] sm:$0xff]  ;;  %v11675_v29 = vld [vmem:[#allocation85_spill] sm:$0xff] }
 0x3eb   :  { %v1625_v30 = vadd.f32 1.0, %v8620_v10  ;;  %7223 = vmatprep.subr.bf16.mxu1 %v11648_v36  ;;  %7255 = vmatprep.subr.bf16.mxu0 %v11649_v37  ;;  %v8622_v33 = vpop.eup %8621  ;;  %v11674_v18 = vld [vmem:[#allocation84_spill] sm:$0xff]  ;;  %v9967_v36 = vpack.c.bf16 %v2122_v51, %v2118_v50 }
 0x3ec   :  { %8625 = vrcp.f32 %v1619_v17  ;;  %1977 = vmatprep.mubr.f32.mxu1 %v11583_v15  ;;  %2048 = vmatprep.mubr.f32.mxu0 %v11583_v15  ;;  %v8624_v34 = vpop.eup %8623  ;;  %v1632_v3 = vadd.f32 1.0, %v8622_v33  ;;  %v2124_v37 = vld [vmem:[#allocation14 + $0x40] sm:$0xff]  ;;  %v2135_v33 = vld [vmem:[#allocation14 + $0x98] sm:$0xff] }
 0x3ed   :  { %8627 = vrcp.f32 %v1625_v30  ;;  %v9965_v30 = vpack.c.bf16 %v2120_v5, %v2116_v16  ;;  %v2155_v16 = vld [vmem:[#allocation14 + $0x138] sm:$0xff]  ;;  %v2152_v50 = vld [vmem:[#allocation14 + $0x120] sm:$0xff] }
 0x3ee   :  { %7225 = vmatpush1.bf16.msra.mxu1 %v11650_v45  ;;  %7257 = vmatpush1.bf16.msra.mxu0 %v11651_v46  ;;  %8629 = vrcp.f32 %v1632_v3  ;;  %v2128_v45 = vld [vmem:[#allocation14 + $0x60] sm:$0xff] }
 0x3ef   :  { %7227 = vmatprep.subr.bf16.mxu1 %v11652_v54  ;;  %7259 = vmatprep.subr.bf16.mxu0 %v11653_v55  ;;  %v9973_v54 = vpack.c.bf16 %v2129_v58, %v2125_v57  ;;  %v9975_v55 = vpack.c.bf16 %v2131_v9, %v2127_v1  ;;  %v2150_v58 = vld [vmem:[#allocation14 + $0x110] sm:$0xff]  ;;  %v2157_v9 = vld [vmem:[#allocation14 + $0x148] sm:$0xff] }
 0x3f0   :  { %v2154_v1 = vld [vmem:[#allocation14 + $0x130] sm:$0xff] }
 0x3f2   :  { %7229 = vmatpush1.bf16.msra.mxu1 %v11654_v63  ;;  %7261 = vmatpush1.bf16.msra.mxu0 %v11655_v8  ;;  %v2126_v63 = vld [vmem:[#allocation14 + $0x50] sm:$0xff] }
 0x3f3   :  { %7231 = vmatprep.subr.bf16.mxu1 %v11656_v20  ;;  %7263 = vmatprep.subr.bf16.mxu0 %v11657_v21  ;;  %v2130_v8 = vld [vmem:[#allocation14 + $0x70] sm:$0xff]  ;;  %v2133_v20 = vld [vmem:[#allocation14 + $0x88] sm:$0xff] }
 0x3f4   :  { %v2137_v21 = vld [vmem:[#allocation14 + $0xa8] sm:$0xff] }
 0x3f6   :  { %v8626_v39 = vpop.eup %8625  ;;  %7233 = vmatpush1.bf16.msra.mxu1 %v11658_v42  ;;  %7265 = vmatpush1.bf16.msra.mxu0 %v11659_v53  ;;  %v9983_v42 = vpack.c.bf16 %v2130_v8, %v2126_v63  ;;  %v2132_v53 = vld [vmem:[#allocation14 + $0x80] sm:$0xff] }
 0x3f7   :  { %v8628_v56 = vpop.eup %8627  ;;  %v1636_v62 = vmul.f32 %v8626_v39, %v8624_v34  ;;  %7235 = vmatprep.subr.bf16.mxu1 %v11660_v6  ;;  %7267 = vmatprep.subr.bf16.mxu0 %v11661_v7  ;;  %v2139_v34 = vld [vmem:[#allocation14 + $0xb8] sm:$0xff]  ;;  %v9981_v39 = vpack.c.bf16 %v2128_v45, %v2124_v37  ;;  %v2134_v6 = vld [vmem:[#allocation14 + $0x90] sm:$0xff]  ;;  %v10021_v37 = vpack.c.bf16 %v2154_v1, %v2150_v58  ;;  %v2156_v45 = vld [vmem:[#allocation14 + $0x140] sm:$0xff] }
 0x3f8   :  { %v1635_v23 = vmul.f32 %v8628_v56, %v9839_v44  ;;  %v11669_v44 = vld [vmem:[#allocation79_spill] sm:$0xff]  ;;  %v8630_v10 = vpop.eup %8629  ;;  %v2136_v56 = vld [vmem:[#allocation14 + $0xa0] sm:$0xff]  ;;  %v9989_v3 = vpack.c.bf16 %v2139_v34, %v2135_v33  ;;  %v2165_v34 = vld [vmem:[#allocation14 + $0x188] sm:$0xff] }
 0x3f9   :  { %v2138_v7 = vld [vmem:[#allocation14 + $0xb0] sm:$0xff]  ;;  %v2160_v63 = vld [vmem:[#allocation14 + $0x160] sm:$0xff] }
 0x3fa   :  { %v9944_v25 = vadd.f32 %v1636_v62, %v1635_v23  ;;  %7237 = vmatpush1.bf16.msra.mxu1 %v11662_v35  ;;  %7269 = vmatpush1.bf16.msra.mxu0 %v11663_v28  ;;  %v9987_v62 = vpack.c.bf16 %v2137_v21, %v2133_v20  ;;  %v2141_v23 = vld [vmem:[#allocation14 + $0xc8] sm:$0xff]  ;;  %v2143_v28 = vld [vmem:[#allocation14 + $0xd8] sm:$0xff]  ;;  %v2158_v21 = vld [vmem:[#allocation14 + $0x150] sm:$0xff] }
 0x3fb   :  { %7239 = vmatprep.subr.bf16.mxu1 %v11664_v49  ;;  %7271 = vmatprep.subr.bf16.mxu0 %v11665_v52  ;;  %v2145_v35 = vld [vmem:[#allocation14 + $0xe8] sm:$0xff]  ;;  %v2147_v49 = vld [vmem:[#allocation14 + $0xf8] sm:$0xff]  ;;  %v9995_v52 = vpack.c.bf16 %v2136_v56, %v2132_v53  ;;  %v2162_v33 = vld [vmem:[#allocation14 + $0x170] sm:$0xff] }
 0x3fc   :  { %8631 = vtanh.f32 %v9944_v25  ;;  %v10003_v14 = vpack.c.bf16 %v2147_v49, %v2143_v28  ;;  %v2169_v53 = vld [vmem:[#allocation14 + $0x1a8] sm:$0xff]  ;;  %v2167_v56 = vld [vmem:[#allocation14 + $0x198] sm:$0xff]  ;;  %v2168_v28 = vld [vmem:[#allocation14 + $0x1a0] sm:$0xff] }
 0x3fd   :  { %v10037_v49 = vpack.c.bf16 %v2169_v53, %v2165_v34  ;;  %v2425_v53 = vld [vmem:[#allocation18 + $0x38] sm:$0xff] }
 0x3fe   :  { %7241 = vmatpush1.bf16.msra.mxu1 %v11666_v61  ;;  %7273 = vmatpush1.bf16.msra.mxu0 %v11667_v4  ;;  %v9997_v61 = vpack.c.bf16 %v2138_v7, %v2134_v6  ;;  %v2140_v4 = vld [vmem:[#allocation14 + $0xc0] sm:$0xff]  ;;  %v2171_v6 = vld [vmem:[#allocation14 + $0x1b8] sm:$0xff]  ;;  %v10031_v7 = vpack.c.bf16 %v2160_v63, %v2156_v45  ;;  %v2419_v63 = vld [vmem:[#allocation18 + $0x8] sm:$0xff] }
 0x3ff   :  { %7243 = vmatprep.subr.bf16.mxu1 %v11668_v22  ;;  %7275 = vmatprep.subr.bf16.mxu0 %v11669_v44  ;;  %v2144_v22 = vld [vmem:[#allocation14 + $0xe0] sm:$0xff]  ;;  %v10001_v44 = vpack.c.bf16 %v2145_v35, %v2141_v23  ;;  %v10033_v23 = vpack.c.bf16 %v2162_v33, %v2158_v21  ;;  %v2423_v21 = vld [vmem:[#allocation18 + $0x28] sm:$0xff] }
 0x400   :  { %v10007_v5 = vpack.c.bf16 %v2144_v22, %v2140_v4  ;;  %v2164_v35 = vld [vmem:[#allocation14 + $0x180] sm:$0xff]  ;;  %v10039_v4 = vpack.c.bf16 %v2171_v6, %v2167_v56  ;;  %v2166_v22 = vld [vmem:[#allocation14 + $0x190] sm:$0xff]  ;;  %v10067_v34 = vpack.c.bf16 %v2423_v21, %v2419_v63 }
 0x401   :  { %v2421_v33 = vld [vmem:[#allocation18 + $0x18] sm:$0xff]  ;;  %v2418_v56 = vld [vmem:[#allocation18] sm:$0xff]  ;;  %v2428_v21 = vld [vmem:[#allocation18 + $0x50] sm:$0xff] }
 0x402   :  { %7245 = vmatpush1.bf16.msra.mxu1 %v11670_v24  ;;  %7277 = vmatpush1.bf16.msra.mxu0 %v11671_v38  ;;  %v2153_v24 = vld [vmem:[#allocation14 + $0x128] sm:$0xff]  ;;  %v2151_v38 = vld [vmem:[#allocation14 + $0x118] sm:$0xff] }
 0x403   :  { %7247 = vmatprep.subr.bf16.mxu1 %v11672_v32  ;;  %7279 = vmatprep.subr.bf16.mxu0 %v11673_v60  ;;  %v10009_v32 = vpack.c.bf16 %v2146_v47, %v2142_v13  ;;  %v2148_v60 = vld [vmem:[#allocation14 + $0x100] sm:$0xff]  ;;  %v10013_v51 = vpack.c.bf16 %v2153_v24, %v2149_v59  ;;  %v10015_v57 = vpack.c.bf16 %v2155_v16, %v2151_v38  ;;  %v2170_v13 = vld [vmem:[#allocation14 + $0x1b0] sm:$0xff]  ;;  %v2173_v47 = vld [vmem:[#allocation14 + $0x1c8] sm:$0xff] }
 0x404   :  { %v2177_v59 = vld [vmem:[#allocation14 + $0x1e8] sm:$0xff]  ;;  %v2175_v24 = vld [vmem:[#allocation14 + $0x1d8] sm:$0xff]  ;;  %v10043_v16 = vpack.c.bf16 %v2168_v28, %v2164_v35  ;;  %v10069_v35 = vpack.c.bf16 %v2425_v53, %v2421_v33 }
 0x405   :  { %v2179_v38 = vld [vmem:[#allocation14 + $0x1f8] sm:$0xff]  ;;  %v10049_v58 = vpack.c.bf16 %v2177_v59, %v2173_v47  ;;  %v2422_v6 = vld [vmem:[#allocation18 + $0x20] sm:$0xff]  ;;  %v2427_v47 = vld [vmem:[#allocation18 + $0x48] sm:$0xff] }
 0x406   :  { %v8632_v17 = vpop.eup %8631  ;;  %7249 = vmatpush1.bf16.msra.mxu1 %v11674_v18  ;;  %7281 = vmatpush1.bf16.msra.mxu0 %v11675_v29  ;;  %v2163_v18 = vld [vmem:[#allocation14 + $0x178] sm:$0xff]  ;;  %v10019_v29 = vpack.c.bf16 %v2152_v50, %v2148_v60  ;;  %v10045_v60 = vpack.c.bf16 %v2170_v13, %v2166_v22  ;;  %v2172_v50 = vld [vmem:[#allocation14 + $0x1c0] sm:$0xff]  ;;  %v10051_v1 = vpack.c.bf16 %v2179_v38, %v2175_v24  ;;  %v2431_v59 = vld [vmem:[#allocation18 + $0x68] sm:$0xff] }
 0x407   :  { %v9969_v46 = vmul.f32 %v8632_v17, %v8630_v10  ;;  %7283 = vmatprep.subr.bf16.mxu1 %v9959_v26  ;;  %7315 = vmatprep.subr.bf16.mxu0 %v9961_v40  ;;  %v2161_v10 = vld [vmem:[#allocation14 + $0x168] sm:$0xff]  ;;  %v2159_v17 = vld [vmem:[#allocation14 + $0x158] sm:$0xff]  ;;  %v10071_v28 = vpack.c.bf16 %v2422_v6, %v2418_v56  ;;  %v10079_v38 = vpack.c.bf16 %v2431_v59, %v2427_v47 }
 0x408   :  { %v10025_v8 = vpack.c.bf16 %v2161_v10, %v2157_v9  ;;  %v10027_v20 = vpack.c.bf16 %v2163_v18, %v2159_v17  ;;  %v2176_v9 = vld [vmem:[#allocation14 + $0x1e0] sm:$0xff]  ;;  %v2174_v10 = vld [vmem:[#allocation14 + $0x1d0] sm:$0xff] }
 0x409   :  { %1978 = vmatmul.mubr.f32.vlgmr.msra.gmra.mrb[18].mxu1 %v9969_v46  ;;  %2049 = vmatmul.mubr.f32.vlgmr.msra.gmra.mrb[26].mxu0 %v9969_v46  ;;  %v2178_v17 = vld [vmem:[#allocation14 + $0x1f0] sm:$0xff]  ;;  %v10055_v18 = vpack.c.bf16 %v2176_v9, %v2172_v50  ;;  %v2429_v24 = vld [vmem:[#allocation18 + $0x58] sm:$0xff]  ;;  %11677 = vst [vmem:[#allocation38_spill] sm:$0xff] %v10079_v38  ;;  %v2426_v9 = vld [vmem:[#allocation18 + $0x40] sm:$0xff] }
 0x40a   :  { %7285 = vmatpush1.bf16.msra.mxu1 %v9965_v30  ;;  %7317 = vmatpush1.bf16.msra.mxu0 %v9967_v36  ;;  %v10057_v45 = vpack.c.bf16 %v2178_v17, %v2174_v10  ;;  %v2420_v22 = vld [vmem:[#allocation18 + $0x10] sm:$0xff]  ;;  %v2433_v50 = vld [vmem:[#allocation18 + $0x78] sm:$0xff]  ;;  %v2430_v10 = vld [vmem:[#allocation18 + $0x60] sm:$0xff] }
 0x40b   :  { %7287 = vmatprep.subr.bf16.mxu1 %v9973_v54  ;;  %7319 = vmatprep.subr.bf16.mxu0 %v9975_v55  ;;  %v2424_v13 = vld [vmem:[#allocation18 + $0x30] sm:$0xff]  ;;  %v10081_v17 = vpack.c.bf16 %v2433_v50, %v2429_v24  ;;  %v10083_v63 = vpack.c.bf16 %v2430_v10, %v2426_v9  ;;  %v2435_v56 = vld [vmem:[#allocation18 + $0x88] sm:$0xff]  ;;  %v2441_v47 = vld [vmem:[#allocation18 + $0xb8] sm:$0xff] }
 0x40c   :  { %2244 = vmatprep.mubr.f32.mxu1 %v11583_v15  ;;  %2315 = vmatprep.mubr.f32.mxu0 %v11583_v15  ;;  %v2432_v33 = vld [vmem:[#allocation18 + $0x70] sm:$0xff]  ;;  %v2439_v6 = vld [vmem:[#allocation18 + $0xa8] sm:$0xff]  ;;  %v2434_v59 = vld [vmem:[#allocation18 + $0x80] sm:$0xff] }
 0x40d   :  { %11678 = vst [vmem:[#allocation39_spill] sm:$0xff] %v10081_v17  ;;  %11679 = vst [vmem:[#allocation40_spill] sm:$0xff] %v10083_v63  ;;  %v10086_v53 = vpack.c.bf16 %v2432_v33, %v2428_v21  ;;  %v2438_v24 = vld [vmem:[#allocation18 + $0xa0] sm:$0xff]  ;;  %v2436_v10 = vld [vmem:[#allocation18 + $0x90] sm:$0xff] }
 0x40e   :  { %7289 = vmatpush1.bf16.msra.mxu1 %v9981_v39  ;;  %7321 = vmatpush1.bf16.msra.mxu0 %v9983_v42  ;;  %v10095_v9 = vpack.c.bf16 %v2438_v24, %v2434_v59  ;;  %v2440_v21 = vld [vmem:[#allocation18 + $0xb0] sm:$0xff]  ;;  %v2446_v59 = vld [vmem:[#allocation18 + $0xe0] sm:$0xff] }
 0x40f   :  { %7291 = vmatprep.subr.bf16.mxu1 %v9987_v62  ;;  %7323 = vmatprep.subr.bf16.mxu0 %v9989_v3  ;;  %11680 = vst [vmem:[#allocation41_spill] sm:$0xff] %v10086_v53  ;;  %v10098_v33 = vpack.c.bf16 %v2440_v21, %v2436_v10  ;;  %v2444_v10 = vld [vmem:[#allocation18 + $0xd0] sm:$0xff] }
 0x410   :  { %11683 = vst [vmem:[#allocation44_spill] sm:$0xff] %v10095_v9  ;;  %v2448_v21 = vld [vmem:[#allocation18 + $0xf0] sm:$0xff] }
 0x411   :  { %11684 = vst [vmem:[#allocation45_spill] sm:$0xff] %v10098_v33 }
 0x412   :  { %7293 = vmatpush1.bf16.msra.mxu1 %v9995_v52  ;;  %7325 = vmatpush1.bf16.msra.mxu0 %v9997_v61 }
 0x413   :  { %7295 = vmatprep.subr.bf16.mxu1 %v10001_v44  ;;  %7327 = vmatprep.subr.bf16.mxu0 %v10003_v14 }
 0x416   :  { %7297 = vmatpush1.bf16.msra.mxu1 %v10007_v5  ;;  %7329 = vmatpush1.bf16.msra.mxu0 %v10009_v32 }
 0x417   :  { %7299 = vmatprep.subr.bf16.mxu1 %v10013_v51  ;;  %7331 = vmatprep.subr.bf16.mxu0 %v10015_v57 }
 0x41a   :  { %7301 = vmatpush1.bf16.msra.mxu1 %v10019_v29  ;;  %7333 = vmatpush1.bf16.msra.mxu0 %v10021_v37 }
 0x41b   :  { %7303 = vmatprep.subr.bf16.mxu1 %v10025_v8  ;;  %7335 = vmatprep.subr.bf16.mxu0 %v10027_v20 }
 0x41e   :  { %7305 = vmatpush1.bf16.msra.mxu1 %v10031_v7  ;;  %7337 = vmatpush1.bf16.msra.mxu0 %v10033_v23 }
 0x41f   :  { %7307 = vmatprep.subr.bf16.mxu1 %v10037_v49  ;;  %7339 = vmatprep.subr.bf16.mxu0 %v10039_v4 }
 0x422   :  { %7309 = vmatpush1.bf16.msra.mxu1 %v10043_v16  ;;  %7341 = vmatpush1.bf16.msra.mxu0 %v10045_v60 }
 0x423   :  { %7311 = vmatprep.subr.bf16.mxu1 %v10049_v58  ;;  %7343 = vmatprep.subr.bf16.mxu0 %v10051_v1 }
 0x426   :  { %7313 = vmatpush1.bf16.msra.mxu1 %v10055_v18  ;;  %7345 = vmatpush1.bf16.msra.mxu0 %v10057_v45 }
 0x427   :  { %7347 = vmatprep.subr.bf16.mxu1 %v10067_v34  ;;  %7379 = vmatprep.subr.bf16.mxu0 %v10069_v35 }
 0x429   :  { %2245 = vmatmul.mubr.f32.vlgmr.msra.gmra.mrb[4].mxu1 %v9969_v46  ;;  %2316 = vmatmul.mubr.f32.vlgmr.msra.gmra.mrb[12].mxu0 %v9969_v46  ;;  %v10074_v46 = vpack.c.bf16 %v2424_v13, %v2420_v22  ;;  %v2437_v22 = vld [vmem:[#allocation18 + $0x98] sm:$0xff]  ;;  %v10091_v13 = vpack.c.bf16 %v2439_v6, %v2435_v56  ;;  %v2447_v56 = vld [vmem:[#allocation18 + $0xe8] sm:$0xff] }
 0x42a   :  { %2546 = vmatprep.mubr.f32.mxu1 %v11583_v15  ;;  %2617 = vmatprep.mubr.f32.mxu0 %v11583_v15  ;;  %v10093_v50 = vpack.c.bf16 %v2441_v47, %v2437_v22  ;;  %v2445_v6 = vld [vmem:[#allocation18 + $0xd8] sm:$0xff]  ;;  %v2442_v47 = vld [vmem:[#allocation18 + $0xc0] sm:$0xff] }
 0x42b   :  { %11676 = vst [vmem:[#allocation37_spill] sm:$0xff] %v10074_v46  ;;  %7349 = vmatpush1.bf16.msra.mxu1 %v10071_v28  ;;  %7381 = vmatpush1.bf16.msra.mxu0 %v10074_v46  ;;  %11681 = vst [vmem:[#allocation42_spill] sm:$0xff] %v10091_v13  ;;  %v2449_v22 = vld [vmem:[#allocation18 + $0xf8] sm:$0xff] }
 0x42c   :  { %7351 = vmatprep.subr.bf16.mxu1 %v10079_v38  ;;  %7383 = vmatprep.subr.bf16.mxu0 %v10081_v17  ;;  %11682 = vst [vmem:[#allocation43_spill] sm:$0xff] %v10093_v50  ;;  %v10105_v24 = vpack.c.bf16 %v2449_v22, %v2445_v6  ;;  %v2457_v6 = vld [vmem:[#allocation18 + $0x138] sm:$0xff]  ;;  %v2450_v22 = vld [vmem:[#allocation18 + $0x100] sm:$0xff] }
 0x42d   :  { %v2372_v46 = vld [vmem:[#allocation17 + $0x98] sm:$0xff] }
 0x42e   :  { %11686 = vst [vmem:[#allocation47_spill] sm:$0xff] %v10105_v24 }
 0x42f   :  { %7353 = vmatpush1.bf16.msra.mxu1 %v10083_v63  ;;  %7385 = vmatpush1.bf16.msra.mxu0 %v10086_v53  ;;  %v10103_v53 = vpack.c.bf16 %v2447_v56, %v2443_v2  ;;  %v10107_v63 = vpack.c.bf16 %v2446_v59, %v2442_v47  ;;  %v2455_v2 = vld [vmem:[#allocation18 + $0x128] sm:$0xff]  ;;  %v2453_v56 = vld [vmem:[#allocation18 + $0x118] sm:$0xff]  ;;  %v2454_v47 = vld [vmem:[#allocation18 + $0x120] sm:$0xff] }
 0x430   :  { %7355 = vmatprep.subr.bf16.mxu1 %v10091_v13  ;;  %7387 = vmatprep.subr.bf16.mxu0 %v10093_v50  ;;  %v10110_v50 = vpack.c.bf16 %v2448_v21, %v2444_v10  ;;  %v10117_v59 = vpack.c.bf16 %v2457_v6, %v2453_v56  ;;  %v10119_v13 = vpack.c.bf16 %v2454_v47, %v2450_v22  ;;  %v2452_v10 = vld [vmem:[#allocation18 + $0x110] sm:$0xff]  ;;  %v2465_v56 = vld [vmem:[#allocation18 + $0x178] sm:$0xff]  ;;  %v2458_v6 = vld [vmem:[#allocation18 + $0x140] sm:$0xff] }
 0x431   :  { %11685 = vst [vmem:[#allocation46_spill] sm:$0xff] %v10103_v53  ;;  %11687 = vst [vmem:[#allocation48_spill] sm:$0xff] %v10107_v63  ;;  %v2456_v21 = vld [vmem:[#allocation18 + $0x130] sm:$0xff]  ;;  %v2462_v22 = vld [vmem:[#allocation18 + $0x160] sm:$0xff] }
 0x432   :  { %11688 = vst [vmem:[#allocation49_spill] sm:$0xff] %v10110_v50  ;;  %11690 = vst [vmem:[#allocation51_spill] sm:$0xff] %v10117_v59 }
 0x433   :  { %7357 = vmatpush1.bf16.msra.mxu1 %v10095_v9  ;;  %7389 = vmatpush1.bf16.msra.mxu0 %v10098_v33  ;;  %v2451_v33 = vld [vmem:[#allocation18 + $0x108] sm:$0xff]  ;;  %11691 = vst [vmem:[#allocation52_spill] sm:$0xff] %v10119_v13 }
 0x434   :  { %7359 = vmatprep.subr.bf16.mxu1 %v10103_v53  ;;  %7391 = vmatprep.subr.bf16.mxu0 %v10105_v24  ;;  %v10115_v9 = vpack.c.bf16 %v2455_v2, %v2451_v33  ;;  %v10122_v24 = vpack.c.bf16 %v2456_v21, %v2452_v10  ;;  %v2463_v33 = vld [vmem:[#allocation18 + $0x168] sm:$0xff]  ;;  %v2461_v2 = vld [vmem:[#allocation18 + $0x158] sm:$0xff]  ;;  %v10131_v53 = vpack.c.bf16 %v2462_v22, %v2458_v6  ;;  %v2460_v10 = vld [vmem:[#allocation18 + $0x150] sm:$0xff] }
 0x435   :  { %v10129_v47 = vpack.c.bf16 %v2465_v56, %v2461_v2  ;;  %v2464_v21 = vld [vmem:[#allocation18 + $0x170] sm:$0xff]  ;;  %v2473_v2 = vld [vmem:[#allocation18 + $0x1b8] sm:$0xff]  ;;  %v2466_v56 = vld [vmem:[#allocation18 + $0x180] sm:$0xff] }
 0x436   :  { %11689 = vst [vmem:[#allocation50_spill] sm:$0xff] %v10115_v9  ;;  %11692 = vst [vmem:[#allocation53_spill] sm:$0xff] %v10122_v24  ;;  %v2470_v6 = vld [vmem:[#allocation18 + $0x1a0] sm:$0xff] }
 0x437   :  { %7361 = vmatpush1.bf16.msra.mxu1 %v10107_v63  ;;  %7393 = vmatpush1.bf16.msra.mxu0 %v10110_v50  ;;  %v2459_v50 = vld [vmem:[#allocation18 + $0x148] sm:$0xff]  ;;  %11694 = vst [vmem:[#allocation55_spill] sm:$0xff] %v10129_v47  ;;  %11695 = vst [vmem:[#allocation56_spill] sm:$0xff] %v10131_v53 }
 0x438   :  { %7363 = vmatprep.subr.bf16.mxu1 %v10115_v9  ;;  %7395 = vmatprep.subr.bf16.mxu0 %v10117_v59  ;;  %v10127_v63 = vpack.c.bf16 %v2463_v33, %v2459_v50  ;;  %v10134_v59 = vpack.c.bf16 %v2464_v21, %v2460_v10  ;;  %v2471_v50 = vld [vmem:[#allocation18 + $0x1a8] sm:$0xff]  ;;  %v2469_v33 = vld [vmem:[#allocation18 + $0x198] sm:$0xff]  ;;  %v10143_v9 = vpack.c.bf16 %v2470_v6, %v2466_v56  ;;  %v2468_v10 = vld [vmem:[#allocation18 + $0x190] sm:$0xff] }
 0x439   :  { %v10141_v22 = vpack.c.bf16 %v2473_v2, %v2469_v33  ;;  %v2472_v21 = vld [vmem:[#allocation18 + $0x1b0] sm:$0xff]  ;;  %v2481_v33 = vld [vmem:[#allocation18 + $0x1f8] sm:$0xff]  ;;  %v2474_v2 = vld [vmem:[#allocation18 + $0x1c0] sm:$0xff] }
 0x43a   :  { %11693 = vst [vmem:[#allocation54_spill] sm:$0xff] %v10127_v63  ;;  %11696 = vst [vmem:[#allocation57_spill] sm:$0xff] %v10134_v59  ;;  %v2478_v56 = vld [vmem:[#allocation18 + $0x1e0] sm:$0xff] }
 0x43b   :  { %7365 = vmatpush1.bf16.msra.mxu1 %v10119_v13  ;;  %7397 = vmatpush1.bf16.msra.mxu0 %v10122_v24  ;;  %v2467_v24 = vld [vmem:[#allocation18 + $0x188] sm:$0xff]  ;;  %11698 = vst [vmem:[#allocation59_spill] sm:$0xff] %v10141_v22  ;;  %11699 = vst [vmem:[#allocation60_spill] sm:$0xff] %v10143_v9 }
 0x43c   :  { %7367 = vmatprep.subr.bf16.mxu1 %v10127_v63  ;;  %7399 = vmatprep.subr.bf16.mxu0 %v10129_v47  ;;  %v10139_v13 = vpack.c.bf16 %v2471_v50, %v2467_v24  ;;  %v10146_v47 = vpack.c.bf16 %v2472_v21, %v2468_v10  ;;  %v2479_v24 = vld [vmem:[#allocation18 + $0x1e8] sm:$0xff]  ;;  %v2477_v50 = vld [vmem:[#allocation18 + $0x1d8] sm:$0xff]  ;;  %v10155_v63 = vpack.c.bf16 %v2478_v56, %v2474_v2  ;;  %v2476_v10 = vld [vmem:[#allocation18 + $0x1d0] sm:$0xff] }
 0x43d   :  { %v10153_v6 = vpack.c.bf16 %v2481_v33, %v2477_v50  ;;  %v2480_v21 = vld [vmem:[#allocation18 + $0x1f0] sm:$0xff]  ;;  %v2360_v50 = vld [vmem:[#allocation17 + $0x38] sm:$0xff]  ;;  %v2055_v2 = vld [vmem:[#allocation20] sm:$0xf] }
 0x43e   :  { %11697 = vst [vmem:[#allocation58_spill] sm:$0xff] %v10139_v13  ;;  %11700 = vst [vmem:[#allocation61_spill] sm:$0xff] %v10146_v47  ;;  %v2060_v56 = vrot.slane %v2055_v2, %v11640_v0 }
 0x43f   :  { %7369 = vmatpush1.bf16.msra.mxu1 %v10131_v53  ;;  %7401 = vmatpush1.bf16.msra.mxu0 %v10134_v59  ;;  %v2475_v59 = vld [vmem:[#allocation18 + $0x1c8] sm:$0xff]  ;;  %11702 = vst [vmem:[#allocation63_spill] sm:$0xff] %v10153_v6  ;;  %11703 = vst [vmem:[#allocation64_spill] sm:$0xff] %v10155_v63 }
 0x440   :  { %7371 = vmatprep.subr.bf16.mxu1 %v10139_v13  ;;  %7403 = vmatprep.subr.bf16.mxu0 %v10141_v22  ;;  %v10151_v53 = vpack.c.bf16 %v2479_v24, %v2475_v59  ;;  %v10158_v22 = vpack.c.bf16 %v2480_v21, %v2476_v10  ;;  %v2358_v59 = vld [vmem:[#allocation17 + $0x28] sm:$0xff]  ;;  %v2356_v24 = vld [vmem:[#allocation17 + $0x18] sm:$0xff]  ;;  %v2064_v10 = vrot.slane %v2055_v2, %v11641_v11 }
 0x441   :  { %v10165_v33 = vpack.c.bf16 %v2360_v50, %v2356_v24  ;;  %v2072_v24 = vrot.slane %v2055_v2, %v9825_v43  ;;  %v2374_v43 = vld [vmem:[#allocation17 + $0xa8] sm:$0xff] }
 0x442   :  { %11701 = vst [vmem:[#allocation62_spill] sm:$0xff] %v10151_v53  ;;  %11704 = vst [vmem:[#allocation65_spill] sm:$0xff] %v10158_v22 }
 0x443   :  { %7373 = vmatpush1.bf16.msra.mxu1 %v10143_v9  ;;  %7405 = vmatpush1.bf16.msra.mxu0 %v10146_v47  ;;  %v2354_v47 = vld [vmem:[#allocation17 + $0x8] sm:$0xff]  ;;  %11706 = vst [vmem:[#allocation67_spill] sm:$0xff] %v10165_v33 }
 0x444   :  { %7375 = vmatprep.subr.bf16.mxu1 %v10151_v53  ;;  %7407 = vmatprep.subr.bf16.mxu0 %v10153_v6  ;;  %v10163_v9 = vpack.c.bf16 %v2358_v59, %v2354_v47 }
 0x446   :  { %11705 = vst [vmem:[#allocation66_spill] sm:$0xff] %v10163_v9 }
 0x447   :  { %7377 = vmatpush1.bf16.msra.mxu1 %v10155_v63  ;;  %7409 = vmatpush1.bf16.msra.mxu0 %v10158_v22 }
 0x448   :  { %7411 = vmatprep.subr.bf16.mxu1 %v10163_v9  ;;  %7443 = vmatprep.subr.bf16.mxu0 %v10165_v33  ;;  %v2068_v33 = vrot.slane %v2055_v2, %v9832_v31  ;;  %v2370_v31 = vld [vmem:[#allocation17 + $0x88] sm:$0xff] }
 0x4dc   :  { %v1979_v21 = vpop.f32.mrb[18].mxu1  ;;  %v2050_v63 = vpop.f32.mrb[26].mxu0 }
 0x4dd   :  { %v2077_v6 = vadd.f32 %v2060_v56, %v1979_v21  ;;  %v1981_v53 = vpop.f32.mrb[19].mxu1  ;;  %v2052_v13 = vpop.f32.mrb[27].mxu0  ;;  %v2079_v17 = vadd.f32 %v2068_v33, %v2050_v63 }
 0x4de   :  { %v2078_v22 = vadd.f32 %v2064_v10, %v1981_v53  ;;  %v2080_v50 = vadd.f32 %v2072_v24, %v2052_v13 }
 0x4df   :  { %v6724_v47 = vmul.f32 -1.442695, %v2077_v6 }
 0x4e0   :  { %v6725_v59 = vmul.f32 -1.442695, %v2078_v22  ;;  %v6726_v9 = vmul.f32 -1.442695, %v2080_v50  ;;  %v2357_v50 = vld [vmem:[#allocation17 + $0x20] sm:$0xff] }
 0x4e1   :  { %8633 = vpow2.f32 %v6724_v47 }
 0x4e2   :  { %8635 = vpow2.f32 %v6725_v59 }
 0x4e3   :  { %8637 = vpow2.f32 %v6726_v9 }
 0x4e4   :  { %8639 = vtanh.f32 %v2079_v17 }
 0x4eb   :  { %v8634_v0 = vpop.eup %8633 }
 0x4ec   :  { %v8636_v38 = vpop.eup %8635  ;;  %v2085_v11 = vadd.f32 1.0, %v8634_v0 }
 0x4ed   :  { %v2091_v56 = vadd.f32 1.0, %v8636_v38  ;;  %v8638_v53 = vpop.eup %8637 }
 0x4ee   :  { %8641 = vrcp.f32 %v2085_v11  ;;  %v8640_v6 = vpop.eup %8639  ;;  %v2098_v47 = vadd.f32 1.0, %v8638_v53  ;;  %v2359_v53 = vld [vmem:[#allocation17 + $0x30] sm:$0xff] }
 0x4ef   :  { %8643 = vrcp.f32 %v2091_v56  ;;  %v2355_v56 = vld [vmem:[#allocation17 + $0x10] sm:$0xff] }
 0x4f0   :  { %8645 = vrcp.f32 %v2098_v47 }
 0x4f8   :  { %v8642_v22 = vpop.eup %8641 }
 0x4f9   :  { %v8644_v10 = vpop.eup %8643  ;;  %v2102_v21 = vmul.f32 %v8642_v22, %v8640_v6  ;;  %v2362_v6 = vld [vmem:[#allocation17 + $0x48] sm:$0xff] }
 0x4fa   :  { %v2101_v13 = vmul.f32 %v8644_v10, %v9914_v27  ;;  %v2353_v27 = vld [vmem:[#allocation17] sm:$0xff]  ;;  %v2366_v22 = vld [vmem:[#allocation17 + $0x68] sm:$0xff]  ;;  %v2364_v10 = vld [vmem:[#allocation17 + $0x58] sm:$0xff]  ;;  %v8646_v47 = vpop.eup %8645 }
 0x4fc   :  { %v10174_v59 = vadd.f32 %v2102_v21, %v2101_v13  ;;  %v2246_v2 = vpop.f32.mrb[4].mxu1  ;;  %v2317_v63 = vpop.f32.mrb[12].mxu0  ;;  %v2368_v21 = vld [vmem:[#allocation17 + $0x78] sm:$0xff] }
 0x4fd   :  { %v8474_v0 = vadd.f32 %v2246_v2, %v11642_v19  ;;  %v2248_v9 = vpop.f32.mrb[5].mxu1  ;;  %v2319_v17 = vpop.f32.mrb[13].mxu0  ;;  %v2363_v19 = vld [vmem:[#allocation17 + $0x50] sm:$0xff] }
 0x4fe   :  { %11707 = vst [vmem:[#allocation68_spill] sm:$0xff] %v10174_v59  ;;  %v8475_v11 = vadd.f32 %v2248_v9, %v11643_v48  ;;  %8647 = vtanh.f32 %v10174_v59  ;;  %v8491_v24 = vadd.f32 %v2319_v17, %v11644_v41  ;;  %v10180_v9 = vpack.c.bf16 %v2357_v50, %v2353_v27  ;;  %v2367_v59 = vld [vmem:[#allocation17 + $0x70] sm:$0xff] }
 0x4ff   :  { %v6727_v38 = vmul.f32 -1.442695, %v8474_v0  ;;  %v10182_v48 = vpack.c.bf16 %v2359_v53, %v2355_v56  ;;  %v2361_v0 = vld [vmem:[#allocation17 + $0x40] sm:$0xff]  ;;  %v10189_v41 = vpack.c.bf16 %v2368_v21, %v2364_v10  ;;  %v10197_v53 = vpack.c.bf16 %v2367_v59, %v2363_v19  ;;  %v2384_v19 = vld [vmem:[#allocation17 + $0xf8] sm:$0xff] }
 0x500   :  { %v6728_v33 = vmul.f32 -1.442695, %v8475_v11  ;;  %v6729_v2 = vmul.f32 -1.442695, %v8491_v24  ;;  %11708 = vst [vmem:[#allocation69_spill] sm:$0xff] %v10180_v9  ;;  %v2365_v11 = vld [vmem:[#allocation17 + $0x60] sm:$0xff]  ;;  %v10201_v21 = vpack.c.bf16 %v2374_v43, %v2370_v31 }
 0x501   :  { %8649 = vpow2.f32 %v6727_v38  ;;  %11709 = vst [vmem:[#allocation70_spill] sm:$0xff] %v10182_v48  ;;  %v8490_v38 = vadd.f32 %v2317_v63, %v9836_v12  ;;  %11712 = vst [vmem:[#allocation73_spill] sm:$0xff] %v10189_v41  ;;  %v2376_v24 = vld [vmem:[#allocation17 + $0xb8] sm:$0xff]  ;;  %v10195_v63 = vpack.c.bf16 %v2365_v11, %v2361_v0  ;;  %v2382_v0 = vld [vmem:[#allocation17 + $0xe8] sm:$0xff] }
 0x502   :  { %8651 = vpow2.f32 %v6728_v33  ;;  %v10187_v33 = vpack.c.bf16 %v2366_v22, %v2362_v6  ;;  %11714 = vst [vmem:[#allocation75_spill] sm:$0xff] %v10197_v53  ;;  %v2369_v6 = vld [vmem:[#allocation17 + $0x80] sm:$0xff]  ;;  %11715 = vst [vmem:[#allocation76_spill] sm:$0xff] %v10201_v21  ;;  %v2380_v11 = vld [vmem:[#allocation17 + $0xd8] sm:$0xff] }
 0x503   :  { %8653 = vpow2.f32 %v6729_v2  ;;  %11713 = vst [vmem:[#allocation74_spill] sm:$0xff] %v10195_v63  ;;  %v2373_v22 = vld [vmem:[#allocation17 + $0xa0] sm:$0xff]  ;;  %v2375_v2 = vld [vmem:[#allocation17 + $0xb0] sm:$0xff] }
 0x504   :  { %11711 = vst [vmem:[#allocation72_spill] sm:$0xff] %v10187_v33  ;;  %8655 = vtanh.f32 %v8490_v38  ;;  %v10209_v31 = vpack.c.bf16 %v2373_v22, %v2369_v6  ;;  %v2381_v59 = vld [vmem:[#allocation17 + $0xe0] sm:$0xff] }
 0x506   :  { %11717 = vst [vmem:[#allocation78_spill] sm:$0xff] %v10209_v31 }
 0x508   :  { %v8648_v13 = vpop.eup %8647 }
 0x509   :  { %v10185_v17 = vmul.f32 %v8648_v13, %v8646_v47  ;;  %v10203_v47 = vpack.c.bf16 %v2376_v24, %v2372_v46  ;;  %v2371_v13 = vld [vmem:[#allocation17 + $0x90] sm:$0xff]  ;;  %v2377_v46 = vld [vmem:[#allocation17 + $0xc0] sm:$0xff]  ;;  %v10217_v24 = vpack.c.bf16 %v2384_v19, %v2380_v11 }
 0x50a   :  { %v10211_v43 = vpack.c.bf16 %v2375_v2, %v2371_v13  ;;  %v10221_v6 = vpack.c.bf16 %v2381_v59, %v2377_v46  ;;  %v2385_v13 = vld [vmem:[#allocation17 + $0x100] sm:$0xff]  ;;  %v2387_v11 = vld [vmem:[#allocation17 + $0x110] sm:$0xff]  ;;  %v2400_v46 = vld [vmem:[#allocation17 + $0x178] sm:$0xff] }
 0x50b   :  { %11710 = vst [vmem:[#allocation71_spill] sm:$0xff] %v10185_v17  ;;  %v8650_v27 = vpop.eup %8649  ;;  %2547 = vmatmul.mubr.f32.vlgmr.msra.gmra.mrb[20].mxu1 %v10185_v17  ;;  %2618 = vmatmul.mubr.f32.vlgmr.msra.gmra.mrb[28].mxu0 %v10185_v17  ;;  %11716 = vst [vmem:[#allocation77_spill] sm:$0xff] %v10203_v47  ;;  %v2390_v17 = vld [vmem:[#allocation17 + $0x128] sm:$0xff]  ;;  %v2389_v2 = vld [vmem:[#allocation17 + $0x120] sm:$0xff] }
 0x50c   :  { %v8652_v50 = vpop.eup %8651  ;;  %v2330_v56 = vadd.f32 1.0, %v8650_v27  ;;  %7413 = vmatpush1.bf16.msra.mxu1 %v10180_v9  ;;  %7445 = vmatpush1.bf16.msra.mxu0 %v10182_v48  ;;  %v2378_v27 = vld [vmem:[#allocation17 + $0xc8] sm:$0xff]  ;;  %11718 = vst [vmem:[#allocation79_spill] sm:$0xff] %v10211_v43  ;;  %11720 = vst [vmem:[#allocation81_spill] sm:$0xff] %v10217_v24  ;;  %v2391_v19 = vld [vmem:[#allocation17 + $0x130] sm:$0xff] }
 0x50d   :  { %v2336_v10 = vadd.f32 1.0, %v8652_v50  ;;  %7415 = vmatprep.subr.bf16.mxu1 %v10187_v33  ;;  %7447 = vmatprep.subr.bf16.mxu0 %v10189_v41  ;;  %v10215_v38 = vpack.c.bf16 %v2382_v0, %v2378_v27  ;;  %v2379_v50 = vld [vmem:[#allocation17 + $0xd0] sm:$0xff]  ;;  %11721 = vst [vmem:[#allocation82_spill] sm:$0xff] %v10221_v6 }
 0x50e   :  { %8657 = vrcp.f32 %v2330_v56  ;;  %2688 = vmatprep.mubr.f32.mxu1 %v11583_v15  ;;  %2759 = vmatprep.mubr.f32.mxu0 %v11583_v15  ;;  %v2383_v56 = vld [vmem:[#allocation17 + $0xf0] sm:$0xff] }
 0x50f   :  { %8659 = vrcp.f32 %v2336_v10  ;;  %11719 = vst [vmem:[#allocation80_spill] sm:$0xff] %v10215_v38  ;;  %v2386_v10 = vld [vmem:[#allocation17 + $0x108] sm:$0xff]  ;;  %v10223_v22 = vpack.c.bf16 %v2383_v56, %v2379_v50  ;;  %v10233_v56 = vpack.c.bf16 %v2389_v2, %v2385_v13  ;;  %v2399_v48 = vld [vmem:[#allocation17 + $0x170] sm:$0xff] }
 0x510   :  { %7417 = vmatpush1.bf16.msra.mxu1 %v10195_v63  ;;  %7449 = vmatpush1.bf16.msra.mxu0 %v10197_v53  ;;  %v2388_v63 = vld [vmem:[#allocation17 + $0x118] sm:$0xff]  ;;  %v10227_v27 = vpack.c.bf16 %v2390_v17, %v2386_v10  ;;  %v2393_v17 = vld [vmem:[#allocation17 + $0x140] sm:$0xff]  ;;  %v2406_v2 = vld [vmem:[#allocation17 + $0x1a8] sm:$0xff] }
 0x511   :  { %7419 = vmatprep.subr.bf16.mxu1 %v10201_v21  ;;  %7451 = vmatprep.subr.bf16.mxu0 %v10203_v47  ;;  %v2392_v53 = vld [vmem:[#allocation17 + $0x138] sm:$0xff]  ;;  %11722 = vst [vmem:[#allocation83_spill] sm:$0xff] %v10223_v22  ;;  %v2394_v47 = vld [vmem:[#allocation17 + $0x148] sm:$0xff] }
 0x512   :  { %v10229_v0 = vpack.c.bf16 %v2392_v53, %v2388_v63  ;;  %v2398_v21 = vld [vmem:[#allocation17 + $0x168] sm:$0xff]  ;;  %v2397_v63 = vld [vmem:[#allocation17 + $0x160] sm:$0xff] }
 0x513   :  { %v10239_v41 = vpack.c.bf16 %v2398_v21, %v2394_v47  ;;  %v2401_v47 = vld [vmem:[#allocation17 + $0x180] sm:$0xff] }
 0x514   :  { %7421 = vmatpush1.bf16.msra.mxu1 %v10209_v31  ;;  %7453 = vmatpush1.bf16.msra.mxu0 %v10211_v43  ;;  %v8654_v31 = vpop.eup %8653  ;;  %v2396_v43 = vld [vmem:[#allocation17 + $0x158] sm:$0xff] }
 0x515   :  { %7423 = vmatprep.subr.bf16.mxu1 %v10215_v38  ;;  %7455 = vmatprep.subr.bf16.mxu0 %v10217_v24  ;;  %v8656_v59 = vpop.eup %8655  ;;  %v10235_v24 = vpack.c.bf16 %v2391_v19, %v2387_v11  ;;  %v2343_v38 = vadd.f32 1.0, %v8654_v31  ;;  %v10241_v33 = vpack.c.bf16 %v2400_v46, %v2396_v43  ;;  %v2404_v11 = vld [vmem:[#allocation17 + $0x198] sm:$0xff]  ;;  %v10248_v31 = vpack.c.bf16 %v2397_v63, %v2393_v17  ;;  %v2405_v43 = vld [vmem:[#allocation17 + $0x1a0] sm:$0xff] }
 0x516   :  { %v2408_v19 = vld [vmem:[#allocation17 + $0x1b8] sm:$0xff] }
 0x517   :  { %8661 = vrcp.f32 %v2343_v38  ;;  %v10256_v46 = vpack.c.bf16 %v2408_v19, %v2404_v11  ;;  %v2416_v17 = vld [vmem:[#allocation17 + $0x1f8] sm:$0xff]  ;;  %v2411_v11 = vld [vmem:[#allocation17 + $0x1d0] sm:$0xff] }
 0x518   :  { %v8658_v50 = vpop.eup %8657  ;;  %7425 = vmatpush1.bf16.msra.mxu1 %v10221_v6  ;;  %7457 = vmatpush1.bf16.msra.mxu0 %v10223_v22  ;;  %v2395_v6 = vld [vmem:[#allocation17 + $0x150] sm:$0xff]  ;;  %v2402_v22 = vld [vmem:[#allocation17 + $0x188] sm:$0xff] }
 0x519   :  { %v8660_v53 = vpop.eup %8659  ;;  %v2347_v10 = vmul.f32 %v8658_v50, %v8656_v59  ;;  %7427 = vmatprep.subr.bf16.mxu1 %v10227_v27  ;;  %7459 = vmatprep.subr.bf16.mxu0 %v10229_v0  ;;  %v10250_v21 = vpack.c.bf16 %v2399_v48, %v2395_v6  ;;  %v2403_v59 = vld [vmem:[#allocation17 + $0x190] sm:$0xff]  ;;  %v10261_v48 = vpack.c.bf16 %v2405_v43, %v2401_v47  ;;  %v2409_v6 = vld [vmem:[#allocation17 + $0x1c0] sm:$0xff] }
 0x51a   :  { %v2346_v13 = vmul.f32 %v8660_v53, %v9944_v25  ;;  %v10254_v25 = vpack.c.bf16 %v2406_v2, %v2402_v22  ;;  %v2407_v50 = vld [vmem:[#allocation17 + $0x1b0] sm:$0xff]  ;;  %v2410_v53 = vld [vmem:[#allocation17 + $0x1c8] sm:$0xff]  ;;  %v2413_v2 = vld [vmem:[#allocation17 + $0x1e0] sm:$0xff] }
 0x51b   :  { %v10263_v38 = vpack.c.bf16 %v2407_v50, %v2403_v59  ;;  %v2415_v19 = vld [vmem:[#allocation17 + $0x1f0] sm:$0xff]  ;;  %v10273_v47 = vpack.c.bf16 %v2413_v2, %v2409_v6 }
 0x51c   :  { %v10244_v9 = vadd.f32 %v2347_v10, %v2346_v13  ;;  %7429 = vmatpush1.bf16.msra.mxu1 %v10233_v56  ;;  %7461 = vmatpush1.bf16.msra.mxu0 %v10235_v24  ;;  %v2414_v10 = vld [vmem:[#allocation17 + $0x1e8] sm:$0xff]  ;;  %v2412_v13 = vld [vmem:[#allocation17 + $0x1d8] sm:$0xff]  ;;  %v10275_v43 = vpack.c.bf16 %v2415_v19, %v2411_v11 }
 0x51d   :  { %7431 = vmatprep.subr.bf16.mxu1 %v10239_v41  ;;  %7463 = vmatprep.subr.bf16.mxu0 %v10241_v33  ;;  %v10267_v22 = vpack.c.bf16 %v2414_v10, %v2410_v53  ;;  %v10269_v63 = vpack.c.bf16 %v2416_v17, %v2412_v13 }
 0x51e   :  { %8663 = vtanh.f32 %v10244_v9 }
 0x520   :  { %7433 = vmatpush1.bf16.msra.mxu1 %v10248_v31  ;;  %7465 = vmatpush1.bf16.msra.mxu0 %v10250_v21 }
 0x521   :  { %7435 = vmatprep.subr.bf16.mxu1 %v10254_v25  ;;  %7467 = vmatprep.subr.bf16.mxu0 %v10256_v46  ;;  %v8662_v59 = vpop.eup %8661 }
 0x524   :  { %7437 = vmatpush1.bf16.msra.mxu1 %v10261_v48  ;;  %7469 = vmatpush1.bf16.msra.mxu0 %v10263_v38 }
 0x525   :  { %7439 = vmatprep.subr.bf16.mxu1 %v10267_v22  ;;  %7471 = vmatprep.subr.bf16.mxu0 %v10269_v63 }
 0x528   :  { %v8664_v50 = vpop.eup %8663  ;;  %7441 = vmatpush1.bf16.msra.mxu1 %v10273_v47  ;;  %7473 = vmatpush1.bf16.msra.mxu0 %v10275_v43 }
 0x529   :  { %7475 = vmatprep.subr.bf16.mxu1 %v9959_v26  ;;  %7507 = vmatprep.subr.bf16.mxu0 %v9961_v40  ;;  %v2350_v53 = vmul.f32 %v8664_v50, %v8662_v59  ;;  %v11723_v26 = vld [vmem:[#allocation37_spill] sm:$0xff]  ;;  %v11724_v40 = vld [vmem:[#allocation38_spill] sm:$0xff] }
 0x52b   :  { %2689 = vmatmul.mubr.f32.vlgmr.msra.gmra.mrb[20].mxu1 %v2350_v53  ;;  %2760 = vmatmul.mubr.f32.vlgmr.msra.gmra.mrb[28].mxu0 %v2350_v53 }
 0x52c   :  { %7477 = vmatpush1.bf16.msra.mxu1 %v9965_v30  ;;  %7509 = vmatpush1.bf16.msra.mxu0 %v9967_v36  ;;  %v11725_v30 = vld [vmem:[#allocation39_spill] sm:$0xff]  ;;  %v11726_v36 = vld [vmem:[#allocation40_spill] sm:$0xff] }
 0x52d   :  { %7479 = vmatprep.subr.bf16.mxu1 %v9973_v54  ;;  %7511 = vmatprep.subr.bf16.mxu0 %v9975_v55  ;;  %v11727_v54 = vld [vmem:[#allocation41_spill] sm:$0xff]  ;;  %v11728_v55 = vld [vmem:[#allocation42_spill] sm:$0xff] }
 0x52e   :  { %2955 = vmatprep.mubr.f32.mxu1 %v11583_v15  ;;  %3026 = vmatprep.mubr.f32.mxu0 %v11583_v15 }
 0x530   :  { %7481 = vmatpush1.bf16.msra.mxu1 %v9981_v39  ;;  %7513 = vmatpush1.bf16.msra.mxu0 %v9983_v42  ;;  %v11729_v39 = vld [vmem:[#allocation43_spill] sm:$0xff]  ;;  %v11730_v42 = vld [vmem:[#allocation44_spill] sm:$0xff] }
 0x531   :  { %7483 = vmatprep.subr.bf16.mxu1 %v9987_v62  ;;  %7515 = vmatprep.subr.bf16.mxu0 %v9989_v3  ;;  %v11731_v62 = vld [vmem:[#allocation45_spill] sm:$0xff]  ;;  %v11732_v3 = vld [vmem:[#allocation46_spill] sm:$0xff] }
 0x534   :  { %7485 = vmatpush1.bf16.msra.mxu1 %v9995_v52  ;;  %7517 = vmatpush1.bf16.msra.mxu0 %v9997_v61  ;;  %v11733_v52 = vld [vmem:[#allocation47_spill] sm:$0xff]  ;;  %v11734_v61 = vld [vmem:[#allocation48_spill] sm:$0xff] }
 0x535   :  { %7487 = vmatprep.subr.bf16.mxu1 %v10001_v44  ;;  %7519 = vmatprep.subr.bf16.mxu0 %v10003_v14  ;;  %v11735_v44 = vld [vmem:[#allocation49_spill] sm:$0xff]  ;;  %v11736_v14 = vld [vmem:[#allocation50_spill] sm:$0xff] }
 0x538   :  { %7489 = vmatpush1.bf16.msra.mxu1 %v10007_v5  ;;  %7521 = vmatpush1.bf16.msra.mxu0 %v10009_v32  ;;  %v11737_v5 = vld [vmem:[#allocation51_spill] sm:$0xff]  ;;  %v11738_v32 = vld [vmem:[#allocation52_spill] sm:$0xff] }
 0x539   :  { %7491 = vmatprep.subr.bf16.mxu1 %v10013_v51  ;;  %7523 = vmatprep.subr.bf16.mxu0 %v10015_v57  ;;  %v11739_v51 = vld [vmem:[#allocation53_spill] sm:$0xff]  ;;  %v11740_v57 = vld [vmem:[#allocation54_spill] sm:$0xff] }
 0x53c   :  { %7493 = vmatpush1.bf16.msra.mxu1 %v10019_v29  ;;  %7525 = vmatpush1.bf16.msra.mxu0 %v10021_v37  ;;  %v11741_v29 = vld [vmem:[#allocation55_spill] sm:$0xff]  ;;  %v11742_v37 = vld [vmem:[#allocation56_spill] sm:$0xff] }
 0x53d   :  { %7495 = vmatprep.subr.bf16.mxu1 %v10025_v8  ;;  %7527 = vmatprep.subr.bf16.mxu0 %v10027_v20  ;;  %v11743_v8 = vld [vmem:[#allocation57_spill] sm:$0xff]  ;;  %v11744_v20 = vld [vmem:[#allocation58_spill] sm:$0xff] }
 0x540   :  { %7497 = vmatpush1.bf16.msra.mxu1 %v10031_v7  ;;  %7529 = vmatpush1.bf16.msra.mxu0 %v10033_v23  ;;  %v11745_v7 = vld [vmem:[#allocation59_spill] sm:$0xff]  ;;  %v11746_v23 = vld [vmem:[#allocation60_spill] sm:$0xff] }
 0x541   :  { %7499 = vmatprep.subr.bf16.mxu1 %v10037_v49  ;;  %7531 = vmatprep.subr.bf16.mxu0 %v10039_v4  ;;  %v11747_v49 = vld [vmem:[#allocation61_spill] sm:$0xff]  ;;  %v11748_v4 = vld [vmem:[#allocation62_spill] sm:$0xff] }
 0x544   :  { %7501 = vmatpush1.bf16.msra.mxu1 %v10043_v16  ;;  %7533 = vmatpush1.bf16.msra.mxu0 %v10045_v60  ;;  %v11749_v16 = vld [vmem:[#allocation63_spill] sm:$0xff]  ;;  %v11750_v60 = vld [vmem:[#allocation64_spill] sm:$0xff] }
 0x545   :  { %7503 = vmatprep.subr.bf16.mxu1 %v10049_v58  ;;  %7535 = vmatprep.subr.bf16.mxu0 %v10051_v1  ;;  %v11751_v58 = vld [vmem:[#allocation65_spill] sm:$0xff]  ;;  %v11752_v1 = vld [vmem:[#allocation66_spill] sm:$0xff] }
 0x548   :  { %7505 = vmatpush1.bf16.msra.mxu1 %v10055_v18  ;;  %7537 = vmatpush1.bf16.msra.mxu0 %v10057_v45  ;;  %v11753_v18 = vld [vmem:[#allocation67_spill] sm:$0xff]  ;;  %v2766_v45 = vld [vmem:[#allocation20] sm:$0xf] }
 0x549   :  { %7539 = vmatprep.subr.bf16.mxu1 %v10067_v34  ;;  %7571 = vmatprep.subr.bf16.mxu0 %v10069_v35  ;;  %v11754_v34 = vld [vmem:[#allocation86_spill] sm:$0xff] }
 0x54a   :  { %v2771_v35 = vrot.slane %v2766_v45, %v11754_v34 }
 0x54b   :  { %2956 = vmatmul.mubr.f32.vlgmr.msra.gmra.mrb[6].mxu1 %v2350_v53  ;;  %3027 = vmatmul.mubr.f32.vlgmr.msra.gmra.mrb[14].mxu0 %v2350_v53  ;;  %v11756_v53 = vld [vmem:[#allocation90_spill] sm:$0xff] }
 0x54c   :  { %7541 = vmatpush1.bf16.msra.mxu1 %v10071_v28  ;;  %7573 = vmatpush1.bf16.msra.mxu0 %v11723_v26  ;;  %v11755_v28 = vld [vmem:[#allocation87_spill] sm:$0xff]  ;;  %v2783_v26 = vrot.slane %v2766_v45, %v11756_v53 }
 0x54d   :  { %7543 = vmatprep.subr.bf16.mxu1 %v11724_v40  ;;  %7575 = vmatprep.subr.bf16.mxu0 %v11725_v30  ;;  %v2775_v10 = vrot.slane %v2766_v45, %v11755_v28  ;;  %v11757_v30 = vld [vmem:[#allocation92_spill] sm:$0xff] }
 0x54e   :  { %3257 = vmatprep.mubr.f32.mxu1 %v11583_v15  ;;  %3328 = vmatprep.mubr.f32.mxu0 %v11583_v15 }
 0x550   :  { %7545 = vmatpush1.bf16.msra.mxu1 %v11726_v36  ;;  %7577 = vmatpush1.bf16.msra.mxu0 %v11727_v54  ;;  %v2779_v36 = vrot.slane %v2766_v45, %v11757_v30 }
 0x551   :  { %7547 = vmatprep.subr.bf16.mxu1 %v11728_v55  ;;  %7579 = vmatprep.subr.bf16.mxu0 %v11729_v39 }
 0x554   :  { %7549 = vmatpush1.bf16.msra.mxu1 %v11730_v42  ;;  %7581 = vmatpush1.bf16.msra.mxu0 %v11731_v62 }
 0x555   :  { %7551 = vmatprep.subr.bf16.mxu1 %v11732_v3  ;;  %7583 = vmatprep.subr.bf16.mxu0 %v11733_v52 }
 0x558   :  { %7553 = vmatpush1.bf16.msra.mxu1 %v11734_v61  ;;  %7585 = vmatpush1.bf16.msra.mxu0 %v11735_v44 }
 0x559   :  { %7555 = vmatprep.subr.bf16.mxu1 %v11736_v14  ;;  %7587 = vmatprep.subr.bf16.mxu0 %v11737_v5 }
 0x55c   :  { %7557 = vmatpush1.bf16.msra.mxu1 %v11738_v32  ;;  %7589 = vmatpush1.bf16.msra.mxu0 %v11739_v51  ;;  %v11758_v51 = vld [vmem:[#allocation68_spill] sm:$0xff] }
 0x55d   :  { %7559 = vmatprep.subr.bf16.mxu1 %v11740_v57  ;;  %7591 = vmatprep.subr.bf16.mxu0 %v11741_v29 }
 0x560   :  { %7561 = vmatpush1.bf16.msra.mxu1 %v11742_v37  ;;  %7593 = vmatpush1.bf16.msra.mxu0 %v11743_v8 }
 0x561   :  { %7563 = vmatprep.subr.bf16.mxu1 %v11744_v20  ;;  %7595 = vmatprep.subr.bf16.mxu0 %v11745_v7  ;;  %v11759_v20 = vld [vmem:[#allocation88_spill] sm:$0xff] }
 0x564   :  { %7565 = vmatpush1.bf16.msra.mxu1 %v11746_v23  ;;  %7597 = vmatpush1.bf16.msra.mxu0 %v11747_v49 }
 0x565   :  { %7567 = vmatprep.subr.bf16.mxu1 %v11748_v4  ;;  %7599 = vmatprep.subr.bf16.mxu0 %v11749_v16  ;;  %v11760_v4 = vld [vmem:[#allocation89_spill] sm:$0xff] }
 0x568   :  { %7569 = vmatpush1.bf16.msra.mxu1 %v11750_v60  ;;  %7601 = vmatpush1.bf16.msra.mxu0 %v11751_v58 }
 0x569   :  { %7603 = vmatprep.subr.bf16.mxu1 %v11752_v1  ;;  %7635 = vmatprep.subr.bf16.mxu0 %v11753_v18  ;;  %v11761_v1 = vld [vmem:[#allocation91_spill] sm:$0xff] }
 0x5fe   :  { %v2690_v13 = vpop.f32.mrb[20].mxu1  ;;  %v2761_v17 = vpop.f32.mrb[28].mxu0 }
 0x5ff   :  { %v2788_v6 = vadd.f32 %v2771_v35, %v2690_v13  ;;  %v2692_v2 = vpop.f32.mrb[21].mxu1  ;;  %v2763_v11 = vpop.f32.mrb[29].mxu0  ;;  %v2790_v55 = vadd.f32 %v2779_v36, %v2761_v17  ;;  %v11767_v36 = vld [vmem:[#allocation74_spill] sm:$0xff] }
 0x600   :  { %v2789_v19 = vadd.f32 %v2775_v10, %v2692_v2  ;;  %v2791_v40 = vadd.f32 %v2783_v26, %v2763_v11  ;;  %v11765_v26 = vld [vmem:[#allocation72_spill] sm:$0xff] }
 0x601   :  { %v6730_v59 = vmul.f32 -1.442695, %v2788_v6 }
 0x602   :  { %v6731_v50 = vmul.f32 -1.442695, %v2789_v19  ;;  %v6732_v54 = vmul.f32 -1.442695, %v2791_v40  ;;  %v11763_v19 = vld [vmem:[#allocation69_spill] sm:$0xff] }
 0x603   :  { %8665 = vpow2.f32 %v6730_v59  ;;  %v11764_v59 = vld [vmem:[#allocation70_spill] sm:$0xff]  ;;  %v11766_v40 = vld [vmem:[#allocation73_spill] sm:$0xff] }
 0x604   :  { %8667 = vpow2.f32 %v6731_v50 }
 0x605   :  { %8669 = vpow2.f32 %v6732_v54  ;;  %v11768_v54 = vld [vmem:[#allocation75_spill] sm:$0xff] }
 0x606   :  { %8671 = vtanh.f32 %v2790_v55  ;;  %v11769_v55 = vld [vmem:[#allocation76_spill] sm:$0xff] }
 0x60d   :  { %v8666_v39 = vpop.eup %8665 }
 0x60e   :  { %v8668_v42 = vpop.eup %8667  ;;  %v2796_v62 = vadd.f32 1.0, %v8666_v39  ;;  %v11770_v39 = vld [vmem:[#allocation77_spill] sm:$0xff] }
 0x60f   :  { %v2802_v3 = vadd.f32 1.0, %v8668_v42  ;;  %v8670_v52 = vpop.eup %8669  ;;  %v11771_v42 = vld [vmem:[#allocation78_spill] sm:$0xff] }
 0x610   :  { %8673 = vrcp.f32 %v2796_v62  ;;  %v8672_v61 = vpop.eup %8671  ;;  %v2809_v32 = vadd.f32 1.0, %v8670_v52  ;;  %v11772_v62 = vld [vmem:[#allocation79_spill] sm:$0xff]  ;;  %v11774_v52 = vld [vmem:[#allocation81_spill] sm:$0xff] }
 0x611   :  { %8675 = vrcp.f32 %v2802_v3  ;;  %v11773_v3 = vld [vmem:[#allocation80_spill] sm:$0xff] }
 0x612   :  { %8677 = vrcp.f32 %v2809_v32  ;;  %v11776_v32 = vld [vmem:[#allocation83_spill] sm:$0xff] }
 0x61a   :  { %v8674_v44 = vpop.eup %8673 }
 0x61b   :  { %v8676_v14 = vpop.eup %8675  ;;  %v2813_v5 = vmul.f32 %v8674_v44, %v8672_v61 }
 0x61c   :  { %v2812_v57 = vmul.f32 %v8676_v14, %v11758_v51  ;;  %v8678_v45 = vpop.eup %8677 }
 0x61e   :  { %v10356_v29 = vadd.f32 %v2813_v5, %v2812_v57  ;;  %v2957_v37 = vpop.f32.mrb[6].mxu1  ;;  %v3028_v8 = vpop.f32.mrb[14].mxu0  ;;  %v11775_v5 = vld [vmem:[#allocation82_spill] sm:$0xff] }
 0x61f   :  { %v8476_v7 = vadd.f32 %v2957_v37, %v11759_v20  ;;  %v2959_v23 = vpop.f32.mrb[7].mxu1  ;;  %v3030_v49 = vpop.f32.mrb[15].mxu0  ;;  %v8492_v13 = vadd.f32 %v3028_v8, %v9836_v12 }
 0x620   :  { %v8477_v16 = vadd.f32 %v2959_v23, %v11760_v4  ;;  %8679 = vtanh.f32 %v10356_v29  ;;  %v8493_v18 = vadd.f32 %v3030_v49, %v11761_v1  ;;  %v3551_v23 = vld [vmem:[#allocation14 + $0x68] sm:$0xff]  ;;  %v3549_v49 = vld [vmem:[#allocation14 + $0x58] sm:$0xff] }
 0x621   :  { %v6733_v60 = vmul.f32 -1.442695, %v8476_v7 }
 0x622   :  { %v6734_v58 = vmul.f32 -1.442695, %v8477_v16  ;;  %v6735_v10 = vmul.f32 -1.442695, %v8493_v18  ;;  %v3553_v16 = vld [vmem:[#allocation14 + $0x78] sm:$0xff] }
 0x623   :  { %8681 = vpow2.f32 %v6733_v60 }
 0x624   :  { %8683 = vpow2.f32 %v6734_v58  ;;  %v3550_v58 = vld [vmem:[#allocation14 + $0x60] sm:$0xff] }
 0x625   :  { %8685 = vpow2.f32 %v6735_v10  ;;  %v3548_v10 = vld [vmem:[#allocation14 + $0x50] sm:$0xff] }
 0x626   :  { %8687 = vtanh.f32 %v8492_v13  ;;  %v3555_v13 = vld [vmem:[#allocation14 + $0x88] sm:$0xff] }
 0x62a   :  { %v8680_v35 = vpop.eup %8679 }
 0x62b   :  { %v10363_v17 = vmul.f32 %v8680_v35, %v8678_v45  ;;  %v10417_v35 = vpack.c.bf16 %v3553_v16, %v3549_v49  ;;  %v3583_v49 = vld [vmem:[#allocation14 + $0x168] sm:$0xff]  ;;  %v3581_v16 = vld [vmem:[#allocation14 + $0x158] sm:$0xff] }
 0x62d   :  { %11762 = vst [vmem:[#allocation84_spill] sm:$0xff] %v10363_v17  ;;  %v8682_v6 = vpop.eup %8681  ;;  %3258 = vmatmul.mubr.f32.vlgmr.msra.gmra.mrb[22].mxu1 %v10363_v17  ;;  %3329 = vmatmul.mubr.f32.vlgmr.msra.gmra.mrb[30].mxu0 %v10363_v17  ;;  %v3865_v17 = vld [vmem:[#allocation18 + $0xc8] sm:$0xff] }
 0x62e   :  { %v8684_v2 = vpop.eup %8683  ;;  %v3041_v11 = vadd.f32 1.0, %v8682_v6  ;;  %7605 = vmatpush1.bf16.msra.mxu1 %v11763_v19  ;;  %7637 = vmatpush1.bf16.msra.mxu0 %v11764_v59  ;;  %v3557_v6 = vld [vmem:[#allocation14 + $0x98] sm:$0xff]  ;;  %v3554_v59 = vld [vmem:[#allocation14 + $0x80] sm:$0xff] }
 0x62f   :  { %v3047_v50 = vadd.f32 1.0, %v8684_v2  ;;  %7607 = vmatprep.subr.bf16.mxu1 %v11765_v26  ;;  %7639 = vmatprep.subr.bf16.mxu0 %v11766_v40  ;;  %v8686_v61 = vpop.eup %8685  ;;  %v3561_v2 = vld [vmem:[#allocation14 + $0xb8] sm:$0xff] }
 0x630   :  { %8689 = vrcp.f32 %v3041_v11  ;;  %3399 = vmatprep.mubr.f32.mxu1 %v11583_v15  ;;  %3470 = vmatprep.mubr.f32.mxu0 %v11583_v15  ;;  %v8688_v44 = vpop.eup %8687  ;;  %v3054_v37 = vadd.f32 1.0, %v8686_v61  ;;  %v10431_v40 = vpack.c.bf16 %v3561_v2, %v3557_v6  ;;  %v3562_v61 = vld [vmem:[#allocation14 + $0xc0] sm:$0xff]  ;;  %v3584_v6 = vld [vmem:[#allocation14 + $0x170] sm:$0xff]  ;;  %v3587_v2 = vld [vmem:[#allocation14 + $0x188] sm:$0xff] }
 0x631   :  { %8691 = vrcp.f32 %v3047_v50  ;;  %v3558_v50 = vld [vmem:[#allocation14 + $0xa0] sm:$0xff] }
 0x632   :  { %7609 = vmatpush1.bf16.msra.mxu1 %v11767_v36  ;;  %7641 = vmatpush1.bf16.msra.mxu0 %v11768_v54  ;;  %8693 = vrcp.f32 %v3054_v37  ;;  %v3556_v36 = vld [vmem:[#allocation14 + $0x90] sm:$0xff]  ;;  %v3575_v37 = vld [vmem:[#allocation14 + $0x128] sm:$0xff] }
 0x633   :  { %7611 = vmatprep.subr.bf16.mxu1 %v11769_v55  ;;  %7643 = vmatprep.subr.bf16.mxu0 %v11770_v39  ;;  %v3560_v54 = vld [vmem:[#allocation14 + $0xb0] sm:$0xff]  ;;  %v3563_v55 = vld [vmem:[#allocation14 + $0xc8] sm:$0xff] }
 0x634   :  { %v3567_v39 = vld [vmem:[#allocation14 + $0xe8] sm:$0xff] }
 0x636   :  { %7613 = vmatpush1.bf16.msra.mxu1 %v11771_v42  ;;  %7645 = vmatpush1.bf16.msra.mxu0 %v11772_v62  ;;  %v3565_v42 = vld [vmem:[#allocation14 + $0xd8] sm:$0xff] }
 0x637   :  { %7615 = vmatprep.subr.bf16.mxu1 %v11773_v3  ;;  %7647 = vmatprep.subr.bf16.mxu0 %v11774_v52  ;;  %v3569_v62 = vld [vmem:[#allocation14 + $0xf8] sm:$0xff]  ;;  %v10437_v3 = vpack.c.bf16 %v3558_v50, %v3554_v59  ;;  %v10439_v52 = vpack.c.bf16 %v3560_v54, %v3556_v36  ;;  %v3591_v59 = vld [vmem:[#allocation14 + $0x1a8] sm:$0xff] }
 0x638   :  { %v3589_v50 = vld [vmem:[#allocation14 + $0x198] sm:$0xff] }
 0x639   :  { %v3593_v36 = vld [vmem:[#allocation14 + $0x1b8] sm:$0xff] }
 0x63a   :  { %v8690_v14 = vpop.eup %8689  ;;  %7617 = vmatpush1.bf16.msra.mxu1 %v11775_v5  ;;  %7649 = vmatpush1.bf16.msra.mxu0 %v11776_v32  ;;  %v10445_v5 = vpack.c.bf16 %v3569_v62, %v3565_v42  ;;  %v3564_v32 = vld [vmem:[#allocation14 + $0xd0] sm:$0xff]  ;;  %v3590_v42 = vld [vmem:[#allocation14 + $0x1a0] sm:$0xff]  ;;  %v10479_v62 = vpack.c.bf16 %v3591_v59, %v3587_v2 }
 0x63b   :  { %v8692_v51 = vpop.eup %8691  ;;  %v3058_v57 = vmul.f32 %v8690_v14, %v8688_v44  ;;  %7619 = vmatprep.subr.bf16.mxu1 %v10227_v27  ;;  %7651 = vmatprep.subr.bf16.mxu0 %v10229_v0  ;;  %v3543_v27 = vld [vmem:[#allocation14 + $0x28] sm:$0xff]  ;;  %v3541_v0 = vld [vmem:[#allocation14 + $0x18] sm:$0xff]  ;;  %v3566_v44 = vld [vmem:[#allocation14 + $0xe0] sm:$0xff]  ;;  %v10443_v14 = vpack.c.bf16 %v3567_v39, %v3563_v55 }
 0x63c   :  { %v3057_v8 = vmul.f32 %v8692_v51, %v10244_v9  ;;  %v3539_v9 = vld [vmem:[#allocation14 + $0x8] sm:$0xff]  ;;  %v8694_v60 = vpop.eup %8693  ;;  %v3568_v51 = vld [vmem:[#allocation14 + $0xf0] sm:$0xff]  ;;  %v3586_v39 = vld [vmem:[#allocation14 + $0x180] sm:$0xff] }
 0x63d   :  { %v3847_v59 = vld [vmem:[#allocation18 + $0x38] sm:$0xff] }
 0x63e   :  { %v10386_v7 = vadd.f32 %v3058_v57, %v3057_v8  ;;  %7621 = vmatpush1.bf16.msra.mxu1 %v10233_v56  ;;  %7653 = vmatpush1.bf16.msra.mxu0 %v10235_v24  ;;  %v3545_v56 = vld [vmem:[#allocation14 + $0x38] sm:$0xff]  ;;  %v10401_v24 = vpack.c.bf16 %v3543_v27, %v3539_v9  ;;  %v3571_v57 = vld [vmem:[#allocation14 + $0x108] sm:$0xff]  ;;  %v10449_v27 = vpack.c.bf16 %v3566_v44, %v3562_v61  ;;  %v3588_v44 = vld [vmem:[#allocation14 + $0x190] sm:$0xff] }
 0x63f   :  { %7623 = vmatprep.subr.bf16.mxu1 %v10239_v41  ;;  %7655 = vmatprep.subr.bf16.mxu0 %v10241_v33  ;;  %v3538_v41 = vld [vmem:[#allocation14] sm:$0xff]  ;;  %v3573_v8 = vld [vmem:[#allocation14 + $0x118] sm:$0xff]  ;;  %v10481_v61 = vpack.c.bf16 %v3593_v36, %v3589_v50 }
 0x640   :  { %8695 = vtanh.f32 %v10386_v7  ;;  %v3542_v33 = vld [vmem:[#allocation14 + $0x20] sm:$0xff]  ;;  %v3577_v9 = vld [vmem:[#allocation14 + $0x138] sm:$0xff] }
 0x641   :  { %v3840_v50 = vld [vmem:[#allocation18] sm:$0xff] }
 0x642   :  { %7625 = vmatpush1.bf16.msra.mxu1 %v10248_v31  ;;  %7657 = vmatpush1.bf16.msra.mxu0 %v10250_v21  ;;  %v10403_v31 = vpack.c.bf16 %v3545_v56, %v3541_v0  ;;  %v3540_v21 = vld [vmem:[#allocation14 + $0x10] sm:$0xff]  ;;  %v10451_v0 = vpack.c.bf16 %v3568_v51, %v3564_v32  ;;  %v3570_v56 = vld [vmem:[#allocation14 + $0x100] sm:$0xff]  ;;  %v3595_v51 = vld [vmem:[#allocation14 + $0x1c8] sm:$0xff] }
 0x643   :  { %7627 = vmatprep.subr.bf16.mxu1 %v10254_v25  ;;  %7659 = vmatprep.subr.bf16.mxu0 %v10256_v46  ;;  %v3544_v25 = vld [vmem:[#allocation14 + $0x30] sm:$0xff]  ;;  %v3547_v46 = vld [vmem:[#allocation14 + $0x48] sm:$0xff] }
 0x644   :  { %v10415_v45 = vpack.c.bf16 %v3551_v23, %v3547_v46  ;;  %v3576_v46 = vld [vmem:[#allocation14 + $0x130] sm:$0xff]  ;;  %v3579_v23 = vld [vmem:[#allocation14 + $0x148] sm:$0xff] }
 0x645   :  { %v3592_v32 = vld [vmem:[#allocation14 + $0x1b0] sm:$0xff]  ;;  %v3844_v36 = vld [vmem:[#allocation18 + $0x20] sm:$0xff] }
 0x646   :  { %7629 = vmatpush1.bf16.msra.mxu1 %v10261_v48  ;;  %7661 = vmatpush1.bf16.msra.mxu0 %v10263_v38  ;;  %v10407_v38 = vpack.c.bf16 %v3542_v33, %v3538_v41  ;;  %v3574_v41 = vld [vmem:[#allocation14 + $0x120] sm:$0xff]  ;;  %v10455_v33 = vpack.c.bf16 %v3575_v37, %v3571_v57  ;;  %v3599_v57 = vld [vmem:[#allocation14 + $0x1e8] sm:$0xff]  ;;  %v3597_v37 = vld [vmem:[#allocation14 + $0x1d8] sm:$0xff] }
 0x647   :  { %7631 = vmatprep.subr.bf16.mxu1 %v10267_v22  ;;  %7663 = vmatprep.subr.bf16.mxu0 %v10269_v63  ;;  %v10409_v22 = vpack.c.bf16 %v3544_v25, %v3540_v21  ;;  %v3546_v63 = vld [vmem:[#allocation14 + $0x40] sm:$0xff]  ;;  %v10457_v21 = vpack.c.bf16 %v3577_v9, %v3573_v8  ;;  %v3572_v25 = vld [vmem:[#allocation14 + $0x110] sm:$0xff]  ;;  %v3601_v8 = vld [vmem:[#allocation14 + $0x1f8] sm:$0xff]  ;;  %v10485_v9 = vpack.c.bf16 %v3590_v42, %v3586_v39 }
 0x648   :  { %v10423_v11 = vpack.c.bf16 %v3550_v58, %v3546_v63  ;;  %v10463_v63 = vpack.c.bf16 %v3576_v46, %v3572_v25  ;;  %v3578_v58 = vld [vmem:[#allocation14 + $0x140] sm:$0xff]  ;;  %v10491_v25 = vpack.c.bf16 %v3599_v57, %v3595_v51  ;;  %v10493_v46 = vpack.c.bf16 %v3601_v8, %v3597_v37  ;;  %v3849_v51 = vld [vmem:[#allocation18 + $0x48] sm:$0xff] }
 0x649   :  { %v10513_v42 = vpack.c.bf16 %v3844_v36, %v3840_v50  ;;  %v3853_v57 = vld [vmem:[#allocation18 + $0x68] sm:$0xff]  ;;  %v3851_v37 = vld [vmem:[#allocation18 + $0x58] sm:$0xff] }
 0x64a   :  { %v8696_v48 = vpop.eup %8695  ;;  %7633 = vmatpush1.bf16.msra.mxu1 %v10273_v47  ;;  %7665 = vmatpush1.bf16.msra.mxu0 %v10275_v43  ;;  %v3552_v47 = vld [vmem:[#allocation14 + $0x70] sm:$0xff]  ;;  %v3559_v43 = vld [vmem:[#allocation14 + $0xa8] sm:$0xff]  ;;  %v10521_v8 = vpack.c.bf16 %v3853_v57, %v3849_v51  ;;  %v3863_v51 = vld [vmem:[#allocation18 + $0xb8] sm:$0xff] }
 0x64b   :  { %v10411_v18 = vmul.f32 %v8696_v48, %v8694_v60  ;;  %7667 = vmatprep.subr.bf16.mxu1 %v10401_v24  ;;  %7699 = vmatprep.subr.bf16.mxu0 %v10403_v31  ;;  %v10425_v19 = vpack.c.bf16 %v3552_v47, %v3548_v10  ;;  %v10429_v26 = vpack.c.bf16 %v3559_v43, %v3555_v13  ;;  %v3585_v60 = vld [vmem:[#allocation14 + $0x178] sm:$0xff]  ;;  %v3582_v10 = vld [vmem:[#allocation14 + $0x160] sm:$0xff]  ;;  %v3580_v43 = vld [vmem:[#allocation14 + $0x150] sm:$0xff] }
 0x64c   :  { %v10461_v48 = vpack.c.bf16 %v3574_v41, %v3570_v56  ;;  %v10467_v47 = vpack.c.bf16 %v3583_v49, %v3579_v23  ;;  %v10469_v13 = vpack.c.bf16 %v3585_v60, %v3581_v16  ;;  %v10473_v54 = vpack.c.bf16 %v3582_v10, %v3578_v58  ;;  %v3594_v41 = vld [vmem:[#allocation14 + $0x1c0] sm:$0xff]  ;;  %v3596_v49 = vld [vmem:[#allocation14 + $0x1d0] sm:$0xff]  ;;  %11778 = vst [vmem:[#allocation37_spill] sm:$0xff] %v10521_v8 }
 0x64d   :  { %3400 = vmatmul.mubr.f32.vlgmr.msra.gmra.mrb[22].mxu1 %v10411_v18  ;;  %3471 = vmatmul.mubr.f32.vlgmr.msra.gmra.mrb[30].mxu0 %v10411_v18  ;;  %v10475_v55 = vpack.c.bf16 %v3584_v6, %v3580_v43  ;;  %v10487_v56 = vpack.c.bf16 %v3592_v32, %v3588_v44  ;;  %v3598_v23 = vld [vmem:[#allocation14 + $0x1e0] sm:$0xff]  ;;  %v3600_v16 = vld [vmem:[#allocation14 + $0x1f0] sm:$0xff] }
 0x64e   :  { %7669 = vmatpush1.bf16.msra.mxu1 %v10407_v38  ;;  %7701 = vmatpush1.bf16.msra.mxu0 %v10409_v22  ;;  %v10497_v60 = vpack.c.bf16 %v3598_v23, %v3594_v41  ;;  %v10499_v58 = vpack.c.bf16 %v3600_v16, %v3596_v49  ;;  %v3841_v10 = vld [vmem:[#allocation18 + $0x8] sm:$0xff]  ;;  %v3843_v6 = vld [vmem:[#allocation18 + $0x18] sm:$0xff]  ;;  %v3842_v44 = vld [vmem:[#allocation18 + $0x10] sm:$0xff] }
 0x64f   :  { %7671 = vmatprep.subr.bf16.mxu1 %v10415_v45  ;;  %7703 = vmatprep.subr.bf16.mxu0 %v10417_v35  ;;  %v3845_v43 = vld [vmem:[#allocation18 + $0x28] sm:$0xff]  ;;  %v10511_v39 = vpack.c.bf16 %v3847_v59, %v3843_v6  ;;  %v3846_v32 = vld [vmem:[#allocation18 + $0x30] sm:$0xff]  ;;  %v3855_v41 = vld [vmem:[#allocation18 + $0x78] sm:$0xff] }
 0x650   :  { %3666 = vmatprep.mubr.f32.mxu1 %v11583_v15  ;;  %3737 = vmatprep.mubr.f32.mxu0 %v11583_v15  ;;  %v10509_v2 = vpack.c.bf16 %v3845_v43, %v3841_v10  ;;  %v3848_v23 = vld [vmem:[#allocation18 + $0x40] sm:$0xff]  ;;  %v10523_v16 = vpack.c.bf16 %v3855_v41, %v3851_v37  ;;  %v3850_v43 = vld [vmem:[#allocation18 + $0x50] sm:$0xff]  ;;  %v3857_v50 = vld [vmem:[#allocation18 + $0x88] sm:$0xff] }
 0x651   :  { %v3852_v49 = vld [vmem:[#allocation18 + $0x60] sm:$0xff]  ;;  %v3854_v6 = vld [vmem:[#allocation18 + $0x70] sm:$0xff]  ;;  %v3861_v36 = vld [vmem:[#allocation18 + $0xa8] sm:$0xff] }
 0x652   :  { %7673 = vmatpush1.bf16.msra.mxu1 %v10423_v11  ;;  %7705 = vmatpush1.bf16.msra.mxu0 %v10425_v19  ;;  %11779 = vst [vmem:[#allocation38_spill] sm:$0xff] %v10523_v16  ;;  %v10525_v10 = vpack.c.bf16 %v3852_v49, %v3848_v23  ;;  %v10528_v59 = vpack.c.bf16 %v3854_v6, %v3850_v43  ;;  %v3856_v57 = vld [vmem:[#allocation18 + $0x80] sm:$0xff]  ;;  %v3858_v49 = vld [vmem:[#allocation18 + $0x90] sm:$0xff] }
 0x653   :  { %7675 = vmatprep.subr.bf16.mxu1 %v10429_v26  ;;  %7707 = vmatprep.subr.bf16.mxu0 %v10431_v40  ;;  %v3860_v37 = vld [vmem:[#allocation18 + $0xa0] sm:$0xff]  ;;  %v3862_v43 = vld [vmem:[#allocation18 + $0xb0] sm:$0xff] }
 0x654   :  { %11780 = vst [vmem:[#allocation39_spill] sm:$0xff] %v10525_v10  ;;  %11781 = vst [vmem:[#allocation40_spill] sm:$0xff] %v10528_v59  ;;  %v10537_v23 = vpack.c.bf16 %v3860_v37, %v3856_v57  ;;  %v10540_v6 = vpack.c.bf16 %v3862_v43, %v3858_v49  ;;  %v3868_v57 = vld [vmem:[#allocation18 + $0xe0] sm:$0xff]  ;;  %v3866_v49 = vld [vmem:[#allocation18 + $0xd0] sm:$0xff] }
 0x655   :  { %v3870_v43 = vld [vmem:[#allocation18 + $0xf0] sm:$0xff] }
 0x656   :  { %7677 = vmatpush1.bf16.msra.mxu1 %v10437_v3  ;;  %7709 = vmatpush1.bf16.msra.mxu0 %v10439_v52  ;;  %11784 = vst [vmem:[#allocation43_spill] sm:$0xff] %v10537_v23  ;;  %11785 = vst [vmem:[#allocation44_spill] sm:$0xff] %v10540_v6 }
 0x657   :  { %7679 = vmatprep.subr.bf16.mxu1 %v10443_v14  ;;  %7711 = vmatprep.subr.bf16.mxu0 %v10445_v5 }
 0x65a   :  { %7681 = vmatpush1.bf16.msra.mxu1 %v10449_v27  ;;  %7713 = vmatpush1.bf16.msra.mxu0 %v10451_v0 }
 0x65b   :  { %7683 = vmatprep.subr.bf16.mxu1 %v10455_v33  ;;  %7715 = vmatprep.subr.bf16.mxu0 %v10457_v21 }
 0x65e   :  { %7685 = vmatpush1.bf16.msra.mxu1 %v10461_v48  ;;  %7717 = vmatpush1.bf16.msra.mxu0 %v10463_v63 }
 0x65f   :  { %7687 = vmatprep.subr.bf16.mxu1 %v10467_v47  ;;  %7719 = vmatprep.subr.bf16.mxu0 %v10469_v13 }
 0x662   :  { %7689 = vmatpush1.bf16.msra.mxu1 %v10473_v54  ;;  %7721 = vmatpush1.bf16.msra.mxu0 %v10475_v55 }
 0x663   :  { %7691 = vmatprep.subr.bf16.mxu1 %v10479_v62  ;;  %7723 = vmatprep.subr.bf16.mxu0 %v10481_v61 }
 0x666   :  { %7693 = vmatpush1.bf16.msra.mxu1 %v10485_v9  ;;  %7725 = vmatpush1.bf16.msra.mxu0 %v10487_v56 }
 0x667   :  { %7695 = vmatprep.subr.bf16.mxu1 %v10491_v25  ;;  %7727 = vmatprep.subr.bf16.mxu0 %v10493_v46 }
 0x66a   :  { %7697 = vmatpush1.bf16.msra.mxu1 %v10497_v60  ;;  %7729 = vmatpush1.bf16.msra.mxu0 %v10499_v58 }
 0x66b   :  { %7731 = vmatprep.subr.bf16.mxu1 %v10509_v2  ;;  %7763 = vmatprep.subr.bf16.mxu0 %v10511_v39 }
 0x66d   :  { %3667 = vmatmul.mubr.f32.vlgmr.msra.gmra.mrb[8].mxu1 %v10411_v18  ;;  %3738 = vmatmul.mubr.f32.vlgmr.msra.gmra.mrb[16].mxu0 %v10411_v18  ;;  %v10516_v18 = vpack.c.bf16 %v3846_v32, %v3842_v44  ;;  %v3859_v44 = vld [vmem:[#allocation18 + $0x98] sm:$0xff]  ;;  %v10533_v32 = vpack.c.bf16 %v3861_v36, %v3857_v50  ;;  %v3869_v50 = vld [vmem:[#allocation18 + $0xe8] sm:$0xff] }
 0x66e   :  { %3968 = vmatprep.mubr.f32.mxu1 %v11583_v15  ;;  %4039 = vmatprep.mubr.f32.mxu0 %v11583_v15  ;;  %v10535_v41 = vpack.c.bf16 %v3863_v51, %v3859_v44  ;;  %v3867_v36 = vld [vmem:[#allocation18 + $0xd8] sm:$0xff]  ;;  %v3864_v51 = vld [vmem:[#allocation18 + $0xc0] sm:$0xff] }
 0x66f   :  { %11777 = vst [vmem:[#allocation85_spill] sm:$0xff] %v10516_v18  ;;  %7733 = vmatpush1.bf16.msra.mxu1 %v10513_v42  ;;  %7765 = vmatpush1.bf16.msra.mxu0 %v10516_v18  ;;  %11782 = vst [vmem:[#allocation41_spill] sm:$0xff] %v10533_v32  ;;  %v3871_v44 = vld [vmem:[#allocation18 + $0xf8] sm:$0xff] }
 0x670   :  { %7735 = vmatprep.subr.bf16.mxu1 %v10521_v8  ;;  %7767 = vmatprep.subr.bf16.mxu0 %v10523_v16  ;;  %11783 = vst [vmem:[#allocation42_spill] sm:$0xff] %v10535_v41  ;;  %v10547_v37 = vpack.c.bf16 %v3871_v44, %v3867_v36  ;;  %v3879_v36 = vld [vmem:[#allocation18 + $0x138] sm:$0xff]  ;;  %v3872_v44 = vld [vmem:[#allocation18 + $0x100] sm:$0xff] }
 0x671   :  { %v3794_v18 = vld [vmem:[#allocation17 + $0x98] sm:$0xff] }
 0x672   :  { %11787 = vst [vmem:[#allocation46_spill] sm:$0xff] %v10547_v37 }
 0x673   :  { %7737 = vmatpush1.bf16.msra.mxu1 %v10525_v10  ;;  %7769 = vmatpush1.bf16.msra.mxu0 %v10528_v59  ;;  %v10545_v59 = vpack.c.bf16 %v3869_v50, %v3865_v17  ;;  %v10549_v10 = vpack.c.bf16 %v3868_v57, %v3864_v51  ;;  %v3877_v17 = vld [vmem:[#allocation18 + $0x128] sm:$0xff]  ;;  %v3875_v50 = vld [vmem:[#allocation18 + $0x118] sm:$0xff]  ;;  %v3876_v51 = vld [vmem:[#allocation18 + $0x120] sm:$0xff] }
 0x674   :  { %7739 = vmatprep.subr.bf16.mxu1 %v10533_v32  ;;  %7771 = vmatprep.subr.bf16.mxu0 %v10535_v41  ;;  %v10552_v41 = vpack.c.bf16 %v3870_v43, %v3866_v49  ;;  %v10559_v57 = vpack.c.bf16 %v3879_v36, %v3875_v50  ;;  %v10561_v32 = vpack.c.bf16 %v3876_v51, %v3872_v44  ;;  %v3874_v49 = vld [vmem:[#allocation18 + $0x110] sm:$0xff]  ;;  %v3887_v50 = vld [vmem:[#allocation18 + $0x178] sm:$0xff]  ;;  %v3880_v36 = vld [vmem:[#allocation18 + $0x140] sm:$0xff] }
 0x675   :  { %11786 = vst [vmem:[#allocation45_spill] sm:$0xff] %v10545_v59  ;;  %11788 = vst [vmem:[#allocation47_spill] sm:$0xff] %v10549_v10  ;;  %v3878_v43 = vld [vmem:[#allocation18 + $0x130] sm:$0xff]  ;;  %v3884_v44 = vld [vmem:[#allocation18 + $0x160] sm:$0xff] }
 0x676   :  { %11789 = vst [vmem:[#allocation48_spill] sm:$0xff] %v10552_v41  ;;  %11791 = vst [vmem:[#allocation50_spill] sm:$0xff] %v10559_v57 }
 0x677   :  { %7741 = vmatpush1.bf16.msra.mxu1 %v10537_v23  ;;  %7773 = vmatpush1.bf16.msra.mxu0 %v10540_v6  ;;  %v3873_v6 = vld [vmem:[#allocation18 + $0x108] sm:$0xff]  ;;  %11792 = vst [vmem:[#allocation51_spill] sm:$0xff] %v10561_v32 }
 0x678   :  { %7743 = vmatprep.subr.bf16.mxu1 %v10545_v59  ;;  %7775 = vmatprep.subr.bf16.mxu0 %v10547_v37  ;;  %v10557_v23 = vpack.c.bf16 %v3877_v17, %v3873_v6  ;;  %v10564_v37 = vpack.c.bf16 %v3878_v43, %v3874_v49  ;;  %v3885_v6 = vld [vmem:[#allocation18 + $0x168] sm:$0xff]  ;;  %v3883_v17 = vld [vmem:[#allocation18 + $0x158] sm:$0xff]  ;;  %v10573_v59 = vpack.c.bf16 %v3884_v44, %v3880_v36  ;;  %v3882_v49 = vld [vmem:[#allocation18 + $0x150] sm:$0xff] }
 0x679   :  { %v10571_v51 = vpack.c.bf16 %v3887_v50, %v3883_v17  ;;  %v3886_v43 = vld [vmem:[#allocation18 + $0x170] sm:$0xff]  ;;  %v3895_v17 = vld [vmem:[#allocation18 + $0x1b8] sm:$0xff]  ;;  %v3888_v50 = vld [vmem:[#allocation18 + $0x180] sm:$0xff] }
 0x67a   :  { %11790 = vst [vmem:[#allocation49_spill] sm:$0xff] %v10557_v23  ;;  %11793 = vst [vmem:[#allocation52_spill] sm:$0xff] %v10564_v37  ;;  %v3892_v36 = vld [vmem:[#allocation18 + $0x1a0] sm:$0xff] }
 0x67b   :  { %7745 = vmatpush1.bf16.msra.mxu1 %v10549_v10  ;;  %7777 = vmatpush1.bf16.msra.mxu0 %v10552_v41  ;;  %v3881_v41 = vld [vmem:[#allocation18 + $0x148] sm:$0xff]  ;;  %11795 = vst [vmem:[#allocation54_spill] sm:$0xff] %v10571_v51  ;;  %11796 = vst [vmem:[#allocation55_spill] sm:$0xff] %v10573_v59 }
 0x67c   :  { %7747 = vmatprep.subr.bf16.mxu1 %v10557_v23  ;;  %7779 = vmatprep.subr.bf16.mxu0 %v10559_v57  ;;  %v10569_v10 = vpack.c.bf16 %v3885_v6, %v3881_v41  ;;  %v10576_v57 = vpack.c.bf16 %v3886_v43, %v3882_v49  ;;  %v3893_v41 = vld [vmem:[#allocation18 + $0x1a8] sm:$0xff]  ;;  %v3891_v6 = vld [vmem:[#allocation18 + $0x198] sm:$0xff]  ;;  %v10585_v23 = vpack.c.bf16 %v3892_v36, %v3888_v50  ;;  %v3890_v49 = vld [vmem:[#allocation18 + $0x190] sm:$0xff] }
 0x67d   :  { %v10583_v44 = vpack.c.bf16 %v3895_v17, %v3891_v6  ;;  %v3894_v43 = vld [vmem:[#allocation18 + $0x1b0] sm:$0xff]  ;;  %v3903_v6 = vld [vmem:[#allocation18 + $0x1f8] sm:$0xff]  ;;  %v3896_v17 = vld [vmem:[#allocation18 + $0x1c0] sm:$0xff] }
 0x67e   :  { %11794 = vst [vmem:[#allocation53_spill] sm:$0xff] %v10569_v10  ;;  %11797 = vst [vmem:[#allocation56_spill] sm:$0xff] %v10576_v57  ;;  %v3900_v50 = vld [vmem:[#allocation18 + $0x1e0] sm:$0xff] }
 0x67f   :  { %7749 = vmatpush1.bf16.msra.mxu1 %v10561_v32  ;;  %7781 = vmatpush1.bf16.msra.mxu0 %v10564_v37  ;;  %v3889_v37 = vld [vmem:[#allocation18 + $0x188] sm:$0xff]  ;;  %11799 = vst [vmem:[#allocation58_spill] sm:$0xff] %v10583_v44  ;;  %11800 = vst [vmem:[#allocation59_spill] sm:$0xff] %v10585_v23 }
 0x680   :  { %7751 = vmatprep.subr.bf16.mxu1 %v10569_v10  ;;  %7783 = vmatprep.subr.bf16.mxu0 %v10571_v51  ;;  %v10581_v32 = vpack.c.bf16 %v3893_v41, %v3889_v37  ;;  %v10588_v51 = vpack.c.bf16 %v3894_v43, %v3890_v49  ;;  %v3901_v37 = vld [vmem:[#allocation18 + $0x1e8] sm:$0xff]  ;;  %v3899_v41 = vld [vmem:[#allocation18 + $0x1d8] sm:$0xff]  ;;  %v10597_v10 = vpack.c.bf16 %v3900_v50, %v3896_v17  ;;  %v3898_v49 = vld [vmem:[#allocation18 + $0x1d0] sm:$0xff] }
 0x681   :  { %v10595_v36 = vpack.c.bf16 %v3903_v6, %v3899_v41  ;;  %v3902_v43 = vld [vmem:[#allocation18 + $0x1f0] sm:$0xff]  ;;  %v3782_v41 = vld [vmem:[#allocation17 + $0x38] sm:$0xff]  ;;  %v3477_v17 = vld [vmem:[#allocation20] sm:$0xf] }
 0x682   :  { %11798 = vst [vmem:[#allocation57_spill] sm:$0xff] %v10581_v32  ;;  %11801 = vst [vmem:[#allocation60_spill] sm:$0xff] %v10588_v51  ;;  %v3482_v50 = vrot.slane %v3477_v17, %v11754_v34 }
 0x683   :  { %7753 = vmatpush1.bf16.msra.mxu1 %v10573_v59  ;;  %7785 = vmatpush1.bf16.msra.mxu0 %v10576_v57  ;;  %v3897_v57 = vld [vmem:[#allocation18 + $0x1c8] sm:$0xff]  ;;  %11803 = vst [vmem:[#allocation62_spill] sm:$0xff] %v10595_v36  ;;  %11804 = vst [vmem:[#allocation63_spill] sm:$0xff] %v10597_v10 }
 0x684   :  { %7755 = vmatprep.subr.bf16.mxu1 %v10581_v32  ;;  %7787 = vmatprep.subr.bf16.mxu0 %v10583_v44  ;;  %v10593_v59 = vpack.c.bf16 %v3901_v37, %v3897_v57  ;;  %v10600_v44 = vpack.c.bf16 %v3902_v43, %v3898_v49  ;;  %v3780_v57 = vld [vmem:[#allocation17 + $0x28] sm:$0xff]  ;;  %v3778_v37 = vld [vmem:[#allocation17 + $0x18] sm:$0xff]  ;;  %v3486_v49 = vrot.slane %v3477_v17, %v11755_v28 }
 0x685   :  { %v10607_v6 = vpack.c.bf16 %v3782_v41, %v3778_v37  ;;  %v3494_v37 = vrot.slane %v3477_v17, %v11756_v53  ;;  %v3796_v53 = vld [vmem:[#allocation17 + $0xa8] sm:$0xff] }
 0x686   :  { %11802 = vst [vmem:[#allocation61_spill] sm:$0xff] %v10593_v59  ;;  %11805 = vst [vmem:[#allocation64_spill] sm:$0xff] %v10600_v44 }
 0x687   :  { %7757 = vmatpush1.bf16.msra.mxu1 %v10585_v23  ;;  %7789 = vmatpush1.bf16.msra.mxu0 %v10588_v51  ;;  %v3776_v51 = vld [vmem:[#allocation17 + $0x8] sm:$0xff]  ;;  %11807 = vst [vmem:[#allocation66_spill] sm:$0xff] %v10607_v6 }
 0x688   :  { %7759 = vmatprep.subr.bf16.mxu1 %v10593_v59  ;;  %7791 = vmatprep.subr.bf16.mxu0 %v10595_v36  ;;  %v10605_v23 = vpack.c.bf16 %v3780_v57, %v3776_v51 }
 0x68a   :  { %11806 = vst [vmem:[#allocation65_spill] sm:$0xff] %v10605_v23 }
 0x68b   :  { %7761 = vmatpush1.bf16.msra.mxu1 %v10597_v10  ;;  %7793 = vmatpush1.bf16.msra.mxu0 %v10600_v44 }
 0x68c   :  { %7795 = vmatprep.subr.bf16.mxu1 %v10605_v23  ;;  %7827 = vmatprep.subr.bf16.mxu0 %v10607_v6  ;;  %v3490_v6 = vrot.slane %v3477_v17, %v11757_v30  ;;  %v3792_v30 = vld [vmem:[#allocation17 + $0x88] sm:$0xff] }
 0x720   :  { %v3401_v43 = vpop.f32.mrb[22].mxu1  ;;  %v3472_v10 = vpop.f32.mrb[30].mxu0 }
 0x721   :  { %v3499_v36 = vadd.f32 %v3482_v50, %v3401_v43  ;;  %v3403_v59 = vpop.f32.mrb[23].mxu1  ;;  %v3474_v32 = vpop.f32.mrb[31].mxu0  ;;  %v3501_v16 = vadd.f32 %v3490_v6, %v3472_v10 }
 0x722   :  { %v3500_v44 = vadd.f32 %v3486_v49, %v3403_v59  ;;  %v3502_v41 = vadd.f32 %v3494_v37, %v3474_v32 }
 0x723   :  { %v6736_v51 = vmul.f32 -1.442695, %v3499_v36 }
 0x724   :  { %v6737_v57 = vmul.f32 -1.442695, %v3500_v44  ;;  %v6738_v23 = vmul.f32 -1.442695, %v3502_v41  ;;  %v3779_v41 = vld [vmem:[#allocation17 + $0x20] sm:$0xff] }
 0x725   :  { %8697 = vpow2.f32 %v6736_v51 }
 0x726   :  { %8699 = vpow2.f32 %v6737_v57 }
 0x727   :  { %8701 = vpow2.f32 %v6738_v23 }
 0x728   :  { %8703 = vtanh.f32 %v3501_v16 }
 0x72f   :  { %v8698_v34 = vpop.eup %8697 }
 0x730   :  { %v8700_v8 = vpop.eup %8699  ;;  %v3507_v28 = vadd.f32 1.0, %v8698_v34 }
 0x731   :  { %v3513_v50 = vadd.f32 1.0, %v8700_v8  ;;  %v8702_v59 = vpop.eup %8701 }
 0x732   :  { %8705 = vrcp.f32 %v3507_v28  ;;  %v8704_v36 = vpop.eup %8703  ;;  %v3520_v51 = vadd.f32 1.0, %v8702_v59  ;;  %v3781_v59 = vld [vmem:[#allocation17 + $0x30] sm:$0xff] }
 0x733   :  { %8707 = vrcp.f32 %v3513_v50  ;;  %v3777_v50 = vld [vmem:[#allocation17 + $0x10] sm:$0xff] }
 0x734   :  { %8709 = vrcp.f32 %v3520_v51 }
 0x73c   :  { %v8706_v44 = vpop.eup %8705 }
 0x73d   :  { %v8708_v49 = vpop.eup %8707  ;;  %v3524_v43 = vmul.f32 %v8706_v44, %v8704_v36  ;;  %v3784_v36 = vld [vmem:[#allocation17 + $0x48] sm:$0xff] }
 0x73e   :  { %v3523_v32 = vmul.f32 %v8708_v49, %v10356_v29  ;;  %v3775_v29 = vld [vmem:[#allocation17] sm:$0xff]  ;;  %v3788_v44 = vld [vmem:[#allocation17 + $0x68] sm:$0xff]  ;;  %v3786_v49 = vld [vmem:[#allocation17 + $0x58] sm:$0xff]  ;;  %v8710_v51 = vpop.eup %8709 }
 0x740   :  { %v10616_v57 = vadd.f32 %v3524_v43, %v3523_v32  ;;  %v3668_v17 = vpop.f32.mrb[8].mxu1  ;;  %v3739_v10 = vpop.f32.mrb[16].mxu0  ;;  %v3790_v43 = vld [vmem:[#allocation17 + $0x78] sm:$0xff] }
 0x741   :  { %v8478_v34 = vadd.f32 %v3668_v17, %v11759_v20  ;;  %v3670_v23 = vpop.f32.mrb[9].mxu1  ;;  %v3741_v16 = vpop.f32.mrb[17].mxu0  ;;  %v3785_v20 = vld [vmem:[#allocation17 + $0x50] sm:$0xff] }
 0x742   :  { %11808 = vst [vmem:[#allocation67_spill] sm:$0xff] %v10616_v57  ;;  %v8479_v28 = vadd.f32 %v3670_v23, %v11760_v4  ;;  %8711 = vtanh.f32 %v10616_v57  ;;  %v8495_v37 = vadd.f32 %v3741_v16, %v11761_v1  ;;  %v10622_v23 = vpack.c.bf16 %v3779_v41, %v3775_v29  ;;  %v3789_v57 = vld [vmem:[#allocation17 + $0x70] sm:$0xff] }
 0x743   :  { %v6739_v8 = vmul.f32 -1.442695, %v8478_v34  ;;  %v10624_v4 = vpack.c.bf16 %v3781_v59, %v3777_v50  ;;  %v3783_v34 = vld [vmem:[#allocation17 + $0x40] sm:$0xff]  ;;  %v10631_v1 = vpack.c.bf16 %v3790_v43, %v3786_v49  ;;  %v10639_v59 = vpack.c.bf16 %v3789_v57, %v3785_v20  ;;  %v3806_v20 = vld [vmem:[#allocation17 + $0xf8] sm:$0xff] }
 0x744   :  { %v6740_v6 = vmul.f32 -1.442695, %v8479_v28  ;;  %v6741_v17 = vmul.f32 -1.442695, %v8495_v37  ;;  %11809 = vst [vmem:[#allocation68_spill] sm:$0xff] %v10622_v23  ;;  %v3787_v28 = vld [vmem:[#allocation17 + $0x60] sm:$0xff]  ;;  %v10643_v43 = vpack.c.bf16 %v3796_v53, %v3792_v30 }
 0x745   :  { %8713 = vpow2.f32 %v6739_v8  ;;  %11810 = vst [vmem:[#allocation69_spill] sm:$0xff] %v10624_v4  ;;  %v8494_v8 = vadd.f32 %v3739_v10, %v9836_v12  ;;  %11813 = vst [vmem:[#allocation73_spill] sm:$0xff] %v10631_v1  ;;  %v3798_v37 = vld [vmem:[#allocation17 + $0xb8] sm:$0xff]  ;;  %v10637_v10 = vpack.c.bf16 %v3787_v28, %v3783_v34  ;;  %v3804_v34 = vld [vmem:[#allocation17 + $0xe8] sm:$0xff] }
 0x746   :  { %8715 = vpow2.f32 %v6740_v6  ;;  %v10629_v6 = vpack.c.bf16 %v3788_v44, %v3784_v36  ;;  %11815 = vst [vmem:[#allocation75_spill] sm:$0xff] %v10639_v59  ;;  %v3791_v36 = vld [vmem:[#allocation17 + $0x80] sm:$0xff]  ;;  %11816 = vst [vmem:[#allocation76_spill] sm:$0xff] %v10643_v43  ;;  %v3802_v28 = vld [vmem:[#allocation17 + $0xd8] sm:$0xff] }
 0x747   :  { %8717 = vpow2.f32 %v6741_v17  ;;  %11814 = vst [vmem:[#allocation74_spill] sm:$0xff] %v10637_v10  ;;  %v3795_v44 = vld [vmem:[#allocation17 + $0xa0] sm:$0xff]  ;;  %v3797_v17 = vld [vmem:[#allocation17 + $0xb0] sm:$0xff] }
 0x748   :  { %11812 = vst [vmem:[#allocation72_spill] sm:$0xff] %v10629_v6  ;;  %8719 = vtanh.f32 %v8494_v8  ;;  %v10651_v53 = vpack.c.bf16 %v3795_v44, %v3791_v36  ;;  %v3803_v57 = vld [vmem:[#allocation17 + $0xe0] sm:$0xff] }
 0x74a   :  { %11818 = vst [vmem:[#allocation78_spill] sm:$0xff] %v10651_v53 }
 0x74c   :  { %v8712_v32 = vpop.eup %8711 }
 0x74d   :  { %v10627_v16 = vmul.f32 %v8712_v32, %v8710_v51  ;;  %v10645_v51 = vpack.c.bf16 %v3798_v37, %v3794_v18  ;;  %v3793_v32 = vld [vmem:[#allocation17 + $0x90] sm:$0xff]  ;;  %v3799_v18 = vld [vmem:[#allocation17 + $0xc0] sm:$0xff]  ;;  %v10659_v37 = vpack.c.bf16 %v3806_v20, %v3802_v28 }
 0x74e   :  { %v10653_v30 = vpack.c.bf16 %v3797_v17, %v3793_v32  ;;  %v10663_v36 = vpack.c.bf16 %v3803_v57, %v3799_v18  ;;  %v3807_v32 = vld [vmem:[#allocation17 + $0x100] sm:$0xff]  ;;  %v3809_v28 = vld [vmem:[#allocation17 + $0x110] sm:$0xff]  ;;  %v3822_v18 = vld [vmem:[#allocation17 + $0x178] sm:$0xff] }
 0x74f   :  { %11811 = vst [vmem:[#allocation70_spill] sm:$0xff] %v10627_v16  ;;  %v8714_v29 = vpop.eup %8713  ;;  %3969 = vmatmul.mubr.f32.vlgmr.msra.gmra.mrb[24].mxu1 %v10627_v16  ;;  %4040 = vmatmul.mubr.f32.vlgmr.msra.gmra.mrb[32].mxu0 %v10627_v16  ;;  %11817 = vst [vmem:[#allocation77_spill] sm:$0xff] %v10645_v51  ;;  %v3812_v16 = vld [vmem:[#allocation17 + $0x128] sm:$0xff]  ;;  %v3811_v17 = vld [vmem:[#allocation17 + $0x120] sm:$0xff] }
 0x750   :  { %v8716_v41 = vpop.eup %8715  ;;  %v3752_v50 = vadd.f32 1.0, %v8714_v29  ;;  %7797 = vmatpush1.bf16.msra.mxu1 %v10622_v23  ;;  %7829 = vmatpush1.bf16.msra.mxu0 %v10624_v4  ;;  %v3800_v29 = vld [vmem:[#allocation17 + $0xc8] sm:$0xff]  ;;  %11819 = vst [vmem:[#allocation79_spill] sm:$0xff] %v10653_v30  ;;  %11821 = vst [vmem:[#allocation81_spill] sm:$0xff] %v10659_v37  ;;  %v3813_v20 = vld [vmem:[#allocation17 + $0x130] sm:$0xff] }
 0x751   :  { %v3758_v49 = vadd.f32 1.0, %v8716_v41  ;;  %7799 = vmatprep.subr.bf16.mxu1 %v10629_v6  ;;  %7831 = vmatprep.subr.bf16.mxu0 %v10631_v1  ;;  %v10657_v8 = vpack.c.bf16 %v3804_v34, %v3800_v29  ;;  %v3801_v41 = vld [vmem:[#allocation17 + $0xd0] sm:$0xff]  ;;  %11822 = vst [vmem:[#allocation82_spill] sm:$0xff] %v10663_v36 }
 0x752   :  { %8721 = vrcp.f32 %v3752_v50  ;;  %4110 = vmatprep.mubr.f32.mxu1 %v11583_v15  ;;  %4181 = vmatprep.mubr.f32.mxu0 %v11583_v15  ;;  %v3805_v50 = vld [vmem:[#allocation17 + $0xf0] sm:$0xff] }
 0x753   :  { %8723 = vrcp.f32 %v3758_v49  ;;  %11820 = vst [vmem:[#allocation80_spill] sm:$0xff] %v10657_v8  ;;  %v3808_v49 = vld [vmem:[#allocation17 + $0x108] sm:$0xff]  ;;  %v10665_v44 = vpack.c.bf16 %v3805_v50, %v3801_v41  ;;  %v10675_v50 = vpack.c.bf16 %v3811_v17, %v3807_v32  ;;  %v3821_v4 = vld [vmem:[#allocation17 + $0x170] sm:$0xff] }
 0x754   :  { %7801 = vmatpush1.bf16.msra.mxu1 %v10637_v10  ;;  %7833 = vmatpush1.bf16.msra.mxu0 %v10639_v59  ;;  %v3810_v10 = vld [vmem:[#allocation17 + $0x118] sm:$0xff]  ;;  %v10669_v29 = vpack.c.bf16 %v3812_v16, %v3808_v49  ;;  %v3815_v16 = vld [vmem:[#allocation17 + $0x140] sm:$0xff]  ;;  %v3828_v17 = vld [vmem:[#allocation17 + $0x1a8] sm:$0xff] }
 0x755   :  { %7803 = vmatprep.subr.bf16.mxu1 %v10643_v43  ;;  %7835 = vmatprep.subr.bf16.mxu0 %v10645_v51  ;;  %v3814_v59 = vld [vmem:[#allocation17 + $0x138] sm:$0xff]  ;;  %11823 = vst [vmem:[#allocation83_spill] sm:$0xff] %v10665_v44  ;;  %v3816_v51 = vld [vmem:[#allocation17 + $0x148] sm:$0xff] }
 0x756   :  { %v10671_v34 = vpack.c.bf16 %v3814_v59, %v3810_v10  ;;  %v3820_v43 = vld [vmem:[#allocation17 + $0x168] sm:$0xff]  ;;  %v3819_v10 = vld [vmem:[#allocation17 + $0x160] sm:$0xff] }
 0x757   :  { %v10681_v1 = vpack.c.bf16 %v3820_v43, %v3816_v51  ;;  %v3823_v51 = vld [vmem:[#allocation17 + $0x180] sm:$0xff] }
 0x758   :  { %7805 = vmatpush1.bf16.msra.mxu1 %v10651_v53  ;;  %7837 = vmatpush1.bf16.msra.mxu0 %v10653_v30  ;;  %v8718_v53 = vpop.eup %8717  ;;  %v3818_v30 = vld [vmem:[#allocation17 + $0x158] sm:$0xff] }
 0x759   :  { %7807 = vmatprep.subr.bf16.mxu1 %v10657_v8  ;;  %7839 = vmatprep.subr.bf16.mxu0 %v10659_v37  ;;  %v8720_v57 = vpop.eup %8719  ;;  %v10677_v37 = vpack.c.bf16 %v3813_v20, %v3809_v28  ;;  %v3765_v8 = vadd.f32 1.0, %v8718_v53  ;;  %v10683_v6 = vpack.c.bf16 %v3822_v18, %v3818_v30  ;;  %v3826_v28 = vld [vmem:[#allocation17 + $0x198] sm:$0xff]  ;;  %v10690_v53 = vpack.c.bf16 %v3819_v10, %v3815_v16  ;;  %v3827_v30 = vld [vmem:[#allocation17 + $0x1a0] sm:$0xff] }
 0x75a   :  { %v3830_v20 = vld [vmem:[#allocation17 + $0x1b8] sm:$0xff] }
 0x75b   :  { %8725 = vrcp.f32 %v3765_v8  ;;  %v10698_v18 = vpack.c.bf16 %v3830_v20, %v3826_v28  ;;  %v3838_v16 = vld [vmem:[#allocation17 + $0x1f8] sm:$0xff]  ;;  %v3833_v28 = vld [vmem:[#allocation17 + $0x1d0] sm:$0xff] }
 0x75c   :  { %v8722_v41 = vpop.eup %8721  ;;  %7809 = vmatpush1.bf16.msra.mxu1 %v10663_v36  ;;  %7841 = vmatpush1.bf16.msra.mxu0 %v10665_v44  ;;  %v3817_v36 = vld [vmem:[#allocation17 + $0x150] sm:$0xff]  ;;  %v3824_v44 = vld [vmem:[#allocation17 + $0x188] sm:$0xff] }
 0x75d   :  { %v8724_v59 = vpop.eup %8723  ;;  %v3769_v49 = vmul.f32 %v8722_v41, %v8720_v57  ;;  %7811 = vmatprep.subr.bf16.mxu1 %v10669_v29  ;;  %7843 = vmatprep.subr.bf16.mxu0 %v10671_v34  ;;  %v10692_v43 = vpack.c.bf16 %v3821_v4, %v3817_v36  ;;  %v3825_v57 = vld [vmem:[#allocation17 + $0x190] sm:$0xff]  ;;  %v10703_v4 = vpack.c.bf16 %v3827_v30, %v3823_v51  ;;  %v3831_v36 = vld [vmem:[#allocation17 + $0x1c0] sm:$0xff] }
 0x75e   :  { %v3768_v32 = vmul.f32 %v8724_v59, %v10386_v7  ;;  %v10696_v7 = vpack.c.bf16 %v3828_v17, %v3824_v44  ;;  %v3829_v41 = vld [vmem:[#allocation17 + $0x1b0] sm:$0xff]  ;;  %v3832_v59 = vld [vmem:[#allocation17 + $0x1c8] sm:$0xff]  ;;  %v3835_v17 = vld [vmem:[#allocation17 + $0x1e0] sm:$0xff] }
 0x75f   :  { %v10705_v8 = vpack.c.bf16 %v3829_v41, %v3825_v57  ;;  %v3837_v20 = vld [vmem:[#allocation17 + $0x1f0] sm:$0xff]  ;;  %v10715_v51 = vpack.c.bf16 %v3835_v17, %v3831_v36 }
 0x760   :  { %v10686_v23 = vadd.f32 %v3769_v49, %v3768_v32  ;;  %7813 = vmatpush1.bf16.msra.mxu1 %v10675_v50  ;;  %7845 = vmatpush1.bf16.msra.mxu0 %v10677_v37  ;;  %v3836_v49 = vld [vmem:[#allocation17 + $0x1e8] sm:$0xff]  ;;  %v3834_v32 = vld [vmem:[#allocation17 + $0x1d8] sm:$0xff]  ;;  %v10717_v30 = vpack.c.bf16 %v3837_v20, %v3833_v28 }
 0x761   :  { %7815 = vmatprep.subr.bf16.mxu1 %v10681_v1  ;;  %7847 = vmatprep.subr.bf16.mxu0 %v10683_v6  ;;  %v10709_v44 = vpack.c.bf16 %v3836_v49, %v3832_v59  ;;  %v10711_v10 = vpack.c.bf16 %v3838_v16, %v3834_v32 }
 0x762   :  { %8727 = vtanh.f32 %v10686_v23 }
 0x764   :  { %7817 = vmatpush1.bf16.msra.mxu1 %v10690_v53  ;;  %7849 = vmatpush1.bf16.msra.mxu0 %v10692_v43 }
 0x765   :  { %7819 = vmatprep.subr.bf16.mxu1 %v10696_v7  ;;  %7851 = vmatprep.subr.bf16.mxu0 %v10698_v18  ;;  %v8726_v57 = vpop.eup %8725 }
 0x768   :  { %7821 = vmatpush1.bf16.msra.mxu1 %v10703_v4  ;;  %7853 = vmatpush1.bf16.msra.mxu0 %v10705_v8 }
 0x769   :  { %7823 = vmatprep.subr.bf16.mxu1 %v10709_v44  ;;  %7855 = vmatprep.subr.bf16.mxu0 %v10711_v10 }
 0x76c   :  { %v8728_v41 = vpop.eup %8727  ;;  %7825 = vmatpush1.bf16.msra.mxu1 %v10715_v51  ;;  %7857 = vmatpush1.bf16.msra.mxu0 %v10717_v30 }
 0x76d   :  { %7859 = vmatprep.subr.bf16.mxu1 %v10401_v24  ;;  %7891 = vmatprep.subr.bf16.mxu0 %v10403_v31  ;;  %v3772_v59 = vmul.f32 %v8728_v41, %v8726_v57  ;;  %v11824_v24 = vld [vmem:[#allocation85_spill] sm:$0xff] }
 0x76e   :  { %v11825_v31 = vld [vmem:[#allocation37_spill] sm:$0xff] }
 0x76f   :  { %4111 = vmatmul.mubr.f32.vlgmr.msra.gmra.mrb[24].mxu1 %v3772_v59  ;;  %4182 = vmatmul.mubr.f32.vlgmr.msra.gmra.mrb[32].mxu0 %v3772_v59 }
 0x770   :  { %7861 = vmatpush1.bf16.msra.mxu1 %v10407_v38  ;;  %7893 = vmatpush1.bf16.msra.mxu0 %v10409_v22  ;;  %v11826_v38 = vld [vmem:[#allocation38_spill] sm:$0xff]  ;;  %v11827_v22 = vld [vmem:[#allocation39_spill] sm:$0xff] }
 0x771   :  { %7863 = vmatprep.subr.bf16.mxu1 %v10415_v45  ;;  %7895 = vmatprep.subr.bf16.mxu0 %v10417_v35  ;;  %v11828_v45 = vld [vmem:[#allocation40_spill] sm:$0xff]  ;;  %v11829_v35 = vld [vmem:[#allocation41_spill] sm:$0xff] }
 0x772   :  { %4377 = vmatprep.mubr.f32.mxu1 %v11583_v15  ;;  %4448 = vmatprep.mubr.f32.mxu0 %v11583_v15 }
 0x774   :  { %7865 = vmatpush1.bf16.msra.mxu1 %v10423_v11  ;;  %7897 = vmatpush1.bf16.msra.mxu0 %v10425_v19  ;;  %v11830_v11 = vld [vmem:[#allocation42_spill] sm:$0xff]  ;;  %v11831_v19 = vld [vmem:[#allocation43_spill] sm:$0xff] }
 0x775   :  { %7867 = vmatprep.subr.bf16.mxu1 %v10429_v26  ;;  %7899 = vmatprep.subr.bf16.mxu0 %v10431_v40  ;;  %v11832_v26 = vld [vmem:[#allocation44_spill] sm:$0xff]  ;;  %v11833_v40 = vld [vmem:[#allocation45_spill] sm:$0xff] }
 0x778   :  { %7869 = vmatpush1.bf16.msra.mxu1 %v10437_v3  ;;  %7901 = vmatpush1.bf16.msra.mxu0 %v10439_v52  ;;  %v11834_v3 = vld [vmem:[#allocation46_spill] sm:$0xff]  ;;  %v11835_v52 = vld [vmem:[#allocation47_spill] sm:$0xff] }
 0x779   :  { %7871 = vmatprep.subr.bf16.mxu1 %v10443_v14  ;;  %7903 = vmatprep.subr.bf16.mxu0 %v10445_v5  ;;  %v11836_v14 = vld [vmem:[#allocation48_spill] sm:$0xff]  ;;  %v11837_v5 = vld [vmem:[#allocation49_spill] sm:$0xff] }
 0x77c   :  { %7873 = vmatpush1.bf16.msra.mxu1 %v10449_v27  ;;  %7905 = vmatpush1.bf16.msra.mxu0 %v10451_v0  ;;  %v11838_v27 = vld [vmem:[#allocation50_spill] sm:$0xff]  ;;  %v11839_v0 = vld [vmem:[#allocation51_spill] sm:$0xff] }
 0x77d   :  { %7875 = vmatprep.subr.bf16.mxu1 %v10455_v33  ;;  %7907 = vmatprep.subr.bf16.mxu0 %v10457_v21  ;;  %v11840_v33 = vld [vmem:[#allocation52_spill] sm:$0xff]  ;;  %v11841_v21 = vld [vmem:[#allocation53_spill] sm:$0xff] }
 0x780   :  { %7877 = vmatpush1.bf16.msra.mxu1 %v10461_v48  ;;  %7909 = vmatpush1.bf16.msra.mxu0 %v10463_v63  ;;  %v11842_v48 = vld [vmem:[#allocation54_spill] sm:$0xff]  ;;  %v11843_v63 = vld [vmem:[#allocation55_spill] sm:$0xff] }
 0x781   :  { %7879 = vmatprep.subr.bf16.mxu1 %v10467_v47  ;;  %7911 = vmatprep.subr.bf16.mxu0 %v10469_v13  ;;  %v11844_v47 = vld [vmem:[#allocation56_spill] sm:$0xff]  ;;  %v11845_v13 = vld [vmem:[#allocation57_spill] sm:$0xff] }
 0x784   :  { %7881 = vmatpush1.bf16.msra.mxu1 %v10473_v54  ;;  %7913 = vmatpush1.bf16.msra.mxu0 %v10475_v55  ;;  %v11846_v54 = vld [vmem:[#allocation58_spill] sm:$0xff]  ;;  %v11847_v55 = vld [vmem:[#allocation59_spill] sm:$0xff] }
 0x785   :  { %7883 = vmatprep.subr.bf16.mxu1 %v10479_v62  ;;  %7915 = vmatprep.subr.bf16.mxu0 %v10481_v61  ;;  %v11848_v62 = vld [vmem:[#allocation60_spill] sm:$0xff]  ;;  %v11849_v61 = vld [vmem:[#allocation61_spill] sm:$0xff] }
 0x788   :  { %7885 = vmatpush1.bf16.msra.mxu1 %v10485_v9  ;;  %7917 = vmatpush1.bf16.msra.mxu0 %v10487_v56  ;;  %v11850_v9 = vld [vmem:[#allocation62_spill] sm:$0xff]  ;;  %v11851_v56 = vld [vmem:[#allocation63_spill] sm:$0xff] }
 0x789   :  { %7887 = vmatprep.subr.bf16.mxu1 %v10491_v25  ;;  %7919 = vmatprep.subr.bf16.mxu0 %v10493_v46  ;;  %v11852_v25 = vld [vmem:[#allocation64_spill] sm:$0xff]  ;;  %v11853_v46 = vld [vmem:[#allocation65_spill] sm:$0xff] }
 0x78c   :  { %7889 = vmatpush1.bf16.msra.mxu1 %v10497_v60  ;;  %7921 = vmatpush1.bf16.msra.mxu0 %v10499_v58  ;;  %v11854_v60 = vld [vmem:[#allocation66_spill] sm:$0xff]  ;;  %v4188_v58 = vld [vmem:[#allocation20] sm:$0xf] }
 0x78d   :  { %7923 = vmatprep.subr.bf16.mxu1 %v10509_v2  ;;  %7955 = vmatprep.subr.bf16.mxu0 %v10511_v39  ;;  %v11855_v2 = vld [vmem:[#allocation86_spill] sm:$0xff] }
 0x78e   :  { %v4193_v39 = vrot.slane %v4188_v58, %v11855_v2 }
 0x78f   :  { %4378 = vmatmul.mubr.f32.vlgmr.msra.gmra.mrb[10].mxu1 %v3772_v59  ;;  %4449 = vmatmul.mubr.f32.vlgmr.msra.gmra.mrb[18].mxu0 %v3772_v59  ;;  %v11857_v59 = vld [vmem:[#allocation90_spill] sm:$0xff] }
 0x790   :  { %7925 = vmatpush1.bf16.msra.mxu1 %v10513_v42  ;;  %7957 = vmatpush1.bf16.msra.mxu0 %v11824_v24  ;;  %v11856_v42 = vld [vmem:[#allocation87_spill] sm:$0xff]  ;;  %v4205_v24 = vrot.slane %v4188_v58, %v11857_v59 }
 0x791   :  { %7927 = vmatprep.subr.bf16.mxu1 %v11825_v31  ;;  %7959 = vmatprep.subr.bf16.mxu0 %v11826_v38  ;;  %v4197_v49 = vrot.slane %v4188_v58, %v11856_v42  ;;  %v11858_v38 = vld [vmem:[#allocation92_spill] sm:$0xff] }
 0x792   :  { %4679 = vmatprep.mubr.f32.mxu1 %v11583_v15  ;;  %4750 = vmatprep.mubr.f32.mxu0 %v11583_v15 }
 0x794   :  { %7929 = vmatpush1.bf16.msra.mxu1 %v11827_v22  ;;  %7961 = vmatpush1.bf16.msra.mxu0 %v11828_v45  ;;  %v4201_v22 = vrot.slane %v4188_v58, %v11858_v38 }
 0x795   :  { %7931 = vmatprep.subr.bf16.mxu1 %v11829_v35  ;;  %7963 = vmatprep.subr.bf16.mxu0 %v11830_v11 }
 0x798   :  { %7933 = vmatpush1.bf16.msra.mxu1 %v11831_v19  ;;  %7965 = vmatpush1.bf16.msra.mxu0 %v11832_v26 }
 0x799   :  { %7935 = vmatprep.subr.bf16.mxu1 %v11833_v40  ;;  %7967 = vmatprep.subr.bf16.mxu0 %v11834_v3 }
 0x79c   :  { %7937 = vmatpush1.bf16.msra.mxu1 %v11835_v52  ;;  %7969 = vmatpush1.bf16.msra.mxu0 %v11836_v14 }
 0x79d   :  { %7939 = vmatprep.subr.bf16.mxu1 %v11837_v5  ;;  %7971 = vmatprep.subr.bf16.mxu0 %v11838_v27 }
 0x7a0   :  { %7941 = vmatpush1.bf16.msra.mxu1 %v11839_v0  ;;  %7973 = vmatpush1.bf16.msra.mxu0 %v11840_v33  ;;  %v11859_v33 = vld [vmem:[#allocation67_spill] sm:$0xff] }
 0x7a1   :  { %7943 = vmatprep.subr.bf16.mxu1 %v11841_v21  ;;  %7975 = vmatprep.subr.bf16.mxu0 %v11842_v48 }
 0x7a4   :  { %7945 = vmatpush1.bf16.msra.mxu1 %v11843_v63  ;;  %7977 = vmatpush1.bf16.msra.mxu0 %v11844_v47 }
 0x7a5   :  { %7947 = vmatprep.subr.bf16.mxu1 %v11845_v13  ;;  %7979 = vmatprep.subr.bf16.mxu0 %v11846_v54  ;;  %v11860_v13 = vld [vmem:[#allocation88_spill] sm:$0xff] }
 0x7a8   :  { %7949 = vmatpush1.bf16.msra.mxu1 %v11847_v55  ;;  %7981 = vmatpush1.bf16.msra.mxu0 %v11848_v62 }
 0x7a9   :  { %7951 = vmatprep.subr.bf16.mxu1 %v11849_v61  ;;  %7983 = vmatprep.subr.bf16.mxu0 %v11850_v9  ;;  %v11861_v61 = vld [vmem:[#allocation89_spill] sm:$0xff] }
 0x7ac   :  { %7953 = vmatpush1.bf16.msra.mxu1 %v11851_v56  ;;  %7985 = vmatpush1.bf16.msra.mxu0 %v11852_v25 }
 0x7ad   :  { %7987 = vmatprep.subr.bf16.mxu1 %v11853_v46  ;;  %8019 = vmatprep.subr.bf16.mxu0 %v11854_v60  ;;  %v11862_v46 = vld [vmem:[#allocation91_spill] sm:$0xff] }
 0x842   :  { %v4112_v32 = vpop.f32.mrb[24].mxu1  ;;  %v4183_v16 = vpop.f32.mrb[32].mxu0 }
 0x843   :  { %v4210_v36 = vadd.f32 %v4193_v39, %v4112_v32  ;;  %v4114_v17 = vpop.f32.mrb[25].mxu1  ;;  %v4185_v28 = vpop.f32.mrb[33].mxu0  ;;  %v4212_v35 = vadd.f32 %v4201_v22, %v4183_v16  ;;  %v11868_v22 = vld [vmem:[#allocation74_spill] sm:$0xff] }
 0x844   :  { %v4211_v20 = vadd.f32 %v4197_v49, %v4114_v17  ;;  %v4213_v31 = vadd.f32 %v4205_v24, %v4185_v28  ;;  %v11866_v24 = vld [vmem:[#allocation72_spill] sm:$0xff] }
 0x845   :  { %v6742_v57 = vmul.f32 -1.442695, %v4210_v36 }
 0x846   :  { %v6743_v41 = vmul.f32 -1.442695, %v4211_v20  ;;  %v6744_v45 = vmul.f32 -1.442695, %v4213_v31  ;;  %v11864_v20 = vld [vmem:[#allocation68_spill] sm:$0xff]  ;;  %v11867_v31 = vld [vmem:[#allocation73_spill] sm:$0xff] }
 0x847   :  { %8729 = vpow2.f32 %v6742_v57  ;;  %v11865_v57 = vld [vmem:[#allocation69_spill] sm:$0xff] }
 0x848   :  { %8731 = vpow2.f32 %v6743_v41 }
 0x849   :  { %8733 = vpow2.f32 %v6744_v45  ;;  %v11869_v45 = vld [vmem:[#allocation75_spill] sm:$0xff] }
 0x84a   :  { %8735 = vtanh.f32 %v4212_v35  ;;  %v11870_v35 = vld [vmem:[#allocation76_spill] sm:$0xff] }
 0x851   :  { %v8730_v11 = vpop.eup %8729 }
 0x852   :  { %v8732_v19 = vpop.eup %8731  ;;  %v4218_v26 = vadd.f32 1.0, %v8730_v11  ;;  %v11871_v11 = vld [vmem:[#allocation77_spill] sm:$0xff] }
 0x853   :  { %v4224_v40 = vadd.f32 1.0, %v8732_v19  ;;  %v8734_v3 = vpop.eup %8733  ;;  %v11872_v19 = vld [vmem:[#allocation78_spill] sm:$0xff] }
 0x854   :  { %8737 = vrcp.f32 %v4218_v26  ;;  %v8736_v52 = vpop.eup %8735  ;;  %v4231_v0 = vadd.f32 1.0, %v8734_v3  ;;  %v11873_v26 = vld [vmem:[#allocation79_spill] sm:$0xff]  ;;  %v11875_v3 = vld [vmem:[#allocation81_spill] sm:$0xff] }
 0x855   :  { %8739 = vrcp.f32 %v4224_v40  ;;  %v11874_v40 = vld [vmem:[#allocation80_spill] sm:$0xff] }
 0x856   :  { %8741 = vrcp.f32 %v4231_v0  ;;  %v11877_v0 = vld [vmem:[#allocation83_spill] sm:$0xff] }
 0x85e   :  { %v8738_v14 = vpop.eup %8737 }
 0x85f   :  { %v8740_v5 = vpop.eup %8739  ;;  %v4235_v27 = vmul.f32 %v8738_v14, %v8736_v52 }
 0x860   :  { %v4234_v21 = vmul.f32 %v8740_v5, %v11859_v33  ;;  %v8742_v58 = vpop.eup %8741 }
 0x862   :  { %v10798_v48 = vadd.f32 %v4235_v27, %v4234_v21  ;;  %v4379_v63 = vpop.f32.mrb[10].mxu1  ;;  %v4450_v47 = vpop.f32.mrb[18].mxu0  ;;  %v11876_v27 = vld [vmem:[#allocation82_spill] sm:$0xff] }
 0x863   :  { %v8480_v54 = vadd.f32 %v4379_v63, %v11860_v13  ;;  %v4381_v55 = vpop.f32.mrb[11].mxu1  ;;  %v4452_v62 = vpop.f32.mrb[19].mxu0  ;;  %v8496_v32 = vadd.f32 %v4450_v47, %v9836_v12 }
 0x864   :  { %v8481_v9 = vadd.f32 %v4381_v55, %v11861_v61  ;;  %8743 = vtanh.f32 %v10798_v48  ;;  %v8497_v60 = vadd.f32 %v4452_v62, %v11862_v46  ;;  %v4973_v55 = vld [vmem:[#allocation14 + $0x68] sm:$0xff]  ;;  %v4971_v62 = vld [vmem:[#allocation14 + $0x58] sm:$0xff] }
 0x865   :  { %v6745_v56 = vmul.f32 -1.442695, %v8480_v54 }
 0x866   :  { %v6746_v25 = vmul.f32 -1.442695, %v8481_v9  ;;  %v6747_v49 = vmul.f32 -1.442695, %v8497_v60  ;;  %v4975_v9 = vld [vmem:[#allocation14 + $0x78] sm:$0xff] }
 0x867   :  { %8745 = vpow2.f32 %v6745_v56 }
 0x868   :  { %8747 = vpow2.f32 %v6746_v25  ;;  %v4972_v25 = vld [vmem:[#allocation14 + $0x60] sm:$0xff] }
 0x869   :  { %8749 = vpow2.f32 %v6747_v49  ;;  %v4970_v49 = vld [vmem:[#allocation14 + $0x50] sm:$0xff] }
 0x86a   :  { %8751 = vtanh.f32 %v8496_v32  ;;  %v4977_v32 = vld [vmem:[#allocation14 + $0x88] sm:$0xff] }
 0x86e   :  { %v8744_v39 = vpop.eup %8743 }
 0x86f   :  { %v10805_v16 = vmul.f32 %v8744_v39, %v8742_v58  ;;  %v10859_v39 = vpack.c.bf16 %v4975_v9, %v4971_v62  ;;  %v5005_v62 = vld [vmem:[#allocation14 + $0x168] sm:$0xff]  ;;  %v5003_v9 = vld [vmem:[#allocation14 + $0x158] sm:$0xff] }
 0x871   :  { %11863 = vst [vmem:[#allocation85_spill] sm:$0xff] %v10805_v16  ;;  %v8746_v36 = vpop.eup %8745  ;;  %4680 = vmatmul.mubr.f32.vlgmr.msra.gmra.mrb[26].mxu1 %v10805_v16  ;;  %4751 = vmatmul.mubr.f32.vlgmr.msra.gmra.mrb[34].mxu0 %v10805_v16  ;;  %v5287_v16 = vld [vmem:[#allocation18 + $0xc8] sm:$0xff] }
 0x872   :  { %v8748_v17 = vpop.eup %8747  ;;  %v4463_v28 = vadd.f32 1.0, %v8746_v36  ;;  %7989 = vmatpush1.bf16.msra.mxu1 %v11864_v20  ;;  %8021 = vmatpush1.bf16.msra.mxu0 %v11865_v57  ;;  %v4979_v36 = vld [vmem:[#allocation14 + $0x98] sm:$0xff]  ;;  %v4976_v57 = vld [vmem:[#allocation14 + $0x80] sm:$0xff] }
 0x873   :  { %v4469_v41 = vadd.f32 1.0, %v8748_v17  ;;  %7991 = vmatprep.subr.bf16.mxu1 %v11866_v24  ;;  %8023 = vmatprep.subr.bf16.mxu0 %v11867_v31  ;;  %v8750_v52 = vpop.eup %8749  ;;  %v4983_v17 = vld [vmem:[#allocation14 + $0xb8] sm:$0xff] }
 0x874   :  { %8753 = vrcp.f32 %v4463_v28  ;;  %4821 = vmatprep.mubr.f32.mxu1 %v11583_v15  ;;  %4892 = vmatprep.mubr.f32.mxu0 %v11583_v15  ;;  %v8752_v14 = vpop.eup %8751  ;;  %v4476_v63 = vadd.f32 1.0, %v8750_v52  ;;  %v10873_v31 = vpack.c.bf16 %v4983_v17, %v4979_v36  ;;  %v4984_v52 = vld [vmem:[#allocation14 + $0xc0] sm:$0xff]  ;;  %v5006_v36 = vld [vmem:[#allocation14 + $0x170] sm:$0xff]  ;;  %v5009_v17 = vld [vmem:[#allocation14 + $0x188] sm:$0xff] }
 0x875   :  { %8755 = vrcp.f32 %v4469_v41  ;;  %v4980_v41 = vld [vmem:[#allocation14 + $0xa0] sm:$0xff] }
 0x876   :  { %7993 = vmatpush1.bf16.msra.mxu1 %v11868_v22  ;;  %8025 = vmatpush1.bf16.msra.mxu0 %v11869_v45  ;;  %8757 = vrcp.f32 %v4476_v63  ;;  %v4978_v22 = vld [vmem:[#allocation14 + $0x90] sm:$0xff]  ;;  %v4997_v63 = vld [vmem:[#allocation14 + $0x128] sm:$0xff] }
 0x877   :  { %7995 = vmatprep.subr.bf16.mxu1 %v11870_v35  ;;  %8027 = vmatprep.subr.bf16.mxu0 %v11871_v11  ;;  %v4982_v45 = vld [vmem:[#allocation14 + $0xb0] sm:$0xff]  ;;  %v4985_v35 = vld [vmem:[#allocation14 + $0xc8] sm:$0xff] }
 0x878   :  { %v4989_v11 = vld [vmem:[#allocation14 + $0xe8] sm:$0xff] }
 0x87a   :  { %7997 = vmatpush1.bf16.msra.mxu1 %v11872_v19  ;;  %8029 = vmatpush1.bf16.msra.mxu0 %v11873_v26  ;;  %v4987_v19 = vld [vmem:[#allocation14 + $0xd8] sm:$0xff] }
 0x87b   :  { %7999 = vmatprep.subr.bf16.mxu1 %v11874_v40  ;;  %8031 = vmatprep.subr.bf16.mxu0 %v11875_v3  ;;  %v4991_v26 = vld [vmem:[#allocation14 + $0xf8] sm:$0xff]  ;;  %v10879_v40 = vpack.c.bf16 %v4980_v41, %v4976_v57  ;;  %v10881_v3 = vpack.c.bf16 %v4982_v45, %v4978_v22  ;;  %v5013_v57 = vld [vmem:[#allocation14 + $0x1a8] sm:$0xff] }
 0x87c   :  { %v5011_v41 = vld [vmem:[#allocation14 + $0x198] sm:$0xff] }
 0x87d   :  { %v5015_v22 = vld [vmem:[#allocation14 + $0x1b8] sm:$0xff] }
 0x87e   :  { %v8754_v5 = vpop.eup %8753  ;;  %8001 = vmatpush1.bf16.msra.mxu1 %v11876_v27  ;;  %8033 = vmatpush1.bf16.msra.mxu0 %v11877_v0  ;;  %v10887_v27 = vpack.c.bf16 %v4991_v26, %v4987_v19  ;;  %v4986_v0 = vld [vmem:[#allocation14 + $0xd0] sm:$0xff]  ;;  %v5012_v19 = vld [vmem:[#allocation14 + $0x1a0] sm:$0xff]  ;;  %v10921_v26 = vpack.c.bf16 %v5013_v57, %v5009_v17 }
 0x87f   :  { %v8756_v33 = vpop.eup %8755  ;;  %v4480_v21 = vmul.f32 %v8754_v5, %v8752_v14  ;;  %8003 = vmatprep.subr.bf16.mxu1 %v10669_v29  ;;  %8035 = vmatprep.subr.bf16.mxu0 %v10671_v34  ;;  %v4965_v29 = vld [vmem:[#allocation14 + $0x28] sm:$0xff]  ;;  %v4963_v34 = vld [vmem:[#allocation14 + $0x18] sm:$0xff]  ;;  %v4988_v14 = vld [vmem:[#allocation14 + $0xe0] sm:$0xff]  ;;  %v10885_v5 = vpack.c.bf16 %v4989_v11, %v4985_v35 }
 0x880   :  { %v4479_v47 = vmul.f32 %v8756_v33, %v10686_v23  ;;  %v4961_v23 = vld [vmem:[#allocation14 + $0x8] sm:$0xff]  ;;  %v8758_v56 = vpop.eup %8757  ;;  %v4990_v33 = vld [vmem:[#allocation14 + $0xf0] sm:$0xff]  ;;  %v5008_v11 = vld [vmem:[#allocation14 + $0x180] sm:$0xff] }
 0x881   :  { %v5269_v57 = vld [vmem:[#allocation18 + $0x38] sm:$0xff] }
 0x882   :  { %v10828_v54 = vadd.f32 %v4480_v21, %v4479_v47  ;;  %8005 = vmatpush1.bf16.msra.mxu1 %v10675_v50  ;;  %8037 = vmatpush1.bf16.msra.mxu0 %v10677_v37  ;;  %v4967_v50 = vld [vmem:[#allocation14 + $0x38] sm:$0xff]  ;;  %v10843_v37 = vpack.c.bf16 %v4965_v29, %v4961_v23  ;;  %v4993_v21 = vld [vmem:[#allocation14 + $0x108] sm:$0xff]  ;;  %v10891_v29 = vpack.c.bf16 %v4988_v14, %v4984_v52  ;;  %v5010_v14 = vld [vmem:[#allocation14 + $0x190] sm:$0xff] }
 0x883   :  { %8007 = vmatprep.subr.bf16.mxu1 %v10681_v1  ;;  %8039 = vmatprep.subr.bf16.mxu0 %v10683_v6  ;;  %v4960_v1 = vld [vmem:[#allocation14] sm:$0xff]  ;;  %v4995_v47 = vld [vmem:[#allocation14 + $0x118] sm:$0xff]  ;;  %v10923_v52 = vpack.c.bf16 %v5015_v22, %v5011_v41 }
 0x884   :  { %8759 = vtanh.f32 %v10828_v54  ;;  %v4964_v6 = vld [vmem:[#allocation14 + $0x20] sm:$0xff]  ;;  %v4999_v23 = vld [vmem:[#allocation14 + $0x138] sm:$0xff] }
 0x885   :  { %v5262_v41 = vld [vmem:[#allocation18] sm:$0xff] }
 0x886   :  { %8009 = vmatpush1.bf16.msra.mxu1 %v10690_v53  ;;  %8041 = vmatpush1.bf16.msra.mxu0 %v10692_v43  ;;  %v10845_v53 = vpack.c.bf16 %v4967_v50, %v4963_v34  ;;  %v4962_v43 = vld [vmem:[#allocation14 + $0x10] sm:$0xff]  ;;  %v10893_v34 = vpack.c.bf16 %v4990_v33, %v4986_v0  ;;  %v4992_v50 = vld [vmem:[#allocation14 + $0x100] sm:$0xff]  ;;  %v5017_v33 = vld [vmem:[#allocation14 + $0x1c8] sm:$0xff] }
 0x887   :  { %8011 = vmatprep.subr.bf16.mxu1 %v10696_v7  ;;  %8043 = vmatprep.subr.bf16.mxu0 %v10698_v18  ;;  %v4966_v7 = vld [vmem:[#allocation14 + $0x30] sm:$0xff]  ;;  %v4969_v18 = vld [vmem:[#allocation14 + $0x48] sm:$0xff] }
 0x888   :  { %v10857_v58 = vpack.c.bf16 %v4973_v55, %v4969_v18  ;;  %v4998_v18 = vld [vmem:[#allocation14 + $0x130] sm:$0xff]  ;;  %v5001_v55 = vld [vmem:[#allocation14 + $0x148] sm:$0xff] }
 0x889   :  { %v5014_v0 = vld [vmem:[#allocation14 + $0x1b0] sm:$0xff]  ;;  %v5266_v22 = vld [vmem:[#allocation18 + $0x20] sm:$0xff] }
 0x88a   :  { %8013 = vmatpush1.bf16.msra.mxu1 %v10703_v4  ;;  %8045 = vmatpush1.bf16.msra.mxu0 %v10705_v8  ;;  %v10849_v8 = vpack.c.bf16 %v4964_v6, %v4960_v1  ;;  %v4996_v1 = vld [vmem:[#allocation14 + $0x120] sm:$0xff]  ;;  %v10897_v6 = vpack.c.bf16 %v4997_v63, %v4993_v21  ;;  %v5021_v21 = vld [vmem:[#allocation14 + $0x1e8] sm:$0xff]  ;;  %v5019_v63 = vld [vmem:[#allocation14 + $0x1d8] sm:$0xff] }
 0x88b   :  { %8015 = vmatprep.subr.bf16.mxu1 %v10709_v44  ;;  %8047 = vmatprep.subr.bf16.mxu0 %v10711_v10  ;;  %v10851_v44 = vpack.c.bf16 %v4966_v7, %v4962_v43  ;;  %v4968_v10 = vld [vmem:[#allocation14 + $0x40] sm:$0xff]  ;;  %v10899_v43 = vpack.c.bf16 %v4999_v23, %v4995_v47  ;;  %v4994_v7 = vld [vmem:[#allocation14 + $0x110] sm:$0xff]  ;;  %v5023_v47 = vld [vmem:[#allocation14 + $0x1f8] sm:$0xff]  ;;  %v10927_v23 = vpack.c.bf16 %v5012_v19, %v5008_v11 }
 0x88c   :  { %v10865_v28 = vpack.c.bf16 %v4972_v25, %v4968_v10  ;;  %v10905_v10 = vpack.c.bf16 %v4998_v18, %v4994_v7  ;;  %v5000_v25 = vld [vmem:[#allocation14 + $0x140] sm:$0xff]  ;;  %v10933_v7 = vpack.c.bf16 %v5021_v21, %v5017_v33  ;;  %v10935_v18 = vpack.c.bf16 %v5023_v47, %v5019_v63  ;;  %v5271_v33 = vld [vmem:[#allocation18 + $0x48] sm:$0xff] }
 0x88d   :  { %v10955_v19 = vpack.c.bf16 %v5266_v22, %v5262_v41  ;;  %v5275_v21 = vld [vmem:[#allocation18 + $0x68] sm:$0xff]  ;;  %v5273_v63 = vld [vmem:[#allocation18 + $0x58] sm:$0xff] }
 0x88e   :  { %v8760_v4 = vpop.eup %8759  ;;  %8017 = vmatpush1.bf16.msra.mxu1 %v10715_v51  ;;  %8049 = vmatpush1.bf16.msra.mxu0 %v10717_v30  ;;  %v4974_v51 = vld [vmem:[#allocation14 + $0x70] sm:$0xff]  ;;  %v4981_v30 = vld [vmem:[#allocation14 + $0xa8] sm:$0xff]  ;;  %v10963_v47 = vpack.c.bf16 %v5275_v21, %v5271_v33  ;;  %v5285_v33 = vld [vmem:[#allocation18 + $0xb8] sm:$0xff] }
 0x88f   :  { %v10853_v60 = vmul.f32 %v8760_v4, %v8758_v56  ;;  %8051 = vmatprep.subr.bf16.mxu1 %v10843_v37  ;;  %8083 = vmatprep.subr.bf16.mxu0 %v10845_v53  ;;  %v10867_v20 = vpack.c.bf16 %v4974_v51, %v4970_v49  ;;  %v10871_v24 = vpack.c.bf16 %v4981_v30, %v4977_v32  ;;  %v5007_v56 = vld [vmem:[#allocation14 + $0x178] sm:$0xff]  ;;  %v5004_v49 = vld [vmem:[#allocation14 + $0x160] sm:$0xff]  ;;  %v5002_v30 = vld [vmem:[#allocation14 + $0x150] sm:$0xff] }
 0x890   :  { %v10903_v4 = vpack.c.bf16 %v4996_v1, %v4992_v50  ;;  %v10909_v51 = vpack.c.bf16 %v5005_v62, %v5001_v55  ;;  %v10911_v32 = vpack.c.bf16 %v5007_v56, %v5003_v9  ;;  %v10915_v45 = vpack.c.bf16 %v5004_v49, %v5000_v25  ;;  %v5016_v1 = vld [vmem:[#allocation14 + $0x1c0] sm:$0xff]  ;;  %v5018_v62 = vld [vmem:[#allocation14 + $0x1d0] sm:$0xff]  ;;  %11879 = vst [vmem:[#allocation38_spill] sm:$0xff] %v10963_v47 }
 0x891   :  { %4822 = vmatmul.mubr.f32.vlgmr.msra.gmra.mrb[26].mxu1 %v10853_v60  ;;  %4893 = vmatmul.mubr.f32.vlgmr.msra.gmra.mrb[34].mxu0 %v10853_v60  ;;  %v10917_v35 = vpack.c.bf16 %v5006_v36, %v5002_v30  ;;  %v10929_v50 = vpack.c.bf16 %v5014_v0, %v5010_v14  ;;  %v5020_v55 = vld [vmem:[#allocation14 + $0x1e0] sm:$0xff]  ;;  %v5022_v9 = vld [vmem:[#allocation14 + $0x1f0] sm:$0xff] }
 0x892   :  { %8053 = vmatpush1.bf16.msra.mxu1 %v10849_v8  ;;  %8085 = vmatpush1.bf16.msra.mxu0 %v10851_v44  ;;  %v10939_v56 = vpack.c.bf16 %v5020_v55, %v5016_v1  ;;  %v10941_v25 = vpack.c.bf16 %v5022_v9, %v5018_v62  ;;  %v5263_v49 = vld [vmem:[#allocation18 + $0x8] sm:$0xff]  ;;  %v5265_v36 = vld [vmem:[#allocation18 + $0x18] sm:$0xff]  ;;  %v5264_v14 = vld [vmem:[#allocation18 + $0x10] sm:$0xff] }
 0x893   :  { %8055 = vmatprep.subr.bf16.mxu1 %v10857_v58  ;;  %8087 = vmatprep.subr.bf16.mxu0 %v10859_v39  ;;  %v5267_v30 = vld [vmem:[#allocation18 + $0x28] sm:$0xff]  ;;  %v10953_v11 = vpack.c.bf16 %v5269_v57, %v5265_v36  ;;  %v5268_v0 = vld [vmem:[#allocation18 + $0x30] sm:$0xff]  ;;  %v5277_v1 = vld [vmem:[#allocation18 + $0x78] sm:$0xff] }
 0x894   :  { %5088 = vmatprep.mubr.f32.mxu1 %v11583_v15  ;;  %5159 = vmatprep.mubr.f32.mxu0 %v11583_v15  ;;  %v10951_v17 = vpack.c.bf16 %v5267_v30, %v5263_v49  ;;  %v5270_v55 = vld [vmem:[#allocation18 + $0x40] sm:$0xff]  ;;  %v10965_v9 = vpack.c.bf16 %v5277_v1, %v5273_v63  ;;  %v5272_v30 = vld [vmem:[#allocation18 + $0x50] sm:$0xff]  ;;  %v5279_v41 = vld [vmem:[#allocation18 + $0x88] sm:$0xff] }
 0x895   :  { %v5274_v62 = vld [vmem:[#allocation18 + $0x60] sm:$0xff]  ;;  %v5276_v36 = vld [vmem:[#allocation18 + $0x70] sm:$0xff]  ;;  %v5283_v22 = vld [vmem:[#allocation18 + $0xa8] sm:$0xff] }
 0x896   :  { %8057 = vmatpush1.bf16.msra.mxu1 %v10865_v28  ;;  %8089 = vmatpush1.bf16.msra.mxu0 %v10867_v20  ;;  %11880 = vst [vmem:[#allocation39_spill] sm:$0xff] %v10965_v9  ;;  %v10967_v49 = vpack.c.bf16 %v5274_v62, %v5270_v55  ;;  %v10970_v57 = vpack.c.bf16 %v5276_v36, %v5272_v30  ;;  %v5278_v21 = vld [vmem:[#allocation18 + $0x80] sm:$0xff]  ;;  %v5280_v62 = vld [vmem:[#allocation18 + $0x90] sm:$0xff] }
 0x897   :  { %8059 = vmatprep.subr.bf16.mxu1 %v10871_v24  ;;  %8091 = vmatprep.subr.bf16.mxu0 %v10873_v31  ;;  %v5282_v63 = vld [vmem:[#allocation18 + $0xa0] sm:$0xff]  ;;  %v5284_v30 = vld [vmem:[#allocation18 + $0xb0] sm:$0xff] }
 0x898   :  { %11881 = vst [vmem:[#allocation40_spill] sm:$0xff] %v10967_v49  ;;  %11882 = vst [vmem:[#allocation41_spill] sm:$0xff] %v10970_v57  ;;  %v10979_v55 = vpack.c.bf16 %v5282_v63, %v5278_v21  ;;  %v10982_v36 = vpack.c.bf16 %v5284_v30, %v5280_v62  ;;  %v5290_v21 = vld [vmem:[#allocation18 + $0xe0] sm:$0xff]  ;;  %v5288_v62 = vld [vmem:[#allocation18 + $0xd0] sm:$0xff] }
 0x899   :  { %v5292_v30 = vld [vmem:[#allocation18 + $0xf0] sm:$0xff] }
 0x89a   :  { %8061 = vmatpush1.bf16.msra.mxu1 %v10879_v40  ;;  %8093 = vmatpush1.bf16.msra.mxu0 %v10881_v3  ;;  %11885 = vst [vmem:[#allocation44_spill] sm:$0xff] %v10979_v55  ;;  %11886 = vst [vmem:[#allocation45_spill] sm:$0xff] %v10982_v36 }
 0x89b   :  { %8063 = vmatprep.subr.bf16.mxu1 %v10885_v5  ;;  %8095 = vmatprep.subr.bf16.mxu0 %v10887_v27 }
 0x89e   :  { %8065 = vmatpush1.bf16.msra.mxu1 %v10891_v29  ;;  %8097 = vmatpush1.bf16.msra.mxu0 %v10893_v34 }
 0x89f   :  { %8067 = vmatprep.subr.bf16.mxu1 %v10897_v6  ;;  %8099 = vmatprep.subr.bf16.mxu0 %v10899_v43 }
 0x8a2   :  { %8069 = vmatpush1.bf16.msra.mxu1 %v10903_v4  ;;  %8101 = vmatpush1.bf16.msra.mxu0 %v10905_v10 }
 0x8a3   :  { %8071 = vmatprep.subr.bf16.mxu1 %v10909_v51  ;;  %8103 = vmatprep.subr.bf16.mxu0 %v10911_v32 }
 0x8a6   :  { %8073 = vmatpush1.bf16.msra.mxu1 %v10915_v45  ;;  %8105 = vmatpush1.bf16.msra.mxu0 %v10917_v35 }
 0x8a7   :  { %8075 = vmatprep.subr.bf16.mxu1 %v10921_v26  ;;  %8107 = vmatprep.subr.bf16.mxu0 %v10923_v52 }
 0x8aa   :  { %8077 = vmatpush1.bf16.msra.mxu1 %v10927_v23  ;;  %8109 = vmatpush1.bf16.msra.mxu0 %v10929_v50 }
 0x8ab   :  { %8079 = vmatprep.subr.bf16.mxu1 %v10933_v7  ;;  %8111 = vmatprep.subr.bf16.mxu0 %v10935_v18 }
 0x8ae   :  { %8081 = vmatpush1.bf16.msra.mxu1 %v10939_v56  ;;  %8113 = vmatpush1.bf16.msra.mxu0 %v10941_v25 }
 0x8af   :  { %8115 = vmatprep.subr.bf16.mxu1 %v10951_v17  ;;  %8147 = vmatprep.subr.bf16.mxu0 %v10953_v11 }
 0x8b1   :  { %5089 = vmatmul.mubr.f32.vlgmr.msra.gmra.mrb[12].mxu1 %v10853_v60  ;;  %5160 = vmatmul.mubr.f32.vlgmr.msra.gmra.mrb[20].mxu0 %v10853_v60  ;;  %v10958_v60 = vpack.c.bf16 %v5268_v0, %v5264_v14  ;;  %v5281_v14 = vld [vmem:[#allocation18 + $0x98] sm:$0xff]  ;;  %v10975_v0 = vpack.c.bf16 %v5283_v22, %v5279_v41  ;;  %v5291_v41 = vld [vmem:[#allocation18 + $0xe8] sm:$0xff] }
 0x8b2   :  { %5390 = vmatprep.mubr.f32.mxu1 %v11583_v15  ;;  %5461 = vmatprep.mubr.f32.mxu0 %v11583_v15  ;;  %v10977_v1 = vpack.c.bf16 %v5285_v33, %v5281_v14  ;;  %v5289_v22 = vld [vmem:[#allocation18 + $0xd8] sm:$0xff]  ;;  %v5286_v33 = vld [vmem:[#allocation18 + $0xc0] sm:$0xff] }
 0x8b3   :  { %11878 = vst [vmem:[#allocation37_spill] sm:$0xff] %v10958_v60  ;;  %8117 = vmatpush1.bf16.msra.mxu1 %v10955_v19  ;;  %8149 = vmatpush1.bf16.msra.mxu0 %v10958_v60  ;;  %11883 = vst [vmem:[#allocation42_spill] sm:$0xff] %v10975_v0  ;;  %v5293_v14 = vld [vmem:[#allocation18 + $0xf8] sm:$0xff] }
 0x8b4   :  { %8119 = vmatprep.subr.bf16.mxu1 %v10963_v47  ;;  %8151 = vmatprep.subr.bf16.mxu0 %v10965_v9  ;;  %11884 = vst [vmem:[#allocation43_spill] sm:$0xff] %v10977_v1  ;;  %v10989_v63 = vpack.c.bf16 %v5293_v14, %v5289_v22  ;;  %v5301_v22 = vld [vmem:[#allocation18 + $0x138] sm:$0xff]  ;;  %v5294_v14 = vld [vmem:[#allocation18 + $0x100] sm:$0xff] }
 0x8b5   :  { %v5216_v60 = vld [vmem:[#allocation17 + $0x98] sm:$0xff] }
 0x8b6   :  { %11888 = vst [vmem:[#allocation47_spill] sm:$0xff] %v10989_v63 }
 0x8b7   :  { %8121 = vmatpush1.bf16.msra.mxu1 %v10967_v49  ;;  %8153 = vmatpush1.bf16.msra.mxu0 %v10970_v57  ;;  %v10987_v57 = vpack.c.bf16 %v5291_v41, %v5287_v16  ;;  %v10991_v49 = vpack.c.bf16 %v5290_v21, %v5286_v33  ;;  %v5299_v16 = vld [vmem:[#allocation18 + $0x128] sm:$0xff]  ;;  %v5297_v41 = vld [vmem:[#allocation18 + $0x118] sm:$0xff]  ;;  %v5298_v33 = vld [vmem:[#allocation18 + $0x120] sm:$0xff] }
 0x8b8   :  { %8123 = vmatprep.subr.bf16.mxu1 %v10975_v0  ;;  %8155 = vmatprep.subr.bf16.mxu0 %v10977_v1  ;;  %v10994_v1 = vpack.c.bf16 %v5292_v30, %v5288_v62  ;;  %v11001_v21 = vpack.c.bf16 %v5301_v22, %v5297_v41  ;;  %v11003_v0 = vpack.c.bf16 %v5298_v33, %v5294_v14  ;;  %v5296_v62 = vld [vmem:[#allocation18 + $0x110] sm:$0xff]  ;;  %v5309_v41 = vld [vmem:[#allocation18 + $0x178] sm:$0xff]  ;;  %v5302_v22 = vld [vmem:[#allocation18 + $0x140] sm:$0xff] }
 0x8b9   :  { %11887 = vst [vmem:[#allocation46_spill] sm:$0xff] %v10987_v57  ;;  %11889 = vst [vmem:[#allocation48_spill] sm:$0xff] %v10991_v49  ;;  %v5300_v30 = vld [vmem:[#allocation18 + $0x130] sm:$0xff]  ;;  %v5306_v14 = vld [vmem:[#allocation18 + $0x160] sm:$0xff] }
 0x8ba   :  { %11890 = vst [vmem:[#allocation49_spill] sm:$0xff] %v10994_v1  ;;  %11892 = vst [vmem:[#allocation51_spill] sm:$0xff] %v11001_v21 }
 0x8bb   :  { %8125 = vmatpush1.bf16.msra.mxu1 %v10979_v55  ;;  %8157 = vmatpush1.bf16.msra.mxu0 %v10982_v36  ;;  %v5295_v36 = vld [vmem:[#allocation18 + $0x108] sm:$0xff]  ;;  %11893 = vst [vmem:[#allocation52_spill] sm:$0xff] %v11003_v0 }
 0x8bc   :  { %8127 = vmatprep.subr.bf16.mxu1 %v10987_v57  ;;  %8159 = vmatprep.subr.bf16.mxu0 %v10989_v63  ;;  %v10999_v55 = vpack.c.bf16 %v5299_v16, %v5295_v36  ;;  %v11006_v63 = vpack.c.bf16 %v5300_v30, %v5296_v62  ;;  %v5307_v36 = vld [vmem:[#allocation18 + $0x168] sm:$0xff]  ;;  %v5305_v16 = vld [vmem:[#allocation18 + $0x158] sm:$0xff]  ;;  %v11015_v57 = vpack.c.bf16 %v5306_v14, %v5302_v22  ;;  %v5304_v62 = vld [vmem:[#allocation18 + $0x150] sm:$0xff] }
 0x8bd   :  { %v11013_v33 = vpack.c.bf16 %v5309_v41, %v5305_v16  ;;  %v5308_v30 = vld [vmem:[#allocation18 + $0x170] sm:$0xff]  ;;  %v5317_v16 = vld [vmem:[#allocation18 + $0x1b8] sm:$0xff]  ;;  %v5310_v41 = vld [vmem:[#allocation18 + $0x180] sm:$0xff] }
 0x8be   :  { %11891 = vst [vmem:[#allocation50_spill] sm:$0xff] %v10999_v55  ;;  %11894 = vst [vmem:[#allocation53_spill] sm:$0xff] %v11006_v63  ;;  %v5314_v22 = vld [vmem:[#allocation18 + $0x1a0] sm:$0xff] }
 0x8bf   :  { %8129 = vmatpush1.bf16.msra.mxu1 %v10991_v49  ;;  %8161 = vmatpush1.bf16.msra.mxu0 %v10994_v1  ;;  %v5303_v1 = vld [vmem:[#allocation18 + $0x148] sm:$0xff]  ;;  %11896 = vst [vmem:[#allocation55_spill] sm:$0xff] %v11013_v33  ;;  %11897 = vst [vmem:[#allocation56_spill] sm:$0xff] %v11015_v57 }
 0x8c0   :  { %8131 = vmatprep.subr.bf16.mxu1 %v10999_v55  ;;  %8163 = vmatprep.subr.bf16.mxu0 %v11001_v21  ;;  %v11011_v49 = vpack.c.bf16 %v5307_v36, %v5303_v1  ;;  %v11018_v21 = vpack.c.bf16 %v5308_v30, %v5304_v62  ;;  %v5315_v1 = vld [vmem:[#allocation18 + $0x1a8] sm:$0xff]  ;;  %v5313_v36 = vld [vmem:[#allocation18 + $0x198] sm:$0xff]  ;;  %v11027_v55 = vpack.c.bf16 %v5314_v22, %v5310_v41  ;;  %v5312_v62 = vld [vmem:[#allocation18 + $0x190] sm:$0xff] }
 0x8c1   :  { %v11025_v14 = vpack.c.bf16 %v5317_v16, %v5313_v36  ;;  %v5316_v30 = vld [vmem:[#allocation18 + $0x1b0] sm:$0xff]  ;;  %v5325_v36 = vld [vmem:[#allocation18 + $0x1f8] sm:$0xff]  ;;  %v5318_v16 = vld [vmem:[#allocation18 + $0x1c0] sm:$0xff] }
 0x8c2   :  { %11895 = vst [vmem:[#allocation54_spill] sm:$0xff] %v11011_v49  ;;  %11898 = vst [vmem:[#allocation57_spill] sm:$0xff] %v11018_v21  ;;  %v5322_v41 = vld [vmem:[#allocation18 + $0x1e0] sm:$0xff] }
 0x8c3   :  { %8133 = vmatpush1.bf16.msra.mxu1 %v11003_v0  ;;  %8165 = vmatpush1.bf16.msra.mxu0 %v11006_v63  ;;  %v5311_v63 = vld [vmem:[#allocation18 + $0x188] sm:$0xff]  ;;  %11900 = vst [vmem:[#allocation59_spill] sm:$0xff] %v11025_v14  ;;  %11901 = vst [vmem:[#allocation60_spill] sm:$0xff] %v11027_v55 }
 0x8c4   :  { %8135 = vmatprep.subr.bf16.mxu1 %v11011_v49  ;;  %8167 = vmatprep.subr.bf16.mxu0 %v11013_v33  ;;  %v11023_v0 = vpack.c.bf16 %v5315_v1, %v5311_v63  ;;  %v11030_v33 = vpack.c.bf16 %v5316_v30, %v5312_v62  ;;  %v5323_v63 = vld [vmem:[#allocation18 + $0x1e8] sm:$0xff]  ;;  %v5321_v1 = vld [vmem:[#allocation18 + $0x1d8] sm:$0xff]  ;;  %v11039_v49 = vpack.c.bf16 %v5322_v41, %v5318_v16  ;;  %v5320_v62 = vld [vmem:[#allocation18 + $0x1d0] sm:$0xff] }
 0x8c5   :  { %v11037_v22 = vpack.c.bf16 %v5325_v36, %v5321_v1  ;;  %v5324_v30 = vld [vmem:[#allocation18 + $0x1f0] sm:$0xff]  ;;  %v5204_v1 = vld [vmem:[#allocation17 + $0x38] sm:$0xff]  ;;  %v4899_v16 = vld [vmem:[#allocation20] sm:$0xf] }
 0x8c6   :  { %11899 = vst [vmem:[#allocation58_spill] sm:$0xff] %v11023_v0  ;;  %11902 = vst [vmem:[#allocation61_spill] sm:$0xff] %v11030_v33  ;;  %v4904_v41 = vrot.slane %v4899_v16, %v11855_v2 }
 0x8c7   :  { %8137 = vmatpush1.bf16.msra.mxu1 %v11015_v57  ;;  %8169 = vmatpush1.bf16.msra.mxu0 %v11018_v21  ;;  %v5319_v21 = vld [vmem:[#allocation18 + $0x1c8] sm:$0xff]  ;;  %11904 = vst [vmem:[#allocation63_spill] sm:$0xff] %v11037_v22  ;;  %11905 = vst [vmem:[#allocation64_spill] sm:$0xff] %v11039_v49 }
 0x8c8   :  { %8139 = vmatprep.subr.bf16.mxu1 %v11023_v0  ;;  %8171 = vmatprep.subr.bf16.mxu0 %v11025_v14  ;;  %v11035_v57 = vpack.c.bf16 %v5323_v63, %v5319_v21  ;;  %v11042_v14 = vpack.c.bf16 %v5324_v30, %v5320_v62  ;;  %v5202_v21 = vld [vmem:[#allocation17 + $0x28] sm:$0xff]  ;;  %v5200_v63 = vld [vmem:[#allocation17 + $0x18] sm:$0xff]  ;;  %v4908_v62 = vrot.slane %v4899_v16, %v11856_v42 }
 0x8c9   :  { %v11049_v36 = vpack.c.bf16 %v5204_v1, %v5200_v63  ;;  %v4916_v63 = vrot.slane %v4899_v16, %v11857_v59  ;;  %v5218_v59 = vld [vmem:[#allocation17 + $0xa8] sm:$0xff] }
 0x8ca   :  { %11903 = vst [vmem:[#allocation62_spill] sm:$0xff] %v11035_v57  ;;  %11906 = vst [vmem:[#allocation65_spill] sm:$0xff] %v11042_v14 }
 0x8cb   :  { %8141 = vmatpush1.bf16.msra.mxu1 %v11027_v55  ;;  %8173 = vmatpush1.bf16.msra.mxu0 %v11030_v33  ;;  %v5198_v33 = vld [vmem:[#allocation17 + $0x8] sm:$0xff]  ;;  %11908 = vst [vmem:[#allocation67_spill] sm:$0xff] %v11049_v36 }
 0x8cc   :  { %8143 = vmatprep.subr.bf16.mxu1 %v11035_v57  ;;  %8175 = vmatprep.subr.bf16.mxu0 %v11037_v22  ;;  %v11047_v55 = vpack.c.bf16 %v5202_v21, %v5198_v33 }
 0x8ce   :  { %11907 = vst [vmem:[#allocation66_spill] sm:$0xff] %v11047_v55 }
 0x8cf   :  { %8145 = vmatpush1.bf16.msra.mxu1 %v11039_v49  ;;  %8177 = vmatpush1.bf16.msra.mxu0 %v11042_v14 }
 0x8d0   :  { %8179 = vmatprep.subr.bf16.mxu1 %v11047_v55  ;;  %8211 = vmatprep.subr.bf16.mxu0 %v11049_v36  ;;  %v4912_v36 = vrot.slane %v4899_v16, %v11858_v38  ;;  %v5214_v38 = vld [vmem:[#allocation17 + $0x88] sm:$0xff] }
 0x964   :  { %v4823_v30 = vpop.f32.mrb[26].mxu1  ;;  %v4894_v49 = vpop.f32.mrb[34].mxu0 }
 0x965   :  { %v4921_v22 = vadd.f32 %v4904_v41, %v4823_v30  ;;  %v4825_v57 = vpop.f32.mrb[27].mxu1  ;;  %v4896_v0 = vpop.f32.mrb[35].mxu0  ;;  %v4923_v9 = vadd.f32 %v4912_v36, %v4894_v49 }
 0x966   :  { %v4922_v14 = vadd.f32 %v4908_v62, %v4825_v57  ;;  %v4924_v1 = vadd.f32 %v4916_v63, %v4896_v0 }
 0x967   :  { %v6748_v33 = vmul.f32 -1.442695, %v4921_v22 }
 0x968   :  { %v6749_v21 = vmul.f32 -1.442695, %v4922_v14  ;;  %v6750_v55 = vmul.f32 -1.442695, %v4924_v1  ;;  %v5201_v1 = vld [vmem:[#allocation17 + $0x20] sm:$0xff] }
 0x969   :  { %8761 = vpow2.f32 %v6748_v33 }
 0x96a   :  { %8763 = vpow2.f32 %v6749_v21 }
 0x96b   :  { %8765 = vpow2.f32 %v6750_v55 }
 0x96c   :  { %8767 = vtanh.f32 %v4923_v9 }
 0x973   :  { %v8762_v2 = vpop.eup %8761 }
 0x974   :  { %v8764_v47 = vpop.eup %8763  ;;  %v4929_v42 = vadd.f32 1.0, %v8762_v2 }
 0x975   :  { %v4935_v41 = vadd.f32 1.0, %v8764_v47  ;;  %v8766_v57 = vpop.eup %8765 }
 0x976   :  { %8769 = vrcp.f32 %v4929_v42  ;;  %v8768_v22 = vpop.eup %8767  ;;  %v4942_v33 = vadd.f32 1.0, %v8766_v57  ;;  %v5203_v57 = vld [vmem:[#allocation17 + $0x30] sm:$0xff] }
 0x977   :  { %8771 = vrcp.f32 %v4935_v41  ;;  %v5199_v41 = vld [vmem:[#allocation17 + $0x10] sm:$0xff] }
 0x978   :  { %8773 = vrcp.f32 %v4942_v33 }
 0x980   :  { %v8770_v14 = vpop.eup %8769 }
 0x981   :  { %v8772_v62 = vpop.eup %8771  ;;  %v4946_v30 = vmul.f32 %v8770_v14, %v8768_v22  ;;  %v5206_v22 = vld [vmem:[#allocation17 + $0x48] sm:$0xff] }
 0x982   :  { %v4945_v0 = vmul.f32 %v8772_v62, %v10798_v48  ;;  %v5197_v48 = vld [vmem:[#allocation17] sm:$0xff]  ;;  %v5210_v14 = vld [vmem:[#allocation17 + $0x68] sm:$0xff]  ;;  %v5208_v62 = vld [vmem:[#allocation17 + $0x58] sm:$0xff]  ;;  %v8774_v33 = vpop.eup %8773 }
 0x984   :  { %v11058_v21 = vadd.f32 %v4946_v30, %v4945_v0  ;;  %v5090_v16 = vpop.f32.mrb[12].mxu1  ;;  %v5161_v49 = vpop.f32.mrb[20].mxu0  ;;  %v5212_v30 = vld [vmem:[#allocation17 + $0x78] sm:$0xff] }
 0x985   :  { %v8482_v2 = vadd.f32 %v5090_v16, %v11860_v13  ;;  %v5092_v55 = vpop.f32.mrb[13].mxu1  ;;  %v5163_v9 = vpop.f32.mrb[21].mxu0  ;;  %v5207_v13 = vld [vmem:[#allocation17 + $0x50] sm:$0xff] }
 0x986   :  { %11909 = vst [vmem:[#allocation68_spill] sm:$0xff] %v11058_v21  ;;  %v8483_v42 = vadd.f32 %v5092_v55, %v11861_v61  ;;  %8775 = vtanh.f32 %v11058_v21  ;;  %v8499_v63 = vadd.f32 %v5163_v9, %v11862_v46  ;;  %v11064_v55 = vpack.c.bf16 %v5201_v1, %v5197_v48  ;;  %v5211_v21 = vld [vmem:[#allocation17 + $0x70] sm:$0xff] }
 0x987   :  { %v6751_v47 = vmul.f32 -1.442695, %v8482_v2  ;;  %v11066_v61 = vpack.c.bf16 %v5203_v57, %v5199_v41  ;;  %v5205_v2 = vld [vmem:[#allocation17 + $0x40] sm:$0xff]  ;;  %v11073_v46 = vpack.c.bf16 %v5212_v30, %v5208_v62  ;;  %v11081_v57 = vpack.c.bf16 %v5211_v21, %v5207_v13  ;;  %v5228_v13 = vld [vmem:[#allocation17 + $0xf8] sm:$0xff] }
 0x988   :  { %v6752_v36 = vmul.f32 -1.442695, %v8483_v42  ;;  %v6753_v16 = vmul.f32 -1.442695, %v8499_v63  ;;  %11910 = vst [vmem:[#allocation69_spill] sm:$0xff] %v11064_v55  ;;  %v5209_v42 = vld [vmem:[#allocation17 + $0x60] sm:$0xff]  ;;  %v11085_v30 = vpack.c.bf16 %v5218_v59, %v5214_v38 }
 0x989   :  { %8777 = vpow2.f32 %v6751_v47  ;;  %11911 = vst [vmem:[#allocation72_spill] sm:$0xff] %v11066_v61  ;;  %v8498_v47 = vadd.f32 %v5161_v49, %v9836_v12  ;;  %11914 = vst [vmem:[#allocation75_spill] sm:$0xff] %v11073_v46  ;;  %v5220_v63 = vld [vmem:[#allocation17 + $0xb8] sm:$0xff]  ;;  %v11079_v49 = vpack.c.bf16 %v5209_v42, %v5205_v2  ;;  %v5226_v2 = vld [vmem:[#allocation17 + $0xe8] sm:$0xff] }
 0x98a   :  { %8779 = vpow2.f32 %v6752_v36  ;;  %v11071_v36 = vpack.c.bf16 %v5210_v14, %v5206_v22  ;;  %11916 = vst [vmem:[#allocation77_spill] sm:$0xff] %v11081_v57  ;;  %v5213_v22 = vld [vmem:[#allocation17 + $0x80] sm:$0xff]  ;;  %11917 = vst [vmem:[#allocation78_spill] sm:$0xff] %v11085_v30  ;;  %v5224_v42 = vld [vmem:[#allocation17 + $0xd8] sm:$0xff] }
 0x98b   :  { %8781 = vpow2.f32 %v6753_v16  ;;  %11915 = vst [vmem:[#allocation76_spill] sm:$0xff] %v11079_v49  ;;  %v5217_v14 = vld [vmem:[#allocation17 + $0xa0] sm:$0xff]  ;;  %v5219_v16 = vld [vmem:[#allocation17 + $0xb0] sm:$0xff] }
 0x98c   :  { %11913 = vst [vmem:[#allocation74_spill] sm:$0xff] %v11071_v36  ;;  %8783 = vtanh.f32 %v8498_v47  ;;  %v11093_v59 = vpack.c.bf16 %v5217_v14, %v5213_v22  ;;  %v5225_v21 = vld [vmem:[#allocation17 + $0xe0] sm:$0xff] }
 0x98e   :  { %11919 = vst [vmem:[#allocation80_spill] sm:$0xff] %v11093_v59 }
 0x990   :  { %v8776_v0 = vpop.eup %8775 }
 0x991   :  { %v11069_v9 = vmul.f32 %v8776_v0, %v8774_v33  ;;  %v11087_v33 = vpack.c.bf16 %v5220_v63, %v5216_v60  ;;  %v5215_v0 = vld [vmem:[#allocation17 + $0x90] sm:$0xff]  ;;  %v5221_v60 = vld [vmem:[#allocation17 + $0xc0] sm:$0xff]  ;;  %v11101_v63 = vpack.c.bf16 %v5228_v13, %v5224_v42 }
 0x992   :  { %v11095_v38 = vpack.c.bf16 %v5219_v16, %v5215_v0  ;;  %v11105_v22 = vpack.c.bf16 %v5225_v21, %v5221_v60  ;;  %v5229_v0 = vld [vmem:[#allocation17 + $0x100] sm:$0xff]  ;;  %v5231_v42 = vld [vmem:[#allocation17 + $0x110] sm:$0xff]  ;;  %v5244_v60 = vld [vmem:[#allocation17 + $0x178] sm:$0xff] }
 0x993   :  { %11912 = vst [vmem:[#allocation73_spill] sm:$0xff] %v11069_v9  ;;  %v8778_v48 = vpop.eup %8777  ;;  %5391 = vmatmul.mubr.f32.vlgmr.msra.gmra.mrb[28].mxu1 %v11069_v9  ;;  %5462 = vmatmul.mubr.f32.vlgmr.msra.gmra.mrb[36].mxu0 %v11069_v9  ;;  %11918 = vst [vmem:[#allocation79_spill] sm:$0xff] %v11087_v33  ;;  %v5234_v9 = vld [vmem:[#allocation17 + $0x128] sm:$0xff]  ;;  %v5233_v16 = vld [vmem:[#allocation17 + $0x120] sm:$0xff] }
 0x994   :  { %v8780_v1 = vpop.eup %8779  ;;  %v5174_v41 = vadd.f32 1.0, %v8778_v48  ;;  %8181 = vmatpush1.bf16.msra.mxu1 %v11064_v55  ;;  %8213 = vmatpush1.bf16.msra.mxu0 %v11066_v61  ;;  %v5222_v48 = vld [vmem:[#allocation17 + $0xc8] sm:$0xff]  ;;  %11920 = vst [vmem:[#allocation81_spill] sm:$0xff] %v11095_v38  ;;  %11922 = vst [vmem:[#allocation83_spill] sm:$0xff] %v11101_v63  ;;  %v5235_v13 = vld [vmem:[#allocation17 + $0x130] sm:$0xff] }
 0x995   :  { %v5180_v62 = vadd.f32 1.0, %v8780_v1  ;;  %8183 = vmatprep.subr.bf16.mxu1 %v11071_v36  ;;  %8215 = vmatprep.subr.bf16.mxu0 %v11073_v46  ;;  %v11099_v47 = vpack.c.bf16 %v5226_v2, %v5222_v48  ;;  %v5223_v1 = vld [vmem:[#allocation17 + $0xd0] sm:$0xff]  ;;  %11923 = vst [vmem:[#allocation93_spill] sm:$0xff] %v11105_v22 }
 0x996   :  { %8785 = vrcp.f32 %v5174_v41  ;;  %5532 = vmatprep.mubr.f32.mxu1 %v11583_v15  ;;  %5603 = vmatprep.mubr.f32.mxu0 %v11583_v15  ;;  %v5227_v41 = vld [vmem:[#allocation17 + $0xf0] sm:$0xff] }
 0x997   :  { %8787 = vrcp.f32 %v5180_v62  ;;  %11921 = vst [vmem:[#allocation82_spill] sm:$0xff] %v11099_v47  ;;  %v5230_v62 = vld [vmem:[#allocation17 + $0x108] sm:$0xff]  ;;  %v11107_v14 = vpack.c.bf16 %v5227_v41, %v5223_v1  ;;  %v11117_v41 = vpack.c.bf16 %v5233_v16, %v5229_v0  ;;  %v5243_v61 = vld [vmem:[#allocation17 + $0x170] sm:$0xff] }
 0x998   :  { %8185 = vmatpush1.bf16.msra.mxu1 %v11079_v49  ;;  %8217 = vmatpush1.bf16.msra.mxu0 %v11081_v57  ;;  %v5232_v49 = vld [vmem:[#allocation17 + $0x118] sm:$0xff]  ;;  %v11111_v48 = vpack.c.bf16 %v5234_v9, %v5230_v62  ;;  %v5237_v9 = vld [vmem:[#allocation17 + $0x140] sm:$0xff]  ;;  %v5250_v16 = vld [vmem:[#allocation17 + $0x1a8] sm:$0xff] }
 0x999   :  { %8187 = vmatprep.subr.bf16.mxu1 %v11085_v30  ;;  %8219 = vmatprep.subr.bf16.mxu0 %v11087_v33  ;;  %v5236_v57 = vld [vmem:[#allocation17 + $0x138] sm:$0xff]  ;;  %11924 = vst [vmem:[#allocation94_spill] sm:$0xff] %v11107_v14  ;;  %v5238_v33 = vld [vmem:[#allocation17 + $0x148] sm:$0xff] }
 0x99a   :  { %v11113_v2 = vpack.c.bf16 %v5236_v57, %v5232_v49  ;;  %v5242_v30 = vld [vmem:[#allocation17 + $0x168] sm:$0xff]  ;;  %v5241_v49 = vld [vmem:[#allocation17 + $0x160] sm:$0xff] }
 0x99b   :  { %v11123_v46 = vpack.c.bf16 %v5242_v30, %v5238_v33  ;;  %v5245_v33 = vld [vmem:[#allocation17 + $0x180] sm:$0xff] }
 0x99c   :  { %8189 = vmatpush1.bf16.msra.mxu1 %v11093_v59  ;;  %8221 = vmatpush1.bf16.msra.mxu0 %v11095_v38  ;;  %v8782_v59 = vpop.eup %8781  ;;  %v5240_v38 = vld [vmem:[#allocation17 + $0x158] sm:$0xff] }
 0x99d   :  { %8191 = vmatprep.subr.bf16.mxu1 %v11099_v47  ;;  %8223 = vmatprep.subr.bf16.mxu0 %v11101_v63  ;;  %v8784_v21 = vpop.eup %8783  ;;  %v11119_v63 = vpack.c.bf16 %v5235_v13, %v5231_v42  ;;  %v5187_v47 = vadd.f32 1.0, %v8782_v59  ;;  %v11125_v36 = vpack.c.bf16 %v5244_v60, %v5240_v38  ;;  %v5248_v42 = vld [vmem:[#allocation17 + $0x198] sm:$0xff]  ;;  %v11132_v59 = vpack.c.bf16 %v5241_v49, %v5237_v9  ;;  %v5249_v38 = vld [vmem:[#allocation17 + $0x1a0] sm:$0xff] }
 0x99e   :  { %v5252_v13 = vld [vmem:[#allocation17 + $0x1b8] sm:$0xff] }
 0x99f   :  { %8789 = vrcp.f32 %v5187_v47  ;;  %v11140_v60 = vpack.c.bf16 %v5252_v13, %v5248_v42  ;;  %v5260_v9 = vld [vmem:[#allocation17 + $0x1f8] sm:$0xff]  ;;  %v5255_v42 = vld [vmem:[#allocation17 + $0x1d0] sm:$0xff] }
 0x9a0   :  { %v8786_v1 = vpop.eup %8785  ;;  %8193 = vmatpush1.bf16.msra.mxu1 %v11105_v22  ;;  %8225 = vmatpush1.bf16.msra.mxu0 %v11107_v14  ;;  %v5239_v22 = vld [vmem:[#allocation17 + $0x150] sm:$0xff]  ;;  %v5246_v14 = vld [vmem:[#allocation17 + $0x188] sm:$0xff] }
 0x9a1   :  { %v8788_v57 = vpop.eup %8787  ;;  %v5191_v62 = vmul.f32 %v8786_v1, %v8784_v21  ;;  %8195 = vmatprep.subr.bf16.mxu1 %v11111_v48  ;;  %8227 = vmatprep.subr.bf16.mxu0 %v11113_v2  ;;  %v11134_v30 = vpack.c.bf16 %v5243_v61, %v5239_v22  ;;  %v5247_v21 = vld [vmem:[#allocation17 + $0x190] sm:$0xff]  ;;  %v11145_v61 = vpack.c.bf16 %v5249_v38, %v5245_v33  ;;  %v5253_v22 = vld [vmem:[#allocation17 + $0x1c0] sm:$0xff] }
 0x9a2   :  { %v5190_v0 = vmul.f32 %v8788_v57, %v10828_v54  ;;  %v11138_v54 = vpack.c.bf16 %v5250_v16, %v5246_v14  ;;  %v5251_v1 = vld [vmem:[#allocation17 + $0x1b0] sm:$0xff]  ;;  %v5254_v57 = vld [vmem:[#allocation17 + $0x1c8] sm:$0xff]  ;;  %v5257_v16 = vld [vmem:[#allocation17 + $0x1e0] sm:$0xff] }
 0x9a3   :  { %v11147_v47 = vpack.c.bf16 %v5251_v1, %v5247_v21  ;;  %v5259_v13 = vld [vmem:[#allocation17 + $0x1f0] sm:$0xff]  ;;  %v11157_v33 = vpack.c.bf16 %v5257_v16, %v5253_v22 }
 0x9a4   :  { %v11128_v55 = vadd.f32 %v5191_v62, %v5190_v0  ;;  %8197 = vmatpush1.bf16.msra.mxu1 %v11117_v41  ;;  %8229 = vmatpush1.bf16.msra.mxu0 %v11119_v63  ;;  %v5258_v62 = vld [vmem:[#allocation17 + $0x1e8] sm:$0xff]  ;;  %v5256_v0 = vld [vmem:[#allocation17 + $0x1d8] sm:$0xff]  ;;  %v11159_v38 = vpack.c.bf16 %v5259_v13, %v5255_v42 }
 0x9a5   :  { %8199 = vmatprep.subr.bf16.mxu1 %v11123_v46  ;;  %8231 = vmatprep.subr.bf16.mxu0 %v11125_v36  ;;  %v11151_v14 = vpack.c.bf16 %v5258_v62, %v5254_v57  ;;  %v11153_v49 = vpack.c.bf16 %v5260_v9, %v5256_v0 }
 0x9a6   :  { %8791 = vtanh.f32 %v11128_v55 }
 0x9a8   :  { %8201 = vmatpush1.bf16.msra.mxu1 %v11132_v59  ;;  %8233 = vmatpush1.bf16.msra.mxu0 %v11134_v30 }
 0x9a9   :  { %8203 = vmatprep.subr.bf16.mxu1 %v11138_v54  ;;  %8235 = vmatprep.subr.bf16.mxu0 %v11140_v60  ;;  %v8790_v21 = vpop.eup %8789 }
 0x9ac   :  { %8205 = vmatpush1.bf16.msra.mxu1 %v11145_v61  ;;  %8237 = vmatpush1.bf16.msra.mxu0 %v11147_v47 }
 0x9ad   :  { %8207 = vmatprep.subr.bf16.mxu1 %v11151_v14  ;;  %8239 = vmatprep.subr.bf16.mxu0 %v11153_v49 }
 0x9b0   :  { %v8792_v1 = vpop.eup %8791  ;;  %8209 = vmatpush1.bf16.msra.mxu1 %v11157_v33  ;;  %8241 = vmatpush1.bf16.msra.mxu0 %v11159_v38 }
 0x9b1   :  { %8243 = vmatprep.subr.bf16.mxu1 %v10843_v37  ;;  %8275 = vmatprep.subr.bf16.mxu0 %v10845_v53  ;;  %v5194_v57 = vmul.f32 %v8792_v1, %v8790_v21  ;;  %v11925_v37 = vld [vmem:[#allocation37_spill] sm:$0xff]  ;;  %v11926_v53 = vld [vmem:[#allocation38_spill] sm:$0xff] }
 0x9b3   :  { %5533 = vmatmul.mubr.f32.vlgmr.msra.gmra.mrb[28].mxu1 %v5194_v57  ;;  %5604 = vmatmul.mubr.f32.vlgmr.msra.gmra.mrb[36].mxu0 %v5194_v57 }
 0x9b4   :  { %8245 = vmatpush1.bf16.msra.mxu1 %v10849_v8  ;;  %8277 = vmatpush1.bf16.msra.mxu0 %v10851_v44  ;;  %v11927_v8 = vld [vmem:[#allocation39_spill] sm:$0xff]  ;;  %v11928_v44 = vld [vmem:[#allocation40_spill] sm:$0xff] }
 0x9b5   :  { %8247 = vmatprep.subr.bf16.mxu1 %v10857_v58  ;;  %8279 = vmatprep.subr.bf16.mxu0 %v10859_v39  ;;  %v11929_v58 = vld [vmem:[#allocation41_spill] sm:$0xff]  ;;  %v11930_v39 = vld [vmem:[#allocation42_spill] sm:$0xff] }
 0x9b6   :  { %5799 = vmatprep.mubr.f32.mxu1 %v11583_v15  ;;  %5870 = vmatprep.mubr.f32.mxu0 %v11583_v15 }
 0x9b8   :  { %8249 = vmatpush1.bf16.msra.mxu1 %v10865_v28  ;;  %8281 = vmatpush1.bf16.msra.mxu0 %v10867_v20  ;;  %v11931_v28 = vld [vmem:[#allocation43_spill] sm:$0xff]  ;;  %v11932_v20 = vld [vmem:[#allocation44_spill] sm:$0xff] }
 0x9b9   :  { %8251 = vmatprep.subr.bf16.mxu1 %v10871_v24  ;;  %8283 = vmatprep.subr.bf16.mxu0 %v10873_v31  ;;  %v11933_v24 = vld [vmem:[#allocation45_spill] sm:$0xff]  ;;  %v11934_v31 = vld [vmem:[#allocation46_spill] sm:$0xff] }
 0x9bc   :  { %8253 = vmatpush1.bf16.msra.mxu1 %v10879_v40  ;;  %8285 = vmatpush1.bf16.msra.mxu0 %v10881_v3  ;;  %v11935_v40 = vld [vmem:[#allocation47_spill] sm:$0xff]  ;;  %v11936_v3 = vld [vmem:[#allocation48_spill] sm:$0xff] }
 0x9bd   :  { %8255 = vmatprep.subr.bf16.mxu1 %v10885_v5  ;;  %8287 = vmatprep.subr.bf16.mxu0 %v10887_v27  ;;  %v11937_v5 = vld [vmem:[#allocation49_spill] sm:$0xff]  ;;  %v11938_v27 = vld [vmem:[#allocation50_spill] sm:$0xff] }
 0x9c0   :  { %8257 = vmatpush1.bf16.msra.mxu1 %v10891_v29  ;;  %8289 = vmatpush1.bf16.msra.mxu0 %v10893_v34  ;;  %v11939_v29 = vld [vmem:[#allocation51_spill] sm:$0xff]  ;;  %v11940_v34 = vld [vmem:[#allocation52_spill] sm:$0xff] }
 0x9c1   :  { %8259 = vmatprep.subr.bf16.mxu1 %v10897_v6  ;;  %8291 = vmatprep.subr.bf16.mxu0 %v10899_v43  ;;  %v11941_v6 = vld [vmem:[#allocation53_spill] sm:$0xff]  ;;  %v11942_v43 = vld [vmem:[#allocation54_spill] sm:$0xff] }
 0x9c4   :  { %8261 = vmatpush1.bf16.msra.mxu1 %v10903_v4  ;;  %8293 = vmatpush1.bf16.msra.mxu0 %v10905_v10  ;;  %v11943_v4 = vld [vmem:[#allocation55_spill] sm:$0xff]  ;;  %v11944_v10 = vld [vmem:[#allocation56_spill] sm:$0xff] }
 0x9c5   :  { %8263 = vmatprep.subr.bf16.mxu1 %v10909_v51  ;;  %8295 = vmatprep.subr.bf16.mxu0 %v10911_v32  ;;  %v11945_v51 = vld [vmem:[#allocation57_spill] sm:$0xff]  ;;  %v11946_v32 = vld [vmem:[#allocation58_spill] sm:$0xff] }
 0x9c8   :  { %8265 = vmatpush1.bf16.msra.mxu1 %v10915_v45  ;;  %8297 = vmatpush1.bf16.msra.mxu0 %v10917_v35  ;;  %v11947_v45 = vld [vmem:[#allocation59_spill] sm:$0xff]  ;;  %v11948_v35 = vld [vmem:[#allocation60_spill] sm:$0xff] }
 0x9c9   :  { %8267 = vmatprep.subr.bf16.mxu1 %v10921_v26  ;;  %8299 = vmatprep.subr.bf16.mxu0 %v10923_v52  ;;  %v11949_v26 = vld [vmem:[#allocation61_spill] sm:$0xff]  ;;  %v11950_v52 = vld [vmem:[#allocation62_spill] sm:$0xff] }
 0x9cc   :  { %8269 = vmatpush1.bf16.msra.mxu1 %v10927_v23  ;;  %8301 = vmatpush1.bf16.msra.mxu0 %v10929_v50  ;;  %v11951_v23 = vld [vmem:[#allocation63_spill] sm:$0xff]  ;;  %v11952_v50 = vld [vmem:[#allocation64_spill] sm:$0xff] }
 0x9cd   :  { %8271 = vmatprep.subr.bf16.mxu1 %v10933_v7  ;;  %8303 = vmatprep.subr.bf16.mxu0 %v10935_v18  ;;  %v11953_v7 = vld [vmem:[#allocation65_spill] sm:$0xff]  ;;  %v11954_v18 = vld [vmem:[#allocation66_spill] sm:$0xff] }
 0x9d0   :  { %8273 = vmatpush1.bf16.msra.mxu1 %v10939_v56  ;;  %8305 = vmatpush1.bf16.msra.mxu0 %v10941_v25  ;;  %v11955_v56 = vld [vmem:[#allocation67_spill] sm:$0xff]  ;;  %v5610_v25 = vld [vmem:[#allocation20] sm:$0xf] }
 0x9d1   :  { %8307 = vmatprep.subr.bf16.mxu1 %v10951_v17  ;;  %8339 = vmatprep.subr.bf16.mxu0 %v10953_v11  ;;  %v11956_v17 = vld [vmem:[#allocation86_spill] sm:$0xff] }
 0x9d2   :  { %v5615_v11 = vrot.slane %v5610_v25, %v11956_v17 }
 0x9d3   :  { %5800 = vmatmul.mubr.f32.vlgmr.msra.gmra.mrb[14].mxu1 %v5194_v57  ;;  %5871 = vmatmul.mubr.f32.vlgmr.msra.gmra.mrb[22].mxu0 %v5194_v57  ;;  %v11958_v57 = vld [vmem:[#allocation90_spill] sm:$0xff] }
 0x9d4   :  { %8309 = vmatpush1.bf16.msra.mxu1 %v10955_v19  ;;  %8341 = vmatpush1.bf16.msra.mxu0 %v11925_v37  ;;  %v11957_v19 = vld [vmem:[#allocation87_spill] sm:$0xff]  ;;  %v5627_v37 = vrot.slane %v5610_v25, %v11958_v57 }
 0x9d5   :  { %8311 = vmatprep.subr.bf16.mxu1 %v11926_v53  ;;  %8343 = vmatprep.subr.bf16.mxu0 %v11927_v8  ;;  %v5619_v62 = vrot.slane %v5610_v25, %v11957_v19  ;;  %v11959_v8 = vld [vmem:[#allocation92_spill] sm:$0xff] }
 0x9d6   :  { %6101 = vmatprep.mubr.f32.mxu1 %v11583_v15  ;;  %6172 = vmatprep.mubr.f32.mxu0 %v11583_v15 }
 0x9d8   :  { %8313 = vmatpush1.bf16.msra.mxu1 %v11928_v44  ;;  %8345 = vmatpush1.bf16.msra.mxu0 %v11929_v58  ;;  %v5623_v44 = vrot.slane %v5610_v25, %v11959_v8 }
 0x9d9   :  { %8315 = vmatprep.subr.bf16.mxu1 %v11930_v39  ;;  %8347 = vmatprep.subr.bf16.mxu0 %v11931_v28 }
 0x9dc   :  { %8317 = vmatpush1.bf16.msra.mxu1 %v11932_v20  ;;  %8349 = vmatpush1.bf16.msra.mxu0 %v11933_v24 }
 0x9dd   :  { %8319 = vmatprep.subr.bf16.mxu1 %v11934_v31  ;;  %8351 = vmatprep.subr.bf16.mxu0 %v11935_v40 }
 0x9e0   :  { %8321 = vmatpush1.bf16.msra.mxu1 %v11936_v3  ;;  %8353 = vmatpush1.bf16.msra.mxu0 %v11937_v5 }
 0x9e1   :  { %8323 = vmatprep.subr.bf16.mxu1 %v11938_v27  ;;  %8355 = vmatprep.subr.bf16.mxu0 %v11939_v29 }
 0x9e4   :  { %8325 = vmatpush1.bf16.msra.mxu1 %v11940_v34  ;;  %8357 = vmatpush1.bf16.msra.mxu0 %v11941_v6  ;;  %v11960_v6 = vld [vmem:[#allocation68_spill] sm:$0xff] }
 0x9e5   :  { %8327 = vmatprep.subr.bf16.mxu1 %v11942_v43  ;;  %8359 = vmatprep.subr.bf16.mxu0 %v11943_v4 }
 0x9e8   :  { %8329 = vmatpush1.bf16.msra.mxu1 %v11944_v10  ;;  %8361 = vmatpush1.bf16.msra.mxu0 %v11945_v51 }
 0x9e9   :  { %8331 = vmatprep.subr.bf16.mxu1 %v11946_v32  ;;  %8363 = vmatprep.subr.bf16.mxu0 %v11947_v45  ;;  %v11961_v32 = vld [vmem:[#allocation88_spill] sm:$0xff] }
 0x9ec   :  { %8333 = vmatpush1.bf16.msra.mxu1 %v11948_v35  ;;  %8365 = vmatpush1.bf16.msra.mxu0 %v11949_v26 }
 0x9ed   :  { %8335 = vmatprep.subr.bf16.mxu1 %v11950_v52  ;;  %8367 = vmatprep.subr.bf16.mxu0 %v11951_v23  ;;  %v11962_v52 = vld [vmem:[#allocation89_spill] sm:$0xff] }
 0x9f0   :  { %8337 = vmatpush1.bf16.msra.mxu1 %v11952_v50  ;;  %8369 = vmatpush1.bf16.msra.mxu0 %v11953_v7 }
 0x9f1   :  { %8371 = vmatprep.subr.bf16.mxu1 %v11954_v18  ;;  %8403 = vmatprep.subr.bf16.mxu0 %v11955_v56  ;;  %v11963_v18 = vld [vmem:[#allocation91_spill] sm:$0xff] }
 0xa86   :  { %v5534_v0 = vpop.f32.mrb[28].mxu1  ;;  %v5605_v9 = vpop.f32.mrb[36].mxu0 }
 0xa87   :  { %v5632_v22 = vadd.f32 %v5615_v11, %v5534_v0  ;;  %v5536_v16 = vpop.f32.mrb[29].mxu1  ;;  %v5607_v42 = vpop.f32.mrb[37].mxu0  ;;  %v5634_v39 = vadd.f32 %v5623_v44, %v5605_v9  ;;  %v11969_v44 = vld [vmem:[#allocation77_spill] sm:$0xff] }
 0xa88   :  { %v5633_v13 = vadd.f32 %v5619_v62, %v5536_v16  ;;  %v5635_v53 = vadd.f32 %v5627_v37, %v5607_v42  ;;  %v11966_v37 = vld [vmem:[#allocation74_spill] sm:$0xff] }
 0xa89   :  { %v6754_v21 = vmul.f32 -1.442695, %v5632_v22 }
 0xa8a   :  { %v6755_v1 = vmul.f32 -1.442695, %v5633_v13  ;;  %v6756_v58 = vmul.f32 -1.442695, %v5635_v53  ;;  %v11964_v13 = vld [vmem:[#allocation69_spill] sm:$0xff]  ;;  %v11967_v53 = vld [vmem:[#allocation75_spill] sm:$0xff] }
 0xa8b   :  { %8793 = vpow2.f32 %v6754_v21  ;;  %v11965_v21 = vld [vmem:[#allocation72_spill] sm:$0xff] }
 0xa8c   :  { %8795 = vpow2.f32 %v6755_v1 }
 0xa8d   :  { %8797 = vpow2.f32 %v6756_v58  ;;  %v11970_v58 = vld [vmem:[#allocation78_spill] sm:$0xff] }
 0xa8e   :  { %8799 = vtanh.f32 %v5634_v39  ;;  %v11971_v39 = vld [vmem:[#allocation79_spill] sm:$0xff] }
 0xa95   :  { %v8794_v28 = vpop.eup %8793 }
 0xa96   :  { %v8796_v20 = vpop.eup %8795  ;;  %v5640_v24 = vadd.f32 1.0, %v8794_v28  ;;  %v11972_v28 = vld [vmem:[#allocation80_spill] sm:$0xff] }
 0xa97   :  { %v5646_v31 = vadd.f32 1.0, %v8796_v20  ;;  %v8798_v40 = vpop.eup %8797  ;;  %v11973_v20 = vld [vmem:[#allocation81_spill] sm:$0xff] }
 0xa98   :  { %8801 = vrcp.f32 %v5640_v24  ;;  %v8800_v3 = vpop.eup %8799  ;;  %v5653_v34 = vadd.f32 1.0, %v8798_v40  ;;  %v11974_v24 = vld [vmem:[#allocation82_spill] sm:$0xff] }
 0xa99   :  { %8803 = vrcp.f32 %v5646_v31  ;;  %v11975_v31 = vld [vmem:[#allocation83_spill] sm:$0xff] }
 0xa9a   :  { %8805 = vrcp.f32 %v5653_v34 }
 0xaa2   :  { %v8802_v5 = vpop.eup %8801 }
 0xaa3   :  { %v8804_v27 = vpop.eup %8803  ;;  %v5657_v29 = vmul.f32 %v8802_v5, %v8800_v3  ;;  %v11976_v5 = vld [vmem:[#allocation93_spill] sm:$0xff] }
 0xaa4   :  { %v5656_v43 = vmul.f32 %v8804_v27, %v11960_v6  ;;  %v8806_v25 = vpop.eup %8805  ;;  %v11977_v27 = vld [vmem:[#allocation94_spill] sm:$0xff] }
 0xaa6   :  { %v11240_v4 = vadd.f32 %v5657_v29, %v5656_v43  ;;  %v5801_v10 = vpop.f32.mrb[14].mxu1  ;;  %v5872_v51 = vpop.f32.mrb[22].mxu0 }
 0xaa7   :  { %v8484_v45 = vadd.f32 %v5801_v10, %v11961_v32  ;;  %v5803_v35 = vpop.f32.mrb[15].mxu1  ;;  %v5874_v26 = vpop.f32.mrb[23].mxu0  ;;  %v8500_v0 = vadd.f32 %v5872_v51, %v9836_v12  ;;  %v11968_v12 = vld [vmem:[#allocation76_spill] sm:$0xff]  ;;  %v6393_v32 = vld [vmem:[#allocation21 + $0x48] sm:$0xff] }
 0xaa8   :  { %v8485_v23 = vadd.f32 %v5803_v35, %v11962_v52  ;;  %8807 = vtanh.f32 %v11240_v4  ;;  %v8501_v56 = vadd.f32 %v5874_v26, %v11963_v18  ;;  %v6395_v35 = vld [vmem:[#allocation21 + $0x58] sm:$0xff]  ;;  %v6396_v52 = vld [vmem:[#allocation21 + $0x60] sm:$0xff] }
 0xaa9   :  { %v6757_v50 = vmul.f32 -1.442695, %v8484_v45  ;;  %v6394_v45 = vld [vmem:[#allocation21 + $0x50] sm:$0xff]  ;;  %v6399_v18 = vld [vmem:[#allocation21 + $0x78] sm:$0xff] }
 0xaaa   :  { %v6758_v7 = vmul.f32 -1.442695, %v8485_v23  ;;  %v6759_v62 = vmul.f32 -1.442695, %v8501_v56  ;;  %v8454_v26 = vpack.c.bf16 %v6395_v35, %v6394_v45  ;;  %v6397_v23 = vld [vmem:[#allocation21 + $0x68] sm:$0xff] }
 0xaab   :  { %8809 = vpow2.f32 %v6757_v50  ;;  %v8458_v50 = vpack.c.bf16 %v6397_v23, %v6396_v52  ;;  %v6764_v52 = vld [vmem:[#allocation26] ss:$0 sm:$0xff] }
 0xaac   :  { %8811 = vpow2.f32 %v6758_v7  ;;  %v6398_v7 = vld [vmem:[#allocation21 + $0x70] sm:$0xff] }
 0xaad   :  { %8813 = vpow2.f32 %v6759_v62  ;;  %v8462_v56 = vpack.c.bf16 %v6399_v18, %v6398_v7  ;;  %v11981_v62 = vld [vmem:[#allocation70_spill] sm:$0xff] }
 0xaae   :  { %8815 = vtanh.f32 %v8500_v0  ;;  %v11982_v0 = vld [vmem:[#allocation85_spill] sm:$0xff] }
 0xab2   :  { %v8808_v11 = vpop.eup %8807 }
 0xab3   :  { %v11247_v9 = vmul.f32 %v8808_v11, %v8806_v25  ;;  %v11979_v25 = vld [vmem:[#allocation71_spill] sm:$0xff]  ;;  %v11980_v11 = vld [vmem:[#allocation84_spill] sm:$0xff] }
 0xab5   :  { %v8810_v22 = vpop.eup %8809  ;;  %6102 = vmatmul.mubr.f32.vlgmr.msra.gmra.mrb[30].mxu1 %v11247_v9  ;;  %6173 = vmatmul.mubr.f32.vlgmr.msra.gmra.mrb[38].mxu0 %v11247_v9 }
 0xab6   :  { %v8812_v16 = vpop.eup %8811  ;;  %v5885_v42 = vadd.f32 1.0, %v8810_v22  ;;  %8373 = vmatpush1.bf16.msra.mxu1 %v11964_v13  ;;  %8405 = vmatpush1.bf16.msra.mxu0 %v11965_v21  ;;  %v11983_v22 = vld [vmem:[#allocation73_spill] sm:$0xff] }
 0xab7   :  { %v5891_v1 = vadd.f32 1.0, %v8812_v16  ;;  %8375 = vmatprep.subr.bf16.mxu1 %v11966_v37  ;;  %8407 = vmatprep.subr.bf16.mxu0 %v11967_v53  ;;  %v8814_v40 = vpop.eup %8813  ;;  %v6520_v16 = vld [vmem:[#allocation24] sm:$0xff]  ;;  %v6321_v21 = vld [vmem:[#allocation20] sm:$0xf] }
 0xab8   :  { %8817 = vrcp.f32 %v5885_v42  ;;  %6243 = vmatprep.mubr.f32.mxu1 %v11583_v15  ;;  %6314 = vmatprep.mubr.f32.mxu0 %v11583_v15  ;;  %v8816_v3 = vpop.eup %8815  ;;  %v5898_v6 = vadd.f32 1.0, %v8814_v40  ;;  %v6521_v42 = vld [vmem:[#allocation24 + $0x8] sm:$0xff]  ;;  %v6330_v37 = vrot.slane %v6321_v21, %v11957_v19  ;;  %v6334_v40 = vrot.slane %v6321_v21, %v11959_v8 }
 0xab9   :  { %8819 = vrcp.f32 %v5891_v1  ;;  %v8466_v13 = vpack.c.bf16 %v6521_v42, %v6520_v16  ;;  %v6326_v1 = vrot.slane %v6321_v21, %v11956_v17 }
 0xaba   :  { %8377 = vmatpush1.bf16.msra.mxu1 %v11968_v12  ;;  %8409 = vmatpush1.bf16.msra.mxu0 %v11969_v44  ;;  %8821 = vrcp.f32 %v5898_v6 }
 0xabb   :  { %8379 = vmatprep.subr.bf16.mxu1 %v11970_v58  ;;  %8411 = vmatprep.subr.bf16.mxu0 %v11971_v39 }
 0xabe   :  { %8381 = vmatpush1.bf16.msra.mxu1 %v11972_v28  ;;  %8413 = vmatpush1.bf16.msra.mxu0 %v11973_v20 }
 0xabf   :  { %8383 = vmatprep.subr.bf16.mxu1 %v11974_v24  ;;  %8415 = vmatprep.subr.bf16.mxu0 %v11975_v31 }
 0xac2   :  { %v8818_v15 = vpop.eup %8817  ;;  %8385 = vmatpush1.bf16.msra.mxu1 %v11976_v5  ;;  %8417 = vmatpush1.bf16.msra.mxu0 %v11977_v27 }
 0xac3   :  { %v8820_v29 = vpop.eup %8819  ;;  %v5902_v34 = vmul.f32 %v8818_v15, %v8816_v3  ;;  %8387 = vmatprep.subr.bf16.mxu1 %v11111_v48  ;;  %8419 = vmatprep.subr.bf16.mxu0 %v11113_v2  ;;  %v6385_v48 = vld [vmem:[#allocation21 + $0x8] sm:$0xff] }
 0xac4   :  { %v5901_v43 = vmul.f32 %v8820_v29, %v11128_v55  ;;  %v6384_v55 = vld [vmem:[#allocation21] sm:$0xff]  ;;  %v8822_v2 = vpop.eup %8821 }
 0xac6   :  { %v5903_v10 = vadd.f32 %v5902_v34, %v5901_v43  ;;  %8389 = vmatpush1.bf16.msra.mxu1 %v11117_v41  ;;  %8421 = vmatpush1.bf16.msra.mxu0 %v11119_v63  ;;  %v6387_v63 = vld [vmem:[#allocation21 + $0x18] sm:$0xff] }
 0xac7   :  { %8391 = vmatprep.subr.bf16.mxu1 %v11123_v46  ;;  %8423 = vmatprep.subr.bf16.mxu0 %v11125_v36  ;;  %v8434_v46 = vpack.c.bf16 %v6385_v48, %v6384_v55  ;;  %v6386_v36 = vld [vmem:[#allocation21 + $0x10] sm:$0xff]  ;;  %v6763_v48 = vld [vmem:[#allocation23] ss:$0 sm:$0xff] }
 0xac8   :  { %8823 = vtanh.f32 %v5903_v10 }
 0xaca   :  { %8393 = vmatpush1.bf16.msra.mxu1 %v11132_v59  ;;  %8425 = vmatpush1.bf16.msra.mxu0 %v11134_v30  ;;  %v8438_v30 = vpack.c.bf16 %v6387_v63, %v6386_v36 }
 0xacb   :  { %8395 = vmatprep.subr.bf16.mxu1 %v11138_v54  ;;  %8427 = vmatprep.subr.bf16.mxu0 %v11140_v60  ;;  %v6388_v54 = vld [vmem:[#allocation21 + $0x20] sm:$0xff]  ;;  %v6389_v60 = vld [vmem:[#allocation21 + $0x28] sm:$0xff] }
 0xace   :  { %8397 = vmatpush1.bf16.msra.mxu1 %v11145_v61  ;;  %8429 = vmatpush1.bf16.msra.mxu0 %v11147_v47  ;;  %v11978_v61 = vld [vmem:[#allocation36_spill] sm:$0xff]  ;;  %v8442_v47 = vpack.c.bf16 %v6389_v60, %v6388_v54 }
 0xacf   :  { %8399 = vmatprep.subr.bf16.mxu1 %v11151_v14  ;;  %8431 = vmatprep.subr.bf16.mxu0 %v11153_v49  ;;  %v6390_v14 = vld [vmem:[#allocation21 + $0x30] sm:$0xff]  ;;  %v6391_v49 = vld [vmem:[#allocation21 + $0x38] sm:$0xff] }
 0xad0   :  { %v8446_v51 = vpack.c.bf16 %v6391_v49, %v6390_v14 }
 0xad2   :  { %v8824_v41 = vpop.eup %8823  ;;  %8401 = vmatpush1.bf16.msra.mxu1 %v11157_v33  ;;  %8433 = vmatpush1.bf16.msra.mxu0 %v11159_v38  ;;  %v6392_v33 = vld [vmem:[#allocation21 + $0x40] sm:$0xff] }
 0xad3   :  { %v5905_v59 = vmul.f32 %v8824_v41, %v8822_v2  ;;  %8435 = vmatprep.subr.bf16.mxu1 %v8434_v46  ;;  %v8450_v38 = vpack.c.bf16 %v6393_v32, %v6392_v33  ;;  %8467 = vmatprep.subr.bf16.mxu0 %v8466_v13 }
 0xad5   :  { %6244 = vmatmul.mubr.f32.vlgmr.msra.gmra.mrb[30].mxu1 %v5905_v59  ;;  %6315 = vmatmul.mubr.f32.vlgmr.msra.gmra.mrb[38].mxu0 %v5905_v59 }
 0xad6   :  { %8437 = vmatpush3.bf16.msra.mxu1 %v8434_v46  ;;  %6862 = vmatprep.mubr.f32.mxu1 %v11978_v61 }
 0xad7   :  { %8439 = vmatprep.subr.bf16.mxu1 %v8438_v30  ;;  %8469 = vmatpush3.bf16.msra.mxu0 %v8466_v13 }
 0xada   :  { %8441 = vmatpush3.bf16.msra.mxu1 %v8438_v30 }
 0xadb   :  { %8443 = vmatprep.subr.bf16.mxu1 %v8442_v47 }
 0xade   :  { %8445 = vmatpush3.bf16.msra.mxu1 %v8442_v47 }
 0xadf   :  { %8447 = vmatprep.subr.bf16.mxu1 %v8446_v51 }
 0xae2   :  { %8449 = vmatpush3.bf16.msra.mxu1 %v8446_v51 }
 0xae3   :  { %8451 = vmatprep.subr.bf16.mxu1 %v8450_v38 }
 0xae6   :  { %8453 = vmatpush3.bf16.msra.mxu1 %v8450_v38 }
 0xae7   :  { %8455 = vmatprep.subr.bf16.mxu1 %v8454_v26 }
 0xaea   :  { %8457 = vmatpush3.bf16.msra.mxu1 %v8454_v26 }
 0xaeb   :  { %8459 = vmatprep.subr.bf16.mxu1 %v8458_v50 }
 0xaee   :  { %8461 = vmatpush3.bf16.msra.mxu1 %v8458_v50 }
 0xaef   :  { %8463 = vmatprep.subr.bf16.mxu1 %v8462_v56 }
 0xaf2   :  { %8465 = vmatpush3.bf16.msra.mxu1 %v8462_v56 }
 0xaf5   :  { %6863 = vmatmul.mubr.f32.vlgmr.msra.gmra.mrb[32].mxu1 %v11979_v25 }
 0xaf6   :  { %6865 = vmatprep.mubr.f32.mxu1 %v11980_v11 }
 0xaf9   :  { %6866 = vmatmul.mubr.f32.gmra.mrb[34].mxu1 %v11981_v62 }
 0xafa   :  { %6868 = vmatprep.mubr.f32.mxu1 %v11982_v0 }
 0xafd   :  { %6869 = vmatmul.mubr.f32.gmra.mrb[36].mxu1 %v11983_v22 }
 0xafe   :  { %6871 = vmatprep.mubr.f32.mxu1 %v11247_v9  ;;  %v6338_v9 = vrot.slane %v6321_v21, %v11958_v57 }
 0xba8   :  { %v6245_v53 = vpop.f32.mrb[30].mxu1  ;;  %v6316_v12 = vpop.f32.mrb[38].mxu0 }
 0xba9   :  { %v6343_v44 = vadd.f32 %v6326_v1, %v6245_v53  ;;  %v6247_v58 = vpop.f32.mrb[31].mxu1  ;;  %v6318_v39 = vpop.f32.mrb[39].mxu0  ;;  %v6345_v15 = vadd.f32 %v6334_v40, %v6316_v12 }
 0xbaa   :  { %v6344_v28 = vadd.f32 %v6330_v37, %v6247_v58  ;;  %v6346_v31 = vadd.f32 %v6338_v9, %v6318_v39 }
 0xbab   :  { %v6760_v20 = vmul.f32 -1.442695, %v6343_v44 }
 0xbac   :  { %v6761_v24 = vmul.f32 -1.442695, %v6344_v28  ;;  %v6762_v3 = vmul.f32 -1.442695, %v6346_v31 }
 0xbad   :  { %8825 = vpow2.f32 %v6760_v20 }
 0xbae   :  { %8827 = vpow2.f32 %v6761_v24 }
 0xbaf   :  { %8829 = vpow2.f32 %v6762_v3 }
 0xbb0   :  { %8831 = vtanh.f32 %v6345_v15 }
 0xbb7   :  { %v8826_v17 = vpop.eup %8825 }
 0xbb8   :  { %v8828_v5 = vpop.eup %8827  ;;  %v6351_v19 = vadd.f32 1.0, %v8826_v17 }
 0xbb9   :  { %v6357_v27 = vadd.f32 1.0, %v8828_v5  ;;  %v8830_v29 = vpop.eup %8829 }
 0xbba   :  { %8833 = vrcp.f32 %v6351_v19  ;;  %v8832_v34 = vpop.eup %8831  ;;  %v6364_v10 = vadd.f32 1.0, %v8830_v29 }
 0xbbb   :  { %8835 = vrcp.f32 %v6357_v27 }
 0xbbc   :  { %8837 = vrcp.f32 %v6364_v10 }
 0xbc4   :  { %v8834_v6 = vpop.eup %8833 }
 0xbc5   :  { %v8836_v43 = vpop.eup %8835  ;;  %v6368_v57 = vmul.f32 %v8834_v6, %v8832_v34 }
 0xbc6   :  { %v6367_v55 = vmul.f32 %v8836_v43, %v11240_v4  ;;  %v8838_v32 = vpop.eup %8837 }
 0xbc8   :  { %v6864_v8 = vpop.f32.mrb[32].mxu1  ;;  %v6369_v46 = vadd.f32 %v6368_v57, %v6367_v55 }
 0xbc9   :  { %v6479_v36 = vadd.f32 %v6864_v8, %v6763_v48  ;;  %v6473_v63 = vpop.f32.mrb[33].mxu1 }
 0xbca   :  { %v6474_v2 = vadd.f32 %v6763_v48, %v6473_v63  ;;  %8839 = vtanh.f32 %v6369_v46 }
 0xbcb   :  { %v6513_v30 = vmax.f32 %v6479_v36, 0.0 }
 0xbcc   :  { %v6512_v41 = vmax.f32 %v6474_v2, 0.0  ;;  %v6867_v59 = vpop.f32.mrb[34].mxu1 }
 0xbcd   :  { %v6489_v54 = vadd.f32 %v6867_v59, %v6763_v48  ;;  %v6483_v60 = vpop.f32.mrb[35].mxu1 }
 0xbce   :  { %v6484_v61 = vadd.f32 %v6763_v48, %v6483_v60  ;;  %6878 = vmatprep.mubr.msk.f32.mxu0 %vm405_vm2, %v6512_v41 }
 0xbcf   :  { %6879 = vmatmul.mubr.msk.f32.vlgmr.msra.gmra.mrb[40].mxu0 %vm405_vm2, %v6513_v30  ;;  %v6515_v14 = vmax.f32 %v6489_v54, 0.0 }
 0xbd0   :  { %v6514_v47 = vmax.f32 %v6484_v61, 0.0  ;;  %v6870_v4 = vpop.f32.mrb[36].mxu1 }
 0xbd1   :  { %v6499_v49 = vadd.f32 %v6870_v4, %v6763_v48  ;;  %v6493_v51 = vpop.f32.mrb[37].mxu1 }
 0xbd2   :  { %v6494_v33 = vadd.f32 %v6763_v48, %v6493_v51  ;;  %6881 = vmatprep.mubr.msk.f32.mxu0 %vm405_vm2, %v6514_v47 }
 0xbd3   :  { %6882 = vmatmul.mubr.msk.f32.gmra.mrb[42].mxu0 %vm405_vm2, %v6515_v14  ;;  %v6517_v35 = vmax.f32 %v6499_v49, 0.0 }
 0xbd4   :  { %v8840_v38 = vpop.eup %8839  ;;  %v6516_v45 = vmax.f32 %v6494_v33, 0.0 }
 0xbd5   :  { %v6371_v26 = vmul.f32 %v8840_v38, %v8838_v32 }
 0xbd6   :  { %6884 = vmatprep.mubr.msk.f32.mxu0 %vm405_vm2, %v6516_v45 }
 0xbd7   :  { %6872 = vmatmul.mubr.f32.gmra.mrb[38].mxu1 %v6371_v26  ;;  %6885 = vmatmul.mubr.msk.f32.gmra.mrb[44].mxu0 %vm405_vm2, %v6517_v35 }
 0xca2   :  { %v6880_v23 = vpop.f32.mrb[40].mxu0 }
 0xca3   :  { %v6625_v50 = vadd.f32 %v6880_v23, %v6764_v52  ;;  %v6619_v7 = vpop.f32.mrb[41].mxu0 }
 0xca4   :  { %v6620_v18 = vadd.f32 %v6764_v52, %v6619_v7 }
 0xca5   :  { %6659 = vst [vmem:[#allocation27 + $0x8] sm:$0xff] %v6625_v50 }
 0xca6   :  { %6658 = vst [vmem:[#allocation27] sm:$0xff] %v6620_v18  ;;  %v6883_v56 = vpop.f32.mrb[42].mxu0 }
 0xca7   :  { %v6635_v25 = vadd.f32 %v6883_v56, %v6764_v52  ;;  %v6629_v11 = vpop.f32.mrb[43].mxu0 }
 0xca8   :  { %v6630_v62 = vadd.f32 %v6764_v52, %v6629_v11 }
 0xca9   :  { %6661 = vst [vmem:[#allocation27 + $0x18] sm:$0xff] %v6635_v25 }
 0xcaa   :  { %6660 = vst [vmem:[#allocation27 + $0x10] sm:$0xff] %v6630_v62  ;;  %v6873_v0 = vpop.f32.mrb[38].mxu1  ;;  %v6886_v22 = vpop.f32.mrb[44].mxu0 }
 0xcab   :  { %v6509_v16 = vadd.f32 %v6873_v0, %v6763_v48  ;;  %v6645_v42 = vadd.f32 %v6886_v22, %v6764_v52  ;;  %v6503_v13 = vpop.f32.mrb[39].mxu1  ;;  %v6639_v21 = vpop.f32.mrb[45].mxu0 }
 0xcac   :  { %v6504_v1 = vadd.f32 %v6763_v48, %v6503_v13  ;;  %v6640_v37 = vadd.f32 %v6764_v52, %v6639_v21 }
 0xcad   :  { %6663 = vst [vmem:[#allocation27 + $0x28] sm:$0xff] %v6645_v42  ;;  %v6519_v12 = vmax.f32 %v6509_v16, 0.0 }
 0xcae   :  { %v6518_v53 = vmax.f32 %v6504_v1, 0.0  ;;  %6662 = vst [vmem:[#allocation27 + $0x20] sm:$0xff] %v6640_v37 }
 0xcb0   :  { %6887 = vmatprep.mubr.msk.f32.mxu0 %vm405_vm2, %v6518_v53 }
 0xcb1   :  { %6888 = vmatmul.mubr.msk.f32.gmra.mrb[46].mxu0 %vm405_vm2, %v6519_v12 }
 0xd84   :  { %v6889_v44 = vpop.f32.mrb[46].mxu0 }
 0xd85   :  { %v6655_v58 = vadd.f32 %v6889_v44, %v6764_v52  ;;  %v6649_v39 = vpop.f32.mrb[47].mxu0 }
 0xd86   :  { %v6650_v28 = vadd.f32 %v6764_v52, %v6649_v39 }
 0xd87   :  { %6665 = vst [vmem:[#allocation27 + $0x38] sm:$0xff] %v6655_v58 }
 0xd88   :  { %6664 = vst [vmem:[#allocation27 + $0x30] sm:$0xff] %v6650_v28 }
 0xd89   :  { %9138 = shalt.err (!%p9135_p10)
}
 0xd8a   :  { %s9139_s25 = scalar_lea.hbm %s11332_s13, 1024 }
 0xd8b   :  { %p9140_p11 = scmp.ne.s32.totalorder %s11332_s13, %s9139_s25  ;;  %p9143_p12 = scmp.lt.u32.totalorder %s9139_s25, %s11332_s13 }
 0xd8d   :  { %p9145_p13 = pnand %p9143_p12, %p9140_p11 }
 0xd8f   :  { %9148 = shalt.err (!%p9145_p13)
}
 0xd90   :  { %6677 = dma.vmem_to_hbm [thread:$0]  %s6672_s6, 1024, %s11332_s13, [#allocation8], %s9173_s20, %s9173_s20, %s9174_s19  }
 0xd91   :  { %9163 = dma.done.wait [#allocation8], 1024  }
 0xd92   :  { %9164 = vsyncadd [#allocation8], 4294966272 }
 0xd93   :  { %6681 = vsyncpa [#allocation7], 1 }
 0xd94   :  { %6682 = vsyncpa [#allocation10], 1 }
 0xd95   :  { %6683 = vsyncpa [#allocation13], 1 }
 0xd96   :  { %6684 = vsyncpa [#allocation16], 1 }
 0xd97   :  { %6685 = vsyncpa [#allocation19], 1 }
 0xd98   :  { %6686 = vsyncpa [#allocation22], 1 }
 0xd99   :  { %6687 = vsyncpa [#allocation25], 1 }
 0xd9a   :  { %6688 = vsyncpa [#allocation8], 1 }

</bundles_post_ra>
